<compile_context>
chip_gen: v7x
topology: tpu7x:2x2x1
jax: 0.10.0
libtpu: 0.0.40
codegen_flags: <defaults>
</compile_context>

<pallas_src>
import functools

import jax
import jax.numpy as jnp
from jax import lax
from jax.experimental import pallas as pl
from jax.experimental.pallas import tpu as pltpu

BN_EPS = 1e-5          # PyTorch BatchNorm2d default
LEAKY_SLOPE = 0.2
LANE = 128             # lane width
W_ALIGN = 16           # sublane-dense output-width padding (covers bf16 packing)


def _round_up(x, m):
    return ((x + m - 1) // m) * m


@functools.lru_cache(maxsize=1)
def _vmem_budget():
    """(vmem_limit_bytes, per-tile VMEM byte budget) derived from the hardware."""
    cap = 128 * 1024 * 1024
    try:
        info_fn = getattr(pltpu, "get_tpu_info", None)
        if info_fn is not None:
            cap = int(getattr(info_fn(), "vmem_capacity_bytes", cap))
    except Exception:
        pass
    limit = min(48 * 1024 * 1024, int(cap * 0.6))      # ~48MiB v5e/v6e, ~38MiB v7x
    tile_budget = (4 << 20) if cap <= (64 << 20) else (8 << 20)
    return limit, tile_budget


def _pick_row_tile(ho, wo_pad, cpad, kdim, cin_eff, kh, kw, out_isz, budget):
    """Largest row tile with M = th*wo_pad <= 1024 fitting the per-tile VMEM budget.
    No exact-divisor requirement: Ho is padded up and the ragged tail is masked."""
    wpp = wo_pad + kw - 1
    cap = max(1, min(ho, 1024 // wo_pad))

    def tile_bytes(d):
        m = d * wo_pad
        return (m * cpad * out_isz                 # output tile
                + m * cpad * 4                     # f32 accumulator
                + m * kdim * 2                     # bf16 im2col patch
                + (d + kh - 1) * wpp * cin_eff * 2)  # staged / sliced input rows

    th = cap
    while th > 1 and tile_bytes(th) > budget:
        th -= 1
    t_steps = -(-ho // th)
    th = -(-ho // t_steps)                         # rebalance the ragged last tile
    t_steps = -(-ho // th)
    return th, t_steps


# ------------------------------ Pallas kernel ------------------------------- #

def _conv_kernel(*refs, kh, kw, ho, wo, act, has_bias, with_stats, fuse_bn,
                 mask_rows, mask_cols):
    """Fused stride-1 conv row-tile.

    Optional prologue: previous layer's BatchNorm scale/shift + LeakyReLU applied
    (f32) to the staged input rows.  Core: ONE big-K bf16 MXU matmul over the
    in-VMEM im2col patch.  Optional epilogue: bias + LeakyReLU and per-channel
    sum / sum^2 accumulation (first pass of the two-pass BatchNorm).
    """
    it = iter(refs)
    x_ref = next(it)                              # (Hp_pad, Wp_pad, Cin_eff) bf16
    w_ref = next(it)                              # (kh*kw*Cin_eff, Cpad)     bf16
    scale_ref = next(it) if fuse_bn else None     # (1, Cin_eff) f32
    shift_ref = next(it) if fuse_bn else None
    b_ref = next(it) if has_bias else None        # (1, Cpad) f32
    o_ref = next(it)                              # (th, Wo_pad, Cpad)
    sum_ref = next(it) if with_stats else None    # (1, Cpad) f32 accumulators
    sq_ref = next(it) if with_stats else None
    xstage_ref = next(it) if fuse_bn else None    # (th+kh-1, Wp_pad, Cin_eff) scratch

    th, wo_pad, cpad = o_ref.shape
    cin = x_ref.shape[-1]
    t = pl.program_id(1)
    row0 = t * th
    if th % 8 == 0:
        row0 = pl.multiple_of(row0, 8)

    # Prologue: fused BatchNorm + LeakyReLU of the previous layer, once per tile.
    if fuse_bn:
        rows = x_ref[pl.ds(row0, th + kh - 1), :, :].astype(jnp.float32)
        z = rows * scale_ref[...].reshape(1, 1, cin) + shift_ref[...].reshape(1, 1, cin)
        xstage_ref[...] = jnp.where(z >= 0, z, LEAKY_SLOPE * z).astype(jnp.bfloat16)

    def tap(ki, kj):
        if fuse_bn:
            s = xstage_ref[pl.ds(ki, th), pl.ds(kj, wo_pad), :]
        else:
            s = x_ref[pl.ds(row0 + ki, th), pl.ds(kj, wo_pad), :]
        return s.reshape(th * wo_pad, cin)

    # Single big-K MXU matmul (K = kh*kw*Cin_eff) over the in-VMEM im2col patch.
    patch = jnp.concatenate([tap(ki, kj) for ki in range(kh) for kj in range(kw)],
                            axis=-1)
    acc = jnp.dot(patch, w_ref[...], preferred_element_type=jnp.float32)
    if has_bias:
        acc = acc + b_ref[...]

    if with_stats:
        @pl.when(t == 0)
        def _init():
            sum_ref[...] = jnp.zeros_like(sum_ref)
            sq_ref[...] = jnp.zeros_like(sq_ref)

        a3 = acc.reshape(th, wo_pad, cpad)
        valid = None
        if mask_rows:                              # exclude ragged-row padding
            r = row0 + lax.broadcasted_iota(jnp.int32, (th, wo_pad, 1), 0)
            valid = r < ho
        if mask_cols:                              # exclude width-alignment padding
            cmask = lax.broadcasted_iota(jnp.int32, (th, wo_pad, 1), 1) < wo
            valid = cmask if valid is None else jnp.logical_and(valid, cmask)
        s = a3 if valid is None else jnp.where(valid, a3, 0.0)
        s = s.reshape(th * wo_pad, cpad)
        sum_ref[...] += jnp.sum(s, axis=0, keepdims=True)
        sq_ref[...] += jnp.sum(s * s, axis=0, keepdims=True)

    if act == "leaky":
        acc = jnp.where(acc >= 0, acc, LEAKY_SLOPE * acc)
    o_ref[...] = acc.reshape(th, wo_pad, cpad).astype(o_ref.dtype)


# ------------------------------ JAX glue ------------------------------------ #

def _space_to_depth2(x):
    """(N, H, W, C) with even H, W -> (N, H/2, W/2, 4C). Pure permutation."""
    n, h, w, c = x.shape
    x = x.reshape(n, h // 2, 2, w // 2, 2, c)
    x = jnp.transpose(x, (0, 1, 3, 2, 4, 5))
    return x.reshape(n, h // 2, w // 2, 4 * c)


def _weight_stride1(w):
    """(Cout, Cin, kh, kw) -> (kh*kw, Cin, Cout)."""
    cout, cin, kh, kw = w.shape
    return jnp.transpose(w, (2, 3, 1, 0)).reshape(kh * kw, cin, cout)


def _weight_s2d(w):
    """4x4/stride-2 conv -> equivalent 2x2/stride-1 conv on space-to-depth input."""
    cout, cin, _, _ = w.shape
    w6 = w.reshape(cout, cin, 2, 2, 2, 2)          # (co, ci, ki, p, kj, q)
    w6 = jnp.transpose(w6, (2, 4, 3, 5, 1, 0))     # (ki, kj, p, q, ci, co)
    return w6.reshape(4, 4 * cin, cout)            # matches s2d channel order (p,q,c)


def pallas_conv(x, w, bias, *, stride, with_stats, act, out_dtype,
                bn_scale=None, bn_shift=None):
    """4x4 conv, padding=1, stride in {1,2} over NHWC x (PyTorch OIHW weights).

    Optional prologue: previous layer's BatchNorm (scale/shift) + LeakyReLU fused
    onto the input.  Optional epilogue: bias + LeakyReLU.  When with_stats, also
    returns per-sample per-channel sum / sum^2 of the (pre-BN) conv output.
    Output is returned padded to (N, Ho_pad, Wo_pad, Cpad).
    """
    n, h, wdim, cin = x.shape
    cout = w.shape[0]
    fuse_bn = bn_scale is not None

    # Spatial padding=1.  With a fused-BN prologue the border must become exactly 0
    # AFTER the affine+leaky, so pad with v_c = -shift_c/scale_c instead of 0.
    if fuse_bn:
        safe = jnp.where(jnp.abs(bn_scale) > 1e-12, bn_scale, 1.0)
        padval = jnp.where(jnp.abs(bn_scale) > 1e-12, -bn_shift / safe, 0.0)
        ring = jnp.broadcast_to(padval.astype(x.dtype).reshape(1, 1, 1, cin),
                                (n, h + 2, wdim + 2, cin))
        xp = lax.dynamic_update_slice(ring, x, (0, 1, 1, 0))
    else:
        xp = jnp.pad(x, ((0, 0), (1, 1), (1, 1), (0, 0)))

    if stride == 2:
        assert (h + 2) % 2 == 0 and (wdim + 2) % 2 == 0
        xp = _space_to_depth2(xp)                  # pure permutation, no expansion
        wk = _weight_s2d(w)                        # (4, 4*cin, cout)
        kh = kw = 2
        if fuse_bn:                                # s2d channel order is (p, q, c)
            bn_scale = jnp.tile(bn_scale, 4)
            bn_shift = jnp.tile(bn_shift, 4)
    else:
        wk = _weight_stride1(w)                    # (16, cin, cout)
        kh = kw = 4

    _, hp, wp, cin_eff = xp.shape
    ho, wo = hp - kh + 1, wp - kw + 1
    kdim = kh * kw * cin_eff

    cpad = _round_up(cout, LANE if cout >= LANE else 8)   # per-layer Cout padding
    wo_pad = _round_up(wo, W_ALIGN)
    out_isz = jnp.dtype(out_dtype).itemsize
    vmem_limit, tile_budget = _vmem_budget()
    th, t_steps = _pick_row_tile(ho, wo_pad, cpad, kdim, cin_eff, kh, kw,
                                 out_isz, tile_budget)
    ho_pad = th * t_steps

    # Extra rows/cols only feed outputs that are masked out of the statistics and
    # sliced off by the caller.
    xp = jnp.pad(xp, ((0, 0), (0, ho_pad - ho), (0, wo_pad - wo), (0, 0)))
    xb = xp.astype(jnp.bfloat16)                   # bf16 MXU operands
    _, hpp, wpp, _ = xb.shape

    wk = wk.reshape(kdim, cout)
    if cpad > cout:
        wk = jnp.pad(wk, ((0, 0), (0, cpad - cout)))
    wb = wk.astype(jnp.bfloat16)

    in_specs = [
        # whole padded sample stays VMEM-resident across the row-tile axis
        pl.BlockSpec((None, hpp, wpp, cin_eff), lambda i, t: (i, 0, 0, 0)),
        pl.BlockSpec((kdim, cpad), lambda i, t: (0, 0)),
    ]
    args = [xb, wb]
    if fuse_bn:
        in_specs += [pl.BlockSpec((1, cin_eff), lambda i, t: (0, 0))] * 2
        args += [bn_scale.reshape(1, cin_eff).astype(jnp.float32),
                 bn_shift.reshape(1, cin_eff).astype(jnp.float32)]
    has_bias = bias is not None
    if has_bias:
        in_specs.append(pl.BlockSpec((1, cpad), lambda i, t: (0, 0)))
        args.append(jnp.pad(bias, (0, cpad - cout)).reshape(1, cpad)
                    .astype(jnp.float32))

    scratch = []
    if fuse_bn:
        scratch.append(pltpu.VMEM((th + kh - 1, wpp, cin_eff), jnp.bfloat16))

    y_spec = pl.BlockSpec((None, th, wo_pad, cpad), lambda i, t: (i, t, 0, 0))
    y_shape = jax.ShapeDtypeStruct((n, ho_pad, wo_pad, cpad), out_dtype)
    if with_stats:
        # per-sample accumulators -> batch axis stays "parallel" (v7x megacore)
        s_spec = pl.BlockSpec((None, 1, cpad), lambda i, t: (i, 0, 0))
        out_specs = (y_spec, s_spec, s_spec)
        out_shape = (y_shape,
                     jax.ShapeDtypeStruct((n, 1, cpad), jnp.float32),
                     jax.ShapeDtypeStruct((n, 1, cpad), jnp.float32))
        dims = ("parallel", "arbitrary")
    else:
        out_specs = y_spec
        out_shape = y_shape
        dims = ("parallel", "parallel")

    kernel = functools.partial(
        _conv_kernel, kh=kh, kw=kw, ho=ho, wo=wo, act=act, has_bias=has_bias,
        with_stats=with_stats, fuse_bn=fuse_bn,
        mask_rows=(ho_pad != ho), mask_cols=(wo_pad != wo))

    flops = 2 * n * ho_pad * wo_pad * kdim * cpad
    bytes_acc = xb.size * 2 + wb.size * 2 + n * ho_pad * wo_pad * cpad * out_isz
    cost = pl.CostEstimate(flops=flops, transcendentals=0, bytes_accessed=bytes_acc)

    return pl.pallas_call(
        kernel,
        out_shape=out_shape,
        grid_spec=pltpu.PrefetchScalarGridSpec(
            num_scalar_prefetch=0,
            grid=(n, t_steps),
            in_specs=in_specs,
            out_specs=out_specs,
            scratch_shapes=scratch),
        compiler_params=pltpu.CompilerParams(
            dimension_semantics=dims,
            vmem_limit_bytes=vmem_limit),
        cost_estimate=cost,
    )(*args)


def bn_fold(ssum, ssq, gamma, beta, cout, count):
    """Fold training-mode BatchNorm2d batch statistics into per-channel scale/shift."""
    # TODO(synk): E[x^2]-E[x]^2 in one pass can lose precision when |mean| >> std;
    # a shifted / Welford accumulation would track PyTorch BatchNorm more closely.
    tot = jnp.sum(ssum, axis=0).reshape(-1)[:cout]
    tot2 = jnp.sum(ssq, axis=0).reshape(-1)[:cout]
    mean = tot / count
    var = jnp.maximum(tot2 / count - mean * mean, 0.0)
    inv = lax.rsqrt(var + BN_EPS)
    scale = gamma * inv
    shift = beta - mean * scale
    return scale, shift


# --------------------------- model config / params -------------------------- #

def build_config(input_nc, ndf, n_layers):
    cfg = [dict(cin=input_nc, cout=ndf, stride=2, bn=False, act="leaky")]
    nf_mult = 1
    for nlayer in range(1, n_layers):
        prev, nf_mult = nf_mult, min(2 ** nlayer, 8)
        cfg.append(dict(cin=ndf * prev, cout=ndf * nf_mult, stride=2, bn=True, act="leaky"))
    prev, nf_mult = nf_mult, min(2 ** n_layers, 8)
    cfg.append(dict(cin=ndf * prev, cout=ndf * nf_mult, stride=1, bn=True, act="leaky"))
    cfg.append(dict(cin=ndf * nf_mult, cout=1, stride=1, bn=False, act="none"))
    return cfg


def init_params(key, cfg):
    p = {}
    for i, layer in enumerate(cfg):
        key, k1, k2, k3, k4 = jax.random.split(key, 5)
        cin, cout = layer["cin"], layer["cout"]
        p[f"w{i}"] = jax.random.normal(k1, (cout, cin, 4, 4), jnp.float32) / jnp.sqrt(16.0 * cin)
        p[f"b{i}"] = 0.02 * jax.random.normal(k2, (cout,), jnp.float32)
        if layer["bn"]:
            p[f"g{i}"] = 1.0 + 0.1 * jax.random.normal(k3, (cout,), jnp.float32)
            p[f"be{i}"] = 0.1 * jax.random.normal(k4, (cout,), jnp.float32)
    return p


def patchdis_forward(x_nchw, params, cfg):
    x = jnp.transpose(x_nchw, (0, 2, 3, 1))              # NCHW -> NHWC
    # TODO(synk): inter-layer pad / space-to-depth / crop re-layouts are still plain
    # XLA ops; keeping the padded layout between layers (review item 4) is not done.
    pending = None                                        # (scale, shift) of BN to fuse
    last = len(cfg) - 1
    for i, layer in enumerate(cfg):
        n, h, wdim, _ = x.shape
        stride, cout = layer["stride"], layer["cout"]
        ho = (h + 2 - 4) // stride + 1
        wo = (wdim + 2 - 4) // stride + 1
        bn_scale, bn_shift = pending if pending is not None else (None, None)
        if layer["bn"]:
            # conv bias cancels exactly under training-mode BatchNorm -> skipped;
            # the BN apply + LeakyReLU is deferred to the NEXT conv's prologue.
            y, ssum, ssq = pallas_conv(
                x, params[f"w{i}"], None, stride=stride, with_stats=True,
                act="none", out_dtype=jnp.bfloat16,
                bn_scale=bn_scale, bn_shift=bn_shift)
            pending = bn_fold(ssum, ssq, params[f"g{i}"], params[f"be{i}"],
                              cout, n * ho * wo)
        else:
            y = pallas_conv(
                x, params[f"w{i}"], params[f"b{i}"], stride=stride,
                with_stats=False, act=layer["act"],
                out_dtype=jnp.float32 if i == last else jnp.bfloat16,
                bn_scale=bn_scale, bn_shift=bn_shift)
            pending = None
        x = y[:, :ho, :wo, :cout]                         # drop row/width/lane padding
    return jnp.transpose(x, (0, 3, 1, 2))                 # NHWC -> NCHW


def reference_forward(x_nchw, params, cfg):
    """Pure-JAX f32 reference with the same semantics (training-mode BatchNorm)."""
    x = x_nchw
    for i, layer in enumerate(cfg):
        y = lax.conv_general_dilated(
            x, params[f"w{i}"], window_strides=(layer["stride"],) * 2,
            padding=((1, 1), (1, 1)),
            dimension_numbers=("NCHW", "OIHW", "NCHW"))
        y = y + params[f"b{i}"].reshape(1, -1, 1, 1)
        if layer["bn"]:
            mean = jnp.mean(y, axis=(0, 2, 3), keepdims=True)
            var = jnp.mean(jnp.square(y - mean), axis=(0, 2, 3), keepdims=True)
            y = (y - mean) * lax.rsqrt(var + BN_EPS)
            y = (y * params[f"g{i}"].reshape(1, -1, 1, 1)
                 + params[f"be{i}"].reshape(1, -1, 1, 1))
        if layer["act"] == "leaky":
            y = jnp.where(y >= 0, y, LEAKY_SLOPE * y)
        x = y
    return x


# ---------------------------------- main ------------------------------------ #

if __name__ == "__main__":
    # spatial=32 (not 16): with n_layers=3 the module itself would shrink a 16x16
    # input to 0x0 at the final 4x4/s1/p1 convs.
    N, input_nc, ndf, n_layers, H = 2, 4, 8, 3, 32
    cfg = build_config(input_nc, ndf, n_layers)
    key = jax.random.PRNGKey(0)
    kx, kp = jax.random.split(key)
    x = jax.random.normal(kx, (N, input_nc, H, H), jnp.float32)   # NCHW like PyTorch
    params = init_params(kp, cfg)

    fwd = jax.jit(functools.partial(patchdis_forward, cfg=cfg))
    out = fwd(x, params)
    jax.block_until_ready(out)

    expect = H // 2 ** n_layers - 2   # three stride-2 convs, then two 4x4/s1/p1 convs
    assert out.shape == (N, 1, expect, expect), out.shape
    assert bool(jnp.all(jnp.isfinite(out)))

    # Loose-tolerance check against a pure-JAX f32 reference (kernel runs bf16 MXU).
    ref = jax.jit(functools.partial(reference_forward, cfg=cfg))(x, params)
    err = float(jnp.max(jnp.abs(out.astype(jnp.float32) - ref)))
    tol = 0.2 * (float(jnp.max(jnp.abs(ref))) + 1.0)
    assert err <= tol, (err, tol)

    print("KERNEL_OK")
</pallas_src>

<mosaic_0001>
module attributes {stable_mosaic.version = 11 : i64} {
  func.func @_conv_kernel(%arg0: i32, %arg1: i32, %arg2: memref<1x17x17x16xbf16, #tpu.memory_space<vmem>>, %arg3: memref<64x8xbf16, #tpu.memory_space<vmem>>, %arg4: memref<1x8xf32, #tpu.memory_space<vmem>>, %arg5: memref<1x16x16x8xbf16, #tpu.memory_space<vmem>>) attributes {dimension_semantics = [#tpu.dimension_semantics<parallel>, #tpu.dimension_semantics<parallel>], iteration_bounds = array<i64: 2, 1>, scalar_prefetch = 0 : i64, scratch_operands = 0 : i64, tpu.core_type = #tpu.core_type<tc>, window_params = [{transform_indices = @transform_0, window_bounds = array<i64: 1, 17, 17, 16>}, {pipeline_mode = #tpu.pipeline_mode<synchronous>, transform_indices = @transform_1, window_bounds = array<i64: 64, 8>}, {pipeline_mode = #tpu.pipeline_mode<synchronous>, transform_indices = @transform_2, window_bounds = array<i64: 1, 8>}, {transform_indices = @transform_3, window_bounds = array<i64: 1, 16, 16, 8>}]} {
    %c16_i32 = arith.constant 16 : i32
    %0 = arith.muli %arg1, %c16_i32 : i32
    %1 = tpu.assume_multiple %0, 8 : i32
    %c0_i32 = arith.constant 0 : i32
    %2 = arith.addi %1, %c0_i32 : i32
    %c0 = arith.constant 0 : index
    %3 = arith.index_cast %2 : i32 to index
    %c0_0 = arith.constant 0 : index
    %c0_1 = arith.constant 0 : index
    %4 = vector.load %arg2[%c0, %3, %c0_0, %c0_1] : memref<1x17x17x16xbf16, #tpu.memory_space<vmem>>, vector<1x16x16x16xbf16>
    %5 = vector.shape_cast %4 : vector<1x16x16x16xbf16> to vector<16x16x16xbf16>
    %6 = vector.shape_cast %5 : vector<16x16x16xbf16> to vector<256x16xbf16>
    %c0_i32_2 = arith.constant 0 : i32
    %7 = arith.addi %1, %c0_i32_2 : i32
    %c0_3 = arith.constant 0 : index
    %8 = arith.index_cast %7 : i32 to index
    %c1 = arith.constant 1 : index
    %c0_4 = arith.constant 0 : index
    %9 = vector.load %arg2[%c0_3, %8, %c1, %c0_4] : memref<1x17x17x16xbf16, #tpu.memory_space<vmem>>, vector<1x16x16x16xbf16>
    %10 = vector.shape_cast %9 : vector<1x16x16x16xbf16> to vector<16x16x16xbf16>
    %11 = vector.shape_cast %10 : vector<16x16x16xbf16> to vector<256x16xbf16>
    %c1_i32 = arith.constant 1 : i32
    %12 = arith.addi %1, %c1_i32 : i32
    %c0_5 = arith.constant 0 : index
    %13 = arith.index_cast %12 : i32 to index
    %c0_6 = arith.constant 0 : index
    %c0_7 = arith.constant 0 : index
    %14 = vector.load %arg2[%c0_5, %13, %c0_6, %c0_7] : memref<1x17x17x16xbf16, #tpu.memory_space<vmem>>, vector<1x16x16x16xbf16>
    %15 = vector.shape_cast %14 : vector<1x16x16x16xbf16> to vector<16x16x16xbf16>
    %16 = vector.shape_cast %15 : vector<16x16x16xbf16> to vector<256x16xbf16>
    %c1_i32_8 = arith.constant 1 : i32
    %17 = arith.addi %1, %c1_i32_8 : i32
    %c0_9 = arith.constant 0 : index
    %18 = arith.index_cast %17 : i32 to index
    %c1_10 = arith.constant 1 : index
    %c0_11 = arith.constant 0 : index
    %19 = vector.load %arg2[%c0_9, %18, %c1_10, %c0_11] : memref<1x17x17x16xbf16, #tpu.memory_space<vmem>>, vector<1x16x16x16xbf16>
    %20 = vector.shape_cast %19 : vector<1x16x16x16xbf16> to vector<16x16x16xbf16>
    %21 = vector.shape_cast %20 : vector<16x16x16xbf16> to vector<256x16xbf16>
    %22 = tpu.concatenate %6, %11, %16, %21 in 1 : vector<256x16xbf16>, vector<256x16xbf16>, vector<256x16xbf16>, vector<256x16xbf16> -> vector<256x64xbf16>
    %c0_12 = arith.constant 0 : index
    %c0_13 = arith.constant 0 : index
    %23 = vector.load %arg3[%c0_12, %c0_13] : memref<64x8xbf16, #tpu.memory_space<vmem>>, vector<64x8xbf16>
    %cst = arith.constant dense<0.000000e+00> : vector<256x8xf32>
    %24 = tpu.matmul %22, %23, %cst {dimension_numbers = #tpu.dot_dimension_numbers<[1], [0], [0], [1], [0, 0, 1, 1], [], []>} : vector<256x64xbf16>, vector<64x8xbf16>, vector<256x8xf32> -> vector<256x8xf32>
    %c0_14 = arith.constant 0 : index
    %c0_15 = arith.constant 0 : index
    %25 = vector.load %arg4[%c0_14, %c0_15] : memref<1x8xf32, #tpu.memory_space<vmem>>, vector<1x8xf32>
    %26 = vector.broadcast %25 : vector<1x8xf32> to vector<256x8xf32>
    %27 = arith.addf %24, %26 : vector<256x8xf32>
    %cst_16 = arith.constant 0.000000e+00 : f32
    %28 = vector.broadcast %cst_16 : f32 to vector<256x8xf32>
    %29 = arith.cmpf oge, %27, %28 : vector<256x8xf32>
    %cst_17 = arith.constant 2.000000e-01 : f32
    %30 = vector.broadcast %cst_17 : f32 to vector<256x8xf32>
    %31 = arith.mulf %30, %27 : vector<256x8xf32>
    %32 = arith.select %29, %27, %31 : vector<256x8xi1>, vector<256x8xf32>
    %33 = vector.shape_cast %32 : vector<256x8xf32> to vector<16x16x8xf32>
    %34 = arith.truncf %33 : vector<16x16x8xf32> to vector<16x16x8xbf16>
    %c0_18 = arith.constant 0 : index
    %c0_19 = arith.constant 0 : index
    %c0_20 = arith.constant 0 : index
    %c0_21 = arith.constant 0 : index
    %35 = vector.load %arg5[%c0_18, %c0_19, %c0_20, %c0_21] : memref<1x16x16x8xbf16, #tpu.memory_space<vmem>>, vector<1x16x16x8xbf16>
    %36 = vector.shape_cast %35 : vector<1x16x16x8xbf16> to vector<16x16x8xbf16>
    %37 = vector.shape_cast %34 : vector<16x16x8xbf16> to vector<1x16x16x8xbf16>
    tpu.vector_store %arg5[%c0_18, %c0_19, %c0_20, %c0_21], %37 {strides = array<i32>} : memref<1x16x16x8xbf16, #tpu.memory_space<vmem>>, vector<1x16x16x8xbf16>,
    return
  }
  func.func @transform_0(%arg0: i32, %arg1: i32) -> (i32, i32, i32, i32) {
    %c0_i32 = arith.constant 0 : i32
    %c0_i32_0 = arith.constant 0 : i32
    %c0_i32_1 = arith.constant 0 : i32
    %c0_i32_2 = arith.constant 0 : i32
    return %arg0, %c0_i32, %c0_i32_0, %c0_i32_1 : i32, i32, i32, i32
  }
  func.func @transform_1(%arg0: i32, %arg1: i32) -> (i32, i32) {
    %c0_i32 = arith.constant 0 : i32
    %c0_i32_0 = arith.constant 0 : i32
    %c0_i32_1 = arith.constant 0 : i32
    return %c0_i32, %c0_i32_0 : i32, i32
  }
  func.func @transform_2(%arg0: i32, %arg1: i32) -> (i32, i32) {
    %c0_i32 = arith.constant 0 : i32
    %c0_i32_0 = arith.constant 0 : i32
    %c0_i32_1 = arith.constant 0 : i32
    return %c0_i32, %c0_i32_0 : i32, i32
  }
  func.func @transform_3(%arg0: i32, %arg1: i32) -> (i32, i32, i32, i32) {
    %c0_i32 = arith.constant 0 : i32
    %c0_i32_0 = arith.constant 0 : i32
    %c0_i32_1 = arith.constant 0 : i32
    return %arg0, %arg1, %c0_i32, %c0_i32_0 : i32, i32, i32, i32
  }
}

module attributes {stable_mosaic.version = 11 : i64} {
  func.func @_conv_kernel(%arg0: i32, %arg1: i32, %arg2: memref<1x9x17x32xbf16, #tpu.memory_space<vmem>>, %arg3: memref<128x16xbf16, #tpu.memory_space<vmem>>, %arg4: memref<1x8x16x16xbf16, #tpu.memory_space<vmem>>, %arg5: memref<1x1x16xf32, #tpu.memory_space<vmem>>, %arg6: memref<1x1x16xf32, #tpu.memory_space<vmem>>) attributes {dimension_semantics = [#tpu.dimension_semantics<parallel>, #tpu.dimension_semantics<arbitrary>], iteration_bounds = array<i64: 2, 1>, scalar_prefetch = 0 : i64, scratch_operands = 0 : i64, tpu.core_type = #tpu.core_type<tc>, window_params = [{transform_indices = @transform_0, window_bounds = array<i64: 1, 9, 17, 32>}, {pipeline_mode = #tpu.pipeline_mode<synchronous>, transform_indices = @transform_1, window_bounds = array<i64: 128, 16>}, {transform_indices = @transform_2, window_bounds = array<i64: 1, 8, 16, 16>}, {transform_indices = @transform_3, window_bounds = array<i64: 1, 1, 16>}, {transform_indices = @transform_4, window_bounds = array<i64: 1, 1, 16>}]} {
    %c8_i32 = arith.constant 8 : i32
    %0 = arith.muli %arg1, %c8_i32 : i32
    %1 = tpu.assume_multiple %0, 8 : i32
    %c0_i32 = arith.constant 0 : i32
    %2 = arith.addi %1, %c0_i32 : i32
    %c0 = arith.constant 0 : index
    %3 = arith.index_cast %2 : i32 to index
    %c0_0 = arith.constant 0 : index
    %c0_1 = arith.constant 0 : index
    %4 = vector.load %arg2[%c0, %3, %c0_0, %c0_1] : memref<1x9x17x32xbf16, #tpu.memory_space<vmem>>, vector<1x8x16x32xbf16>
    %5 = vector.shape_cast %4 : vector<1x8x16x32xbf16> to vector<8x16x32xbf16>
    %6 = vector.shape_cast %5 : vector<8x16x32xbf16> to vector<128x32xbf16>
    %c0_i32_2 = arith.constant 0 : i32
    %7 = arith.addi %1, %c0_i32_2 : i32
    %c0_3 = arith.constant 0 : index
    %8 = arith.index_cast %7 : i32 to index
    %c1 = arith.constant 1 : index
    %c0_4 = arith.constant 0 : index
    %9 = vector.load %arg2[%c0_3, %8, %c1, %c0_4] : memref<1x9x17x32xbf16, #tpu.memory_space<vmem>>, vector<1x8x16x32xbf16>
    %10 = vector.shape_cast %9 : vector<1x8x16x32xbf16> to vector<8x16x32xbf16>
    %11 = vector.shape_cast %10 : vector<8x16x32xbf16> to vector<128x32xbf16>
    %c1_i32 = arith.constant 1 : i32
    %12 = arith.addi %1, %c1_i32 : i32
    %c0_5 = arith.constant 0 : index
    %13 = arith.index_cast %12 : i32 to index
    %c0_6 = arith.constant 0 : index
    %c0_7 = arith.constant 0 : index
    %14 = vector.load %arg2[%c0_5, %13, %c0_6, %c0_7] : memref<1x9x17x32xbf16, #tpu.memory_space<vmem>>, vector<1x8x16x32xbf16>
    %15 = vector.shape_cast %14 : vector<1x8x16x32xbf16> to vector<8x16x32xbf16>
    %16 = vector.shape_cast %15 : vector<8x16x32xbf16> to vector<128x32xbf16>
    %c1_i32_8 = arith.constant 1 : i32
    %17 = arith.addi %1, %c1_i32_8 : i32
    %c0_9 = arith.constant 0 : index
    %18 = arith.index_cast %17 : i32 to index
    %c1_10 = arith.constant 1 : index
    %c0_11 = arith.constant 0 : index
    %19 = vector.load %arg2[%c0_9, %18, %c1_10, %c0_11] : memref<1x9x17x32xbf16, #tpu.memory_space<vmem>>, vector<1x8x16x32xbf16>
    %20 = vector.shape_cast %19 : vector<1x8x16x32xbf16> to vector<8x16x32xbf16>
    %21 = vector.shape_cast %20 : vector<8x16x32xbf16> to vector<128x32xbf16>
    %22 = tpu.concatenate %6, %11, %16, %21 in 1 : vector<128x32xbf16>, vector<128x32xbf16>, vector<128x32xbf16>, vector<128x32xbf16> -> vector<128x128xbf16>
    %c0_12 = arith.constant 0 : index
    %c0_13 = arith.constant 0 : index
    %23 = vector.load %arg3[%c0_12, %c0_13] : memref<128x16xbf16, #tpu.memory_space<vmem>>, vector<128x16xbf16>
    %cst = arith.constant dense<0.000000e+00> : vector<128x16xf32>
    %24 = tpu.matmul %22, %23, %cst {dimension_numbers = #tpu.dot_dimension_numbers<[1], [0], [0], [1], [0, 0, 1, 1], [], []>} : vector<128x128xbf16>, vector<128x16xbf16>, vector<128x16xf32> -> vector<128x16xf32>
    %c0_i32_14 = arith.constant 0 : i32
    %25 = arith.cmpi eq, %arg1, %c0_i32_14 : i32
    %26 = arith.extui %25 : i1 to i32
    %c0_i32_15 = arith.constant 0 : i32
    %27 = arith.cmpi ne, %26, %c0_i32_15 : i32
    scf.if %27 {
      %cst_36 = arith.constant 0.000000e+00 : f32
      %59 = vector.broadcast %cst_36 : f32 to vector<1x16xf32>
      %c0_37 = arith.constant 0 : index
      %c0_38 = arith.constant 0 : index
      %c0_39 = arith.constant 0 : index
      %60 = vector.load %arg5[%c0_37, %c0_38, %c0_39] : memref<1x1x16xf32, #tpu.memory_space<vmem>>, vector<1x1x16xf32>
      %61 = vector.shape_cast %60 : vector<1x1x16xf32> to vector<1x16xf32>
      %62 = vector.shape_cast %59 : vector<1x16xf32> to vector<1x1x16xf32>
      tpu.vector_store %arg5[%c0_37, %c0_38, %c0_39], %62 {strides = array<i32>} : memref<1x1x16xf32, #tpu.memory_space<vmem>>, vector<1x1x16xf32>,
      %cst_40 = arith.constant 0.000000e+00 : f32
      %63 = vector.broadcast %cst_40 : f32 to vector<1x16xf32>
      %c0_41 = arith.constant 0 : index
      %c0_42 = arith.constant 0 : index
      %c0_43 = arith.constant 0 : index
      %64 = vector.load %arg6[%c0_41, %c0_42, %c0_43] : memref<1x1x16xf32, #tpu.memory_space<vmem>>, vector<1x1x16xf32>
      %65 = vector.shape_cast %64 : vector<1x1x16xf32> to vector<1x16xf32>
      %66 = vector.shape_cast %63 : vector<1x16xf32> to vector<1x1x16xf32>
      tpu.vector_store %arg6[%c0_41, %c0_42, %c0_43], %66 {strides = array<i32>} : memref<1x1x16xf32, #tpu.memory_space<vmem>>, vector<1x1x16xf32>,
    } else {
    }
    %28 = vector.shape_cast %24 : vector<128x16xf32> to vector<8x16x16xf32>
    %29 = tpu.iota {dimensions = array<i32: 1>} : vector<8x16x1xi32>
    %c8_i32_16 = arith.constant 8 : i32
    %30 = vector.broadcast %c8_i32_16 : i32 to vector<8x16x1xi32>
    %31 = arith.cmpi slt, %29, %30 : vector<8x16x1xi32>
    %cst_17 = arith.constant 0.000000e+00 : f32
    %32 = vector.shape_cast %31 : vector<8x16x1xi1> to vector<8x16x1xi1>
    %33 = vector.broadcast %32 : vector<8x16x1xi1> to vector<8x16x16xi1>
    %34 = vector.broadcast %cst_17 : f32 to vector<8x16x16xf32>
    %35 = arith.select %33, %28, %34 : vector<8x16x16xi1>, vector<8x16x16xf32>
    %36 = vector.shape_cast %35 : vector<8x16x16xf32> to vector<128x16xf32>
    %c0_18 = arith.constant 0 : index
    %c0_19 = arith.constant 0 : index
    %c0_20 = arith.constant 0 : index
    %37 = vector.load %arg5[%c0_18, %c0_19, %c0_20] : memref<1x1x16xf32, #tpu.memory_space<vmem>>, vector<1x1x16xf32>
    %38 = vector.shape_cast %37 : vector<1x1x16xf32> to vector<1x16xf32>
    %cst_21 = arith.constant dense<0.000000e+00> : vector<16xf32>
    %39 = vector.multi_reduction <add>, %36, %cst_21 [0] : vector<128x16xf32> to vector<16xf32>
    %40 = vector.shape_cast %39 : vector<16xf32> to vector<1x16xf32>
    %41 = arith.addf %38, %40 : vector<1x16xf32>
    %c0_22 = arith.constant 0 : index
    %c0_23 = arith.constant 0 : index
    %c0_24 = arith.constant 0 : index
    %42 = vector.load %arg5[%c0_22, %c0_23, %c0_24] : memref<1x1x16xf32, #tpu.memory_space<vmem>>, vector<1x1x16xf32>
    %43 = vector.shape_cast %42 : vector<1x1x16xf32> to vector<1x16xf32>
    %44 = vector.shape_cast %41 : vector<1x16xf32> to vector<1x1x16xf32>
    tpu.vector_store %arg5[%c0_22, %c0_23, %c0_24], %44 {strides = array<i32>} : memref<1x1x16xf32, #tpu.memory_space<vmem>>, vector<1x1x16xf32>,
    %c0_25 = arith.constant 0 : index
    %c0_26 = arith.constant 0 : index
    %c0_27 = arith.constant 0 : index
    %45 = vector.load %arg6[%c0_25, %c0_26, %c0_27] : memref<1x1x16xf32, #tpu.memory_space<vmem>>, vector<1x1x16xf32>
    %46 = vector.shape_cast %45 : vector<1x1x16xf32> to vector<1x16xf32>
    %47 = arith.mulf %36, %36 : vector<128x16xf32>
    %cst_28 = arith.constant dense<0.000000e+00> : vector<16xf32>
    %48 = vector.multi_reduction <add>, %47, %cst_28 [0] : vector<128x16xf32> to vector<16xf32>
    %49 = vector.shape_cast %48 : vector<16xf32> to vector<1x16xf32>
    %50 = arith.addf %46, %49 : vector<1x16xf32>
    %c0_29 = arith.constant 0 : index
    %c0_30 = arith.constant 0 : index
    %c0_31 = arith.constant 0 : index
    %51 = vector.load %arg6[%c0_29, %c0_30, %c0_31] : memref<1x1x16xf32, #tpu.memory_space<vmem>>, vector<1x1x16xf32>
    %52 = vector.shape_cast %51 : vector<1x1x16xf32> to vector<1x16xf32>
    %53 = vector.shape_cast %50 : vector<1x16xf32> to vector<1x1x16xf32>
    tpu.vector_store %arg6[%c0_29, %c0_30, %c0_31], %53 {strides = array<i32>} : memref<1x1x16xf32, #tpu.memory_space<vmem>>, vector<1x1x16xf32>,
    %54 = vector.shape_cast %24 : vector<128x16xf32> to vector<8x16x16xf32>
    %55 = arith.truncf %54 : vector<8x16x16xf32> to vector<8x16x16xbf16>
    %c0_32 = arith.constant 0 : index
    %c0_33 = arith.constant 0 : index
    %c0_34 = arith.constant 0 : index
    %c0_35 = arith.constant 0 : index
    %56 = vector.load %arg4[%c0_32, %c0_33, %c0_34, %c0_35] : memref<1x8x16x16xbf16, #tpu.memory_space<vmem>>, vector<1x8x16x16xbf16>
    %57 = vector.shape_cast %56 : vector<1x8x16x16xbf16> to vector<8x16x16xbf16>
    %58 = vector.shape_cast %55 : vector<8x16x16xbf16> to vector<1x8x16x16xbf16>
    tpu.vector_store %arg4[%c0_32, %c0_33, %c0_34, %c0_35], %58 {strides = array<i32>} : memref<1x8x16x16xbf16, #tpu.memory_space<vmem>>, vector<1x8x16x16xbf16>,
    return
  }
  func.func @transform_0(%arg0: i32, %arg1: i32) -> (i32, i32, i32, i32) {
    %c0_i32 = arith.constant 0 : i32
    %c0_i32_0 = arith.constant 0 : i32
    %c0_i32_1 = arith.constant 0 : i32
    %c0_i32_2 = arith.constant 0 : i32
    return %arg0, %c0_i32, %c0_i32_0, %c0_i32_1 : i32, i32, i32, i32
  }
  func.func @transform_1(%arg0: i32, %arg1: i32) -> (i32, i32) {
    %c0_i32 = arith.constant 0 : i32
    %c0_i32_0 = arith.constant 0 : i32
    %c0_i32_1 = arith.constant 0 : i32
    return %c0_i32, %c0_i32_0 : i32, i32
  }
  func.func @transform_2(%arg0: i32, %arg1: i32) -> (i32, i32, i32, i32) {
    %c0_i32 = arith.constant 0 : i32
    %c0_i32_0 = arith.constant 0 : i32
    %c0_i32_1 = arith.constant 0 : i32
    return %arg0, %arg1, %c0_i32, %c0_i32_0 : i32, i32, i32, i32
  }
  func.func @transform_3(%arg0: i32, %arg1: i32) -> (i32, i32, i32) {
    %c0_i32 = arith.constant 0 : i32
    %c0_i32_0 = arith.constant 0 : i32
    %c0_i32_1 = arith.constant 0 : i32
    return %arg0, %c0_i32, %c0_i32_0 : i32, i32, i32
  }
  func.func @transform_4(%arg0: i32, %arg1: i32) -> (i32, i32, i32) {
    %c0_i32 = arith.constant 0 : i32
    %c0_i32_0 = arith.constant 0 : i32
    %c0_i32_1 = arith.constant 0 : i32
    return %arg0, %c0_i32, %c0_i32_0 : i32, i32, i32
  }
}

module attributes {stable_mosaic.version = 11 : i64} {
  func.func @_conv_kernel(%arg0: i32, %arg1: i32, %arg2: memref<1x5x17x64xbf16, #tpu.memory_space<vmem>>, %arg3: memref<256x32xbf16, #tpu.memory_space<vmem>>, %arg4: memref<1x64xf32, #tpu.memory_space<vmem>>, %arg5: memref<1x64xf32, #tpu.memory_space<vmem>>, %arg6: memref<1x4x16x32xbf16, #tpu.memory_space<vmem>>, %arg7: memref<1x1x32xf32, #tpu.memory_space<vmem>>, %arg8: memref<1x1x32xf32, #tpu.memory_space<vmem>>, %arg9: memref<5x17x64xbf16, #tpu.memory_space<vmem>>) attributes {dimension_semantics = [#tpu.dimension_semantics<parallel>, #tpu.dimension_semantics<arbitrary>], iteration_bounds = array<i64: 2, 1>, scalar_prefetch = 0 : i64, scratch_operands = 1 : i64, tpu.core_type = #tpu.core_type<tc>, window_params = [{transform_indices = @transform_0, window_bounds = array<i64: 1, 5, 17, 64>}, {pipeline_mode = #tpu.pipeline_mode<synchronous>, transform_indices = @transform_1, window_bounds = array<i64: 256, 32>}, {pipeline_mode = #tpu.pipeline_mode<synchronous>, transform_indices = @transform_2, window_bounds = array<i64: 1, 64>}, {pipeline_mode = #tpu.pipeline_mode<synchronous>, transform_indices = @transform_3, window_bounds = array<i64: 1, 64>}, {transform_indices = @transform_4, window_bounds = array<i64: 1, 4, 16, 32>}, {transform_indices = @transform_5, window_bounds = array<i64: 1, 1, 32>}, {transform_indices = @transform_6, window_bounds = array<i64: 1, 1, 32>}]} {
    %c4_i32 = arith.constant 4 : i32
    %0 = arith.muli %arg1, %c4_i32 : i32
    %c0 = arith.constant 0 : index
    %1 = arith.index_cast %0 : i32 to index
    %c0_0 = arith.constant 0 : index
    %c0_1 = arith.constant 0 : index
    %2 = vector.load %arg2[%c0, %1, %c0_0, %c0_1] : memref<1x5x17x64xbf16, #tpu.memory_space<vmem>>, vector<1x5x17x64xbf16>
    %3 = vector.shape_cast %2 : vector<1x5x17x64xbf16> to vector<5x17x64xbf16>
    %4 = arith.extf %3 : vector<5x17x64xbf16> to vector<5x17x64xf32>
    %c0_2 = arith.constant 0 : index
    %c0_3 = arith.constant 0 : index
    %5 = vector.load %arg4[%c0_2, %c0_3] : memref<1x64xf32, #tpu.memory_space<vmem>>, vector<1x64xf32>
    %6 = vector.shape_cast %5 : vector<1x64xf32> to vector<1x1x64xf32>
    %7 = vector.broadcast %6 : vector<1x1x64xf32> to vector<5x17x64xf32>
    %8 = arith.mulf %4, %7 : vector<5x17x64xf32>
    %c0_4 = arith.constant 0 : index
    %c0_5 = arith.constant 0 : index
    %9 = vector.load %arg5[%c0_4, %c0_5] : memref<1x64xf32, #tpu.memory_space<vmem>>, vector<1x64xf32>
    %10 = vector.shape_cast %9 : vector<1x64xf32> to vector<1x1x64xf32>
    %11 = vector.broadcast %10 : vector<1x1x64xf32> to vector<5x17x64xf32>
    %12 = arith.addf %8, %11 : vector<5x17x64xf32>
    %cst = arith.constant 0.000000e+00 : f32
    %13 = vector.broadcast %cst : f32 to vector<5x17x64xf32>
    %14 = arith.cmpf oge, %12, %13 : vector<5x17x64xf32>
    %cst_6 = arith.constant 2.000000e-01 : f32
    %15 = vector.broadcast %cst_6 : f32 to vector<5x17x64xf32>
    %16 = arith.mulf %15, %12 : vector<5x17x64xf32>
    %17 = arith.select %14, %12, %16 : vector<5x17x64xi1>, vector<5x17x64xf32>
    %18 = arith.truncf %17 : vector<5x17x64xf32> to vector<5x17x64xbf16>
    %c0_7 = arith.constant 0 : index
    %c0_8 = arith.constant 0 : index
    %c0_9 = arith.constant 0 : index
    %19 = vector.load %arg9[%c0_7, %c0_8, %c0_9] : memref<5x17x64xbf16, #tpu.memory_space<vmem>>, vector<5x17x64xbf16>
    tpu.vector_store %arg9[%c0_7, %c0_8, %c0_9], %18 {strides = array<i32>} : memref<5x17x64xbf16, #tpu.memory_space<vmem>>, vector<5x17x64xbf16>,
    %c0_10 = arith.constant 0 : index
    %c0_11 = arith.constant 0 : index
    %c0_12 = arith.constant 0 : index
    %20 = vector.load %arg9[%c0_10, %c0_11, %c0_12] : memref<5x17x64xbf16, #tpu.memory_space<vmem>>, vector<4x16x64xbf16>
    %21 = vector.shape_cast %20 : vector<4x16x64xbf16> to vector<64x64xbf16>
    %c0_13 = arith.constant 0 : index
    %c1 = arith.constant 1 : index
    %c0_14 = arith.constant 0 : index
    %22 = vector.load %arg9[%c0_13, %c1, %c0_14] : memref<5x17x64xbf16, #tpu.memory_space<vmem>>, vector<4x16x64xbf16>
    %23 = vector.shape_cast %22 : vector<4x16x64xbf16> to vector<64x64xbf16>
    %c1_15 = arith.constant 1 : index
    %c0_16 = arith.constant 0 : index
    %c0_17 = arith.constant 0 : index
    %24 = vector.load %arg9[%c1_15, %c0_16, %c0_17] : memref<5x17x64xbf16, #tpu.memory_space<vmem>>, vector<4x16x64xbf16>
    %25 = vector.shape_cast %24 : vector<4x16x64xbf16> to vector<64x64xbf16>
    %c1_18 = arith.constant 1 : index
    %c1_19 = arith.constant 1 : index
    %c0_20 = arith.constant 0 : index
    %26 = vector.load %arg9[%c1_18, %c1_19, %c0_20] : memref<5x17x64xbf16, #tpu.memory_space<vmem>>, vector<4x16x64xbf16>
    %27 = vector.shape_cast %26 : vector<4x16x64xbf16> to vector<64x64xbf16>
    %28 = tpu.concatenate %21, %23, %25, %27 in 1 : vector<64x64xbf16>, vector<64x64xbf16>, vector<64x64xbf16>, vector<64x64xbf16> -> vector<64x256xbf16>
    %c0_21 = arith.constant 0 : index
    %c0_22 = arith.constant 0 : index
    %29 = vector.load %arg3[%c0_21, %c0_22] : memref<256x32xbf16, #tpu.memory_space<vmem>>, vector<256x32xbf16>
    %cst_23 = arith.constant dense<0.000000e+00> : vector<64x32xf32>
    %30 = tpu.matmul %28, %29, %cst_23 {dimension_numbers = #tpu.dot_dimension_numbers<[1], [0], [0], [1], [0, 0, 1, 1], [], []>} : vector<64x256xbf16>, vector<256x32xbf16>, vector<64x32xf32> -> vector<64x32xf32>
    %c0_i32 = arith.constant 0 : i32
    %31 = arith.cmpi eq, %arg1, %c0_i32 : i32
    %32 = arith.extui %31 : i1 to i32
    %c0_i32_24 = arith.constant 0 : i32
    %33 = arith.cmpi ne, %32, %c0_i32_24 : i32
    scf.if %33 {
      %cst_45 = arith.constant 0.000000e+00 : f32
      %65 = vector.broadcast %cst_45 : f32 to vector<1x32xf32>
      %c0_46 = arith.constant 0 : index
      %c0_47 = arith.constant 0 : index
      %c0_48 = arith.constant 0 : index
      %66 = vector.load %arg7[%c0_46, %c0_47, %c0_48] : memref<1x1x32xf32, #tpu.memory_space<vmem>>, vector<1x1x32xf32>
      %67 = vector.shape_cast %66 : vector<1x1x32xf32> to vector<1x32xf32>
      %68 = vector.shape_cast %65 : vector<1x32xf32> to vector<1x1x32xf32>
      tpu.vector_store %arg7[%c0_46, %c0_47, %c0_48], %68 {strides = array<i32>} : memref<1x1x32xf32, #tpu.memory_space<vmem>>, vector<1x1x32xf32>,
      %cst_49 = arith.constant 0.000000e+00 : f32
      %69 = vector.broadcast %cst_49 : f32 to vector<1x32xf32>
      %c0_50 = arith.constant 0 : index
      %c0_51 = arith.constant 0 : index
      %c0_52 = arith.constant 0 : index
      %70 = vector.load %arg8[%c0_50, %c0_51, %c0_52] : memref<1x1x32xf32, #tpu.memory_space<vmem>>, vector<1x1x32xf32>
      %71 = vector.shape_cast %70 : vector<1x1x32xf32> to vector<1x32xf32>
      %72 = vector.shape_cast %69 : vector<1x32xf32> to vector<1x1x32xf32>
      tpu.vector_store %arg8[%c0_50, %c0_51, %c0_52], %72 {strides = array<i32>} : memref<1x1x32xf32, #tpu.memory_space<vmem>>, vector<1x1x32xf32>,
    } else {
    }
    %34 = vector.shape_cast %30 : vector<64x32xf32> to vector<4x16x32xf32>
    %35 = tpu.iota {dimensions = array<i32: 1>} : vector<4x16x1xi32>
    %c4_i32_25 = arith.constant 4 : i32
    %36 = vector.broadcast %c4_i32_25 : i32 to vector<4x16x1xi32>
    %37 = arith.cmpi slt, %35, %36 : vector<4x16x1xi32>
    %cst_26 = arith.constant 0.000000e+00 : f32
    %38 = vector.shape_cast %37 : vector<4x16x1xi1> to vector<4x16x1xi1>
    %39 = vector.broadcast %38 : vector<4x16x1xi1> to vector<4x16x32xi1>
    %40 = vector.broadcast %cst_26 : f32 to vector<4x16x32xf32>
    %41 = arith.select %39, %34, %40 : vector<4x16x32xi1>, vector<4x16x32xf32>
    %42 = vector.shape_cast %41 : vector<4x16x32xf32> to vector<64x32xf32>
    %c0_27 = arith.constant 0 : index
    %c0_28 = arith.constant 0 : index
    %c0_29 = arith.constant 0 : index
    %43 = vector.load %arg7[%c0_27, %c0_28, %c0_29] : memref<1x1x32xf32, #tpu.memory_space<vmem>>, vector<1x1x32xf32>
    %44 = vector.shape_cast %43 : vector<1x1x32xf32> to vector<1x32xf32>
    %cst_30 = arith.constant dense<0.000000e+00> : vector<32xf32>
    %45 = vector.multi_reduction <add>, %42, %cst_30 [0] : vector<64x32xf32> to vector<32xf32>
    %46 = vector.shape_cast %45 : vector<32xf32> to vector<1x32xf32>
    %47 = arith.addf %44, %46 : vector<1x32xf32>
    %c0_31 = arith.constant 0 : index
    %c0_32 = arith.constant 0 : index
    %c0_33 = arith.constant 0 : index
    %48 = vector.load %arg7[%c0_31, %c0_32, %c0_33] : memref<1x1x32xf32, #tpu.memory_space<vmem>>, vector<1x1x32xf32>
    %49 = vector.shape_cast %48 : vector<1x1x32xf32> to vector<1x32xf32>
    %50 = vector.shape_cast %47 : vector<1x32xf32> to vector<1x1x32xf32>
    tpu.vector_store %arg7[%c0_31, %c0_32, %c0_33], %50 {strides = array<i32>} : memref<1x1x32xf32, #tpu.memory_space<vmem>>, vector<1x1x32xf32>,
    %c0_34 = arith.constant 0 : index
    %c0_35 = arith.constant 0 : index
    %c0_36 = arith.constant 0 : index
    %51 = vector.load %arg8[%c0_34, %c0_35, %c0_36] : memref<1x1x32xf32, #tpu.memory_space<vmem>>, vector<1x1x32xf32>
    %52 = vector.shape_cast %51 : vector<1x1x32xf32> to vector<1x32xf32>
    %53 = arith.mulf %42, %42 : vector<64x32xf32>
    %cst_37 = arith.constant dense<0.000000e+00> : vector<32xf32>
    %54 = vector.multi_reduction <add>, %53, %cst_37 [0] : vector<64x32xf32> to vector<32xf32>
    %55 = vector.shape_cast %54 : vector<32xf32> to vector<1x32xf32>
    %56 = arith.addf %52, %55 : vector<1x32xf32>
    %c0_38 = arith.constant 0 : index
    %c0_39 = arith.constant 0 : index
    %c0_40 = arith.constant 0 : index
    %57 = vector.load %arg8[%c0_38, %c0_39, %c0_40] : memref<1x1x32xf32, #tpu.memory_space<vmem>>, vector<1x1x32xf32>
    %58 = vector.shape_cast %57 : vector<1x1x32xf32> to vector<1x32xf32>
    %59 = vector.shape_cast %56 : vector<1x32xf32> to vector<1x1x32xf32>
    tpu.vector_store %arg8[%c0_38, %c0_39, %c0_40], %59 {strides = array<i32>} : memref<1x1x32xf32, #tpu.memory_space<vmem>>, vector<1x1x32xf32>,
    %60 = vector.shape_cast %30 : vector<64x32xf32> to vector<4x16x32xf32>
    %61 = arith.truncf %60 : vector<4x16x32xf32> to vector<4x16x32xbf16>
    %c0_41 = arith.constant 0 : index
    %c0_42 = arith.constant 0 : index
    %c0_43 = arith.constant 0 : index
    %c0_44 = arith.constant 0 : index
    %62 = vector.load %arg6[%c0_41, %c0_42, %c0_43, %c0_44] : memref<1x4x16x32xbf16, #tpu.memory_space<vmem>>, vector<1x4x16x32xbf16>
    %63 = vector.shape_cast %62 : vector<1x4x16x32xbf16> to vector<4x16x32xbf16>
    %64 = vector.shape_cast %61 : vector<4x16x32xbf16> to vector<1x4x16x32xbf16>
    tpu.vector_store %arg6[%c0_41, %c0_42, %c0_43, %c0_44], %64 {strides = array<i32>} : memref<1x4x16x32xbf16, #tpu.memory_space<vmem>>, vector<1x4x16x32xbf16>,
    return
  }
  func.func @transform_0(%arg0: i32, %arg1: i32) -> (i32, i32, i32, i32) {
    %c0_i32 = arith.constant 0 : i32
    %c0_i32_0 = arith.constant 0 : i32
    %c0_i32_1 = arith.constant 0 : i32
    %c0_i32_2 = arith.constant 0 : i32
    return %arg0, %c0_i32, %c0_i32_0, %c0_i32_1 : i32, i32, i32, i32
  }
  func.func @transform_1(%arg0: i32, %arg1: i32) -> (i32, i32) {
    %c0_i32 = arith.constant 0 : i32
    %c0_i32_0 = arith.constant 0 : i32
    %c0_i32_1 = arith.constant 0 : i32
    return %c0_i32, %c0_i32_0 : i32, i32
  }
  func.func @transform_2(%arg0: i32, %arg1: i32) -> (i32, i32) {
    %c0_i32 = arith.constant 0 : i32
    %c0_i32_0 = arith.constant 0 : i32
    %c0_i32_1 = arith.constant 0 : i32
    return %c0_i32, %c0_i32_0 : i32, i32
  }
  func.func @transform_3(%arg0: i32, %arg1: i32) -> (i32, i32) {
    %c0_i32 = arith.constant 0 : i32
    %c0_i32_0 = arith.constant 0 : i32
    %c0_i32_1 = arith.constant 0 : i32
    return %c0_i32, %c0_i32_0 : i32, i32
  }
  func.func @transform_4(%arg0: i32, %arg1: i32) -> (i32, i32, i32, i32) {
    %c0_i32 = arith.constant 0 : i32
    %c0_i32_0 = arith.constant 0 : i32
    %c0_i32_1 = arith.constant 0 : i32
    return %arg0, %arg1, %c0_i32, %c0_i32_0 : i32, i32, i32, i32
  }
  func.func @transform_5(%arg0: i32, %arg1: i32) -> (i32, i32, i32) {
    %c0_i32 = arith.constant 0 : i32
    %c0_i32_0 = arith.constant 0 : i32
    %c0_i32_1 = arith.constant 0 : i32
    return %arg0, %c0_i32, %c0_i32_0 : i32, i32, i32
  }
  func.func @transform_6(%arg0: i32, %arg1: i32) -> (i32, i32, i32) {
    %c0_i32 = arith.constant 0 : i32
    %c0_i32_0 = arith.constant 0 : i32
    %c0_i32_1 = arith.constant 0 : i32
    return %arg0, %c0_i32, %c0_i32_0 : i32, i32, i32
  }
}

module attributes {stable_mosaic.version = 11 : i64} {
  func.func @_conv_kernel(%arg0: i32, %arg1: i32, %arg2: memref<1x6x19x32xbf16, #tpu.memory_space<vmem>>, %arg3: memref<512x64xbf16, #tpu.memory_space<vmem>>, %arg4: memref<1x32xf32, #tpu.memory_space<vmem>>, %arg5: memref<1x32xf32, #tpu.memory_space<vmem>>, %arg6: memref<1x3x16x64xbf16, #tpu.memory_space<vmem>>, %arg7: memref<1x1x64xf32, #tpu.memory_space<vmem>>, %arg8: memref<1x1x64xf32, #tpu.memory_space<vmem>>, %arg9: memref<6x19x32xbf16, #tpu.memory_space<vmem>>) attributes {dimension_semantics = [#tpu.dimension_semantics<parallel>, #tpu.dimension_semantics<arbitrary>], iteration_bounds = array<i64: 2, 1>, scalar_prefetch = 0 : i64, scratch_operands = 1 : i64, tpu.core_type = #tpu.core_type<tc>, window_params = [{transform_indices = @transform_0, window_bounds = array<i64: 1, 6, 19, 32>}, {pipeline_mode = #tpu.pipeline_mode<synchronous>, transform_indices = @transform_1, window_bounds = array<i64: 512, 64>}, {pipeline_mode = #tpu.pipeline_mode<synchronous>, transform_indices = @transform_2, window_bounds = array<i64: 1, 32>}, {pipeline_mode = #tpu.pipeline_mode<synchronous>, transform_indices = @transform_3, window_bounds = array<i64: 1, 32>}, {transform_indices = @transform_4, window_bounds = array<i64: 1, 3, 16, 64>}, {transform_indices = @transform_5, window_bounds = array<i64: 1, 1, 64>}, {transform_indices = @transform_6, window_bounds = array<i64: 1, 1, 64>}]} {
    %c3_i32 = arith.constant 3 : i32
    %0 = arith.muli %arg1, %c3_i32 : i32
    %c0 = arith.constant 0 : index
    %1 = arith.index_cast %0 : i32 to index
    %c0_0 = arith.constant 0 : index
    %c0_1 = arith.constant 0 : index
    %2 = vector.load %arg2[%c0, %1, %c0_0, %c0_1] : memref<1x6x19x32xbf16, #tpu.memory_space<vmem>>, vector<1x6x19x32xbf16>
    %3 = vector.shape_cast %2 : vector<1x6x19x32xbf16> to vector<6x19x32xbf16>
    %4 = arith.extf %3 : vector<6x19x32xbf16> to vector<6x19x32xf32>
    %c0_2 = arith.constant 0 : index
    %c0_3 = arith.constant 0 : index
    %5 = vector.load %arg4[%c0_2, %c0_3] : memref<1x32xf32, #tpu.memory_space<vmem>>, vector<1x32xf32>
    %6 = vector.shape_cast %5 : vector<1x32xf32> to vector<1x1x32xf32>
    %7 = vector.broadcast %6 : vector<1x1x32xf32> to vector<6x19x32xf32>
    %8 = arith.mulf %4, %7 : vector<6x19x32xf32>
    %c0_4 = arith.constant 0 : index
    %c0_5 = arith.constant 0 : index
    %9 = vector.load %arg5[%c0_4, %c0_5] : memref<1x32xf32, #tpu.memory_space<vmem>>, vector<1x32xf32>
    %10 = vector.shape_cast %9 : vector<1x32xf32> to vector<1x1x32xf32>
    %11 = vector.broadcast %10 : vector<1x1x32xf32> to vector<6x19x32xf32>
    %12 = arith.addf %8, %11 : vector<6x19x32xf32>
    %cst = arith.constant 0.000000e+00 : f32
    %13 = vector.broadcast %cst : f32 to vector<6x19x32xf32>
    %14 = arith.cmpf oge, %12, %13 : vector<6x19x32xf32>
    %cst_6 = arith.constant 2.000000e-01 : f32
    %15 = vector.broadcast %cst_6 : f32 to vector<6x19x32xf32>
    %16 = arith.mulf %15, %12 : vector<6x19x32xf32>
    %17 = arith.select %14, %12, %16 : vector<6x19x32xi1>, vector<6x19x32xf32>
    %18 = arith.truncf %17 : vector<6x19x32xf32> to vector<6x19x32xbf16>
    %c0_7 = arith.constant 0 : index
    %c0_8 = arith.constant 0 : index
    %c0_9 = arith.constant 0 : index
    %19 = vector.load %arg9[%c0_7, %c0_8, %c0_9] : memref<6x19x32xbf16, #tpu.memory_space<vmem>>, vector<6x19x32xbf16>
    tpu.vector_store %arg9[%c0_7, %c0_8, %c0_9], %18 {strides = array<i32>} : memref<6x19x32xbf16, #tpu.memory_space<vmem>>, vector<6x19x32xbf16>,
    %c0_10 = arith.constant 0 : index
    %c0_11 = arith.constant 0 : index
    %c0_12 = arith.constant 0 : index
    %20 = vector.load %arg9[%c0_10, %c0_11, %c0_12] : memref<6x19x32xbf16, #tpu.memory_space<vmem>>, vector<3x16x32xbf16>
    %21 = vector.shape_cast %20 : vector<3x16x32xbf16> to vector<48x32xbf16>
    %c0_13 = arith.constant 0 : index
    %c1 = arith.constant 1 : index
    %c0_14 = arith.constant 0 : index
    %22 = vector.load %arg9[%c0_13, %c1, %c0_14] : memref<6x19x32xbf16, #tpu.memory_space<vmem>>, vector<3x16x32xbf16>
    %23 = vector.shape_cast %22 : vector<3x16x32xbf16> to vector<48x32xbf16>
    %c0_15 = arith.constant 0 : index
    %c2 = arith.constant 2 : index
    %c0_16 = arith.constant 0 : index
    %24 = vector.load %arg9[%c0_15, %c2, %c0_16] : memref<6x19x32xbf16, #tpu.memory_space<vmem>>, vector<3x16x32xbf16>
    %25 = vector.shape_cast %24 : vector<3x16x32xbf16> to vector<48x32xbf16>
    %c0_17 = arith.constant 0 : index
    %c3 = arith.constant 3 : index
    %c0_18 = arith.constant 0 : index
    %26 = vector.load %arg9[%c0_17, %c3, %c0_18] : memref<6x19x32xbf16, #tpu.memory_space<vmem>>, vector<3x16x32xbf16>
    %27 = vector.shape_cast %26 : vector<3x16x32xbf16> to vector<48x32xbf16>
    %c1_19 = arith.constant 1 : index
    %c0_20 = arith.constant 0 : index
    %c0_21 = arith.constant 0 : index
    %28 = vector.load %arg9[%c1_19, %c0_20, %c0_21] : memref<6x19x32xbf16, #tpu.memory_space<vmem>>, vector<3x16x32xbf16>
    %29 = vector.shape_cast %28 : vector<3x16x32xbf16> to vector<48x32xbf16>
    %c1_22 = arith.constant 1 : index
    %c1_23 = arith.constant 1 : index
    %c0_24 = arith.constant 0 : index
    %30 = vector.load %arg9[%c1_22, %c1_23, %c0_24] : memref<6x19x32xbf16, #tpu.memory_space<vmem>>, vector<3x16x32xbf16>
    %31 = vector.shape_cast %30 : vector<3x16x32xbf16> to vector<48x32xbf16>
    %c1_25 = arith.constant 1 : index
    %c2_26 = arith.constant 2 : index
    %c0_27 = arith.constant 0 : index
    %32 = vector.load %arg9[%c1_25, %c2_26, %c0_27] : memref<6x19x32xbf16, #tpu.memory_space<vmem>>, vector<3x16x32xbf16>
    %33 = vector.shape_cast %32 : vector<3x16x32xbf16> to vector<48x32xbf16>
    %c1_28 = arith.constant 1 : index
    %c3_29 = arith.constant 3 : index
    %c0_30 = arith.constant 0 : index
    %34 = vector.load %arg9[%c1_28, %c3_29, %c0_30] : memref<6x19x32xbf16, #tpu.memory_space<vmem>>, vector<3x16x32xbf16>
    %35 = vector.shape_cast %34 : vector<3x16x32xbf16> to vector<48x32xbf16>
    %c2_31 = arith.constant 2 : index
    %c0_32 = arith.constant 0 : index
    %c0_33 = arith.constant 0 : index
    %36 = vector.load %arg9[%c2_31, %c0_32, %c0_33] : memref<6x19x32xbf16, #tpu.memory_space<vmem>>, vector<3x16x32xbf16>
    %37 = vector.shape_cast %36 : vector<3x16x32xbf16> to vector<48x32xbf16>
    %c2_34 = arith.constant 2 : index
    %c1_35 = arith.constant 1 : index
    %c0_36 = arith.constant 0 : index
    %38 = vector.load %arg9[%c2_34, %c1_35, %c0_36] : memref<6x19x32xbf16, #tpu.memory_space<vmem>>, vector<3x16x32xbf16>
    %39 = vector.shape_cast %38 : vector<3x16x32xbf16> to vector<48x32xbf16>
    %c2_37 = arith.constant 2 : index
    %c2_38 = arith.constant 2 : index
    %c0_39 = arith.constant 0 : index
    %40 = vector.load %arg9[%c2_37, %c2_38, %c0_39] : memref<6x19x32xbf16, #tpu.memory_space<vmem>>, vector<3x16x32xbf16>
    %41 = vector.shape_cast %40 : vector<3x16x32xbf16> to vector<48x32xbf16>
    %c2_40 = arith.constant 2 : index
    %c3_41 = arith.constant 3 : index
    %c0_42 = arith.constant 0 : index
    %42 = vector.load %arg9[%c2_40, %c3_41, %c0_42] : memref<6x19x32xbf16, #tpu.memory_space<vmem>>, vector<3x16x32xbf16>
    %43 = vector.shape_cast %42 : vector<3x16x32xbf16> to vector<48x32xbf16>
    %c3_43 = arith.constant 3 : index
    %c0_44 = arith.constant 0 : index
    %c0_45 = arith.constant 0 : index
    %44 = vector.load %arg9[%c3_43, %c0_44, %c0_45] : memref<6x19x32xbf16, #tpu.memory_space<vmem>>, vector<3x16x32xbf16>
    %45 = vector.shape_cast %44 : vector<3x16x32xbf16> to vector<48x32xbf16>
    %c3_46 = arith.constant 3 : index
    %c1_47 = arith.constant 1 : index
    %c0_48 = arith.constant 0 : index
    %46 = vector.load %arg9[%c3_46, %c1_47, %c0_48] : memref<6x19x32xbf16, #tpu.memory_space<vmem>>, vector<3x16x32xbf16>
    %47 = vector.shape_cast %46 : vector<3x16x32xbf16> to vector<48x32xbf16>
    %c3_49 = arith.constant 3 : index
    %c2_50 = arith.constant 2 : index
    %c0_51 = arith.constant 0 : index
    %48 = vector.load %arg9[%c3_49, %c2_50, %c0_51] : memref<6x19x32xbf16, #tpu.memory_space<vmem>>, vector<3x16x32xbf16>
    %49 = vector.shape_cast %48 : vector<3x16x32xbf16> to vector<48x32xbf16>
    %c3_52 = arith.constant 3 : index
    %c3_53 = arith.constant 3 : index
    %c0_54 = arith.constant 0 : index
    %50 = vector.load %arg9[%c3_52, %c3_53, %c0_54] : memref<6x19x32xbf16, #tpu.memory_space<vmem>>, vector<3x16x32xbf16>
    %51 = vector.shape_cast %50 : vector<3x16x32xbf16> to vector<48x32xbf16>
    %52 = tpu.concatenate %21, %23, %25, %27, %29, %31, %33, %35, %37, %39, %41, %43, %45, %47, %49, %51 in 1 : vector<48x32xbf16>, vector<48x32xbf16>, vector<48x32xbf16>, vector<48x32xbf16>, vector<48x32xbf16>, vector<48x32xbf16>, vector<48x32xbf16>, vector<48x32xbf16>, vector<48x32xbf16>, vector<48x32xbf16>, vector<48x32xbf16>, vector<48x32xbf16>, vector<48x32xbf16>, vector<48x32xbf16>, vector<48x32xbf16>, vector<48x32xbf16> -> vector<48x512xbf16>
    %c0_55 = arith.constant 0 : index
    %c0_56 = arith.constant 0 : index
    %53 = vector.load %arg3[%c0_55, %c0_56] : memref<512x64xbf16, #tpu.memory_space<vmem>>, vector<512x64xbf16>
    %cst_57 = arith.constant dense<0.000000e+00> : vector<48x64xf32>
    %54 = tpu.matmul %52, %53, %cst_57 {dimension_numbers = #tpu.dot_dimension_numbers<[1], [0], [0], [1], [0, 0, 1, 1], [], []>} : vector<48x512xbf16>, vector<512x64xbf16>, vector<48x64xf32> -> vector<48x64xf32>
    %c0_i32 = arith.constant 0 : i32
    %55 = arith.cmpi eq, %arg1, %c0_i32 : i32
    %56 = arith.extui %55 : i1 to i32
    %c0_i32_58 = arith.constant 0 : i32
    %57 = arith.cmpi ne, %56, %c0_i32_58 : i32
    scf.if %57 {
      %cst_79 = arith.constant 0.000000e+00 : f32
      %89 = vector.broadcast %cst_79 : f32 to vector<1x64xf32>
      %c0_80 = arith.constant 0 : index
      %c0_81 = arith.constant 0 : index
      %c0_82 = arith.constant 0 : index
      %90 = vector.load %arg7[%c0_80, %c0_81, %c0_82] : memref<1x1x64xf32, #tpu.memory_space<vmem>>, vector<1x1x64xf32>
      %91 = vector.shape_cast %90 : vector<1x1x64xf32> to vector<1x64xf32>
      %92 = vector.shape_cast %89 : vector<1x64xf32> to vector<1x1x64xf32>
      tpu.vector_store %arg7[%c0_80, %c0_81, %c0_82], %92 {strides = array<i32>} : memref<1x1x64xf32, #tpu.memory_space<vmem>>, vector<1x1x64xf32>,
      %cst_83 = arith.constant 0.000000e+00 : f32
      %93 = vector.broadcast %cst_83 : f32 to vector<1x64xf32>
      %c0_84 = arith.constant 0 : index
      %c0_85 = arith.constant 0 : index
      %c0_86 = arith.constant 0 : index
      %94 = vector.load %arg8[%c0_84, %c0_85, %c0_86] : memref<1x1x64xf32, #tpu.memory_space<vmem>>, vector<1x1x64xf32>
      %95 = vector.shape_cast %94 : vector<1x1x64xf32> to vector<1x64xf32>
      %96 = vector.shape_cast %93 : vector<1x64xf32> to vector<1x1x64xf32>
      tpu.vector_store %arg8[%c0_84, %c0_85, %c0_86], %96 {strides = array<i32>} : memref<1x1x64xf32, #tpu.memory_space<vmem>>, vector<1x1x64xf32>,
    } else {
    }
    %58 = vector.shape_cast %54 : vector<48x64xf32> to vector<3x16x64xf32>
    %59 = tpu.iota {dimensions = array<i32: 1>} : vector<3x16x1xi32>
    %c3_i32_59 = arith.constant 3 : i32
    %60 = vector.broadcast %c3_i32_59 : i32 to vector<3x16x1xi32>
    %61 = arith.cmpi slt, %59, %60 : vector<3x16x1xi32>
    %cst_60 = arith.constant 0.000000e+00 : f32
    %62 = vector.shape_cast %61 : vector<3x16x1xi1> to vector<3x16x1xi1>
    %63 = vector.broadcast %62 : vector<3x16x1xi1> to vector<3x16x64xi1>
    %64 = vector.broadcast %cst_60 : f32 to vector<3x16x64xf32>
    %65 = arith.select %63, %58, %64 : vector<3x16x64xi1>, vector<3x16x64xf32>
    %66 = vector.shape_cast %65 : vector<3x16x64xf32> to vector<48x64xf32>
    %c0_61 = arith.constant 0 : index
    %c0_62 = arith.constant 0 : index
    %c0_63 = arith.constant 0 : index
    %67 = vector.load %arg7[%c0_61, %c0_62, %c0_63] : memref<1x1x64xf32, #tpu.memory_space<vmem>>, vector<1x1x64xf32>
    %68 = vector.shape_cast %67 : vector<1x1x64xf32> to vector<1x64xf32>
    %cst_64 = arith.constant dense<0.000000e+00> : vector<64xf32>
    %69 = vector.multi_reduction <add>, %66, %cst_64 [0] : vector<48x64xf32> to vector<64xf32>
    %70 = vector.shape_cast %69 : vector<64xf32> to vector<1x64xf32>
    %71 = arith.addf %68, %70 : vector<1x64xf32>
    %c0_65 = arith.constant 0 : index
    %c0_66 = arith.constant 0 : index
    %c0_67 = arith.constant 0 : index
    %72 = vector.load %arg7[%c0_65, %c0_66, %c0_67] : memref<1x1x64xf32, #tpu.memory_space<vmem>>, vector<1x1x64xf32>
    %73 = vector.shape_cast %72 : vector<1x1x64xf32> to vector<1x64xf32>
    %74 = vector.shape_cast %71 : vector<1x64xf32> to vector<1x1x64xf32>
    tpu.vector_store %arg7[%c0_65, %c0_66, %c0_67], %74 {strides = array<i32>} : memref<1x1x64xf32, #tpu.memory_space<vmem>>, vector<1x1x64xf32>,
    %c0_68 = arith.constant 0 : index
    %c0_69 = arith.constant 0 : index
    %c0_70 = arith.constant 0 : index
    %75 = vector.load %arg8[%c0_68, %c0_69, %c0_70] : memref<1x1x64xf32, #tpu.memory_space<vmem>>, vector<1x1x64xf32>
    %76 = vector.shape_cast %75 : vector<1x1x64xf32> to vector<1x64xf32>
    %77 = arith.mulf %66, %66 : vector<48x64xf32>
    %cst_71 = arith.constant dense<0.000000e+00> : vector<64xf32>
    %78 = vector.multi_reduction <add>, %77, %cst_71 [0] : vector<48x64xf32> to vector<64xf32>
    %79 = vector.shape_cast %78 : vector<64xf32> to vector<1x64xf32>
    %80 = arith.addf %76, %79 : vector<1x64xf32>
    %c0_72 = arith.constant 0 : index
    %c0_73 = arith.constant 0 : index
    %c0_74 = arith.constant 0 : index
    %81 = vector.load %arg8[%c0_72, %c0_73, %c0_74] : memref<1x1x64xf32, #tpu.memory_space<vmem>>, vector<1x1x64xf32>
    %82 = vector.shape_cast %81 : vector<1x1x64xf32> to vector<1x64xf32>
    %83 = vector.shape_cast %80 : vector<1x64xf32> to vector<1x1x64xf32>
    tpu.vector_store %arg8[%c0_72, %c0_73, %c0_74], %83 {strides = array<i32>} : memref<1x1x64xf32, #tpu.memory_space<vmem>>, vector<1x1x64xf32>,
    %84 = vector.shape_cast %54 : vector<48x64xf32> to vector<3x16x64xf32>
    %85 = arith.truncf %84 : vector<3x16x64xf32> to vector<3x16x64xbf16>
    %c0_75 = arith.constant 0 : index
    %c0_76 = arith.constant 0 : index
    %c0_77 = arith.constant 0 : index
    %c0_78 = arith.constant 0 : index
    %86 = vector.load %arg6[%c0_75, %c0_76, %c0_77, %c0_78] : memref<1x3x16x64xbf16, #tpu.memory_space<vmem>>, vector<1x3x16x64xbf16>
    %87 = vector.shape_cast %86 : vector<1x3x16x64xbf16> to vector<3x16x64xbf16>
    %88 = vector.shape_cast %85 : vector<3x16x64xbf16> to vector<1x3x16x64xbf16>
    tpu.vector_store %arg6[%c0_75, %c0_76, %c0_77, %c0_78], %88 {strides = array<i32>} : memref<1x3x16x64xbf16, #tpu.memory_space<vmem>>, vector<1x3x16x64xbf16>,
    return
  }
  func.func @transform_0(%arg0: i32, %arg1: i32) -> (i32, i32, i32, i32) {
    %c0_i32 = arith.constant 0 : i32
    %c0_i32_0 = arith.constant 0 : i32
    %c0_i32_1 = arith.constant 0 : i32
    %c0_i32_2 = arith.constant 0 : i32
    return %arg0, %c0_i32, %c0_i32_0, %c0_i32_1 : i32, i32, i32, i32
  }
  func.func @transform_1(%arg0: i32, %arg1: i32) -> (i32, i32) {
    %c0_i32 = arith.constant 0 : i32
    %c0_i32_0 = arith.constant 0 : i32
    %c0_i32_1 = arith.constant 0 : i32
    return %c0_i32, %c0_i32_0 : i32, i32
  }
  func.func @transform_2(%arg0: i32, %arg1: i32) -> (i32, i32) {
    %c0_i32 = arith.constant 0 : i32
    %c0_i32_0 = arith.constant 0 : i32
    %c0_i32_1 = arith.constant 0 : i32
    return %c0_i32, %c0_i32_0 : i32, i32
  }
  func.func @transform_3(%arg0: i32, %arg1: i32) -> (i32, i32) {
    %c0_i32 = arith.constant 0 : i32
    %c0_i32_0 = arith.constant 0 : i32
    %c0_i32_1 = arith.constant 0 : i32
    return %c0_i32, %c0_i32_0 : i32, i32
  }
  func.func @transform_4(%arg0: i32, %arg1: i32) -> (i32, i32, i32, i32) {
    %c0_i32 = arith.constant 0 : i32
    %c0_i32_0 = arith.constant 0 : i32
    %c0_i32_1 = arith.constant 0 : i32
    return %arg0, %arg1, %c0_i32, %c0_i32_0 : i32, i32, i32, i32
  }
  func.func @transform_5(%arg0: i32, %arg1: i32) -> (i32, i32, i32) {
    %c0_i32 = arith.constant 0 : i32
    %c0_i32_0 = arith.constant 0 : i32
    %c0_i32_1 = arith.constant 0 : i32
    return %arg0, %c0_i32, %c0_i32_0 : i32, i32, i32
  }
  func.func @transform_6(%arg0: i32, %arg1: i32) -> (i32, i32, i32) {
    %c0_i32 = arith.constant 0 : i32
    %c0_i32_0 = arith.constant 0 : i32
    %c0_i32_1 = arith.constant 0 : i32
    return %arg0, %c0_i32, %c0_i32_0 : i32, i32, i32
  }
}

module attributes {stable_mosaic.version = 11 : i64} {
  func.func @_conv_kernel(%arg0: i32, %arg1: i32, %arg2: memref<1x5x19x64xbf16, #tpu.memory_space<vmem>>, %arg3: memref<1024x8xbf16, #tpu.memory_space<vmem>>, %arg4: memref<1x64xf32, #tpu.memory_space<vmem>>, %arg5: memref<1x64xf32, #tpu.memory_space<vmem>>, %arg6: memref<1x8xf32, #tpu.memory_space<vmem>>, %arg7: memref<1x2x16x8xf32, #tpu.memory_space<vmem>>, %arg8: memref<5x19x64xbf16, #tpu.memory_space<vmem>>) attributes {dimension_semantics = [#tpu.dimension_semantics<parallel>, #tpu.dimension_semantics<parallel>], iteration_bounds = array<i64: 2, 1>, scalar_prefetch = 0 : i64, scratch_operands = 1 : i64, tpu.core_type = #tpu.core_type<tc>, window_params = [{transform_indices = @transform_0, window_bounds = array<i64: 1, 5, 19, 64>}, {pipeline_mode = #tpu.pipeline_mode<synchronous>, transform_indices = @transform_1, window_bounds = array<i64: 1024, 8>}, {pipeline_mode = #tpu.pipeline_mode<synchronous>, transform_indices = @transform_2, window_bounds = array<i64: 1, 64>}, {pipeline_mode = #tpu.pipeline_mode<synchronous>, transform_indices = @transform_3, window_bounds = array<i64: 1, 64>}, {pipeline_mode = #tpu.pipeline_mode<synchronous>, transform_indices = @transform_4, window_bounds = array<i64: 1, 8>}, {transform_indices = @transform_5, window_bounds = array<i64: 1, 2, 16, 8>}]} {
    %c2_i32 = arith.constant 2 : i32
    %0 = arith.muli %arg1, %c2_i32 : i32
    %c0 = arith.constant 0 : index
    %1 = arith.index_cast %0 : i32 to index
    %c0_0 = arith.constant 0 : index
    %c0_1 = arith.constant 0 : index
    %2 = vector.load %arg2[%c0, %1, %c0_0, %c0_1] : memref<1x5x19x64xbf16, #tpu.memory_space<vmem>>, vector<1x5x19x64xbf16>
    %3 = vector.shape_cast %2 : vector<1x5x19x64xbf16> to vector<5x19x64xbf16>
    %4 = arith.extf %3 : vector<5x19x64xbf16> to vector<5x19x64xf32>
    %c0_2 = arith.constant 0 : index
    %c0_3 = arith.constant 0 : index
    %5 = vector.load %arg4[%c0_2, %c0_3] : memref<1x64xf32, #tpu.memory_space<vmem>>, vector<1x64xf32>
    %6 = vector.shape_cast %5 : vector<1x64xf32> to vector<1x1x64xf32>
    %7 = vector.broadcast %6 : vector<1x1x64xf32> to vector<5x19x64xf32>
    %8 = arith.mulf %4, %7 : vector<5x19x64xf32>
    %c0_4 = arith.constant 0 : index
    %c0_5 = arith.constant 0 : index
    %9 = vector.load %arg5[%c0_4, %c0_5] : memref<1x64xf32, #tpu.memory_space<vmem>>, vector<1x64xf32>
    %10 = vector.shape_cast %9 : vector<1x64xf32> to vector<1x1x64xf32>
    %11 = vector.broadcast %10 : vector<1x1x64xf32> to vector<5x19x64xf32>
    %12 = arith.addf %8, %11 : vector<5x19x64xf32>
    %cst = arith.constant 0.000000e+00 : f32
    %13 = vector.broadcast %cst : f32 to vector<5x19x64xf32>
    %14 = arith.cmpf oge, %12, %13 : vector<5x19x64xf32>
    %cst_6 = arith.constant 2.000000e-01 : f32
    %15 = vector.broadcast %cst_6 : f32 to vector<5x19x64xf32>
    %16 = arith.mulf %15, %12 : vector<5x19x64xf32>
    %17 = arith.select %14, %12, %16 : vector<5x19x64xi1>, vector<5x19x64xf32>
    %18 = arith.truncf %17 : vector<5x19x64xf32> to vector<5x19x64xbf16>
    %c0_7 = arith.constant 0 : index
    %c0_8 = arith.constant 0 : index
    %c0_9 = arith.constant 0 : index
    %19 = vector.load %arg8[%c0_7, %c0_8, %c0_9] : memref<5x19x64xbf16, #tpu.memory_space<vmem>>, vector<5x19x64xbf16>
    tpu.vector_store %arg8[%c0_7, %c0_8, %c0_9], %18 {strides = array<i32>} : memref<5x19x64xbf16, #tpu.memory_space<vmem>>, vector<5x19x64xbf16>,
    %c0_10 = arith.constant 0 : index
    %c0_11 = arith.constant 0 : index
    %c0_12 = arith.constant 0 : index
    %20 = vector.load %arg8[%c0_10, %c0_11, %c0_12] : memref<5x19x64xbf16, #tpu.memory_space<vmem>>, vector<2x16x64xbf16>
    %21 = vector.shape_cast %20 : vector<2x16x64xbf16> to vector<32x64xbf16>
    %c0_13 = arith.constant 0 : index
    %c1 = arith.constant 1 : index
    %c0_14 = arith.constant 0 : index
    %22 = vector.load %arg8[%c0_13, %c1, %c0_14] : memref<5x19x64xbf16, #tpu.memory_space<vmem>>, vector<2x16x64xbf16>
    %23 = vector.shape_cast %22 : vector<2x16x64xbf16> to vector<32x64xbf16>
    %c0_15 = arith.constant 0 : index
    %c2 = arith.constant 2 : index
    %c0_16 = arith.constant 0 : index
    %24 = vector.load %arg8[%c0_15, %c2, %c0_16] : memref<5x19x64xbf16, #tpu.memory_space<vmem>>, vector<2x16x64xbf16>
    %25 = vector.shape_cast %24 : vector<2x16x64xbf16> to vector<32x64xbf16>
    %c0_17 = arith.constant 0 : index
    %c3 = arith.constant 3 : index
    %c0_18 = arith.constant 0 : index
    %26 = vector.load %arg8[%c0_17, %c3, %c0_18] : memref<5x19x64xbf16, #tpu.memory_space<vmem>>, vector<2x16x64xbf16>
    %27 = vector.shape_cast %26 : vector<2x16x64xbf16> to vector<32x64xbf16>
    %c1_19 = arith.constant 1 : index
    %c0_20 = arith.constant 0 : index
    %c0_21 = arith.constant 0 : index
    %28 = vector.load %arg8[%c1_19, %c0_20, %c0_21] : memref<5x19x64xbf16, #tpu.memory_space<vmem>>, vector<2x16x64xbf16>
    %29 = vector.shape_cast %28 : vector<2x16x64xbf16> to vector<32x64xbf16>
    %c1_22 = arith.constant 1 : index
    %c1_23 = arith.constant 1 : index
    %c0_24 = arith.constant 0 : index
    %30 = vector.load %arg8[%c1_22, %c1_23, %c0_24] : memref<5x19x64xbf16, #tpu.memory_space<vmem>>, vector<2x16x64xbf16>
    %31 = vector.shape_cast %30 : vector<2x16x64xbf16> to vector<32x64xbf16>
    %c1_25 = arith.constant 1 : index
    %c2_26 = arith.constant 2 : index
    %c0_27 = arith.constant 0 : index
    %32 = vector.load %arg8[%c1_25, %c2_26, %c0_27] : memref<5x19x64xbf16, #tpu.memory_space<vmem>>, vector<2x16x64xbf16>
    %33 = vector.shape_cast %32 : vector<2x16x64xbf16> to vector<32x64xbf16>
    %c1_28 = arith.constant 1 : index
    %c3_29 = arith.constant 3 : index
    %c0_30 = arith.constant 0 : index
    %34 = vector.load %arg8[%c1_28, %c3_29, %c0_30] : memref<5x19x64xbf16, #tpu.memory_space<vmem>>, vector<2x16x64xbf16>
    %35 = vector.shape_cast %34 : vector<2x16x64xbf16> to vector<32x64xbf16>
    %c2_31 = arith.constant 2 : index
    %c0_32 = arith.constant 0 : index
    %c0_33 = arith.constant 0 : index
    %36 = vector.load %arg8[%c2_31, %c0_32, %c0_33] : memref<5x19x64xbf16, #tpu.memory_space<vmem>>, vector<2x16x64xbf16>
    %37 = vector.shape_cast %36 : vector<2x16x64xbf16> to vector<32x64xbf16>
    %c2_34 = arith.constant 2 : index
    %c1_35 = arith.constant 1 : index
    %c0_36 = arith.constant 0 : index
    %38 = vector.load %arg8[%c2_34, %c1_35, %c0_36] : memref<5x19x64xbf16, #tpu.memory_space<vmem>>, vector<2x16x64xbf16>
    %39 = vector.shape_cast %38 : vector<2x16x64xbf16> to vector<32x64xbf16>
    %c2_37 = arith.constant 2 : index
    %c2_38 = arith.constant 2 : index
    %c0_39 = arith.constant 0 : index
    %40 = vector.load %arg8[%c2_37, %c2_38, %c0_39] : memref<5x19x64xbf16, #tpu.memory_space<vmem>>, vector<2x16x64xbf16>
    %41 = vector.shape_cast %40 : vector<2x16x64xbf16> to vector<32x64xbf16>
    %c2_40 = arith.constant 2 : index
    %c3_41 = arith.constant 3 : index
    %c0_42 = arith.constant 0 : index
    %42 = vector.load %arg8[%c2_40, %c3_41, %c0_42] : memref<5x19x64xbf16, #tpu.memory_space<vmem>>, vector<2x16x64xbf16>
    %43 = vector.shape_cast %42 : vector<2x16x64xbf16> to vector<32x64xbf16>
    %c3_43 = arith.constant 3 : index
    %c0_44 = arith.constant 0 : index
    %c0_45 = arith.constant 0 : index
    %44 = vector.load %arg8[%c3_43, %c0_44, %c0_45] : memref<5x19x64xbf16, #tpu.memory_space<vmem>>, vector<2x16x64xbf16>
    %45 = vector.shape_cast %44 : vector<2x16x64xbf16> to vector<32x64xbf16>
    %c3_46 = arith.constant 3 : index
    %c1_47 = arith.constant 1 : index
    %c0_48 = arith.constant 0 : index
    %46 = vector.load %arg8[%c3_46, %c1_47, %c0_48] : memref<5x19x64xbf16, #tpu.memory_space<vmem>>, vector<2x16x64xbf16>
    %47 = vector.shape_cast %46 : vector<2x16x64xbf16> to vector<32x64xbf16>
    %c3_49 = arith.constant 3 : index
    %c2_50 = arith.constant 2 : index
    %c0_51 = arith.constant 0 : index
    %48 = vector.load %arg8[%c3_49, %c2_50, %c0_51] : memref<5x19x64xbf16, #tpu.memory_space<vmem>>, vector<2x16x64xbf16>
    %49 = vector.shape_cast %48 : vector<2x16x64xbf16> to vector<32x64xbf16>
    %c3_52 = arith.constant 3 : index
    %c3_53 = arith.constant 3 : index
    %c0_54 = arith.constant 0 : index
    %50 = vector.load %arg8[%c3_52, %c3_53, %c0_54] : memref<5x19x64xbf16, #tpu.memory_space<vmem>>, vector<2x16x64xbf16>
    %51 = vector.shape_cast %50 : vector<2x16x64xbf16> to vector<32x64xbf16>
    %52 = tpu.concatenate %21, %23, %25, %27, %29, %31, %33, %35, %37, %39, %41, %43, %45, %47, %49, %51 in 1 : vector<32x64xbf16>, vector<32x64xbf16>, vector<32x64xbf16>, vector<32x64xbf16>, vector<32x64xbf16>, vector<32x64xbf16>, vector<32x64xbf16>, vector<32x64xbf16>, vector<32x64xbf16>, vector<32x64xbf16>, vector<32x64xbf16>, vector<32x64xbf16>, vector<32x64xbf16>, vector<32x64xbf16>, vector<32x64xbf16>, vector<32x64xbf16> -> vector<32x1024xbf16>
    %c0_55 = arith.constant 0 : index
    %c0_56 = arith.constant 0 : index
    %53 = vector.load %arg3[%c0_55, %c0_56] : memref<1024x8xbf16, #tpu.memory_space<vmem>>, vector<1024x8xbf16>
    %cst_57 = arith.constant dense<0.000000e+00> : vector<32x8xf32>
    %54 = tpu.matmul %52, %53, %cst_57 {dimension_numbers = #tpu.dot_dimension_numbers<[1], [0], [0], [1], [0, 0, 1, 1], [], []>} : vector<32x1024xbf16>, vector<1024x8xbf16>, vector<32x8xf32> -> vector<32x8xf32>
    %c0_58 = arith.constant 0 : index
    %c0_59 = arith.constant 0 : index
    %55 = vector.load %arg6[%c0_58, %c0_59] : memref<1x8xf32, #tpu.memory_space<vmem>>, vector<1x8xf32>
    %56 = vector.broadcast %55 : vector<1x8xf32> to vector<32x8xf32>
    %57 = arith.addf %54, %56 : vector<32x8xf32>
    %58 = vector.shape_cast %57 : vector<32x8xf32> to vector<2x16x8xf32>
    %c0_60 = arith.constant 0 : index
    %c0_61 = arith.constant 0 : index
    %c0_62 = arith.constant 0 : index
    %c0_63 = arith.constant 0 : index
    %59 = vector.load %arg7[%c0_60, %c0_61, %c0_62, %c0_63] : memref<1x2x16x8xf32, #tpu.memory_space<vmem>>, vector<1x2x16x8xf32>
    %60 = vector.shape_cast %59 : vector<1x2x16x8xf32> to vector<2x16x8xf32>
    %61 = vector.shape_cast %58 : vector<2x16x8xf32> to vector<1x2x16x8xf32>
    tpu.vector_store %arg7[%c0_60, %c0_61, %c0_62, %c0_63], %61 {strides = array<i32>} : memref<1x2x16x8xf32, #tpu.memory_space<vmem>>, vector<1x2x16x8xf32>,
    return
  }
  func.func @transform_0(%arg0: i32, %arg1: i32) -> (i32, i32, i32, i32) {
    %c0_i32 = arith.constant 0 : i32
    %c0_i32_0 = arith.constant 0 : i32
    %c0_i32_1 = arith.constant 0 : i32
    %c0_i32_2 = arith.constant 0 : i32
    return %arg0, %c0_i32, %c0_i32_0, %c0_i32_1 : i32, i32, i32, i32
  }
  func.func @transform_1(%arg0: i32, %arg1: i32) -> (i32, i32) {
    %c0_i32 = arith.constant 0 : i32
    %c0_i32_0 = arith.constant 0 : i32
    %c0_i32_1 = arith.constant 0 : i32
    return %c0_i32, %c0_i32_0 : i32, i32
  }
  func.func @transform_2(%arg0: i32, %arg1: i32) -> (i32, i32) {
    %c0_i32 = arith.constant 0 : i32
    %c0_i32_0 = arith.constant 0 : i32
    %c0_i32_1 = arith.constant 0 : i32
    return %c0_i32, %c0_i32_0 : i32, i32
  }
  func.func @transform_3(%arg0: i32, %arg1: i32) -> (i32, i32) {
    %c0_i32 = arith.constant 0 : i32
    %c0_i32_0 = arith.constant 0 : i32
    %c0_i32_1 = arith.constant 0 : i32
    return %c0_i32, %c0_i32_0 : i32, i32
  }
  func.func @transform_4(%arg0: i32, %arg1: i32) -> (i32, i32) {
    %c0_i32 = arith.constant 0 : i32
    %c0_i32_0 = arith.constant 0 : i32
    %c0_i32_1 = arith.constant 0 : i32
    return %c0_i32, %c0_i32_0 : i32, i32
  }
  func.func @transform_5(%arg0: i32, %arg1: i32) -> (i32, i32, i32, i32) {
    %c0_i32 = arith.constant 0 : i32
    %c0_i32_0 = arith.constant 0 : i32
    %c0_i32_1 = arith.constant 0 : i32
    return %arg0, %arg1, %c0_i32, %c0_i32_0 : i32, i32, i32, i32
  }
}

</mosaic_0001>

<bundles_post_ra>
// kernel: patchdis_forward.5
= control target key start
LH: loop header
LB: loop body
LE: loop exit
PB: predicated region body
PF: predicated region fallthrough
CT: control target
= control target key end

     0   :  { %s2525_s12 = smov 0   ;;  %s2527_s13 = smov 0   ;;  %s3198_s0 = inlined_call_operand.vmem [shape: bf16[2,17,17,16], index: 0, kind: input, shape index: {}]   ;;  %s3199_s1 = inlined_call_operand.vmem [shape: bf16[64,8], index: 1, kind: input, shape index: {}]   ;;  %s3200_s2 = inlined_call_operand.vmem [shape: f32[1,8], index: 2, kind: input, shape index: {}]   ;;  %s3201_s3 = inlined_call_operand.vmem [shape: bf16[2,16,16,8], index: 3, kind: output, shape index: {}]  }
   0x1   :  { %s2529_s14 = smov 0  }
   0x2 LB: > { %s25_s15 = sadd.s32 1, %s2496_s13  ;;  %p2126_p0 = scmp.ge.s32.totalorder %s2500_s14, 1  ;;  %s2500_s14 = sphi %s2529_s14, %s13_s14   ;;  %s2496_s13 = sphi %s2527_s13, %s3205_s13   ;;  %s2492_s12 = sphi %s2525_s12, %s3204_s12  }
   0x3   : > { %p27_p1 = scmp.ge.s32.totalorder %s25_s15, 2  ;;  %p151_p2 = scmp.lt.s32.totalorder %s2500_s14, 3 }
   0x5   : > { %s3207_s15 = smov (%p27_p1, %s25_s15), 0  ;;  %p152_p3 = pnand %p2126_p0, %p151_p2 }
   0x6   : > { %p180_p4 = scmp.lt.s32.totalorder (!%p152_p3), %s2492_s12, 1  ;;  %s2502_s20 = smov (!%p152_p3), 32   ;;  %vm249_vm0 = vsmask.f32 (!%p152_p3), 3328  ;;  %vm250_vm1 = vsmask.f32 (!%p152_p3), 7440 }
   0x7   : > { %155 = sbr.rel (%p152_p3) target bundleno = 505 (0x1f9), region = 32  ;;  %vm2603_vm2 = vmor (!%p152_p3), %vm249_vm0, %vm250_vm1  ;;  %s2503_s25 = smov (!%p152_p3), 16   ;;  %vm1424_vm3 = vcmask (!%p152_p3), 130048   ;;  %vm1506_vm4 = vcmask (!%p152_p3), 392192   ;;  %vm1473_vm5 = vcmask (!%p152_p3), 261120   ;;  %vm1578_vm6 = vcmask (!%p152_p3), 523264  }
   0x8   : > { %s2504_s30 = smov (!%p152_p3), 48   ;;  %vm1996_vm9 = vcmask (!%p152_p3), 60416  }
   0xe   : > { %s3209_s12 = smov (!%p180_p4, %s2492_s12), 1 }
   0xf   : > { %s2398_s16 = smul.u32 204, %s3209_s12  ;;  %s2297_s6 = sshll.u32 %s3209_s12, 7 }
  0x10   : > { %s3093_s9 = scalar_lea.vmem %s3201_s3, %s2297_s6 }
  0x11   : > { %s2549_s19 = scalar_lea.vmem %s3198_s0, %s2398_s16 }
  0x12   : > { %v2146_v0 = vld [vmem:[%s2549_s19 + $0x6c] sm:$0xf]  ;;  %v2147_v1 = vld [vmem:[%s2549_s19 + $0x70] sm:$0xf]  ;;  %v2148_v20 = vld [vmem:[%s2549_s19 + $0x78] sm:$0xf] }
  0x13   : > { %v2130_v2 = vld [vmem:[%s2549_s19 + $0xc] sm:$0xf]  ;;  %v890_v3 = vshll.u32 %v2147_v1, 16  ;;  %v894_v4 = vshrl.u32 %v2147_v1, 16  ;;  %v2218_v5 = vcombine.low %v2146_v0, %v2147_v1  ;;  %v881_v6 = vshrl.u32 %v2146_v0, 16 }
  0x14   : > { %v2131_v7 = vld [vmem:[%s2549_s19 + $0x10] sm:$0xf]  ;;  %v884_v8 = vshll.u32 %v2146_v0, 16  ;;  %v689_v15 = vshrl.u32 %v2130_v2, 16  ;;  %v692_v19 = vshll.u32 %v2130_v2, 16  ;;  %v905_v24 = vshrl.u32 %v2148_v20, 16 }
  0x15   : > { %v698_v9 = vshll.u32 %v2131_v7, 16  ;;  %v702_v10 = vshrl.u32 %v2131_v7, 16  ;;  %v2210_v11 = vcombine.low %v2130_v2, %v2131_v7  ;;  %v2555_v12 = vrot.slane %v890_v3, 5  ;;  %1328 = vrot.lane.b32.xlu1 %v2218_v5, %s2502_s20  ;;  %v2149_v23 = vld [vmem:[%s2549_s19 + $0x7c] sm:$0xf] }
  0x16   : > { %v896_v13 = vrot.slane %v894_v4, 4  ;;  %v883_v14 = vrot.slane %v881_v6, 4  ;;  %v886_v16 = vrot.slane %v884_v8, 5  ;;  %v691_v22 = vrot.slane %v689_v15, 4  ;;  %v2132_v30 = vld [vmem:[%s2549_s19 + $0x18] sm:$0xf] }
  0x17   : > { %v2558_v17 = vrot.slane %v698_v9, 5  ;;  %v704_v18 = vrot.slane %v702_v10, 4  ;;  %1312 = vrot.lane.b32.xlu0 %v2210_v11, %s2502_s20  ;;  %v908_v25 = vshll.u32 %v2148_v20, 16  ;;  %v694_v28 = vrot.slane %v692_v19, 5  ;;  %v2133_v31 = vld [vmem:[%s2549_s19 + $0x1c] sm:$0xf] }
  0x18   : > { %v897_v21 = vor.u32 %v896_v13, %v2555_v12  ;;  %v887_v26 = vor.u32 %v886_v16, %v883_v14  ;;  %v914_v29 = vshll.u32 %v2149_v23, 16  ;;  %v2569_v33 = vrot.slane %v905_v24, 4  ;;  %v203_v36 = vld [vmem:[%s2549_s19 + $0xc] sm:$0xf]  ;;  %v204_v41 = vld [vmem:[%s2549_s19 + $0x10] sm:$0xf] }
  0x19   : > { %v705_v27 = vor.u32 %v704_v18, %v2558_v17  ;;  %v2571_v34 = vrot.slane %v908_v25, 5  ;;  %v918_v35 = vshrl.u32 %v2149_v23, 16  ;;  %v695_v39 = vor.u32 %v694_v28, %v691_v22  ;;  %v234_v46 = vld [vmem:[%s2549_s19 + $0x14] sm:$0x1]  ;;  %v201_v51 = vld [vmem:[%s2549_s19] sm:$0xf] }
  0x1a   : > { %v2567_v32 = vrot.slane %v897_v21, 4  ;;  %v2574_v37 = vrot.slane %v887_v26, 4  ;;  %v2578_v40 = vrot.slane %v914_v29, 5  ;;  %v2219_v43 = vcombine.low %v2148_v20, %v2149_v23  ;;  %v202_v56 = vld [vmem:[%s2549_s19 + $0x4] sm:$0xf] }
  0x1b   : > { %v2576_v38 = vrot.slane %v705_v27, 4  ;;  %v2581_v42 = vrot.slane %v918_v35, 4  ;;  %v713_v44 = vshrl.u32 %v2132_v30, 16  ;;  %v716_v45 = vshll.u32 %v2132_v30, 16  ;;  %v233_v0 = vld [vmem:[%s2549_s19 + $0x8] sm:$0x1] }
  0x1c   : > { %v2584_v47 = vrot.slane %v695_v39, 4  ;;  %v722_v48 = vshll.u32 %v2133_v31, 16  ;;  %v726_v49 = vshrl.u32 %v2133_v31, 16  ;;  %v2211_v50 = vcombine.low %v2132_v30, %v2133_v31  ;;  %1330 = vrot.lane.b32.xlu1 %v2219_v43, %s2502_s20  ;;  %v219_v6 = vld [vmem:[%s2549_s19 + $0x6c] sm:$0xf]  ;;  %v2442_v28 = vld [vmem:[%s3199_s1] sm:$0xff]  }
  0x1d   : > { %v2588_v52 = vrot.slane %v713_v44, 4  ;;  %v2590_v53 = vrot.slane %v716_v45, 5  ;;  %v277_v54 = vshrl.u32 %v203_v36, 16  ;;  %v280_v55 = vshll.u32 %v203_v36, 16  ;;  %v220_v11 = vld [vmem:[%s2549_s19 + $0x70] sm:$0xf]  ;;  %2350 = vmatprep.subr.bf16.mxu0 %v2442_v28  ;;  %2390 = vmatprep.subr.bf16.mxu1 %v2442_v28 }
  0x1e   : > { %v2593_v57 = vrot.slane %v722_v48, 5  ;;  %v2595_v58 = vrot.slane %v726_v49, 4  ;;  %1314 = vrot.lane.b32.xlu0 %v2211_v50, %s2502_s20  ;;  %v286_v59 = vshll.u32 %v204_v41, 16  ;;  %v290_v60 = vshrl.u32 %v204_v41, 16  ;;  %v242_v26 = vld [vmem:[%s2549_s19 + $0x74] sm:$0x1]  ;;  %2351 = vmatpush3.bf16.msra.mxu0 %v2442_v28 }
  0x1f   : > { %v279_v61 = vrot.slane %v277_v54, 4  ;;  %v282_v62 = vrot.slane %v280_v55, 5  ;;  %v296_v63 = vshll.u32 %v234_v46, 16  ;;  %v253_v1 = vshrl.u32 %v201_v51, 16  ;;  %v217_v36 = vld [vmem:[%s2549_s19 + $0x60] sm:$0xf]  ;;  %2394 = vmatpush3.bf16.msra.mxu1 %v2442_v28 }
  0x20   : > { %v288_v2 = vrot.slane %v286_v59, 5  ;;  %v292_v3 = vrot.slane %v290_v60, 4  ;;  %v256_v4 = vshll.u32 %v201_v51, 16  ;;  %v262_v5 = vshll.u32 %v202_v56, 16  ;;  %v218_v45 = vld [vmem:[%s2549_s19 + $0x64] sm:$0xf] }
  0x21   : > { %v283_v7 = vor.u32 %v282_v62, %v279_v61  ;;  %v298_v8 = vrot.slane %v296_v63, 5  ;;  %v255_v9 = vrot.slane %v253_v1, 4  ;;  %v266_v10 = vshrl.u32 %v202_v56, 16  ;;  %v2445_v46 = vld [vmem:[%s3199_s1 + $0x8] sm:$0xff]   ;;  %v2170_v1 = vld [vmem:[%s2549_s19 + $0x74] sm:$0x1] }
  0x22   : > { %v293_v14 = vor.u32 %v292_v3, %v288_v2  ;;  %v258_v15 = vrot.slane %v256_v4, 5  ;;  %v264_v16 = vrot.slane %v262_v5, 5  ;;  %v272_v18 = vshll.u32 %v233_v0, 16  ;;  %v241_v56 = vld [vmem:[%s2549_s19 + $0x68] sm:$0x1]  ;;  %2352 = vmatprep.subr.bf16.mxu0 %v2445_v46  ;;  %2391 = vmatprep.subr.bf16.mxu1 %v2445_v46 }
  0x23   : > { %v284_v19 = vrot.slane %v283_v7, 4  ;;  %v268_v20 = vrot.slane %v266_v10, 4  ;;  %v469_v21 = vshrl.u32 %v219_v6, 16  ;;  %v472_v22 = vshll.u32 %v219_v6, 16  ;;  %v2162_v7 = vld [vmem:[%s2549_s19 + $0x14] sm:$0x1]  ;;  %2353 = vmatpush3.bf16.msra.mxu0 %v2445_v46  ;;  %2395 = vmatpush3.bf16.msra.mxu1 %v2445_v46 }
  0x24   : > { %v294_v23 = vrot.slane %v293_v14, 4  ;;  %v259_v24 = vor.u32 %v258_v15, %v255_v9  ;;  %v274_v25 = vrot.slane %v272_v18, 5  ;;  %v478_v27 = vshll.u32 %v220_v11, 16 }
  0x25   : > { %v289_v29 = vsel %vm2603_vm2, %v284_v19, %v288_v2  ;;  %v269_v30 = vor.u32 %v268_v20, %v264_v16  ;;  %v471_v31 = vrot.slane %v469_v21, 4  ;;  %v474_v35 = vrot.slane %v472_v22, 5  ;;  %v2448_v2 = vld [vmem:[%s3199_s1 + $0x10] sm:$0xff]  }
  0x26   : > { %v299_v39 = vsel %vm2603_vm2, %v294_v23, %v298_v8  ;;  %v260_v41 = vrot.slane %v259_v24, 4  ;;  %v480_v43 = vrot.slane %v478_v27, 5  ;;  %v482_v44 = vshrl.u32 %v220_v11, 16  ;;  %2354 = vmatprep.subr.bf16.mxu0 %v2448_v2  ;;  %v2171_v23 = vld [vmem:[%s2549_s19 + $0x80] sm:$0x1]  ;;  %2392 = vmatprep.subr.bf16.mxu1 %v2448_v2  ;;  %v2449_v24 = vld [vmem:[%s3199_s1 + $0x18] sm:$0xff]  }
  0x27   : > { %v2195_v48 = vcombine.low %v289_v29, %v299_v39  ;;  %v270_v49 = vrot.slane %v269_v30, 4  ;;  %v475_v50 = vor.u32 %v474_v35, %v471_v31  ;;  %v488_v51 = vshll.u32 %v242_v26, 16  ;;  %2355 = vmatpush3.bf16.msra.mxu0 %v2448_v2  ;;  %2396 = vmatpush3.bf16.msra.mxu1 %v2448_v2 }
  0x28   : > { %v265_v54 = vsel %vm2603_vm2, %v260_v41, %v264_v16  ;;  %v484_v55 = vrot.slane %v482_v44, 4  ;;  %v445_v59 = vshrl.u32 %v217_v36, 16  ;;  %v448_v60 = vshll.u32 %v217_v36, 16  ;;  %v2163_v36 = vld [vmem:[%s2549_s19 + $0x20] sm:$0x1]  ;;  %2356 = vmatprep.subr.bf16.mxu0 %v2449_v24  ;;  %2393 = vmatprep.subr.bf16.mxu1 %v2449_v24 }
  0x29   : > { %1202 = vrot.lane.b32.xlu1 %v2195_v48, %s2503_s25  ;;  %v275_v61 = vsel %vm2603_vm2, %v270_v49, %v274_v25  ;;  %v476_v62 = vrot.slane %v475_v50, 4  ;;  %v490_v63 = vrot.slane %v488_v51, 5  ;;  %v454_v0 = vshll.u32 %v218_v45, 16 }
  0x2a   : > { %v2194_v3 = vcombine.low %v265_v54, %v275_v61  ;;  %v485_v4 = vor.u32 %v484_v55, %v480_v43  ;;  %v447_v5 = vrot.slane %v445_v59, 4  ;;  %v450_v6 = vrot.slane %v448_v60, 5  ;;  %v243_v55 = vld [vmem:[%s2549_s19 + $0x80] sm:$0x1] }
  0x2b   : > { %v481_v8 = vsel %vm2603_vm2, %v476_v62, %v480_v43  ;;  %v456_v9 = vrot.slane %v454_v0, 5  ;;  %v458_v10 = vshrl.u32 %v218_v45, 16  ;;  %v464_v11 = vshll.u32 %v241_v56, 16  ;;  %2357 = vmatpush3.bf16.msra.mxu0 %v2449_v24  ;;  %2397 = vmatpush3.bf16.msra.mxu1 %v2449_v24 }
  0x2c   : > { %1200 = vrot.lane.b32.xlu0 %v2194_v3, %s2503_s25  ;;  %v486_v14 = vrot.slane %v485_v4, 4  ;;  %v451_v15 = vor.u32 %v450_v6, %v447_v5  ;;  %v893_v16 = vsel %vm2603_vm2, %v2574_v37, %v2555_v12  ;;  %v900_v18 = vshll.u32 %v2170_v1, 16  ;;  %v206_v1 = vld [vmem:[%s2549_s19 + $0x1c] sm:$0xf]  ;;  %v235_v4 = vld [vmem:[%s2549_s19 + $0x20] sm:$0x1] }
  0x2d   : > { %v460_v19 = vrot.slane %v458_v10, 4  ;;  %v466_v20 = vrot.slane %v464_v11, 5  ;;  %v701_v21 = vsel %vm2603_vm2, %v2584_v47, %v2558_v17  ;;  %v708_v22 = vshll.u32 %v2162_v7, 16  ;;  %v223_v11 = vld [vmem:[%s2549_s19 + $0x84] sm:$0xf] }
  0x2e   : > { %v491_v12 = vsel %vm2603_vm2, %v486_v14, %v490_v63  ;;  %v452_v37 = vrot.slane %v451_v15, 4  ;;  %v902_v25 = vrot.slane %v900_v18, 5  ;;  %v911_v26 = vor.u32 %v2571_v34, %v2569_v33  ;;  %v221_v33 = vld [vmem:[%s2549_s19 + $0x78] sm:$0xf] }
  0x2f   : > { %v2203_v27 = vcombine.low %v481_v8, %v491_v12  ;;  %v461_v28 = vor.u32 %v460_v19, %v456_v9  ;;  %v710_v17 = vrot.slane %v708_v22, 5  ;;  %v921_v47 = vor.u32 %v2581_v42, %v2578_v40  ;;  %v224_v22 = vld [vmem:[%s2549_s19 + $0x88] sm:$0xf]  ;;  %v244_v12 = vld [vmem:[%s2549_s19 + $0x8c] sm:$0x1] }
  0x30   : > { %v457_v29 = vsel %vm2603_vm2, %v452_v37, %v456_v9  ;;  %v903_v30 = vsel %vm2603_vm2, %v2567_v32, %v902_v25  ;;  %v912_v31 = vrot.slane %v911_v26, 4  ;;  %v924_v35 = vshll.u32 %v2171_v23, 16 }
  0x31   : > { %1218 = vrot.lane.b32.xlu1 %v2203_v27, %s2503_s25  ;;  %v462_v34 = vrot.slane %v461_v28, 4  ;;  %v2234_v42 = vcombine.low %v893_v16, %v903_v30  ;;  %v711_v39 = vsel %vm2603_vm2, %v2576_v38, %v710_v17  ;;  %v922_v41 = vrot.slane %v921_v47, 4  ;;  %v222_v38 = vld [vmem:[%s2549_s19 + $0x7c] sm:$0xf] }
  0x32   : > { %v2226_v43 = vcombine.low %v701_v21, %v711_v39  ;;  %v917_v32 = vsel %vm2603_vm2, %v912_v31, %v2578_v40  ;;  %v926_v44 = vrot.slane %v924_v35, 5  ;;  %v719_v45 = vor.u32 %v2590_v53, %v2588_v52  ;;  %v205_v52 = vld [vmem:[%s2549_s19 + $0x18] sm:$0xf]  ;;  %v207_v35 = vld [vmem:[%s2549_s19 + $0x24] sm:$0xf] }
  0x33   : > { %v467_v46 = vsel %vm2603_vm2, %v462_v34, %v466_v20  ;;  %v729_v48 = vor.u32 %v2595_v58, %v2593_v57  ;;  %v732_v49 = vshll.u32 %v2163_v36, 16  ;;  %v493_v50 = vshrl.u32 %v221_v33, 16  ;;  %v208_v39 = vld [vmem:[%s2549_s19 + $0x28] sm:$0xf] }
  0x34   : > { %v2202_v51 = vcombine.low %v457_v29, %v467_v46  ;;  %v927_v54 = vsel %vm2603_vm2, %v922_v41, %v926_v44  ;;  %v720_v40 = vrot.slane %v719_v45, 4  ;;  %v496_v56 = vshll.u32 %v221_v33, 16  ;;  %v236_v45 = vld [vmem:[%s2549_s19 + $0x2c] sm:$0x1] }
  0x35   : > { %1408 = vrot.lane.b32.xlu1 %v2234_v42, %s2504_s30  ;;  %v2235_v53 = vcombine.low %v917_v32, %v927_v54  ;;  %v730_v58 = vrot.slane %v729_v48, 4  ;;  %v734_v59 = vrot.slane %v732_v49, 5  ;;  %v495_v60 = vrot.slane %v493_v50, 4 }
  0x36   : > { %1216 = vrot.lane.b32.xlu0 %v2202_v51, %s2503_s25  ;;  %v725_v61 = vsel %vm2603_vm2, %v720_v40, %v2593_v57  ;;  %v498_v62 = vrot.slane %v496_v56, 5  ;;  %v502_v63 = vshll.u32 %v222_v38, 16  ;;  %v506_v0 = vshrl.u32 %v222_v38, 16 }
  0x37   : > { %v735_v2 = vsel %vm2603_vm2, %v730_v58, %v734_v59  ;;  %v512_v3 = vshll.u32 %v243_v55, 16  ;;  %v301_v5 = vshrl.u32 %v205_v52, 16  ;;  %v304_v6 = vshll.u32 %v205_v52, 16  ;;  %v2150_v55 = vld [vmem:[%s2549_s19 + $0x84] sm:$0xf] }
  0x38   : > { %v2227_v7 = vcombine.low %v725_v61, %v735_v2  ;;  %v499_v8 = vor.u32 %v498_v62, %v495_v60  ;;  %v504_v9 = vrot.slane %v502_v63, 5  ;;  %v508_v10 = vrot.slane %v506_v0, 4  ;;  %v2151_v59 = vld [vmem:[%s2549_s19 + $0x88] sm:$0xf] }
  0x39   : > { %1410 = vrot.lane.b32.xlu1 %v2235_v53, %s2504_s30  ;;  %v514_v57 = vrot.slane %v512_v3, 5  ;;  %v303_v14 = vrot.slane %v301_v5, 4  ;;  %v306_v15 = vrot.slane %v304_v6, 5  ;;  %v310_v16 = vshll.u32 %v206_v1, 16 }
  0x3a   : > { %1392 = vrot.lane.b32.xlu0 %v2226_v43, %s2504_s30  ;;  %v500_v18 = vrot.slane %v499_v8, 4  ;;  %v509_v19 = vor.u32 %v508_v10, %v504_v9  ;;  %v314_v20 = vshrl.u32 %v206_v1, 16  ;;  %v320_v21 = vshll.u32 %v235_v4, 16  ;;  %v2134_v8 = vld [vmem:[%s2549_s19 + $0x24] sm:$0xf] }
  0x3b   : > { %v307_v23 = vor.u32 %v306_v15, %v303_v14  ;;  %v312_v24 = vrot.slane %v310_v16, 5  ;;  %v517_v37 = vshrl.u32 %v223_v11, 16  ;;  %v520_v25 = vshll.u32 %v223_v11, 16  ;;  %v2135_v14 = vld [vmem:[%s2549_s19 + $0x28] sm:$0xf] }
  0x3c   : > { %v505_v26 = vsel %vm2603_vm2, %v500_v18, %v504_v9  ;;  %v510_v27 = vrot.slane %v509_v19, 4  ;;  %v316_v28 = vrot.slane %v314_v20, 4  ;;  %v322_v17 = vrot.slane %v320_v21, 5  ;;  %v2152_v20 = vld [vmem:[%s2549_s19 + $0x90] sm:$0xf] }
  0x3d   : > { %v308_v47 = vrot.slane %v307_v23, 4  ;;  %v519_v29 = vrot.slane %v517_v37, 4  ;;  %v522_v30 = vrot.slane %v520_v25, 5  ;;  %v526_v31 = vshll.u32 %v224_v22, 16 }
  0x3e   : > { %1394 = vrot.lane.b32.xlu0 %v2227_v7, %s2504_s30  ;;  %v515_v36 = vsel %vm2603_vm2, %v510_v27, %v514_v57  ;;  %v317_v33 = vor.u32 %v316_v28, %v312_v24  ;;  %v530_v34 = vshrl.u32 %v224_v22, 16  ;;  %v536_v42 = vshll.u32 %v244_v12, 16  ;;  %v2153_v27 = vld [vmem:[%s2549_s19 + $0x94] sm:$0xf]  ;;  %v2136_v28 = vld [vmem:[%s2549_s19 + $0x30] sm:$0xf] }
  0x3f   : > { %v2204_v41 = vcombine.low %v505_v26, %v515_v36  ;;  %v313_v43 = vsel %vm2603_vm2, %v308_v47, %v312_v24  ;;  %v523_v32 = vor.u32 %v522_v30, %v519_v29  ;;  %v528_v44 = vrot.slane %v526_v31, 5  ;;  %v2137_v31 = vld [vmem:[%s2549_s19 + $0x34] sm:$0xf] }
  0x40   : > { %v318_v46 = vrot.slane %v317_v33, 4  ;;  %v532_v48 = vrot.slane %v530_v34, 4  ;;  %v538_v49 = vrot.slane %v536_v42, 5  ;;  %v325_v38 = vshrl.u32 %v207_v35, 16 }
  0x41   : > { %1220 = vrot.lane.b32.xlu1 %v2204_v41, %s2503_s25  ;;  %v524_v50 = vrot.slane %v523_v32, 4  ;;  %v328_v51 = vshll.u32 %v207_v35, 16  ;;  %v334_v54 = vshll.u32 %v208_v39, 16  ;;  %v338_v40 = vshrl.u32 %v208_v39, 16 }
  0x42   : > { %v323_v56 = vsel %vm2603_vm2, %v318_v46, %v322_v17  ;;  %v533_v52 = vor.u32 %v532_v48, %v528_v44  ;;  %v327_v53 = vrot.slane %v325_v38, 4  ;;  %v344_v58 = vshll.u32 %v236_v45, 16  ;;  %v2172_v48 = vld [vmem:[%s2549_s19 + $0x8c] sm:$0x1] }
  0x43   : > { %v2196_v60 = vcombine.low %v313_v43, %v323_v56  ;;  %v529_v61 = vsel %vm2603_vm2, %v524_v50, %v528_v44  ;;  %v330_v62 = vrot.slane %v328_v51, 5  ;;  %v336_v63 = vrot.slane %v334_v54, 5  ;;  %v2164_v54 = vld [vmem:[%s2549_s19 + $0x2c] sm:$0x1] }
  0x44   : > { %v534_v0 = vrot.slane %v533_v52, 4  ;;  %v340_v1 = vrot.slane %v338_v40, 4  ;;  %v346_v2 = vrot.slane %v344_v58, 5  ;;  %v929_v3 = vshrl.u32 %v2150_v55, 16 }
  0x45   : > { %1204 = vrot.lane.b32.xlu0 %v2196_v60, %s2503_s25  ;;  %v331_v4 = vor.u32 %v330_v62, %v327_v53  ;;  %v932_v5 = vshll.u32 %v2150_v55, 16  ;;  %v938_v6 = vshll.u32 %v2151_v59, 16  ;;  %v942_v7 = vshrl.u32 %v2151_v59, 16 }
  0x46   : > { %v539_v9 = vsel %vm2603_vm2, %v534_v0, %v538_v49  ;;  %v341_v10 = vor.u32 %v340_v1, %v336_v63  ;;  %v931_v11 = vrot.slane %v929_v3, 4  ;;  %v2220_v57 = vcombine.low %v2150_v55, %v2151_v59  ;;  %v2173_v0 = vld [vmem:[%s2549_s19 + $0x98] sm:$0x1] }
  0x47   : > { %v2205_v15 = vcombine.low %v529_v61, %v539_v9  ;;  %v332_v16 = vrot.slane %v331_v4, 4  ;;  %v934_v18 = vrot.slane %v932_v5, 5  ;;  %v2713_v19 = vrot.slane %v938_v6, 5 }
  0x48   : > { %v342_v21 = vrot.slane %v341_v10, 4  ;;  %v944_v22 = vrot.slane %v942_v7, 4  ;;  %v737_v23 = vshrl.u32 %v2134_v8, 16  ;;  %v740_v24 = vshll.u32 %v2134_v8, 16  ;;  %v2165_v10 = vld [vmem:[%s2549_s19 + $0x38] sm:$0x1] }
  0x49   : > { %1222 = vrot.lane.b32.xlu1 %v2205_v15, %s2503_s25  ;;  %v337_v12 = vsel %vm2603_vm2, %v332_v16, %v336_v63  ;;  %v746_v37 = vshll.u32 %v2135_v14, 16  ;;  %v750_v25 = vshrl.u32 %v2135_v14, 16  ;;  %v2212_v26 = vcombine.low %v2134_v8, %v2135_v14  ;;  %v2741_v16 = vld [vmem:[%s2549_s19 + $0x90] sm:$0xf] }
  0x4a   : > { %v347_v17 = vsel %vm2603_vm2, %v342_v21, %v346_v2  ;;  %v739_v47 = vrot.slane %v737_v23, 4  ;;  %v742_v29 = vrot.slane %v740_v24, 5  ;;  %v953_v30 = vshrl.u32 %v2152_v20, 16 }
  0x4b   : > { %v2197_v35 = vcombine.low %v337_v12, %v347_v17  ;;  %v748_v36 = vrot.slane %v746_v37, 5  ;;  %v752_v33 = vrot.slane %v750_v25, 4  ;;  %v956_v34 = vshll.u32 %v2152_v20, 16 }
  0x4c   : > { %v955_v42 = vrot.slane %v953_v30, 4  ;;  %v962_v39 = vshll.u32 %v2153_v27, 16  ;;  %v966_v41 = vshrl.u32 %v2153_v27, 16  ;;  %v2221_v43 = vcombine.low %v2152_v20, %v2153_v27 }
  0x4d   : > { %1206 = vrot.lane.b32.xlu0 %v2197_v35, %s2503_s25  ;;  %1332 = vrot.lane.b32.xlu1 %v2220_v57, %s2502_s20  ;;  %v958_v32 = vrot.slane %v956_v34, 5  ;;  %v761_v44 = vshrl.u32 %v2136_v28, 16  ;;  %v764_v45 = vshll.u32 %v2136_v28, 16  ;;  %v770_v46 = vshll.u32 %v2137_v31, 16  ;;  %v2760_v35 = vld [vmem:[%s2549_s19 + $0x30] sm:$0xf] }
  0x4e   : > { %v964_v49 = vrot.slane %v962_v39, 5  ;;  %v968_v38 = vrot.slane %v966_v41, 4  ;;  %v774_v50 = vshrl.u32 %v2137_v31, 16  ;;  %v2213_v51 = vcombine.low %v2136_v28, %v2137_v31  ;;  %v2766_v39 = vld [vmem:[%s2549_s19 + $0x34] sm:$0xf] }
  0x4f   : > { %v763_v40 = vrot.slane %v761_v44, 4  ;;  %v766_v55 = vrot.slane %v764_v45, 5  ;;  %v772_v56 = vrot.slane %v770_v46, 5  ;;  %v935_v52 = vor.u32 %v934_v18, %v931_v11  ;;  %v2744_v18 = vld [vmem:[%s2549_s19 + $0x94] sm:$0xf] }
  0x50   : > { %v776_v53 = vrot.slane %v774_v50, 4  ;;  %v945_v58 = vor.u32 %v944_v22, %v2713_v19  ;;  %v948_v59 = vshll.u32 %v2172_v48, 16  ;;  %v743_v60 = vor.u32 %v742_v29, %v739_v47  ;;  %v237_v45 = vld [vmem:[%s2549_s19 + $0x38] sm:$0x1]  ;;  %v2775_v50 = vld [vmem:[%s2549_s19 + $0x9c] sm:$0xf] }
  0x51   : > { %1316 = vrot.lane.b32.xlu0 %v2212_v26, %s2502_s20  ;;  %1334 = vrot.lane.b32.xlu1 %v2221_v43, %s2502_s20  ;;  %v936_v61 = vrot.slane %v935_v52, 4  ;;  %v753_v62 = vor.u32 %v752_v33, %v748_v36  ;;  %v756_v63 = vshll.u32 %v2164_v54, 16  ;;  %v959_v1 = vor.u32 %v958_v32, %v955_v42  ;;  %v245_v26 = vld [vmem:[%s2549_s19 + $0x98] sm:$0x1] }
  0x52   : > { %v946_v2 = vrot.slane %v945_v58, 4  ;;  %v950_v3 = vrot.slane %v948_v59, 5  ;;  %v744_v4 = vrot.slane %v743_v60, 4  ;;  %v969_v5 = vor.u32 %v968_v38, %v964_v49  ;;  %v2781_v59 = vld [vmem:[%s2549_s19 + $0xa0] sm:$0xf] }
  0x53   : > { %v941_v6 = vsel %vm2603_vm2, %v936_v61, %v2713_v19  ;;  %v754_v7 = vrot.slane %v753_v62, 4  ;;  %v758_v8 = vrot.slane %v756_v63, 5  ;;  %v960_v9 = vrot.slane %v959_v1, 4 }
  0x54   : > { %v951_v11 = vsel %vm2603_vm2, %v946_v2, %v950_v3  ;;  %v749_v57 = vsel %vm2603_vm2, %v744_v4, %v748_v36  ;;  %v970_v14 = vrot.slane %v969_v5, 4  ;;  %v972_v15 = vshll.u32 %v2173_v0, 16  ;;  %v246_v3 = vld [vmem:[%s2549_s19 + $0xa4] sm:$0x1]  ;;  %v2789_v5 = vld [vmem:[%s2549_s19 + $0x3c] sm:$0xf] }
  0x55   : > { %1318 = vrot.lane.b32.xlu0 %v2213_v51, %s2502_s20  ;;  %v2236_v19 = vcombine.low %v941_v6, %v951_v11  ;;  %v759_v20 = vsel %vm2603_vm2, %v754_v7, %v758_v8  ;;  %v965_v21 = vsel %vm2603_vm2, %v960_v9, %v964_v49  ;;  %v767_v22 = vor.u32 %v766_v55, %v763_v40 }
  0x56   : > { %v2228_v23 = vcombine.low %v749_v57, %v759_v20  ;;  %v974_v24 = vrot.slane %v972_v15, 5  ;;  %v777_v12 = vor.u32 %v776_v53, %v772_v56  ;;  %v780_v37 = vshll.u32 %v2165_v10, 16  ;;  %v2796_v15 = vld [vmem:[%s2549_s19 + $0x40] sm:$0xf] }
  0x57   : > { %1412 = vrot.lane.b32.xlu1 %v2236_v19, %s2504_s30  ;;  %v768_v25 = vrot.slane %v767_v22, 4  ;;  %v541_v27 = vshrl.u32 %v2741_v16, 16  ;;  %v544_v28 = vshll.u32 %v2741_v16, 16  ;;  %v550_v17 = vshll.u32 %v2744_v18, 16 }
  0x58   : > { %v975_v47 = vsel %vm2603_vm2, %v970_v14, %v974_v24  ;;  %v778_v29 = vrot.slane %v777_v12, 4  ;;  %v782_v30 = vrot.slane %v780_v37, 5  ;;  %v554_v31 = vshrl.u32 %v2744_v18, 16  ;;  %v238_v37 = vld [vmem:[%s2549_s19 + $0x44] sm:$0x1] }
  0x59   : > { %1396 = vrot.lane.b32.xlu0 %v2228_v23, %s2504_s30  ;;  %v2237_v36 = vcombine.low %v965_v21, %v975_v47  ;;  %v773_v33 = vsel %vm2603_vm2, %v768_v25, %v772_v56  ;;  %v543_v34 = vrot.slane %v541_v27, 4  ;;  %v546_v42 = vrot.slane %v544_v28, 5 }
  0x5a   : > { %v783_v41 = vsel %vm2603_vm2, %v778_v29, %v782_v30  ;;  %v552_v43 = vrot.slane %v550_v17, 5  ;;  %v556_v32 = vrot.slane %v554_v31, 4  ;;  %v560_v44 = vshll.u32 %v245_v26, 16  ;;  %v2154_v26 = vld [vmem:[%s2549_s19 + $0x9c] sm:$0xf] }
  0x5b   : > { %1414 = vrot.lane.b32.xlu1 %v2237_v36, %s2504_s30  ;;  %v2229_v46 = vcombine.low %v773_v33, %v783_v41  ;;  %v547_v48 = vor.u32 %v546_v42, %v543_v34  ;;  %v349_v49 = vshrl.u32 %v2760_v35, 16  ;;  %v352_v38 = vshll.u32 %v2760_v35, 16  ;;  %v2155_v33 = vld [vmem:[%s2549_s19 + $0xa0] sm:$0xf] }
  0x5c   : > { %v557_v51 = vor.u32 %v556_v32, %v552_v43  ;;  %v562_v54 = vrot.slane %v560_v44, 5  ;;  %v358_v40 = vshll.u32 %v2766_v39, 16  ;;  %v362_v55 = vshrl.u32 %v2766_v39, 16 }
  0x5d   : > { %1398 = vrot.lane.b32.xlu0 %v2229_v46, %s2504_s30  ;;  %v548_v56 = vrot.slane %v547_v48, 4  ;;  %v351_v52 = vrot.slane %v349_v49, 4  ;;  %v354_v53 = vrot.slane %v352_v38, 5  ;;  %v368_v58 = vshll.u32 %v237_v45, 16 }
  0x5e   : > { %v558_v60 = vrot.slane %v557_v51, 4  ;;  %v360_v61 = vrot.slane %v358_v40, 5  ;;  %v364_v62 = vrot.slane %v362_v55, 4  ;;  %v565_v63 = vshrl.u32 %v2775_v50, 16 }
  0x5f   : > { %v553_v0 = vsel %vm2603_vm2, %v548_v56, %v552_v43  ;;  %v355_v1 = vor.u32 %v354_v53, %v351_v52  ;;  %v370_v2 = vrot.slane %v368_v58, 5  ;;  %v568_v4 = vshll.u32 %v2775_v50, 16  ;;  %v2139_v53 = vld [vmem:[%s2549_s19 + $0x40] sm:$0xf] }
  0x60   : > { %v563_v6 = vsel %vm2603_vm2, %v558_v60, %v562_v54  ;;  %v365_v7 = vor.u32 %v364_v62, %v360_v61  ;;  %v567_v8 = vrot.slane %v565_v63, 4  ;;  %v574_v9 = vshll.u32 %v2781_v59, 16  ;;  %v2138_v54 = vld [vmem:[%s2549_s19 + $0x3c] sm:$0xf]  ;;  %v2156_v63 = vld [vmem:[%s2549_s19 + $0xa8] sm:$0xf] }
  0x61   : > { %v2206_v10 = vcombine.low %v553_v0, %v563_v6  ;;  %v356_v11 = vrot.slane %v355_v1, 4  ;;  %v570_v57 = vrot.slane %v568_v4, 5  ;;  %v578_v14 = vshrl.u32 %v2781_v59, 16  ;;  %v2157_v4 = vld [vmem:[%s2549_s19 + $0xac] sm:$0xf] }
  0x62   : > { %v366_v19 = vrot.slane %v365_v7, 4  ;;  %v576_v20 = vrot.slane %v574_v9, 5  ;;  %v584_v21 = vshll.u32 %v246_v3, 16  ;;  %v373_v22 = vshrl.u32 %v2789_v5, 16 }
  0x63   : > { %1224 = vrot.lane.b32.xlu1 %v2206_v10, %s2503_s25  ;;  %v361_v23 = vsel %vm2603_vm2, %v356_v11, %v360_v61  ;;  %v571_v24 = vor.u32 %v570_v57, %v567_v8  ;;  %v580_v12 = vrot.slane %v578_v14, 4  ;;  %v376_v25 = vshll.u32 %v2789_v5, 16 }
  0x64   : > { %v371_v27 = vsel %vm2603_vm2, %v366_v19, %v370_v2  ;;  %v586_v28 = vrot.slane %v584_v21, 5  ;;  %v375_v17 = vrot.slane %v373_v22, 4  ;;  %v382_v47 = vshll.u32 %v2796_v15, 16  ;;  %v2140_v19 = vld [vmem:[%s2549_s19 + $0x48] sm:$0xf] }
  0x65   : > { %v2198_v29 = vcombine.low %v361_v23, %v371_v27  ;;  %v572_v30 = vrot.slane %v571_v24, 4  ;;  %v581_v31 = vor.u32 %v580_v12, %v576_v20  ;;  %v378_v36 = vrot.slane %v376_v25, 5  ;;  %v2141_v24 = vld [vmem:[%s2549_s19 + $0x4c] sm:$0xf] }
  0x66   : > { %v384_v34 = vrot.slane %v382_v47, 5  ;;  %v386_v42 = vshrl.u32 %v2796_v15, 16  ;;  %v392_v41 = vshll.u32 %v238_v37, 16  ;;  %v977_v43 = vshrl.u32 %v2154_v26, 16 }
  0x67   : > { %1208 = vrot.lane.b32.xlu0 %v2198_v29, %s2503_s25  ;;  %v577_v32 = vsel %vm2603_vm2, %v572_v30, %v576_v20  ;;  %v582_v44 = vrot.slane %v581_v31, 4  ;;  %v379_v45 = vor.u32 %v378_v36, %v375_v17  ;;  %v980_v46 = vshll.u32 %v2154_v26, 16  ;;  %v2174_v29 = vld [vmem:[%s2549_s19 + $0xa4] sm:$0x1] }
  0x68   : > { %v388_v48 = vrot.slane %v386_v42, 4  ;;  %v394_v49 = vrot.slane %v392_v41, 5  ;;  %v979_v38 = vrot.slane %v977_v43, 4  ;;  %v986_v51 = vshll.u32 %v2155_v33, 16 }
  0x69   : > { %v587_v40 = vsel %vm2603_vm2, %v582_v44, %v586_v28  ;;  %v380_v55 = vrot.slane %v379_v45, 4  ;;  %v982_v56 = vrot.slane %v980_v46, 5  ;;  %v990_v52 = vshrl.u32 %v2155_v33, 16 }
  0x6a   : > { %v2207_v58 = vcombine.low %v577_v32, %v587_v40  ;;  %v389_v60 = vor.u32 %v388_v48, %v384_v34  ;;  %v2817_v61 = vrot.slane %v986_v51, 5  ;;  %v2222_v62 = vcombine.low %v2154_v26, %v2155_v33 }
  0x6b   : > { %v385_v0 = vsel %vm2603_vm2, %v380_v55, %v384_v34  ;;  %v992_v1 = vrot.slane %v990_v52, 4  ;;  %v785_v2 = vshrl.u32 %v2138_v54, 16  ;;  %v788_v3 = vshll.u32 %v2138_v54, 16  ;;  %v2166_v34 = vld [vmem:[%s2549_s19 + $0x44] sm:$0x1] }
  0x6c   : > { %1226 = vrot.lane.b32.xlu1 %v2207_v58, %s2503_s25  ;;  %v390_v6 = vrot.slane %v389_v60, 4  ;;  %v794_v7 = vshll.u32 %v2139_v53, 16  ;;  %v798_v8 = vshrl.u32 %v2139_v53, 16  ;;  %v2214_v9 = vcombine.low %v2138_v54, %v2139_v53 }
  0x6d   : > { %v787_v10 = vrot.slane %v785_v2, 4  ;;  %v790_v11 = vrot.slane %v788_v3, 5  ;;  %v1001_v57 = vshrl.u32 %v2156_v63, 16  ;;  %v1004_v14 = vshll.u32 %v2156_v63, 16 }
  0x6e   : > { %v395_v20 = vsel %vm2603_vm2, %v390_v6, %v394_v49  ;;  %v796_v21 = vrot.slane %v794_v7, 5  ;;  %v800_v22 = vrot.slane %v798_v8, 4  ;;  %v1010_v23 = vshll.u32 %v2157_v4, 16  ;;  %v2175_v49 = vld [vmem:[%s2549_s19 + $0xb0] sm:$0x1] }
  0x6f   : > { %v2199_v12 = vcombine.low %v385_v0, %v395_v20  ;;  %v1003_v37 = vrot.slane %v1001_v57, 4  ;;  %v1006_v25 = vrot.slane %v1004_v14, 5  ;;  %v1014_v26 = vshrl.u32 %v2157_v4, 16  ;;  %v2167_v0 = vld [vmem:[%s2549_s19 + $0x50] sm:$0x1] }
  0x70   : > { %1336 = vrot.lane.b32.xlu1 %v2222_v62, %s2502_s20  ;;  %v1012_v27 = vrot.slane %v1010_v23, 5  ;;  %v2223_v28 = vcombine.low %v2156_v63, %v2157_v4  ;;  %v809_v17 = vshrl.u32 %v2140_v19, 16  ;;  %v812_v47 = vshll.u32 %v2140_v19, 16  ;;  %v2845_v6 = vld [vmem:[%s2549_s19 + $0xa8] sm:$0xf] }
  0x71   : > { %1210 = vrot.lane.b32.xlu0 %v2199_v12, %s2503_s25  ;;  %v1016_v30 = vrot.slane %v1014_v26, 4  ;;  %v818_v31 = vshll.u32 %v2141_v24, 16  ;;  %v822_v36 = vshrl.u32 %v2141_v24, 16  ;;  %v2215_v33 = vcombine.low %v2140_v19, %v2141_v24  ;;  %v247_v20 = vld [vmem:[%s2549_s19 + $0xb0] sm:$0x1] }
  0x72   : > { %v811_v42 = vrot.slane %v809_v17, 4  ;;  %v814_v41 = vrot.slane %v812_v47, 5  ;;  %v983_v43 = vor.u32 %v982_v56, %v979_v38  ;;  %v993_v32 = vor.u32 %v992_v1, %v2817_v61  ;;  %v2862_v12 = vld [vmem:[%s2549_s19 + $0x48] sm:$0xf] }
  0x73   : > { %v820_v44 = vrot.slane %v818_v31, 5  ;;  %v824_v45 = vrot.slane %v822_v36, 4  ;;  %v996_v46 = vshll.u32 %v2174_v29, 16  ;;  %v791_v48 = vor.u32 %v790_v11, %v787_v10  ;;  %v2850_v10 = vld [vmem:[%s2549_s19 + $0xac] sm:$0xf] }
  0x74   : > { %1338 = vrot.lane.b32.xlu1 %v2223_v28, %s2502_s20  ;;  %v984_v51 = vrot.slane %v983_v43, 4  ;;  %v994_v54 = vrot.slane %v993_v32, 4  ;;  %v801_v40 = vor.u32 %v800_v22, %v796_v21  ;;  %v804_v55 = vshll.u32 %v2166_v34, 16  ;;  %v239_v34 = vld [vmem:[%s2549_s19 + $0x50] sm:$0x1] }
  0x75   : > { %1320 = vrot.lane.b32.xlu0 %v2214_v9, %s2502_s20  ;;  %v998_v52 = vrot.slane %v996_v46, 5  ;;  %v792_v53 = vrot.slane %v791_v48, 4  ;;  %v1007_v38 = vor.u32 %v1006_v25, %v1003_v37  ;;  %v1017_v56 = vor.u32 %v1016_v30, %v1012_v27  ;;  %v2869_v30 = vld [vmem:[%s2549_s19 + $0x4c] sm:$0xf] }
  0x76   : > { %v989_v58 = vsel %vm2603_vm2, %v984_v51, %v2817_v61  ;;  %v802_v60 = vrot.slane %v801_v40, 4  ;;  %v806_v62 = vrot.slane %v804_v55, 5  ;;  %v1020_v63 = vshll.u32 %v2175_v49, 16 }
  0x77   : > { %v999_v1 = vsel %vm2603_vm2, %v994_v54, %v998_v52  ;;  %v797_v2 = vsel %vm2603_vm2, %v792_v53, %v796_v21  ;;  %v1008_v3 = vrot.slane %v1007_v38, 4  ;;  %v1018_v4 = vrot.slane %v1017_v56, 4  ;;  %v2884_v53 = vld [vmem:[%s2549_s19 + $0xb8] sm:$0xf] }
  0x78   : > { %v2238_v7 = vcombine.low %v989_v58, %v999_v1  ;;  %v807_v61 = vsel %vm2603_vm2, %v802_v60, %v806_v62  ;;  %v1022_v8 = vrot.slane %v1020_v63, 5  ;;  %v815_v9 = vor.u32 %v814_v41, %v811_v42  ;;  %v248_v58 = vld [vmem:[%s2549_s19 + $0xbc] sm:$0x1] }
  0x79   : > { %1322 = vrot.lane.b32.xlu0 %v2215_v33, %s2502_s20  ;;  %v2230_v11 = vcombine.low %v797_v2, %v807_v61  ;;  %v1013_v57 = vsel %vm2603_vm2, %v1008_v3, %v1012_v27  ;;  %v825_v14 = vor.u32 %v824_v45, %v820_v44  ;;  %v828_v19 = vshll.u32 %v2167_v0, 16  ;;  %v2879_v45 = vld [vmem:[%s2549_s19 + $0xb4] sm:$0xf] }
  0x7a   : > { %1416 = vrot.lane.b32.xlu1 %v2238_v7, %s2504_s30  ;;  %v1023_v21 = vsel %vm2603_vm2, %v1018_v4, %v1022_v8  ;;  %v816_v22 = vrot.slane %v815_v9, 4  ;;  %v589_v23 = vshrl.u32 %v2845_v6, 16  ;;  %v592_v24 = vshll.u32 %v2845_v6, 16  ;;  %v2894_v8 = vld [vmem:[%s2549_s19 + $0x54] sm:$0xf] }
  0x7b   : > { %v2239_v37 = vcombine.low %v1013_v57, %v1023_v21  ;;  %v826_v25 = vrot.slane %v825_v14, 4  ;;  %v830_v26 = vrot.slane %v828_v19, 5  ;;  %v598_v27 = vshll.u32 %v2850_v10, 16  ;;  %v2900_v19 = vld [vmem:[%s2549_s19 + $0x58] sm:$0xf] }
  0x7c   : > { %v821_v28 = vsel %vm2603_vm2, %v816_v22, %v820_v44  ;;  %v591_v17 = vrot.slane %v589_v23, 4  ;;  %v594_v47 = vrot.slane %v592_v24, 5  ;;  %v602_v29 = vshrl.u32 %v2850_v10, 16 }
  0x7d   : > { %1400 = vrot.lane.b32.xlu0 %v2230_v11, %s2504_s30  ;;  %v831_v31 = vsel %vm2603_vm2, %v826_v25, %v830_v26  ;;  %v600_v36 = vrot.slane %v598_v27, 5  ;;  %v608_v33 = vshll.u32 %v247_v20, 16  ;;  %v397_v42 = vshrl.u32 %v2862_v12, 16  ;;  %v240_v26 = vld [vmem:[%s2549_s19 + $0x5c] sm:$0x1] }
  0x7e   : > { %1418 = vrot.lane.b32.xlu1 %v2239_v37, %s2504_s30  ;;  %v2231_v41 = vcombine.low %v821_v28, %v831_v31  ;;  %v595_v43 = vor.u32 %v594_v47, %v591_v17  ;;  %v604_v32 = vrot.slane %v602_v29, 4  ;;  %v400_v44 = vshll.u32 %v2862_v12, 16  ;;  %v2158_v31 = vld [vmem:[%s2549_s19 + $0xb4] sm:$0xf] }
  0x7f   : > { %v610_v46 = vrot.slane %v608_v33, 5  ;;  %v399_v48 = vrot.slane %v397_v42, 4  ;;  %v406_v49 = vshll.u32 %v2869_v30, 16  ;;  %v410_v51 = vshrl.u32 %v2869_v30, 16 }
  0x80   : > { %v596_v54 = vrot.slane %v595_v43, 4  ;;  %v605_v40 = vor.u32 %v604_v32, %v600_v36  ;;  %v402_v55 = vrot.slane %v400_v44, 5  ;;  %v416_v52 = vshll.u32 %v239_v34, 16 }
  0x81   : > { %1402 = vrot.lane.b32.xlu0 %v2231_v41, %s2504_s30  ;;  %v408_v38 = vrot.slane %v406_v49, 5  ;;  %v412_v56 = vrot.slane %v410_v51, 4  ;;  %v613_v60 = vshrl.u32 %v2879_v45, 16  ;;  %v616_v62 = vshll.u32 %v2879_v45, 16  ;;  %v2159_v41 = vld [vmem:[%s2549_s19 + $0xb8] sm:$0xf] }
  0x82   : > { %v601_v63 = vsel %vm2603_vm2, %v596_v54, %v600_v36  ;;  %v606_v0 = vrot.slane %v605_v40, 4  ;;  %v403_v1 = vor.u32 %v402_v55, %v399_v48  ;;  %v418_v2 = vrot.slane %v416_v52, 5 }
  0x83   : > { %v413_v3 = vor.u32 %v412_v56, %v408_v38  ;;  %v615_v4 = vrot.slane %v613_v60, 4  ;;  %v618_v7 = vrot.slane %v616_v62, 5  ;;  %v622_v61 = vshll.u32 %v2884_v53, 16  ;;  %v2142_v56 = vld [vmem:[%s2549_s19 + $0x54] sm:$0xf] }
  0x84   : > { %v611_v9 = vsel %vm2603_vm2, %v606_v0, %v610_v46  ;;  %v404_v11 = vrot.slane %v403_v1, 4  ;;  %v626_v57 = vshrl.u32 %v2884_v53, 16  ;;  %v632_v14 = vshll.u32 %v248_v58, 16  ;;  %v2143_v0 = vld [vmem:[%s2549_s19 + $0x58] sm:$0xf] }
  0x85   : > { %v2208_v20 = vcombine.low %v601_v63, %v611_v9  ;;  %v414_v21 = vrot.slane %v413_v3, 4  ;;  %v619_v22 = vor.u32 %v618_v7, %v615_v4  ;;  %v624_v23 = vrot.slane %v622_v61, 5  ;;  %v2160_v7 = vld [vmem:[%s2549_s19 + $0xc0] sm:$0xf] }
  0x86   : > { %v409_v24 = vsel %vm2603_vm2, %v404_v11, %v408_v38  ;;  %v628_v37 = vrot.slane %v626_v57, 4  ;;  %v634_v25 = vrot.slane %v632_v14, 5  ;;  %v421_v27 = vshrl.u32 %v2894_v8, 16 }
  0x87   : > { %1228 = vrot.lane.b32.xlu1 %v2208_v20, %s2503_s25  ;;  %v419_v28 = vsel %vm2603_vm2, %v414_v21, %v418_v2  ;;  %v620_v17 = vrot.slane %v619_v22, 4  ;;  %v424_v47 = vshll.u32 %v2894_v8, 16  ;;  %v430_v29 = vshll.u32 %v2900_v19, 16 }
  0x88   : > { %v2200_v36 = vcombine.low %v409_v24, %v419_v28  ;;  %v629_v33 = vor.u32 %v628_v37, %v624_v23  ;;  %v423_v34 = vrot.slane %v421_v27, 4  ;;  %v434_v42 = vshrl.u32 %v2900_v19, 16  ;;  %v2144_v24 = vld [vmem:[%s2549_s19 + $0x60] sm:$0xf]  ;;  %v2145_v28 = vld [vmem:[%s2549_s19 + $0x64] sm:$0xf] }
  0x89   : > { %v625_v43 = vsel %vm2603_vm2, %v620_v17, %v624_v23  ;;  %v426_v32 = vrot.slane %v424_v47, 5  ;;  %v432_v44 = vrot.slane %v430_v29, 5  ;;  %v440_v46 = vshll.u32 %v240_v26, 16  ;;  %v2161_v23 = vld [vmem:[%s2549_s19 + $0xc4] sm:$0xf] }
  0x8a   : > { %1212 = vrot.lane.b32.xlu0 %v2200_v36, %s2503_s25  ;;  %v630_v48 = vrot.slane %v629_v33, 4  ;;  %v436_v49 = vrot.slane %v434_v42, 4  ;;  %v1025_v51 = vshrl.u32 %v2158_v31, 16  ;;  %v1028_v54 = vshll.u32 %v2158_v31, 16  ;;  %v2932_v36 = vpop.permute.xlu1 %1328 }
  0x8b   : > { %v427_v40 = vor.u32 %v426_v32, %v423_v34  ;;  %v442_v55 = vrot.slane %v440_v46, 5  ;;  %v1034_v52 = vshll.u32 %v2159_v41, 16  ;;  %v1038_v38 = vshrl.u32 %v2159_v41, 16 }
  0x8c   : > { %v635_v58 = vsel %vm2603_vm2, %v630_v48, %v634_v25  ;;  %v437_v60 = vor.u32 %v436_v49, %v432_v44  ;;  %v1027_v62 = vrot.slane %v1025_v51, 4  ;;  %v1030_v63 = vrot.slane %v1028_v54, 5  ;;  %v2176_v48 = vld [vmem:[%s2549_s19 + $0xbc] sm:$0x1] }
  0x8d   : > { %v2209_v1 = vcombine.low %v625_v43, %v635_v58  ;;  %v428_v2 = vrot.slane %v427_v40, 4  ;;  %v2921_v3 = vrot.slane %v1034_v52, 5  ;;  %v1040_v4 = vrot.slane %v1038_v38, 4 }
  0x8e   : > { %v438_v61 = vrot.slane %v437_v60, 4  ;;  %v2224_v9 = vcombine.low %v2158_v31, %v2159_v41  ;;  %v833_v11 = vshrl.u32 %v2142_v56, 16  ;;  %v836_v57 = vshll.u32 %v2142_v56, 16 }
  0x8f   : > { %1230 = vrot.lane.b32.xlu1 %v2209_v1, %s2503_s25  ;;  %v433_v14 = vsel %vm2603_vm2, %v428_v2, %v432_v44  ;;  %v842_v20 = vshll.u32 %v2143_v0, 16  ;;  %v846_v21 = vshrl.u32 %v2143_v0, 16  ;;  %v2216_v22 = vcombine.low %v2142_v56, %v2143_v0 }
  0x90   : > { %v443_v37 = vsel %vm2603_vm2, %v438_v61, %v442_v55  ;;  %v835_v25 = vrot.slane %v833_v11, 4  ;;  %v838_v26 = vrot.slane %v836_v57, 5  ;;  %v1049_v27 = vshrl.u32 %v2160_v7, 16  ;;  %v2168_v55 = vld [vmem:[%s2549_s19 + $0x5c] sm:$0x1] }
  0x91   : > { %v2201_v17 = vcombine.low %v433_v14, %v443_v37  ;;  %v844_v47 = vrot.slane %v842_v20, 5  ;;  %v848_v29 = vrot.slane %v846_v21, 4  ;;  %v1052_v31 = vshll.u32 %v2160_v7, 16  ;;  %v2177_v57 = vld [vmem:[%s2549_s19 + $0xc8] sm:$0x1]  ;;  %v2944_v20 = vpop.permute.xlu1 %1330 }
  0x92   : > { %v1051_v33 = vrot.slane %v1049_v27, 4  ;;  %v1058_v34 = vshll.u32 %v2161_v23, 16  ;;  %v1062_v42 = vshrl.u32 %v2161_v23, 16  ;;  %v2225_v41 = vcombine.low %v2160_v7, %v2161_v23  ;;  %v2939_v7 = vpop.permute.xlu0 %1312 }
  0x93   : > { %1214 = vrot.lane.b32.xlu0 %v2201_v17, %s2503_s25  ;;  %1340 = vrot.lane.b32.xlu1 %v2224_v9, %s2502_s20  ;;  %v1054_v43 = vrot.slane %v1052_v31, 5  ;;  %v857_v32 = vshrl.u32 %v2144_v24, 16  ;;  %v860_v44 = vshll.u32 %v2144_v24, 16  ;;  %v866_v46 = vshll.u32 %v2145_v28, 16 }
  0x94   : > { %v1060_v49 = vrot.slane %v1058_v34, 5  ;;  %v1064_v51 = vrot.slane %v1062_v42, 4  ;;  %v870_v54 = vshrl.u32 %v2145_v28, 16  ;;  %v2217_v40 = vcombine.low %v2144_v24, %v2145_v28 }
  0x95   : > { %v859_v52 = vrot.slane %v857_v32, 4  ;;  %v862_v38 = vrot.slane %v860_v44, 5  ;;  %v868_v56 = vrot.slane %v866_v46, 5  ;;  %v1031_v58 = vor.u32 %v1030_v63, %v1027_v62 }
  0x96   : > { %v872_v60 = vrot.slane %v870_v54, 4  ;;  %v1041_v0 = vor.u32 %v1040_v4, %v2921_v3  ;;  %v1044_v1 = vshll.u32 %v2176_v48, 16  ;;  %v839_v2 = vor.u32 %v838_v26, %v835_v25  ;;  %v2169_v25 = vld [vmem:[%s2549_s19 + $0x68] sm:$0x1]  ;;  %v1315_v32 = vpop.permute.xlu0 %1314 }
  0x97   : > { %1324 = vrot.lane.b32.xlu0 %v2216_v22, %s2502_s20  ;;  %1342 = vrot.lane.b32.xlu1 %v2225_v41, %s2502_s20  ;;  %v1032_v61 = vrot.slane %v1031_v58, 4  ;;  %v849_v9 = vor.u32 %v848_v29, %v844_v47  ;;  %v852_v11 = vshll.u32 %v2168_v55, 16  ;;  %v1055_v14 = vor.u32 %v1054_v43, %v1051_v33  ;;  %v2462_v58 = vld [vmem:[%s2549_s19 + $0x6c] sm:$0xf] }
  0x98   : > { %v1042_v62 = vrot.slane %v1041_v0, 4  ;;  %v1046_v63 = vrot.slane %v1044_v1, 5  ;;  %v840_v21 = vrot.slane %v839_v2, 4  ;;  %v1065_v4 = vor.u32 %v1064_v51, %v1060_v49  ;;  %v2464_v2 = vld [vmem:[%s2549_s19] sm:$0xf] }
  0x99   : > { %v1037_v23 = vsel %vm2603_vm2, %v1032_v61, %v2921_v3  ;;  %v850_v24 = vrot.slane %v849_v9, 4  ;;  %v854_v22 = vrot.slane %v852_v11, 5  ;;  %v1056_v37 = vrot.slane %v1055_v14, 4  ;;  %v2465_v61 = vld [vmem:[%s2549_s19 + $0x4] sm:$0xf] }
  0x9a   : > { %v1047_v26 = vsel %vm2603_vm2, %v1042_v62, %v1046_v63  ;;  %v845_v27 = vsel %vm2603_vm2, %v840_v21, %v844_v47  ;;  %v1066_v28 = vrot.slane %v1065_v4, 4  ;;  %v1068_v17 = vshll.u32 %v2177_v57, 16  ;;  %v2466_v11 = vld [vmem:[%s2549_s19 + $0x60] sm:$0xf]  ;;  %v2467_v57 = vld [vmem:[%s2549_s19 + $0x64] sm:$0xf] }
  0x9b   : > { %1326 = vrot.lane.b32.xlu0 %v2217_v40, %s2502_s20  ;;  %v2240_v29 = vcombine.low %v1037_v23, %v1047_v26  ;;  %v855_v31 = vsel %vm2603_vm2, %v850_v24, %v854_v22  ;;  %v1061_v3 = vsel %vm2603_vm2, %v1056_v37, %v1060_v49  ;;  %v863_v33 = vor.u32 %v862_v38, %v859_v52  ;;  %v1203_v44 = vpop.permute.xlu1 %1202  ;;  %v2468_v21 = vld [vmem:[%s2549_s19 + $0xc] sm:$0xf]  ;;  %v2469_v4 = vld [vmem:[%s2549_s19 + $0x10] sm:$0xf] }
  0x9c   : > { %v2232_v34 = vcombine.low %v845_v27, %v855_v31  ;;  %v1070_v42 = vrot.slane %v1068_v17, 5  ;;  %v873_v41 = vor.u32 %v872_v60, %v868_v56  ;;  %v876_v43 = vshll.u32 %v2169_v25, 16  ;;  %v2463_v60 = vld [vmem:[%s2549_s19 + $0x70] sm:$0xf] }
  0x9d   : > { %1420 = vrot.lane.b32.xlu1 %v2240_v29, %s2504_s30  ;;  %v864_v47 = vrot.slane %v863_v33, 4  ;;  %v2187_v0 = vcombine.low %v2462_v58, %v2463_v60  ;;  %v2184_v13 = vcombine.low %v2862_v12, %v2869_v30  ;;  %v2193_v1 = vcombine.low %v2879_v45, %v2884_v53  ;;  %v2474_v58 = vld [vmem:[%s2549_s19 + $0x84] sm:$0xf]  ;;  %v2475_v60 = vld [vmem:[%s2549_s19 + $0x88] sm:$0xf] }
  0x9e   : > { %v1071_v46 = vsel %vm2603_vm2, %v1066_v28, %v1070_v42  ;;  %v874_v48 = vrot.slane %v873_v41, 4  ;;  %v878_v51 = vrot.slane %v876_v43, 5  ;;  %v1201_v52 = vpop.permute.xlu0 %1200  ;;  %v2178_v9 = vcombine.low %v2464_v2, %v2465_v61 }
  0x9f   : > { %1404 = vrot.lane.b32.xlu0 %v2232_v34, %s2504_s30  ;;  %v2241_v49 = vcombine.low %v1061_v3, %v1071_v46  ;;  %v869_v54 = vsel %vm2603_vm2, %v864_v47, %v868_v56  ;;  %v2192_v56 = vcombine.low %v2845_v6, %v2850_v10  ;;  %v2186_v14 = vcombine.low %v2466_v11, %v2467_v57  ;;  %v2476_v11 = vld [vmem:[%s2549_s19 + $0x24] sm:$0xf]  ;;  %v2477_v57 = vld [vmem:[%s2549_s19 + $0x28] sm:$0xf] }
  0xa0   : > { %v879_v40 = vsel %vm2603_vm2, %v874_v48, %v878_v51  ;;  %v2185_v62 = vcombine.low %v2894_v8, %v2900_v19  ;;  %v2179_v23 = vcombine.low %v2468_v21, %v2469_v4  ;;  %v1427_v37 = vsel %vm1424_vm3, %v2178_v9, %v1201_v52  ;;  %v2470_v51 = vld [vmem:[%s2549_s19 + $0x78] sm:$0xf] }
  0xa1   : > { %1422 = vrot.lane.b32.xlu1 %v2241_v49, %s2504_s30  ;;  %v2233_v55 = vcombine.low %v869_v54, %v879_v40  ;;  %v1475_v31 = vsel %vm1473_vm5, %v1427_v37, %v2939_v7  ;;  %v2471_v49 = vld [vmem:[%s2549_s19 + $0x7c] sm:$0xf] }
  0xa2   : > { %v1430_v33 = vsel %vm1424_vm3, %v2179_v23, %v1203_v44  ;;  %v2188_v54 = vcombine.low %v2470_v51, %v2471_v49  ;;  %v2473_v40 = vld [vmem:[%s2549_s19 + $0x1c] sm:$0xf] }
  0xa3   : > { %1406 = vrot.lane.b32.xlu0 %v2233_v55, %s2504_s30  ;;  %v1219_v38 = vpop.permute.xlu1 %1218 }
  0xa4   : > { %v1454_v24 = vsel %vm1424_vm3, %v2187_v0, %v1219_v38  ;;  %v2189_v0 = vcombine.low %v2474_v58, %v2475_v60 }
  0xa5   : > { %v1493_v28 = vsel %vm1473_vm5, %v1454_v24, %v2944_v20  ;;  %v1477_v20 = vsel %vm1473_vm5, %v1430_v33, %v1315_v32  ;;  %v2472_v32 = vld [vmem:[%s2549_s19 + $0x18] sm:$0xf] }
  0xa6   : > { %v2180_v55 = vcombine.low %v2472_v32, %v2473_v40 }
  0xa7   : > { %v1409_v63 = vpop.permute.xlu1 %1408 }
  0xa8   : > { %v1217_v22 = vpop.permute.xlu0 %1216 }
  0xa9   : > { %v1451_v25 = vsel %vm1424_vm3, %v2186_v14, %v1217_v22  ;;  %v2181_v14 = vcombine.low %v2476_v11, %v2477_v57 }
  0xaa   : > { %v1491_v26 = vsel %vm1473_vm5, %v1451_v25, %v2932_v36 }
  0xab   : > { %v1524_v27 = vsel %vm1506_vm4, %v1491_v26, %v1409_v63  ;;  %v1411_v17 = vpop.permute.xlu1 %1410 }
  0xac   : > { %v1393_v29 = vpop.permute.xlu0 %1392  ;;  %2374 = vmatprep.mubr.msk.bf16.mxu1 %vm1578_vm6, %v1524_v27  ;;  %v1526_v3 = vsel %vm1506_vm4, %v1493_v28, %v1411_v17 }
  0xad   : > { %v1508_v36 = vsel %vm1506_vm4, %v1475_v31, %v1393_v29  ;;  %2375 = vmatmul.mubr.msk.bf16.vlgmr.msra.gmra.mrb[0].mxu1 %vm1578_vm6, %v1526_v3 }
  0xae   : > { %2358 = vmatprep.mubr.msk.bf16.mxu0 %vm1578_vm6, %v1508_v36 }
  0xb0   : > { %v1395_v34 = vpop.permute.xlu0 %1394 }
  0xb1   : > { %v1510_v7 = vsel %vm1506_vm4, %v1477_v20, %v1395_v34  ;;  %v2190_v34 = vcombine.low %v2741_v16, %v2744_v18  ;;  %v2183_v16 = vcombine.low %v2789_v5, %v2796_v15 }
  0xb2   : > { %2359 = vmatmul.mubr.msk.bf16.vlgmr.msra.gmra.mrb[0].mxu0 %vm1578_vm6, %v1510_v7 }
  0xb3   : > { %v1221_v42 = vpop.permute.xlu1 %1220 }
  0xb4   : > { %v1457_v38 = vsel %vm1424_vm3, %v2188_v54, %v1221_v42  ;;  %v2182_v42 = vcombine.low %v2760_v35, %v2766_v39 }
  0xb7   : > { %v1205_v41 = vpop.permute.xlu0 %1204 }
  0xb8   : > { %v1433_v9 = vsel %vm1424_vm3, %v2180_v55, %v1205_v41 }
  0xbb   : > { %v1223_v43 = vpop.permute.xlu1 %1222 }
  0xbc   : > { %v1460_v23 = vsel %vm1424_vm3, %v2189_v0, %v1223_v43  ;;  %v2191_v43 = vcombine.low %v2775_v50, %v2781_v59 }
  0xbf   : > { %v1207_v47 = vpop.permute.xlu0 %1206  ;;  %v1333_v44 = vpop.permute.xlu1 %1332 }
  0xc0   : > { %v1495_v2 = vsel %vm1473_vm5, %v1457_v38, %v1333_v44  ;;  %v1436_v25 = vsel %vm1424_vm3, %v2181_v14, %v1207_v47 }
  0xc3   : > { %v1317_v46 = vpop.permute.xlu0 %1316  ;;  %v1335_v48 = vpop.permute.xlu1 %1334 }
  0xc4   : > { %v1479_v21 = vsel %vm1473_vm5, %v1433_v9, %v1317_v46  ;;  %v1497_v22 = vsel %vm1473_vm5, %v1460_v23, %v1335_v48 }
  0xc7   : > { %v1319_v52 = vpop.permute.xlu0 %1318 }
  0xc8   : > { %v1481_v27 = vsel %vm1473_vm5, %v1436_v25, %v1319_v52 }
  0xc9   : > { %v1413_v61 = vpop.permute.xlu1 %1412 }
  0xca   : > { %v1528_v63 = vsel %vm1506_vm4, %v1495_v2, %v1413_v61 }
  0xcb   : > { %v1397_v4 = vpop.permute.xlu0 %1396  ;;  %2378 = vmatprep.mubr.msk.bf16.mxu1 %vm1578_vm6, %v1528_v63 }
  0xcc   : > { %v1512_v24 = vsel %vm1506_vm4, %v1479_v21, %v1397_v4 }
  0xcd   : > { %2362 = vmatprep.mubr.msk.bf16.mxu0 %vm1578_vm6, %v1512_v24  ;;  %v1415_v37 = vpop.permute.xlu1 %1414 }
  0xce   : > { %v1530_v26 = vsel %vm1506_vm4, %v1497_v22, %v1415_v37 }
  0xcf   : > { %v1399_v28 = vpop.permute.xlu0 %1398  ;;  %2379 = vmatmul.mubr.msk.bf16.gmra.mrb[4].mxu1 %vm1578_vm6, %v1530_v26 }
  0xd0   : > { %v1514_v17 = vsel %vm1506_vm4, %v1481_v27, %v1399_v28 }
  0xd1   : > { %2363 = vmatmul.mubr.msk.bf16.gmra.mrb[4].mxu0 %vm1578_vm6, %v1514_v17 }
  0xd5   : > { %v1225_v29 = vpop.permute.xlu1 %1224 }
  0xd6   : > { %v1463_v41 = vsel %vm1424_vm3, %v2190_v34, %v1225_v29 }
  0xd9   : > { %v1209_v31 = vpop.permute.xlu0 %1208 }
  0xda   : > { %v1439_v51 = vsel %vm1424_vm3, %v2182_v42, %v1209_v31 }
  0xde   : > { %v1227_v3 = vpop.permute.xlu1 %1226 }
  0xdf   : > { %v1466_v18 = vsel %vm1424_vm3, %v2191_v43, %v1227_v3 }
  0xe2   : > { %v1337_v33 = vpop.permute.xlu1 %1336 }
  0xe3   : > { %v1211_v36 = vpop.permute.xlu0 %1210  ;;  %v1499_v44 = vsel %vm1473_vm5, %v1463_v41, %v1337_v33 }
  0xe4   : > { %v1442_v32 = vsel %vm1424_vm3, %v2183_v16, %v1211_v36 }
  0xe6   : > { %v1339_v20 = vpop.permute.xlu1 %1338 }
  0xe7   : > { %v1321_v7 = vpop.permute.xlu0 %1320  ;;  %v1501_v50 = vsel %vm1473_vm5, %v1466_v18, %v1339_v20 }
  0xe8   : > { %v1483_v35 = vsel %vm1473_vm5, %v1439_v51, %v1321_v7 }
  0xeb   : > { %v1323_v47 = vpop.permute.xlu0 %1322 }
  0xec   : > { %v1417_v46 = vpop.permute.xlu1 %1416  ;;  %v1485_v5 = vsel %vm1473_vm5, %v1442_v32, %v1323_v47 }
  0xed   : > { %v1532_v48 = vsel %vm1506_vm4, %v1499_v44, %v1417_v46 }
  0xee   : > { %2382 = vmatprep.mubr.msk.bf16.mxu1 %vm1578_vm6, %v1532_v48 }
  0xef   : > { %v1401_v39 = vpop.permute.xlu0 %1400 }
  0xf0   : > { %v1516_v59 = vsel %vm1506_vm4, %v1483_v35, %v1401_v39  ;;  %v1419_v49 = vpop.permute.xlu1 %1418 }
  0xf1   : > { %2366 = vmatprep.mubr.msk.bf16.mxu0 %vm1578_vm6, %v1516_v59  ;;  %v1534_v54 = vsel %vm1506_vm4, %v1501_v50, %v1419_v49 }
  0xf2   : > { %2383 = vmatmul.mubr.msk.bf16.gmra.mrb[8].mxu1 %vm1578_vm6, %v1534_v54 }
  0xf3   : > { %v1403_v15 = vpop.permute.xlu0 %1402 }
  0xf4   : > { %v1518_v40 = vsel %vm1506_vm4, %v1485_v5, %v1403_v15 }
  0xf5   : > { %2367 = vmatmul.mubr.msk.bf16.gmra.mrb[8].mxu0 %vm1578_vm6, %v1518_v40 }
  0xf9   : > { %v1229_v55 = vpop.permute.xlu1 %1228 }
  0xfa   : > { %v1469_v9 = vsel %vm1424_vm3, %v2192_v56, %v1229_v55 }
  0xfc   : > { %v1213_v52 = vpop.permute.xlu0 %1212 }
  0xfd   : > { %v1445_v14 = vsel %vm1424_vm3, %v2184_v13, %v1213_v52 }
 0x101   : > { %v1231_v38 = vpop.permute.xlu1 %1230 }
 0x102   : > { %v1472_v6 = vsel %vm1424_vm3, %v2193_v1, %v1231_v38  ;;  %v3083_v1 = vld [vmem:[%s3200_s2] ss:$0 sm:$0xff] }
 0x105   : > { %v1215_v58 = vpop.permute.xlu0 %1214  ;;  %v1341_v60 = vpop.permute.xlu1 %1340 }
 0x106   : > { %v1503_v11 = vsel %vm1473_vm5, %v1469_v9, %v1341_v60  ;;  %v1448_v30 = vsel %vm1424_vm3, %v2185_v62, %v1215_v58 }
 0x109   : > { %v1325_v0 = vpop.permute.xlu0 %1324  ;;  %v1343_v2 = vpop.permute.xlu1 %1342 }
 0x10a   : > { %v1487_v21 = vsel %vm1473_vm5, %v1445_v14, %v1325_v0  ;;  %v1505_v56 = vsel %vm1473_vm5, %v1472_v6, %v1343_v2 }
 0x10d   : > { %v1327_v61 = vpop.permute.xlu0 %1326 }
 0x10e   : > { %v1489_v23 = vsel %vm1473_vm5, %v1448_v30, %v1327_v61 }
 0x10f   : > { %v1421_v57 = vpop.permute.xlu1 %1420 }
 0x110   : > { %v1536_v63 = vsel %vm1506_vm4, %v1503_v11, %v1421_v57 }
 0x111   : > { %v1405_v4 = vpop.permute.xlu0 %1404  ;;  %2386 = vmatprep.mubr.msk.bf16.mxu1 %vm1578_vm6, %v1536_v63 }
 0x112   : > { %v1520_v10 = vsel %vm1506_vm4, %v1487_v21, %v1405_v4 }
 0x113   : > { %2370 = vmatprep.mubr.msk.bf16.mxu0 %vm1578_vm6, %v1520_v10  ;;  %v1423_v12 = vpop.permute.xlu1 %1422 }
 0x114   : > { %v1538_v13 = vsel %vm1506_vm4, %v1505_v56, %v1423_v12 }
 0x115   : > { %v1407_v45 = vpop.permute.xlu0 %1406  ;;  %2387 = vmatmul.mubr.msk.bf16.gmra.mrb[12].mxu1 %vm1578_vm6, %v1538_v13 }
 0x116   : > { %v1522_v53 = vsel %vm1506_vm4, %v1489_v23, %v1407_v45 }
 0x117   : > { %2371 = vmatmul.mubr.msk.bf16.gmra.mrb[12].mxu0 %vm1578_vm6, %v1522_v53 }
 0x180   : > { %v2376_v24 = vpop.f32.mrb[0].mxu1 }
 0x181   : > { %v1718_v8 = vadd.f32 %v2376_v24, %v3083_v1  ;;  %v1709_v19 = vpop.f32.mrb[1].mxu1 }
 0x182   : > { %v1710_v62 = vadd.f32 %v3083_v1, %v1709_v19  ;;  %v2377_v22 = vpop.f32.mrb[2].mxu1 }
 0x183   : > { %vm1790_vm7 = vcmp.ge.f32.partialorder %v1718_v8, 0.0  ;;  %v1822_v37 = vmul.f32 0.2, %v1718_v8  ;;  %v1721_v25 = vadd.f32 %v2377_v22, %v3083_v1  ;;  %v1712_v26 = vpop.f32.mrb[3].mxu1 }
 0x184   : > { %vm1788_vm8 = vcmp.ge.f32.partialorder %v1710_v62, 0.0  ;;  %v1820_v27 = vmul.f32 0.2, %v1710_v62  ;;  %v1713_v28 = vadd.f32 %v3083_v1, %v1712_v26 }
 0x185   : > { %v2360_v17 = vpop.f32.mrb[0].mxu0  ;;  %v1854_v29 = vsel %vm1790_vm7, %v1718_v8, %v1822_v37  ;;  %vm1791_vm10 = vcmp.ge.f32.partialorder %v1721_v25, 0.0  ;;  %v1823_v31 = vmul.f32 0.2, %v1721_v25 }
 0x186   : > { %v1654_v3 = vadd.f32 %v2360_v17, %v3083_v1  ;;  %v2316_v33 = vpack.c.bf16 %v1854_v29, %v1854_v29  ;;  %v1645_v36 = vpop.f32.mrb[1].mxu0  ;;  %v1852_v20 = vsel %vm1788_vm8, %v1710_v62, %v1820_v27  ;;  %vm1789_vm11 = vcmp.ge.f32.partialorder %v1713_v28, 0.0 }
 0x187   : > { %v1646_v34 = vadd.f32 %v3083_v1, %v1645_v36  ;;  %v2314_v7 = vpack.c.bf16 %v1852_v20, %v1852_v20  ;;  %v2361_v42 = vpop.f32.mrb[2].mxu0  ;;  %v1855_v41 = vsel %vm1791_vm10, %v1721_v25, %v1823_v31  ;;  %v1821_v43 = vmul.f32 0.2, %v1713_v28 }
 0x188   : > { %vm1774_vm12 = vcmp.ge.f32.partialorder %v1654_v3, 0.0  ;;  %v1806_v47 = vmul.f32 0.2, %v1654_v3  ;;  %2015 = vst.msk [vmem:[%s3093_s9 + $0x48] sm:$0xf] %vm1996_vm9, %v2316_v33  ;;  %v1657_v44 = vadd.f32 %v2361_v42, %v3083_v1  ;;  %v2317_v46 = vpack.c.bf16 %v1855_v41, %v1855_v41  ;;  %v1648_v48 = vpop.f32.mrb[3].mxu0 }
 0x189   : > { %vm1772_vm13 = vcmp.ge.f32.partialorder %v1646_v34, 0.0  ;;  %v1804_v51 = vmul.f32 0.2, %v1646_v34  ;;  %2013 = vst.msk [vmem:[%s3093_s9 + $0x40] sm:$0xf] %vm1996_vm9, %v2314_v7  ;;  %v1649_v16 = vadd.f32 %v3083_v1, %v1648_v48  ;;  %v1853_v18 = vsel %vm1789_vm11, %v1713_v28, %v1821_v43 }
 0x18a   : > { %v1838_v35 = vsel %vm1774_vm12, %v1654_v3, %v1806_v47  ;;  %vm1775_vm14 = vcmp.ge.f32.partialorder %v1657_v44, 0.0  ;;  %v1807_v39 = vmul.f32 0.2, %v1657_v44  ;;  %2016 = vst.msk [vmem:[%s3093_s9 + $0x4c] sm:$0xf] %vm1996_vm9, %v2317_v46  ;;  %v2315_v50 = vpack.c.bf16 %v1853_v18, %v1853_v18 }
 0x18b   : > { %v2300_v59 = vpack.c.bf16 %v1838_v35, %v1838_v35  ;;  %v1836_v49 = vsel %vm1772_vm13, %v1646_v34, %v1804_v51  ;;  %vm1773_vm15 = vcmp.ge.f32.partialorder %v1649_v16, 0.0  ;;  %v1805_v54 = vmul.f32 0.2, %v1649_v16 }
 0x18c   : > { %v2298_v32 = vpack.c.bf16 %v1836_v49, %v1836_v49  ;;  %v1839_v5 = vsel %vm1775_vm14, %v1657_v44, %v1807_v39  ;;  %2014 = vst.msk [vmem:[%s3093_s9 + $0x44] sm:$0xf] %vm1996_vm9, %v2315_v50 }
 0x18d   : > { %1999 = vst.msk [vmem:[%s3093_s9 + $0x8] sm:$0xf] %vm1996_vm9, %v2300_v59  ;;  %v2301_v15 = vpack.c.bf16 %v1839_v5, %v1839_v5  ;;  %v1837_v40 = vsel %vm1773_vm15, %v1649_v16, %v1805_v54 }
 0x18e   : > { %1997 = vst.msk [vmem:[%s3093_s9] sm:$0xf] %vm1996_vm9, %v2298_v32  ;;  %v2299_v55 = vpack.c.bf16 %v1837_v40, %v1837_v40 }
 0x18f   : > { %2000 = vst.msk [vmem:[%s3093_s9 + $0xc] sm:$0xf] %vm1996_vm9, %v2301_v15 }
 0x190   : > { %1998 = vst.msk [vmem:[%s3093_s9 + $0x4] sm:$0xf] %vm1996_vm9, %v2299_v55 }
 0x1a2   : > { %v2380_v52 = vpop.f32.mrb[4].mxu1 }
 0x1a3   : > { %v1734_v38 = vadd.f32 %v2380_v52, %v3083_v1  ;;  %v1725_v58 = vpop.f32.mrb[5].mxu1 }
 0x1a4   : > { %v2364_v60 = vpop.f32.mrb[4].mxu0  ;;  %v1726_v0 = vadd.f32 %v3083_v1, %v1725_v58  ;;  %v2381_v2 = vpop.f32.mrb[6].mxu1 }
 0x1a5   : > { %v1670_v61 = vadd.f32 %v2364_v60, %v3083_v1  ;;  %vm1794_vm0 = vcmp.ge.f32.partialorder %v1734_v38, 0.0  ;;  %v1826_v9 = vmul.f32 0.2, %v1734_v38  ;;  %v1661_v11 = vpop.f32.mrb[5].mxu0  ;;  %v1737_v57 = vadd.f32 %v2381_v2, %v3083_v1  ;;  %v1728_v14 = vpop.f32.mrb[7].mxu1 }
 0x1a6   : > { %v1662_v63 = vadd.f32 %v3083_v1, %v1661_v11  ;;  %vm1792_vm1 = vcmp.ge.f32.partialorder %v1726_v0, 0.0  ;;  %v1824_v21 = vmul.f32 0.2, %v1726_v0  ;;  %v2365_v4 = vpop.f32.mrb[6].mxu0  ;;  %v1729_v6 = vadd.f32 %v3083_v1, %v1728_v14 }
 0x1a7   : > { %vm1778_vm2 = vcmp.ge.f32.partialorder %v1670_v61, 0.0  ;;  %v1810_v10 = vmul.f32 0.2, %v1670_v61  ;;  %v1858_v56 = vsel %vm1794_vm0, %v1734_v38, %v1826_v9  ;;  %v1673_v12 = vadd.f32 %v2365_v4, %v3083_v1  ;;  %v1664_v30 = vpop.f32.mrb[7].mxu0 }
 0x1a8   : > { %v2320_v13 = vpack.c.bf16 %v1858_v56, %v1858_v56  ;;  %vm1776_vm3 = vcmp.ge.f32.partialorder %v1662_v63, 0.0  ;;  %v1808_v23 = vmul.f32 0.2, %v1662_v63  ;;  %v1856_v45 = vsel %vm1792_vm1, %v1726_v0, %v1824_v21 }
 0x1a9   : > { %v1842_v53 = vsel %vm1778_vm2, %v1670_v61, %v1810_v10  ;;  %v2318_v24 = vpack.c.bf16 %v1856_v45, %v1856_v45  ;;  %vm1779_vm4 = vcmp.ge.f32.partialorder %v1673_v12, 0.0  ;;  %v1811_v8 = vmul.f32 0.2, %v1673_v12 }
 0x1aa   : > { %v2304_v19 = vpack.c.bf16 %v1842_v53, %v1842_v53  ;;  %2019 = vst.msk [vmem:[%s3093_s9 + $0x58] sm:$0xf] %vm1996_vm9, %v2320_v13  ;;  %v1840_v62 = vsel %vm1776_vm3, %v1662_v63, %v1808_v23  ;;  %vm1795_vm5 = vcmp.ge.f32.partialorder %v1737_v57, 0.0  ;;  %v1827_v22 = vmul.f32 0.2, %v1737_v57 }
 0x1ab   : > { %v2302_v37 = vpack.c.bf16 %v1840_v62, %v1840_v62  ;;  %2017 = vst.msk [vmem:[%s3093_s9 + $0x50] sm:$0xf] %vm1996_vm9, %v2318_v24  ;;  %v1843_v25 = vsel %vm1779_vm4, %v1673_v12, %v1811_v8  ;;  %v1665_v26 = vadd.f32 %v3083_v1, %v1664_v30  ;;  %vm1793_vm6 = vcmp.ge.f32.partialorder %v1729_v6, 0.0 }
 0x1ac   : > { %2003 = vst.msk [vmem:[%s3093_s9 + $0x18] sm:$0xf] %vm1996_vm9, %v2304_v19  ;;  %v2305_v27 = vpack.c.bf16 %v1843_v25, %v1843_v25  ;;  %v1859_v28 = vsel %vm1795_vm5, %v1737_v57, %v1827_v22  ;;  %v1825_v17 = vmul.f32 0.2, %v1729_v6 }
 0x1ad   : > { %2001 = vst.msk [vmem:[%s3093_s9 + $0x10] sm:$0xf] %vm1996_vm9, %v2302_v37  ;;  %v2321_v29 = vpack.c.bf16 %v1859_v28, %v1859_v28  ;;  %vm1777_vm7 = vcmp.ge.f32.partialorder %v1665_v26, 0.0  ;;  %v1809_v31 = vmul.f32 0.2, %v1665_v26 }
 0x1ae   : > { %2004 = vst.msk [vmem:[%s3093_s9 + $0x1c] sm:$0xf] %vm1996_vm9, %v2305_v27  ;;  %v1857_v3 = vsel %vm1793_vm6, %v1729_v6, %v1825_v17 }
 0x1af   : > { %2020 = vst.msk [vmem:[%s3093_s9 + $0x5c] sm:$0xf] %vm1996_vm9, %v2321_v29  ;;  %v1841_v33 = vsel %vm1777_vm7, %v1665_v26, %v1809_v31  ;;  %v2319_v36 = vpack.c.bf16 %v1857_v3, %v1857_v3 }
 0x1b0   : > { %v2303_v20 = vpack.c.bf16 %v1841_v33, %v1841_v33 }
 0x1b1   : > { %2018 = vst.msk [vmem:[%s3093_s9 + $0x54] sm:$0xf] %vm1996_vm9, %v2319_v36 }
 0x1b2   : > { %2002 = vst.msk [vmem:[%s3093_s9 + $0x14] sm:$0xf] %vm1996_vm9, %v2303_v20 }
 0x1c5   : > { %v2384_v34 = vpop.f32.mrb[8].mxu1 }
 0x1c6   : > { %v1750_v7 = vadd.f32 %v2384_v34, %v3083_v1  ;;  %v1741_v42 = vpop.f32.mrb[9].mxu1 }
 0x1c7   : > { %v1742_v41 = vadd.f32 %v3083_v1, %v1741_v42  ;;  %v2385_v43 = vpop.f32.mrb[10].mxu1 }
 0x1c8   : > { %v2368_v47 = vpop.f32.mrb[8].mxu0  ;;  %vm1798_vm8 = vcmp.ge.f32.partialorder %v1750_v7, 0.0  ;;  %v1830_v44 = vmul.f32 0.2, %v1750_v7  ;;  %v1753_v46 = vadd.f32 %v2385_v43, %v3083_v1  ;;  %v1744_v48 = vpop.f32.mrb[11].mxu1 }
 0x1c9   : > { %v1686_v51 = vadd.f32 %v2368_v47, %v3083_v1  ;;  %v1677_v16 = vpop.f32.mrb[9].mxu0  ;;  %vm1796_vm10 = vcmp.ge.f32.partialorder %v1742_v41, 0.0  ;;  %v1828_v18 = vmul.f32 0.2, %v1742_v41  ;;  %v1745_v35 = vadd.f32 %v3083_v1, %v1744_v48 }
 0x1ca   : > { %v1862_v39 = vsel %vm1798_vm8, %v1750_v7, %v1830_v44  ;;  %v1678_v50 = vadd.f32 %v3083_v1, %v1677_v16  ;;  %v2369_v59 = vpop.f32.mrb[10].mxu0  ;;  %vm1799_vm11 = vcmp.ge.f32.partialorder %v1753_v46, 0.0  ;;  %v1831_v49 = vmul.f32 0.2, %v1753_v46 }
 0x1cb   : > { %vm1782_vm12 = vcmp.ge.f32.partialorder %v1686_v51, 0.0  ;;  %v1814_v54 = vmul.f32 0.2, %v1686_v51  ;;  %v2324_v32 = vpack.c.bf16 %v1862_v39, %v1862_v39  ;;  %v1860_v5 = vsel %vm1796_vm10, %v1742_v41, %v1828_v18  ;;  %v1680_v15 = vpop.f32.mrb[11].mxu0 }
 0x1cc   : > { %vm1780_vm13 = vcmp.ge.f32.partialorder %v1678_v50, 0.0  ;;  %v1812_v40 = vmul.f32 0.2, %v1678_v50  ;;  %v2322_v55 = vpack.c.bf16 %v1860_v5, %v1860_v5  ;;  %v1689_v52 = vadd.f32 %v2369_v59, %v3083_v1 }
 0x1cd   : > { %v1846_v38 = vsel %vm1782_vm12, %v1686_v51, %v1814_v54  ;;  %2023 = vst.msk [vmem:[%s3093_s9 + $0x68] sm:$0xf] %vm1996_vm9, %v2324_v32  ;;  %v1863_v58 = vsel %vm1799_vm11, %v1753_v46, %v1831_v49  ;;  %v1681_v60 = vadd.f32 %v3083_v1, %v1680_v15  ;;  %vm1797_vm14 = vcmp.ge.f32.partialorder %v1745_v35, 0.0 }
 0x1ce   : > { %v2308_v0 = vpack.c.bf16 %v1846_v38, %v1846_v38  ;;  %v1844_v2 = vsel %vm1780_vm13, %v1678_v50, %v1812_v40  ;;  %2021 = vst.msk [vmem:[%s3093_s9 + $0x60] sm:$0xf] %vm1996_vm9, %v2322_v55  ;;  %vm1783_vm15 = vcmp.ge.f32.partialorder %v1689_v52, 0.0  ;;  %v1815_v61 = vmul.f32 0.2, %v1689_v52 }
 0x1cf   : > { %v2306_v9 = vpack.c.bf16 %v1844_v2, %v1844_v2  ;;  %v2325_v11 = vpack.c.bf16 %v1863_v58, %v1863_v58  ;;  %vm1781_vm0 = vcmp.ge.f32.partialorder %v1681_v60, 0.0  ;;  %v1813_v57 = vmul.f32 0.2, %v1681_v60 }
 0x1d0   : > { %2007 = vst.msk [vmem:[%s3093_s9 + $0x28] sm:$0xf] %vm1996_vm9, %v2308_v0  ;;  %v1847_v14 = vsel %vm1783_vm15, %v1689_v52, %v1815_v61  ;;  %v1829_v63 = vmul.f32 0.2, %v1745_v35 }
 0x1d1   : > { %2005 = vst.msk [vmem:[%s3093_s9 + $0x20] sm:$0xf] %vm1996_vm9, %v2306_v9  ;;  %v2309_v21 = vpack.c.bf16 %v1847_v14, %v1847_v14  ;;  %2024 = vst.msk [vmem:[%s3093_s9 + $0x6c] sm:$0xf] %vm1996_vm9, %v2325_v11  ;;  %v1845_v4 = vsel %vm1781_vm0, %v1681_v60, %v1813_v57 }
 0x1d2   : > { %v2307_v6 = vpack.c.bf16 %v1845_v4, %v1845_v4  ;;  %v1861_v10 = vsel %vm1797_vm14, %v1745_v35, %v1829_v63 }
 0x1d3   : > { %2008 = vst.msk [vmem:[%s3093_s9 + $0x2c] sm:$0xf] %vm1996_vm9, %v2309_v21  ;;  %v2323_v56 = vpack.c.bf16 %v1861_v10, %v1861_v10 }
 0x1d4   : > { %2006 = vst.msk [vmem:[%s3093_s9 + $0x24] sm:$0xf] %vm1996_vm9, %v2307_v6 }
 0x1d5   : > { %2022 = vst.msk [vmem:[%s3093_s9 + $0x64] sm:$0xf] %vm1996_vm9, %v2323_v56 }
 0x1e8   : > { %v2388_v12 = vpop.f32.mrb[12].mxu1 }
 0x1e9   : > { %v1766_v30 = vadd.f32 %v2388_v12, %v3083_v1  ;;  %v1757_v13 = vpop.f32.mrb[13].mxu1 }
 0x1ea   : > { %v2372_v23 = vpop.f32.mrb[12].mxu0  ;;  %v1758_v45 = vadd.f32 %v3083_v1, %v1757_v13  ;;  %v2389_v53 = vpop.f32.mrb[14].mxu1 }
 0x1eb   : > { %v1702_v24 = vadd.f32 %v2372_v23, %v3083_v1  ;;  %vm1802_vm1 = vcmp.ge.f32.partialorder %v1766_v30, 0.0  ;;  %v1834_v8 = vmul.f32 0.2, %v1766_v30  ;;  %v1693_v19 = vpop.f32.mrb[13].mxu0  ;;  %v1769_v62 = vadd.f32 %v2389_v53, %v3083_v1  ;;  %v1760_v22 = vpop.f32.mrb[15].mxu1 }
 0x1ec   : > { %v1694_v37 = vadd.f32 %v3083_v1, %v1693_v19  ;;  %vm1800_vm2 = vcmp.ge.f32.partialorder %v1758_v45, 0.0  ;;  %v1832_v25 = vmul.f32 0.2, %v1758_v45  ;;  %v2373_v26 = vpop.f32.mrb[14].mxu0  ;;  %v1761_v27 = vadd.f32 %v3083_v1, %v1760_v22 }
 0x1ed   : > { %vm1786_vm3 = vcmp.ge.f32.partialorder %v1702_v24, 0.0  ;;  %v1818_v28 = vmul.f32 0.2, %v1702_v24  ;;  %v1866_v17 = vsel %vm1802_vm1, %v1766_v30, %v1834_v8  ;;  %v1705_v29 = vadd.f32 %v2373_v26, %v3083_v1  ;;  %v1696_v31 = vpop.f32.mrb[15].mxu0 }
 0x1ee   : > { %v2328_v3 = vpack.c.bf16 %v1866_v17, %v1866_v17  ;;  %vm1784_vm4 = vcmp.ge.f32.partialorder %v1694_v37, 0.0  ;;  %v1816_v33 = vmul.f32 0.2, %v1694_v37  ;;  %v1864_v36 = vsel %vm1800_vm2, %v1758_v45, %v1832_v25 }
 0x1ef   : > { %v1850_v20 = vsel %vm1786_vm3, %v1702_v24, %v1818_v28  ;;  %v2326_v34 = vpack.c.bf16 %v1864_v36, %v1864_v36  ;;  %vm1787_vm5 = vcmp.ge.f32.partialorder %v1705_v29, 0.0  ;;  %v1819_v7 = vmul.f32 0.2, %v1705_v29 }
 0x1f0   : > { %v2312_v42 = vpack.c.bf16 %v1850_v20, %v1850_v20  ;;  %2027 = vst.msk [vmem:[%s3093_s9 + $0x78] sm:$0xf] %vm1996_vm9, %v2328_v3  ;;  %v1848_v41 = vsel %vm1784_vm4, %v1694_v37, %v1816_v33  ;;  %vm1803_vm6 = vcmp.ge.f32.partialorder %v1769_v62, 0.0  ;;  %v1835_v43 = vmul.f32 0.2, %v1769_v62 }
 0x1f1   : > { %v2310_v47 = vpack.c.bf16 %v1848_v41, %v1848_v41  ;;  %2025 = vst.msk [vmem:[%s3093_s9 + $0x70] sm:$0xf] %vm1996_vm9, %v2326_v34  ;;  %v1851_v44 = vsel %vm1787_vm5, %v1705_v29, %v1819_v7  ;;  %v1697_v46 = vadd.f32 %v3083_v1, %v1696_v31  ;;  %vm1801_vm7 = vcmp.ge.f32.partialorder %v1761_v27, 0.0 }
 0x1f2   : > { %2011 = vst.msk [vmem:[%s3093_s9 + $0x38] sm:$0xf] %vm1996_vm9, %v2312_v42  ;;  %v2313_v48 = vpack.c.bf16 %v1851_v44, %v1851_v44  ;;  %v1867_v51 = vsel %vm1803_vm6, %v1769_v62, %v1835_v43  ;;  %v1833_v16 = vmul.f32 0.2, %v1761_v27 }
 0x1f3   : > { %2009 = vst.msk [vmem:[%s3093_s9 + $0x30] sm:$0xf] %vm1996_vm9, %v2310_v47  ;;  %v2329_v18 = vpack.c.bf16 %v1867_v51, %v1867_v51  ;;  %vm1785_vm8 = vcmp.ge.f32.partialorder %v1697_v46, 0.0  ;;  %v1817_v35 = vmul.f32 0.2, %v1697_v46 }
 0x1f4   : > { %2012 = vst.msk [vmem:[%s3093_s9 + $0x3c] sm:$0xf] %vm1996_vm9, %v2313_v48  ;;  %v1865_v39 = vsel %vm1801_vm7, %v1761_v27, %v1833_v16 }
 0x1f5   : > { %2028 = vst.msk [vmem:[%s3093_s9 + $0x7c] sm:$0xf] %vm1996_vm9, %v2329_v18  ;;  %v1849_v50 = vsel %vm1785_vm8, %v1697_v46, %v1817_v35  ;;  %v2327_v1 = vpack.c.bf16 %v1865_v39, %v1865_v39 }
 0x1f6   : > { %v2311_v59 = vpack.c.bf16 %v1849_v50, %v1849_v50 }
 0x1f7   : > { %2026 = vst.msk [vmem:[%s3093_s9 + $0x74] sm:$0xf] %vm1996_vm9, %v2327_v1 }
 0x1f8   : > { %2010 = vst.msk [vmem:[%s3093_s9 + $0x34] sm:$0xf] %vm1996_vm9, %v2311_v59 }
 0x1f9 PF: > { %s13_s14 = sadd.s32 1, %s2500_s14   ;;  %s3204_s12 = smov %s2496_s13 }
 0x1fa   : > { %p10_p5 = scmp.ge.s32.totalorder %s13_s14, 4   ;;  %s3205_s13 = smov %s3207_s15 }
 0x1fc   :  { %12 = sbr.rel (!%p10_p5) target bundleno = 2 (0x2), region = 64 }

// kernel: tile.13
= control target key start
LH: loop header
LB: loop body
LE: loop exit
PB: predicated region body
PF: predicated region fallthrough
CT: control target
= control target key end

     0   :  { %s22_s0 = inlined_call_operand.vmem [shape: f32[16], index: 0, kind: input, shape index: {}]   ;;  %s23_s1 = inlined_call_operand.vmem [shape: f32[4,16], index: 1, kind: output, shape index: {}]  }
   0x1   :  { %v4_v0 = vld [vmem:[%s22_s0] ss:$0 sm:$0xff] }
   0x2   :  { %5 = vst [vmem:[%s23_s1] sm:$0xf] %v4_v0 }

// kernel: tile.18
= control target key start
LH: loop header
LB: loop body
LE: loop exit
PB: predicated region body
PF: predicated region fallthrough
CT: control target
= control target key end

     0   :  { %vm7_vm0 = vcmask 130048   ;;  %s37_s8 = smov 16   ;;  %s38_s9 = smov 32   ;;  %vm13_vm1 = vcmask 523648   ;;  %vm19_vm2 = vcmask 392448   ;;  %vm25_vm3 = vcmask 261248   ;;  %s55_s0 = inlined_call_operand.vmem [shape: f32[4,16], index: 0, kind: input, shape index: {}]   ;;  %s56_s1 = inlined_call_operand.vmem [shape: f32[1,64], index: 1, kind: output, shape index: {}]  }
   0x1   :  { %v4_v0 = vld [vmem:[%s55_s0] sm:$0xf]  ;;  %s36_s0 = smov 48  }
   0x2   :  { %5 = vst [vmem:[#allocation1] sm:$0xf] %v4_v0 }
   0x9   :  { %v10_v1 = vld [vmem:[#allocation1 + $0x3] sm:$0x1]   ;;  %v22_v2 = vld [vmem:[#allocation1 + $0x1] sm:$0x1]   ;;  %v6_v3 = vld [vmem:[#allocation1] sm:$0x1]  }
   0xa   :  { %11 = vrot.lane.b32.xlu0 %v10_v1, %s36_s0  ;;  %23 = vrot.lane.b32.xlu1 %v22_v2, %s37_s8  ;;  %v16_v4 = vld [vmem:[#allocation1 + $0x2] sm:$0x1]   ;;  %8 = vst.msk [vmem:[#allocation0] sm:$0x1] %vm7_vm0, %v6_v3  }
   0xe   :  { %17 = vrot.lane.b32.xlu0 %v16_v4, %s38_s9 }
  0x7c   :  { %v12_v5 = vpop.permute.xlu0 %11   ;;  %v24_v6 = vpop.permute.xlu1 %23  }
  0x7d   :  { %14 = vst.msk [vmem:[#allocation0] sm:$0x1] %vm13_vm1, %v12_v5  }
  0x80   :  { %v18_v7 = vpop.permute.xlu0 %17  }
  0x81   :  { %20 = vst.msk [vmem:[#allocation0] sm:$0x1] %vm19_vm2, %v18_v7  }
  0x82   :  { %26 = vst.msk [vmem:[#allocation0] sm:$0x1] %vm25_vm3, %v24_v6  }
  0x89   :  { %v30_v8 = vld [vmem:[#allocation0] sm:$0x1] }
  0x8a   :  { %32 = vst [vmem:[%s56_s1] sm:$0x1] %v30_v8 }

// kernel: patchdis_forward.6
= control target key start
LH: loop header
LB: loop body
LE: loop exit
PB: predicated region body
PF: predicated region fallthrough
CT: control target
= control target key end

     0   :  { %s1719_s15 = smov 0   ;;  %s1721_s16 = smov 0   ;;  %s2144_s0 = inlined_call_operand.vmem [shape: bf16[2,9,17,32], index: 0, kind: input, shape index: {}]   ;;  %s2145_s1 = inlined_call_operand.vmem [shape: bf16[128,16], index: 1, kind: input, shape index: {}]   ;;  %s2146_s2 = inlined_call_operand.vmem [shape: bf16[2,8,16,16], index: 2, kind: output, shape index: {0}]   ;;  %s2147_s3 = inlined_call_operand.vmem [shape: f32[2,1,16], index: 3, kind: output, shape index: {1}]   ;;  %s2148_s4 = inlined_call_operand.vmem [shape: f32[2,1,16], index: 4, kind: output, shape index: {2}]  }
   0x1   :  { %s1723_s17 = smov 0  }
   0x2 LB: > { %s27_s18 = sadd.s32 1, %s1684_s16  ;;  %p1446_p0 = scmp.ge.s32.totalorder %s1688_s17, 1  ;;  %s1688_s17 = sphi %s1723_s17, %s15_s17   ;;  %s1684_s16 = sphi %s1721_s16, %s2152_s16   ;;  %s1680_s15 = sphi %s1719_s15, %s2151_s15  }
   0x3   : > { %p29_p1 = scmp.ge.s32.totalorder %s27_s18, 2  ;;  %p181_p2 = scmp.lt.s32.totalorder %s1688_s17, 3 }
   0x5   : > { %s2154_s18 = smov (%p29_p1, %s27_s18), 0  ;;  %p182_p3 = pnand %p1446_p0, %p181_p2 }
   0x6   : > { %p218_p4 = scmp.lt.s32.totalorder (!%p182_p3), %s1680_s15, 1  ;;  %v1650_v0 = vld [vmem:[%s2145_s1] sm:$0xff] (!%p182_p3)   ;;  %vm269_vm0 = vsmask.f32 (!%p182_p3), 3328  ;;  %v1651_v1 = vld [vmem:[%s2145_s1 + $0x8] sm:$0xff] (!%p182_p3)   ;;  %v1652_v2 = vld [vmem:[%s2145_s1 + $0x10] sm:$0xff] (!%p182_p3)  }
   0x7   : > { %185 = sbr.rel (%p182_p3) target bundleno = 449 (0x1c1), region = 28  ;;  %1565 = vmatprep.subr.bf16.mxu0 (!%p182_p3), %v1650_v0  ;;  %1597 = vmatprep.subr.bf16.mxu1 (!%p182_p3), %v1650_v0  ;;  %vm270_vm1 = vsmask.f32 (!%p182_p3), 7440  ;;  %v1653_v11 = vld [vmem:[%s2145_s1 + $0x18] sm:$0xff] (!%p182_p3)   ;;  %s1690_s5 = smov (!%p182_p3), 64   ;;  %v1654_v42 = vld [vmem:[%s2145_s1 + $0x20] sm:$0xff] (!%p182_p3)  }
   0x8   : > { %1566 = vmatpush3.bf16.msra.mxu0 (!%p182_p3), %v1650_v0  ;;  %1605 = vmatpush3.bf16.msra.mxu1 (!%p182_p3), %v1650_v0  ;;  %vm1780_vm2 = vmor (!%p182_p3), %vm269_vm0, %vm270_vm1  ;;  %v1655_v62 = vld [vmem:[%s2145_s1 + $0x28] sm:$0xff] (!%p182_p3)   ;;  %s1691_s10 = smov (!%p182_p3), 96   ;;  %s1692_s19 = smov (!%p182_p3), 32   ;;  %vm860_vm3 = vcmask (!%p182_p3), 261120   ;;  %vm885_vm4 = vcmask (!%p182_p3), 523264   ;;  %vm902_vm5 = vcmask (!%p182_p3), 785408  }
   0x9   : > { %1567 = vmatprep.subr.bf16.mxu0 (!%p182_p3), %v1651_v1  ;;  %1598 = vmatprep.subr.bf16.mxu1 (!%p182_p3), %v1651_v1  ;;  %vm1092_vm6 = vcmask (!%p182_p3), 122880   ;;  %vm1121_vm7 = vcmask (!%p182_p3), 130048   ;;  %vm1282_vm8 = vcmask (!%p182_p3), 125952  }
   0xc   : > { %1568 = vmatpush3.bf16.msra.mxu0 (!%p182_p3), %v1651_v1  ;;  %1606 = vmatpush3.bf16.msra.mxu1 (!%p182_p3), %v1651_v1 }
   0xd   : > { %1569 = vmatprep.subr.bf16.mxu0 (!%p182_p3), %v1652_v2  ;;  %1599 = vmatprep.subr.bf16.mxu1 (!%p182_p3), %v1652_v2 }
   0xe   : > { %s2156_s15 = smov (!%p218_p4, %s1680_s15), 1 }
   0xf   : > { %s1613_s23 = smul.u32 108, %s2156_s15  ;;  %s2063_s22 = scalar_lea.vmem %s2147_s3, %s2156_s15 }
  0x10   : > { %1570 = vmatpush3.bf16.msra.mxu0 %v1652_v2  ;;  %1607 = vmatpush3.bf16.msra.mxu1 %v1652_v2  ;;  %s2069_s25 = scalar_lea.vmem %s2148_s4, %s2156_s15 }
  0x11   : > { %s1749_s26 = scalar_lea.vmem %s2144_s0, %s1613_s23  ;;  %1571 = vmatprep.subr.bf16.mxu0 %v1653_v11  ;;  %1600 = vmatprep.subr.bf16.mxu1 %v1653_v11 }
  0x12   : > { %v1450_v3 = vld [vmem:[%s1749_s26 + $0xc] sm:$0xf]  ;;  %v1451_v4 = vld [vmem:[%s1749_s26 + $0x10] sm:$0xf]  ;;  %v1452_v5 = vld [vmem:[%s1749_s26 + $0x18] sm:$0xf] }
  0x13   : > { %v502_v6 = vshll.u32 %v1451_v4, 16  ;;  %v506_v7 = vshrl.u32 %v1451_v4, 16  ;;  %v1490_v8 = vcombine.low %v1450_v3, %v1451_v4  ;;  %v493_v9 = vshrl.u32 %v1450_v3, 16  ;;  %v1453_v10 = vld [vmem:[%s1749_s26 + $0x1c] sm:$0xf] }
  0x14   : > { %v496_v12 = vshll.u32 %v1450_v3, 16  ;;  %v517_v13 = vshrl.u32 %v1452_v5, 16  ;;  %v520_v14 = vshll.u32 %v1452_v5, 16  ;;  %v526_v15 = vshll.u32 %v1453_v10, 16  ;;  %v1467_v16 = vld [vmem:[%s1749_s26 + $0x20] sm:$0x1]  ;;  %1572 = vmatpush3.bf16.msra.mxu0 %v1653_v11  ;;  %1608 = vmatpush3.bf16.msra.mxu1 %v1653_v11 }
  0x15   : > { %v1762_v17 = vrot.slane %v502_v6, 5  ;;  %v508_v18 = vrot.slane %v506_v7, 4  ;;  %804 = vrot.lane.b32.xlu1 %v1490_v8, %s1690_s5  ;;  %v495_v19 = vrot.slane %v493_v9, 4  ;;  %v530_v20 = vshrl.u32 %v1453_v10, 16  ;;  %v1766_v21 = vld [vmem:[%s1749_s26] sm:$0xf]  ;;  %1573 = vmatprep.subr.bf16.mxu0 %v1654_v42 }
  0x16   : > { %v498_v22 = vrot.slane %v496_v12, 5  ;;  %v519_v23 = vrot.slane %v517_v13, 4  ;;  %v522_v24 = vrot.slane %v520_v14, 5  ;;  %v528_v25 = vrot.slane %v526_v15, 5  ;;  %v1769_v26 = vld [vmem:[%s1749_s26 + $0x4] sm:$0xf]  ;;  %1601 = vmatprep.subr.bf16.mxu1 %v1654_v42 }
  0x17   : > { %v509_v27 = vor.u32 %v508_v18, %v1762_v17  ;;  %v532_v28 = vrot.slane %v530_v20, 4  ;;  %v1491_v29 = vcombine.low %v1452_v5, %v1453_v10  ;;  %v536_v30 = vshll.u32 %v1467_v16, 16  ;;  %v261_v33 = vld [vmem:[%s1749_s26 + $0x8] sm:$0x1]  ;;  %v1786_v41 = vld [vmem:[%s1749_s26 + $0x30] sm:$0xf] }
  0x18   : > { %v499_v31 = vor.u32 %v498_v22, %v495_v19  ;;  %v523_v32 = vor.u32 %v522_v24, %v519_v23  ;;  %v273_v34 = vshrl.u32 %v1766_v21, 16  ;;  %v276_v35 = vshll.u32 %v1766_v21, 16  ;;  %v1794_v47 = vld [vmem:[%s1749_s26 + $0x34] sm:$0xf]  ;;  %v265_v54 = vld [vmem:[%s1749_s26 + $0x38] sm:$0x1]  ;;  %1574 = vmatpush3.bf16.msra.mxu0 %v1654_v42  ;;  %1609 = vmatpush3.bf16.msra.mxu1 %v1654_v42 }
  0x19   : > { %v1775_v36 = vrot.slane %v509_v27, 4  ;;  %806 = vrot.lane.b32.xlu1 %v1491_v29, %s1690_s5  ;;  %v533_v38 = vor.u32 %v532_v28, %v528_v25  ;;  %v538_v39 = vrot.slane %v536_v30, 5  ;;  %v282_v40 = vshll.u32 %v1769_v26, 16  ;;  %v1806_v61 = vld [vmem:[%s1749_s26 + $0xc] sm:$0xf]  ;;  %1575 = vmatprep.subr.bf16.mxu0 %v1655_v62  ;;  %v1657_v18 = vld [vmem:[%s2145_s1 + $0x30] sm:$0xff]  }
  0x1a   : > { %v1791_v43 = vrot.slane %v499_v31, 4  ;;  %v524_v44 = vrot.slane %v523_v32, 4  ;;  %v275_v45 = vrot.slane %v273_v34, 4  ;;  %v278_v46 = vrot.slane %v276_v35, 5  ;;  %v1812_v3 = vld [vmem:[%s1749_s26 + $0x10] sm:$0xf]  ;;  %1602 = vmatprep.subr.bf16.mxu1 %v1655_v62 }
  0x1b   : > { %v534_v48 = vrot.slane %v533_v38, 4  ;;  %v284_v49 = vrot.slane %v282_v40, 5  ;;  %v286_v50 = vshrl.u32 %v1769_v26, 16  ;;  %v292_v51 = vshll.u32 %v261_v33, 16  ;;  %v262_v10 = vld [vmem:[%s1749_s26 + $0x14] sm:$0x1] }
  0x1c   : > { %v529_v52 = vsel %vm1780_vm2, %v524_v44, %v528_v25  ;;  %v279_v53 = vor.u32 %v278_v46, %v275_v45  ;;  %v369_v55 = vshrl.u32 %v1786_v41, 16  ;;  %v372_v56 = vshll.u32 %v1786_v41, 16  ;;  %v1827_v24 = vld [vmem:[%s1749_s26 + $0x3c] sm:$0xf]  ;;  %v1832_v30 = vld [vmem:[%s1749_s26 + $0x40] sm:$0xf]  ;;  %1576 = vmatpush3.bf16.msra.mxu0 %v1655_v62  ;;  %1610 = vmatpush3.bf16.msra.mxu1 %v1655_v62 }
  0x1d   : > { %v539_v57 = vsel %vm1780_vm2, %v534_v48, %v538_v39  ;;  %v288_v58 = vrot.slane %v286_v50, 4  ;;  %v294_v59 = vrot.slane %v292_v51, 5  ;;  %v378_v60 = vshll.u32 %v1794_v47, 16  ;;  %v266_v35 = vld [vmem:[%s1749_s26 + $0x44] sm:$0x1]  ;;  %1577 = vmatprep.subr.bf16.mxu0 %v1657_v18  ;;  %v1660_v44 = vld [vmem:[%s2145_s1 + $0x38] sm:$0xff]   ;;  %1603 = vmatprep.subr.bf16.mxu1 %v1657_v18 }
  0x1e   : > { %v1499_v63 = vcombine.low %v529_v52, %v539_v57  ;;  %v280_v0 = vrot.slane %v279_v53, 4  ;;  %v371_v1 = vrot.slane %v369_v55, 4  ;;  %v374_v2 = vrot.slane %v372_v56, 5  ;;  %v1466_v50 = vld [vmem:[%s1749_s26 + $0x14] sm:$0x1] }
  0x1f   : > { %v289_v4 = vor.u32 %v288_v58, %v284_v49  ;;  %v380_v5 = vrot.slane %v378_v60, 5  ;;  %v382_v6 = vshrl.u32 %v1794_v47, 16  ;;  %v388_v7 = vshll.u32 %v265_v54, 16  ;;  %v1849_v55 = vld [vmem:[%s1749_s26 + $0x3c] sm:$0xf] }
  0x20   : > { %846 = vrot.lane.b32.xlu1 %v1499_v63, %s1691_s10  ;;  %v285_v8 = vsel %vm1780_vm2, %v280_v0, %v284_v49  ;;  %v375_v9 = vor.u32 %v374_v2, %v371_v1  ;;  %v297_v11 = vshrl.u32 %v1806_v61, 16  ;;  %v300_v12 = vshll.u32 %v1806_v61, 16  ;;  %v1854_v60 = vld [vmem:[%s1749_s26 + $0x40] sm:$0xf]  ;;  %1578 = vmatpush3.bf16.msra.mxu0 %v1657_v18 }
  0x21   : > { %v290_v13 = vrot.slane %v289_v4, 4  ;;  %v384_v14 = vrot.slane %v382_v6, 4  ;;  %v390_v15 = vrot.slane %v388_v7, 5  ;;  %v306_v16 = vshll.u32 %v1812_v3, 16  ;;  %1579 = vmatprep.subr.bf16.mxu0 %v1660_v44  ;;  %1611 = vmatpush3.bf16.msra.mxu1 %v1657_v18 }
  0x22   : > { %v376_v19 = vrot.slane %v375_v9, 4  ;;  %v299_v20 = vrot.slane %v297_v11, 4  ;;  %v302_v22 = vrot.slane %v300_v12, 5  ;;  %v310_v23 = vshrl.u32 %v1812_v3, 16  ;;  %1604 = vmatprep.subr.bf16.mxu1 %v1660_v44 }
  0x23   : > { %v295_v25 = vsel %vm1780_vm2, %v290_v13, %v294_v59  ;;  %v385_v27 = vor.u32 %v384_v14, %v380_v5  ;;  %v308_v28 = vrot.slane %v306_v16, 5  ;;  %v316_v29 = vshll.u32 %v262_v10, 16  ;;  %v1875_v14 = vld [vmem:[%s1749_s26 + $0x1c] sm:$0xf] }
  0x24   : > { %v1482_v31 = vcombine.low %v285_v8, %v295_v25  ;;  %v381_v32 = vsel %vm1780_vm2, %v376_v19, %v380_v5  ;;  %v303_v33 = vor.u32 %v302_v22, %v299_v20  ;;  %v312_v34 = vrot.slane %v310_v23, 4  ;;  %1580 = vmatpush3.bf16.msra.mxu0 %v1660_v44  ;;  %v263_v20 = vld [vmem:[%s1749_s26 + $0x20] sm:$0x1] }
  0x25   : > { %v386_v38 = vrot.slane %v385_v27, 4  ;;  %v318_v39 = vrot.slane %v316_v29, 5  ;;  %v393_v40 = vshrl.u32 %v1827_v24, 16  ;;  %v396_v42 = vshll.u32 %v1827_v24, 16  ;;  %1612 = vmatpush3.bf16.msra.mxu1 %v1660_v44 }
  0x26   : > { %748 = vrot.lane.b32.xlu0 %v1482_v31, %s1692_s19  ;;  %v304_v45 = vrot.slane %v303_v33, 4  ;;  %v313_v46 = vor.u32 %v312_v34, %v308_v28  ;;  %v402_v48 = vshll.u32 %v1832_v30, 16  ;;  %v406_v49 = vshrl.u32 %v1832_v30, 16  ;;  %v1461_v34 = vld [vmem:[%s1749_s26 + $0x4c] sm:$0xf] }
  0x27   : > { %v391_v51 = vsel %vm1780_vm2, %v386_v38, %v390_v15  ;;  %v395_v52 = vrot.slane %v393_v40, 4  ;;  %v398_v53 = vrot.slane %v396_v42, 5  ;;  %v412_v54 = vshll.u32 %v266_v35, 16 }
  0x28   : > { %v1486_v56 = vcombine.low %v381_v32, %v391_v51  ;;  %v309_v57 = vsel %vm1780_vm2, %v304_v45, %v308_v28  ;;  %v314_v58 = vrot.slane %v313_v46, 4  ;;  %v404_v59 = vrot.slane %v402_v48, 5  ;;  %v1460_v28 = vld [vmem:[%s1749_s26 + $0x48] sm:$0xf]  ;;  %v1898_v46 = vld [vmem:[%s1749_s26 + $0x24] sm:$0xf] }
  0x29   : > { %v399_v62 = vor.u32 %v398_v53, %v395_v52  ;;  %v408_v63 = vrot.slane %v406_v49, 4  ;;  %v414_v0 = vrot.slane %v412_v54, 5  ;;  %v505_v1 = vsel %vm1780_vm2, %v1791_v43, %v1762_v17  ;;  %v1867_v43 = vld [vmem:[%s1749_s26 + $0x18] sm:$0xf]  ;;  %v1902_v52 = vld [vmem:[%s1749_s26 + $0x28] sm:$0xf] }
  0x2a   : > { %756 = vrot.lane.b32.xlu1 %v1486_v56, %s1692_s19  ;;  %v319_v2 = vsel %vm1780_vm2, %v314_v58, %v318_v39  ;;  %v512_v4 = vshll.u32 %v1466_v50, 16  ;;  %v589_v5 = vshrl.u32 %v1849_v55, 16  ;;  %v592_v6 = vshll.u32 %v1849_v55, 16 }
  0x2b   : > { %v1483_v7 = vcombine.low %v309_v57, %v319_v2  ;;  %v400_v8 = vrot.slane %v399_v62, 4  ;;  %v409_v9 = vor.u32 %v408_v63, %v404_v59  ;;  %v598_v17 = vshll.u32 %v1854_v60, 16  ;;  %v264_v57 = vld [vmem:[%s1749_s26 + $0x2c] sm:$0x1]  ;;  %v1470_v63 = vld [vmem:[%s1749_s26 + $0x44] sm:$0x1] }
  0x2c   : > { %v514_v10 = vrot.slane %v512_v4, 5  ;;  %v1869_v11 = vrot.slane %v589_v5, 4  ;;  %v1871_v12 = vrot.slane %v592_v6, 5  ;;  %v602_v13 = vshrl.u32 %v1854_v60, 16 }
  0x2d   : > { %750 = vrot.lane.b32.xlu0 %v1483_v7, %s1692_s19  ;;  %v405_v15 = vsel %vm1780_vm2, %v400_v8, %v404_v59  ;;  %v410_v16 = vrot.slane %v409_v9, 4  ;;  %v1880_v18 = vrot.slane %v598_v17, 5  ;;  %v1494_v19 = vcombine.low %v1849_v55, %v1854_v60 }
  0x2e   : > { %v515_v22 = vsel %vm1780_vm2, %v1775_v36, %v514_v10  ;;  %v604_v23 = vrot.slane %v602_v13, 4  ;;  %v321_v25 = vshrl.u32 %v1867_v43, 16  ;;  %v324_v27 = vshll.u32 %v1867_v43, 16 }
  0x2f   : > { %v415_v29 = vsel %vm1780_vm2, %v410_v16, %v414_v0  ;;  %v1498_v31 = vcombine.low %v505_v1, %v515_v22  ;;  %v330_v32 = vshll.u32 %v1875_v14, 16  ;;  %v334_v33 = vshrl.u32 %v1875_v14, 16  ;;  %v1910_v0 = vld [vmem:[%s1749_s26 + $0x24] sm:$0xf]  ;;  %v1455_v16 = vld [vmem:[%s1749_s26 + $0x28] sm:$0xf] }
  0x30   : > { %v1487_v35 = vcombine.low %v405_v15, %v415_v29  ;;  %v323_v38 = vrot.slane %v321_v25, 4  ;;  %v326_v36 = vrot.slane %v324_v27, 5  ;;  %v340_v39 = vshll.u32 %v263_v20, 16 }
  0x31   : > { %844 = vrot.lane.b32.xlu0 %v1498_v31, %s1691_s10  ;;  %v332_v40 = vrot.slane %v330_v32, 5  ;;  %v336_v42 = vrot.slane %v334_v33, 4  ;;  %v613_v44 = vshrl.u32 %v1460_v28, 16  ;;  %v616_v45 = vshll.u32 %v1460_v28, 16 }
  0x32   : > { %758 = vrot.lane.b32.xlu1 %v1487_v35, %s1692_s19  ;;  %v327_v48 = vor.u32 %v326_v36, %v323_v38  ;;  %v342_v49 = vrot.slane %v340_v39, 5  ;;  %v622_v50 = vshll.u32 %v1461_v34, 16  ;;  %v626_v51 = vshrl.u32 %v1461_v34, 16  ;;  %v1471_v36 = vld [vmem:[%s1749_s26 + $0x50] sm:$0x1] }
  0x33   : > { %v337_v53 = vor.u32 %v336_v42, %v332_v40  ;;  %v615_v54 = vrot.slane %v613_v44, 4  ;;  %v618_v55 = vrot.slane %v616_v45, 5  ;;  %v1495_v56 = vcombine.low %v1460_v28, %v1461_v34  ;;  %v1456_v45 = vld [vmem:[%s1749_s26 + $0x30] sm:$0xf] }
  0x34   : > { %v328_v58 = vrot.slane %v327_v48, 4  ;;  %v1905_v59 = vrot.slane %v622_v50, 5  ;;  %v628_v60 = vrot.slane %v626_v51, 4  ;;  %v345_v62 = vshrl.u32 %v1898_v46, 16  ;;  %v1457_v51 = vld [vmem:[%s1749_s26 + $0x34] sm:$0xf] }
  0x35   : > { %v338_v1 = vrot.slane %v337_v53, 4  ;;  %v348_v2 = vshll.u32 %v1898_v46, 16  ;;  %v354_v4 = vshll.u32 %v1902_v52, 16  ;;  %v358_v5 = vshrl.u32 %v1902_v52, 16 }
  0x36   : > { %812 = vrot.lane.b32.xlu1 %v1494_v19, %s1690_s5  ;;  %v333_v6 = vsel %vm1780_vm2, %v328_v58, %v332_v40  ;;  %v347_v7 = vrot.slane %v345_v62, 4  ;;  %v364_v8 = vshll.u32 %v264_v57, 16  ;;  %v595_v9 = vor.u32 %v1871_v12, %v1869_v11 }
  0x37   : > { %v343_v17 = vsel %vm1780_vm2, %v338_v1, %v342_v49  ;;  %v350_v10 = vrot.slane %v348_v2, 5  ;;  %v356_v13 = vrot.slane %v354_v4, 5  ;;  %v360_v15 = vrot.slane %v358_v5, 4  ;;  %v1468_v2 = vld [vmem:[%s1749_s26 + $0x2c] sm:$0x1] }
  0x38   : > { %v1484_v20 = vcombine.low %v333_v6, %v343_v17  ;;  %v366_v22 = vrot.slane %v364_v8, 5  ;;  %v596_v25 = vrot.slane %v595_v9, 4  ;;  %v605_v19 = vor.u32 %v604_v23, %v1880_v18  ;;  %v1946_v6 = vld [vmem:[%s1749_s26 + $0x54] sm:$0xf]  ;;  %v1952_v17 = vld [vmem:[%s1749_s26 + $0x58] sm:$0xf] }
  0x39   : > { %v351_v27 = vor.u32 %v350_v10, %v347_v7  ;;  %v361_v28 = vor.u32 %v360_v15, %v356_v13  ;;  %v608_v29 = vshll.u32 %v1470_v63, 16  ;;  %v541_v31 = vshrl.u32 %v1910_v0, 16 }
  0x3a   : > { %752 = vrot.lane.b32.xlu0 %v1484_v20, %s1692_s19  ;;  %814 = vrot.lane.b32.xlu1 %v1495_v56, %s1690_s5  ;;  %v601_v11 = vsel %vm1780_vm2, %v596_v25, %v1880_v18  ;;  %v606_v12 = vrot.slane %v605_v19, 4  ;;  %v544_v32 = vshll.u32 %v1910_v0, 16  ;;  %v550_v33 = vshll.u32 %v1455_v16, 16  ;;  %v268_v25 = vld [vmem:[%s1749_s26 + $0x5c] sm:$0x1] }
  0x3b   : > { %v352_v23 = vrot.slane %v351_v27, 4  ;;  %v362_v34 = vrot.slane %v361_v28, 4  ;;  %v610_v35 = vrot.slane %v608_v29, 5  ;;  %v543_v38 = vrot.slane %v541_v31, 4 }
  0x3c   : > { %v546_v39 = vrot.slane %v544_v32, 5  ;;  %v552_v40 = vrot.slane %v550_v33, 5  ;;  %v554_v42 = vshrl.u32 %v1455_v16, 16  ;;  %v1492_v44 = vcombine.low %v1910_v0, %v1455_v16 }
  0x3d   : > { %v357_v18 = vsel %vm1780_vm2, %v352_v23, %v356_v13  ;;  %v367_v48 = vsel %vm1780_vm2, %v362_v34, %v366_v22  ;;  %v611_v49 = vsel %vm1780_vm2, %v606_v12, %v610_v35  ;;  %v619_v50 = vor.u32 %v618_v55, %v615_v54  ;;  %v1469_v23 = vld [vmem:[%s1749_s26 + $0x38] sm:$0x1] }
  0x3e   : > { %v1485_v53 = vcombine.low %v357_v18, %v367_v48  ;;  %v1502_v56 = vcombine.low %v601_v11, %v611_v49  ;;  %v556_v57 = vrot.slane %v554_v42, 4  ;;  %v629_v58 = vor.u32 %v628_v60, %v1905_v59  ;;  %v1465_v48 = vld [vmem:[%s1749_s26 + $0x64] sm:$0xf] }
  0x3f   : > { %v620_v62 = vrot.slane %v619_v50, 4  ;;  %v632_v63 = vshll.u32 %v1471_v36, 16  ;;  %v565_v0 = vshrl.u32 %v1456_v45, 16  ;;  %v568_v1 = vshll.u32 %v1456_v45, 16 }
  0x40   : > { %754 = vrot.lane.b32.xlu0 %v1485_v53, %s1692_s19  ;;  %852 = vrot.lane.b32.xlu1 %v1502_v56, %s1691_s10  ;;  %v630_v4 = vrot.slane %v629_v58, 4  ;;  %v574_v54 = vshll.u32 %v1457_v51, 16  ;;  %v578_v55 = vshrl.u32 %v1457_v51, 16  ;;  %v1493_v5 = vcombine.low %v1456_v45, %v1457_v51 }
  0x41   : > { %v625_v60 = vsel %vm1780_vm2, %v620_v62, %v1905_v59  ;;  %v634_v7 = vrot.slane %v632_v63, 5  ;;  %v567_v8 = vrot.slane %v565_v0, 4  ;;  %v570_v9 = vrot.slane %v568_v1, 5 }
  0x42   : > { %v576_v10 = vrot.slane %v574_v54, 5  ;;  %v580_v13 = vrot.slane %v578_v55, 4  ;;  %v547_v15 = vor.u32 %v546_v39, %v543_v38  ;;  %v557_v16 = vor.u32 %v556_v57, %v552_v40  ;;  %v1967_v39 = vld [vmem:[%s1749_s26 + $0x60] sm:$0xf] }
  0x43   : > { %v635_v20 = vsel %vm1780_vm2, %v630_v4, %v634_v7  ;;  %v560_v22 = vshll.u32 %v1468_v2, 16  ;;  %v441_v19 = vshrl.u32 %v1946_v6, 16  ;;  %v444_v27 = vshll.u32 %v1946_v6, 16  ;;  %v1978_v2 = vld [vmem:[%s1749_s26 + $0x48] sm:$0xf] }
  0x44   : > { %808 = vrot.lane.b32.xlu0 %v1492_v44, %s1690_s5  ;;  %v1503_v59 = vcombine.low %v625_v60, %v635_v20  ;;  %v548_v28 = vrot.slane %v547_v15, 4  ;;  %v558_v29 = vrot.slane %v557_v16, 4  ;;  %v450_v31 = vshll.u32 %v1952_v17, 16  ;;  %v1983_v60 = vld [vmem:[%s1749_s26 + $0x4c] sm:$0xf] }
  0x45   : > { %v562_v11 = vrot.slane %v560_v22, 5  ;;  %v443_v12 = vrot.slane %v441_v19, 4  ;;  %v446_v32 = vrot.slane %v444_v27, 5  ;;  %v454_v33 = vshrl.u32 %v1952_v17, 16 }
  0x46   : > { %854 = vrot.lane.b32.xlu1 %v1503_v59, %s1691_s10  ;;  %v553_v34 = vsel %vm1780_vm2, %v548_v28, %v552_v40  ;;  %v452_v35 = vrot.slane %v450_v31, 5  ;;  %v460_v38 = vshll.u32 %v268_v25, 16  ;;  %v571_v36 = vor.u32 %v570_v9, %v567_v8  ;;  %v1473_v25 = vld [vmem:[%s1749_s26 + $0x68] sm:$0x1] }
  0x47   : > { %v563_v42 = vsel %vm1780_vm2, %v558_v29, %v562_v11  ;;  %v447_v44 = vor.u32 %v446_v32, %v443_v12  ;;  %v456_v45 = vrot.slane %v454_v33, 4  ;;  %v581_v18 = vor.u32 %v580_v13, %v576_v10  ;;  %v267_v13 = vld [vmem:[%s1749_s26 + $0x50] sm:$0x1]  ;;  %v1462_v29 = vld [vmem:[%s1749_s26 + $0x54] sm:$0xf] }
  0x48   : > { %810 = vrot.lane.b32.xlu0 %v1493_v5, %s1690_s5  ;;  %v1500_v49 = vcombine.low %v553_v34, %v563_v42  ;;  %v462_v50 = vrot.slane %v460_v38, 5  ;;  %v572_v51 = vrot.slane %v571_v36, 4  ;;  %v584_v40 = vshll.u32 %v1469_v23, 16  ;;  %v1463_v38 = vld [vmem:[%s1749_s26 + $0x58] sm:$0xf] }
  0x49   : > { %v448_v53 = vrot.slane %v447_v44, 4  ;;  %v457_v56 = vor.u32 %v456_v45, %v452_v35  ;;  %v582_v57 = vrot.slane %v581_v18, 4  ;;  %v661_v58 = vshrl.u32 %v1967_v39, 16 }
  0x4a   : > { %v577_v62 = vsel %vm1780_vm2, %v572_v51, %v576_v10  ;;  %v586_v63 = vrot.slane %v584_v40, 5  ;;  %v664_v0 = vshll.u32 %v1967_v39, 16  ;;  %v670_v1 = vshll.u32 %v1465_v48, 16 }
  0x4b   : > { %v453_v4 = vsel %vm1780_vm2, %v448_v53, %v452_v35  ;;  %v458_v54 = vrot.slane %v457_v56, 4  ;;  %v663_v55 = vrot.slane %v661_v58, 4  ;;  %v674_v5 = vshrl.u32 %v1465_v48, 16  ;;  %v1472_v56 = vld [vmem:[%s1749_s26 + $0x5c] sm:$0x1]  ;;  %s1532_s26 = sshll.u32 %s2156_s15, 6 }
  0x4c   : > { %848 = vrot.lane.b32.xlu0 %v1500_v49, %s1691_s10  ;;  %v587_v7 = vsel %vm1780_vm2, %v582_v57, %v586_v63  ;;  %v666_v8 = vrot.slane %v664_v0, 5  ;;  %v672_v9 = vrot.slane %v670_v1, 5  ;;  %v1497_v10 = vcombine.low %v1967_v39, %v1465_v48  ;;  %s2079_s29 = scalar_lea.vmem %s2146_s2, %s1532_s26 }
  0x4d   : > { %v463_v15 = vsel %vm1780_vm2, %v458_v54, %v462_v50  ;;  %v1501_v16 = vcombine.low %v577_v62, %v587_v7  ;;  %v676_v20 = vrot.slane %v674_v5, 4  ;;  %v417_v22 = vshrl.u32 %v1978_v2, 16 }
  0x4e   : > { %v1489_v19 = vcombine.low %v453_v4, %v463_v15  ;;  %v420_v27 = vshll.u32 %v1978_v2, 16  ;;  %v426_v59 = vshll.u32 %v1983_v60, 16  ;;  %v430_v28 = vshrl.u32 %v1983_v60, 16 }
  0x4f   : > { %v419_v31 = vrot.slane %v417_v22, 4  ;;  %v436_v11 = vshll.u32 %v267_v13, 16  ;;  %v667_v12 = vor.u32 %v666_v8, %v663_v55  ;;  %v677_v32 = vor.u32 %v676_v20, %v672_v9 }
  0x50   : > { %762 = vrot.lane.b32.xlu1 %v1489_v19, %s1692_s19  ;;  %850 = vrot.lane.b32.xlu0 %v1501_v16, %s1691_s10  ;;  %v422_v33 = vrot.slane %v420_v27, 5  ;;  %v428_v23 = vrot.slane %v426_v59, 5  ;;  %v432_v34 = vrot.slane %v430_v28, 4  ;;  %v680_v35 = vshll.u32 %v1473_v25, 16 }
  0x51   : > { %v438_v36 = vrot.slane %v436_v11, 5  ;;  %v668_v39 = vrot.slane %v667_v12, 4  ;;  %v678_v42 = vrot.slane %v677_v32, 4  ;;  %v637_v44 = vshrl.u32 %v1462_v29, 16 }
  0x52   : > { %v423_v45 = vor.u32 %v422_v33, %v419_v31  ;;  %v433_v18 = vor.u32 %v432_v34, %v428_v23  ;;  %v682_v48 = vrot.slane %v680_v35, 5  ;;  %v640_v49 = vshll.u32 %v1462_v29, 16 }
  0x53   : > { %v673_v50 = vsel %vm1780_vm2, %v668_v39, %v672_v9  ;;  %v639_v51 = vrot.slane %v637_v44, 4  ;;  %v646_v40 = vshll.u32 %v1463_v38, 16  ;;  %v650_v53 = vshrl.u32 %v1463_v38, 16 }
  0x54   : > { %818 = vrot.lane.b32.xlu1 %v1497_v10, %s1690_s5  ;;  %v424_v57 = vrot.slane %v423_v45, 4  ;;  %v434_v58 = vrot.slane %v433_v18, 4  ;;  %v683_v62 = vsel %vm1780_vm2, %v678_v42, %v682_v48  ;;  %v642_v63 = vrot.slane %v640_v49, 5 }
  0x55   : > { %v1505_v0 = vcombine.low %v673_v50, %v683_v62  ;;  %v648_v1 = vrot.slane %v646_v40, 5  ;;  %v652_v4 = vrot.slane %v650_v53, 4  ;;  %v656_v7 = vshll.u32 %v1472_v56, 16 }
  0x56   : > { %v429_v54 = vsel %vm1780_vm2, %v424_v57, %v428_v23  ;;  %v439_v55 = vsel %vm1780_vm2, %v434_v58, %v438_v36  ;;  %v643_v5 = vor.u32 %v642_v63, %v639_v51  ;;  %v1474_v10 = vcombine.low %v1766_v21, %v1769_v26 }
  0x57   : > { %v1488_v8 = vcombine.low %v429_v54, %v439_v55  ;;  %v653_v9 = vor.u32 %v652_v4, %v648_v1  ;;  %v658_v15 = vrot.slane %v656_v7, 5  ;;  %v1478_v16 = vcombine.low %v1786_v41, %v1794_v47 }
  0x58   : > { %858 = vrot.lane.b32.xlu1 %v1505_v0, %s1691_s10  ;;  %v644_v13 = vrot.slane %v643_v5, 4  ;;  %v1475_v20 = vcombine.low %v1806_v61, %v1812_v3  ;;  %v1496_v22 = vcombine.low %v1462_v29, %v1463_v38  ;;  %v1479_v19 = vcombine.low %v1827_v24, %v1832_v30 }
  0x59   : > { %760 = vrot.lane.b32.xlu0 %v1488_v8, %s1692_s19  ;;  %v654_v25 = vrot.slane %v653_v9, 4  ;;  %v1476_v26 = vcombine.low %v1867_v43, %v1875_v14  ;;  %v1477_v27 = vcombine.low %v1898_v46, %v1902_v52  ;;  %v1481_v41 = vcombine.low %v1946_v6, %v1952_v17 }
  0x5a   : > { %v649_v21 = vsel %vm1780_vm2, %v644_v13, %v648_v1  ;;  %v1480_v61 = vcombine.low %v1978_v2, %v1983_v60  ;;  %v1693_v9 = vmov 0.0  }
  0x5b   : > { %v659_v47 = vsel %vm1780_vm2, %v654_v25, %v658_v15  ;;  %1093 = vst.msk [vmem:[%s2063_s22] sm:$0x1] %vm1092_vm6, %v1693_v9  ;;  %1094 = vst.msk [vmem:[%s2069_s25] sm:$0x1] %vm1092_vm6, %v1693_v9 }
  0x5c   : > { %v1504_v3 = vcombine.low %v649_v21, %v659_v47 }
  0x5d   : > { %816 = vrot.lane.b32.xlu0 %v1496_v22, %s1690_s5 }
  0x61   : > { %856 = vrot.lane.b32.xlu0 %v1504_v3, %s1691_s10 }
  0x87   : > { %v805_v24 = vpop.permute.xlu1 %804 }
  0x8b   : > { %v807_v30 = vpop.permute.xlu1 %806 }
  0x92   : > { %v847_v43 = vpop.permute.xlu1 %846 }
  0x98   : > { %v749_v14 = vpop.permute.xlu0 %748 }
  0x99   : > { %v863_v6 = vsel %vm860_vm3, %v1474_v10, %v749_v14 }
  0x9a   : > { %v887_v60 = vsel %vm885_vm4, %v863_v6, %v805_v24 }
  0x9c   : > { %v757_v46 = vpop.permute.xlu1 %756 }
  0x9d   : > { %v875_v32 = vsel %vm860_vm3, %v1478_v16, %v757_v46 }
  0x9f   : > { %v751_v52 = vpop.permute.xlu0 %750 }
  0xa0   : > { %v866_v37 = vsel %vm860_vm3, %v1475_v20, %v751_v52 }
  0xa1   : > { %v889_v17 = vsel %vm885_vm4, %v866_v37, %v807_v30 }
  0xa2   : > { %v907_v29 = vsel %vm902_vm5, %v889_v17, %v847_v43 }
  0xa3   : > { %v845_v2 = vpop.permute.xlu0 %844 }
  0xa4   : > { %v759_v59 = vpop.permute.xlu1 %758  ;;  %v904_v28 = vsel %vm902_vm5, %v887_v60, %v845_v2 }
  0xa5   : > { %1581 = vmatprep.mubr.bf16.mxu0 %v904_v28  ;;  %v878_v38 = vsel %vm860_vm3, %v1479_v19, %v759_v59 }
  0xa6   : > { %1582 = vmatmul.mubr.bf16.vlgmr.msra.gmra.mrb[0].mxu0 %v907_v29 }
  0xa8   : > { %v813_v31 = vpop.permute.xlu1 %812 }
  0xa9   : > { %v895_v33 = vsel %vm885_vm4, %v875_v32, %v813_v31 }
  0xac   : > { %v753_v11 = vpop.permute.xlu0 %752  ;;  %v815_v12 = vpop.permute.xlu1 %814 }
  0xad   : > { %v897_v39 = vsel %vm885_vm4, %v878_v38, %v815_v12  ;;  %v869_v18 = vsel %vm860_vm3, %v1476_v26, %v753_v11 }
  0xb2   : > { %v755_v23 = vpop.permute.xlu0 %754  ;;  %v853_v34 = vpop.permute.xlu1 %852 }
  0xb3   : > { %v916_v35 = vsel %vm902_vm5, %v895_v33, %v853_v34  ;;  %v872_v51 = vsel %vm860_vm3, %v1477_v27, %v755_v23 }
  0xb4   : > { %1589 = vmatprep.mubr.bf16.mxu1 %v916_v35 }
  0xb6   : > { %v809_v36 = vpop.permute.xlu0 %808 }
  0xb7   : > { %v891_v48 = vsel %vm885_vm4, %v869_v18, %v809_v36 }
  0xb8   : > { %v855_v42 = vpop.permute.xlu1 %854 }
  0xb9   : > { %v919_v44 = vsel %vm902_vm5, %v897_v39, %v855_v42 }
  0xba   : > { %v811_v45 = vpop.permute.xlu0 %810  ;;  %1590 = vmatmul.mubr.bf16.vlgmr.msra.gmra.mrb[0].mxu1 %v919_v44 }
  0xbb   : > { %v893_v40 = vsel %vm885_vm4, %v872_v51, %v811_v45 }
  0xbe   : > { %v849_v49 = vpop.permute.xlu0 %848 }
  0xbf   : > { %v910_v50 = vsel %vm902_vm5, %v891_v48, %v849_v49 }
  0xc0   : > { %1585 = vmatprep.mubr.bf16.mxu0 %v910_v50 }
  0xc2   : > { %v851_v53 = vpop.permute.xlu0 %850  ;;  %v763_v57 = vpop.permute.xlu1 %762 }
  0xc3   : > { %v913_v56 = vsel %vm902_vm5, %v893_v40, %v851_v53  ;;  %v884_v63 = vsel %vm860_vm3, %v1481_v41, %v763_v57 }
  0xc4   : > { %1586 = vmatmul.mubr.bf16.gmra.mrb[4].mxu0 %v913_v56 }
  0xc6   : > { %v819_v62 = vpop.permute.xlu1 %818 }
  0xc7   : > { %v901_v1 = vsel %vm885_vm4, %v884_v63, %v819_v62 }
  0xca   : > { %v859_v54 = vpop.permute.xlu1 %858 }
  0xcb   : > { %v761_v58 = vpop.permute.xlu0 %760  ;;  %v925_v8 = vsel %vm902_vm5, %v901_v1, %v859_v54 }
  0xcc   : > { %v881_v4 = vsel %vm860_vm3, %v1480_v61, %v761_v58 }
  0xcf   : > { %v817_v0 = vpop.permute.xlu0 %816 }
  0xd0   : > { %v899_v55 = vsel %vm885_vm4, %v881_v4, %v817_v0 }
  0xd3   : > { %v857_v5 = vpop.permute.xlu0 %856 }
  0xd4   : > { %v922_v7 = vsel %vm902_vm5, %v899_v55, %v857_v5 }
  0xd5   : > { %1593 = vmatprep.mubr.bf16.mxu1 %v922_v7 }
  0xd6   : > { %1594 = vmatmul.mubr.bf16.gmra.mrb[4].mxu1 %v925_v8 }
 0x179   : > { %v1583_v10 = vpop.f32.mrb[0].mxu0 }
 0x17a   : > { %v1125_v13 = vsel %vm1121_vm7, %v1583_v10, 0.0  ;;  %v1165_v15 = vmul.f32 %v1583_v10, %v1583_v10  ;;  %v1535_v16 = vpack.c.bf16 %v1583_v10, %v1583_v10  ;;  %v1025_v20 = vpop.f32.mrb[1].mxu0 }
 0x17b   : > { %v1122_v22 = vsel %vm1121_vm7, %v1025_v20, 0.0  ;;  %v1163_v25 = vmul.f32 %v1025_v20, %v1025_v20  ;;  %v1533_v19 = vpack.c.bf16 %v1025_v20, %v1025_v20  ;;  %v1584_v21 = vpop.f32.mrb[2].mxu0 }
 0x17c   : > { %v1182_v26 = vsel %vm1121_vm7, %v1165_v15, 0.0  ;;  %1285 = vst.msk [vmem:[%s2079_s29 + $0x8] sm:$0xf] %vm1282_vm8, %v1535_v16  ;;  %v1126_v27 = vadd.f32 %v1125_v13, %v1122_v22  ;;  %v1536_v41 = vpack.c.bf16 %v1584_v21, %v1584_v21  ;;  %v1028_v47 = vpop.f32.mrb[3].mxu0 }
 0x17d   : > { %v1179_v61 = vsel %vm1121_vm7, %v1163_v25, 0.0  ;;  %1283 = vst.msk [vmem:[%s2079_s29] sm:$0xf] %vm1282_vm8, %v1533_v19  ;;  %v1534_v3 = vpack.c.bf16 %v1028_v47, %v1028_v47 }
 0x17e   : > { %v1183_v24 = vadd.f32 %v1182_v26, %v1179_v61  ;;  %1286 = vst.msk [vmem:[%s2079_s29 + $0xc] sm:$0xf] %vm1282_vm8, %v1536_v41 }
 0x17f   : > { %1284 = vst.msk [vmem:[%s2079_s29 + $0x4] sm:$0xf] %vm1282_vm8, %v1534_v3 }
 0x18d   : > { %v1591_v30 = vpop.f32.mrb[0].mxu1 }
 0x18e   : > { %v1543_v43 = vpack.c.bf16 %v1591_v30, %v1591_v30  ;;  %v1057_v14 = vpop.f32.mrb[1].mxu1  ;;  %v1173_v44 = vmul.f32 %v1591_v30, %v1591_v30  ;;  %v1141_v50 = vsel %vm1121_vm7, %v1591_v30, 0.0 }
 0x18f   : > { %v1541_v46 = vpack.c.bf16 %v1057_v14, %v1057_v14  ;;  %v1592_v52 = vpop.f32.mrb[2].mxu1  ;;  %v1171_v34 = vmul.f32 %v1057_v14, %v1057_v14  ;;  %v1137_v45 = vsel %vm1121_vm7, %v1057_v14, 0.0  ;;  %v1162_v14 = vld [vmem:[%s2069_s25] sm:$0x1] }
 0x190   : > { %1293 = vst.msk [vmem:[%s2079_s29 + $0x28] sm:$0xf] %vm1282_vm8, %v1543_v43  ;;  %v1544_v6 = vpack.c.bf16 %v1592_v52, %v1592_v52  ;;  %v1060_v37 = vpop.f32.mrb[3].mxu1  ;;  %v1198_v56 = vsel %vm1121_vm7, %v1173_v44, 0.0 }
 0x191   : > { %1291 = vst.msk [vmem:[%s2079_s29 + $0x20] sm:$0xf] %vm1282_vm8, %v1541_v46  ;;  %v1542_v17 = vpack.c.bf16 %v1060_v37, %v1060_v37  ;;  %v1194_v51 = vsel %vm1121_vm7, %v1171_v34, 0.0 }
 0x192   : > { %1294 = vst.msk [vmem:[%s2079_s29 + $0x2c] sm:$0xf] %vm1282_vm8, %v1544_v6 }
 0x193   : > { %1292 = vst.msk [vmem:[%s2079_s29 + $0x24] sm:$0xf] %vm1282_vm8, %v1542_v17 }
 0x197   : > { %v1587_v2 = vpop.f32.mrb[4].mxu0 }
 0x198   : > { %v1539_v60 = vpack.c.bf16 %v1587_v2, %v1587_v2  ;;  %v1041_v59 = vpop.f32.mrb[5].mxu0  ;;  %v1169_v28 = vmul.f32 %v1587_v2, %v1587_v2  ;;  %v1133_v35 = vsel %vm1121_vm7, %v1587_v2, 0.0 }
 0x199   : > { %v1129_v29 = vsel %vm1121_vm7, %v1041_v59, 0.0  ;;  %v1167_v31 = vmul.f32 %v1041_v59, %v1041_v59  ;;  %v1537_v11 = vpack.c.bf16 %v1041_v59, %v1041_v59  ;;  %v1588_v12 = vpop.f32.mrb[6].mxu0 }
 0x19a   : > { %1289 = vst.msk [vmem:[%s2079_s29 + $0x18] sm:$0xf] %vm1282_vm8, %v1539_v60  ;;  %v1130_v32 = vadd.f32 %v1129_v29, %v1126_v27  ;;  %v1540_v33 = vpack.c.bf16 %v1588_v12, %v1588_v12  ;;  %v1044_v23 = vpop.f32.mrb[7].mxu0  ;;  %v1190_v18 = vsel %vm1121_vm7, %v1169_v28, 0.0 }
 0x19b   : > { %v1186_v38 = vsel %vm1121_vm7, %v1167_v31, 0.0  ;;  %1287 = vst.msk [vmem:[%s2079_s29 + $0x10] sm:$0xf] %vm1282_vm8, %v1537_v11  ;;  %v1538_v36 = vpack.c.bf16 %v1044_v23, %v1044_v23 }
 0x19c   : > { %v1134_v39 = vadd.f32 %v1133_v35, %v1130_v32  ;;  %v1187_v42 = vadd.f32 %v1186_v38, %v1183_v24  ;;  %1290 = vst.msk [vmem:[%s2079_s29 + $0x1c] sm:$0xf] %vm1282_vm8, %v1540_v33  ;;  %v1120_v24 = vld [vmem:[%s2063_s22] sm:$0x1] }
 0x19d   : > { %1288 = vst.msk [vmem:[%s2079_s29 + $0x14] sm:$0xf] %vm1282_vm8, %v1538_v36 }
 0x19e   : > { %v1191_v48 = vadd.f32 %v1190_v18, %v1187_v42  ;;  %v1138_v49 = vadd.f32 %v1137_v45, %v1134_v39 }
 0x1a0   : > { %v1142_v40 = vadd.f32 %v1141_v50, %v1138_v49  ;;  %v1195_v53 = vadd.f32 %v1194_v51, %v1191_v48 }
 0x1a2   : > { %v1199_v57 = vadd.f32 %v1198_v56, %v1195_v53 }
 0x1a9   : > { %v1595_v58 = vpop.f32.mrb[4].mxu1 }
 0x1aa   : > { %v1547_v62 = vpack.c.bf16 %v1595_v58, %v1595_v58  ;;  %v1073_v63 = vpop.f32.mrb[5].mxu1  ;;  %v1177_v0 = vmul.f32 %v1595_v58, %v1595_v58  ;;  %v1149_v9 = vsel %vm1121_vm7, %v1595_v58, 0.0 }
 0x1ab   : > { %v1145_v1 = vsel %vm1121_vm7, %v1073_v63, 0.0  ;;  %v1175_v4 = vmul.f32 %v1073_v63, %v1073_v63  ;;  %v1545_v54 = vpack.c.bf16 %v1073_v63, %v1073_v63  ;;  %v1596_v55 = vpop.f32.mrb[6].mxu1 }
 0x1ac   : > { %1297 = vst.msk [vmem:[%s2079_s29 + $0x38] sm:$0xf] %vm1282_vm8, %v1547_v62  ;;  %v1146_v5 = vadd.f32 %v1145_v1, %v1142_v40  ;;  %v1548_v7 = vpack.c.bf16 %v1596_v55, %v1596_v55  ;;  %v1076_v8 = vpop.f32.mrb[7].mxu1  ;;  %v1206_v20 = vsel %vm1121_vm7, %v1177_v0, 0.0 }
 0x1ad   : > { %v1202_v10 = vsel %vm1121_vm7, %v1175_v4, 0.0  ;;  %1295 = vst.msk [vmem:[%s2079_s29 + $0x30] sm:$0xf] %vm1282_vm8, %v1545_v54  ;;  %v1546_v13 = vpack.c.bf16 %v1076_v8, %v1076_v8 }
 0x1ae   : > { %v1150_v15 = vadd.f32 %v1149_v9, %v1146_v5  ;;  %v1203_v16 = vadd.f32 %v1202_v10, %v1199_v57  ;;  %1298 = vst.msk [vmem:[%s2079_s29 + $0x3c] sm:$0xf] %vm1282_vm8, %v1548_v7 }
 0x1af   : > { %1296 = vst.msk [vmem:[%s2079_s29 + $0x34] sm:$0xf] %vm1282_vm8, %v1546_v13 }
 0x1b0   : > { %v1153_v22 = vrot.slane %v1150_v15, 4  ;;  %v1207_v25 = vadd.f32 %v1206_v20, %v1203_v16 }
 0x1b2   : > { %v1154_v19 = vadd.f32 %v1153_v22, %v1150_v15  ;;  %v1210_v21 = vrot.slane %v1207_v25, 4 }
 0x1b4   : > { %v1155_v26 = vrot.slane %v1154_v19, 2  ;;  %v1211_v27 = vadd.f32 %v1210_v21, %v1207_v25 }
 0x1b6   : > { %v1156_v41 = vadd.f32 %v1155_v26, %v1154_v19  ;;  %v1212_v47 = vrot.slane %v1211_v27, 2 }
 0x1b8   : > { %v1157_v61 = vrot.slane %v1156_v41, 1  ;;  %v1213_v3 = vadd.f32 %v1212_v47, %v1211_v27 }
 0x1ba   : > { %v1158_v30 = vadd.f32 %v1157_v61, %v1156_v41  ;;  %v1214_v43 = vrot.slane %v1213_v3, 1 }
 0x1bc   : > { %v1159_v46 = vadd.f32 %v1158_v30, %v1120_v24  ;;  %v1215_v52 = vadd.f32 %v1214_v43, %v1213_v3 }
 0x1be   : > { %1161 = vst.msk [vmem:[%s2063_s22] sm:$0x1] %vm1092_vm6, %v1159_v46  ;;  %v1216_v6 = vadd.f32 %v1215_v52, %v1162_v14 }
 0x1c0   : > { %1217 = vst.msk [vmem:[%s2069_s25] sm:$0x1] %vm1092_vm6, %v1216_v6 }
 0x1c1 PF: > { %s15_s17 = sadd.s32 1, %s1688_s17   ;;  %s2151_s15 = smov %s1684_s16 }
 0x1c2   : > { %p12_p5 = scmp.ge.s32.totalorder %s15_s17, 4   ;;  %s2152_s16 = smov %s2154_s18 }
 0x1c4   :  { %14 = sbr.rel (!%p12_p5) target bundleno = 2 (0x2), region = 88 }

// kernel: patchdis_forward.7
= control target key start
LH: loop header
LB: loop body
LE: loop exit
PB: predicated region body
PF: predicated region fallthrough
CT: control target
= control target key end

     0   :  { %s1567_s21 = smov 0   ;;  %s1569_s22 = smov 0   ;;  %s1963_s0 = inlined_call_operand.vmem [shape: bf16[2,5,17,64], index: 0, kind: input, shape index: {}]   ;;  %s1964_s1 = inlined_call_operand.vmem [shape: bf16[256,32], index: 1, kind: input, shape index: {}]   ;;  %s1965_s2 = inlined_call_operand.vmem [shape: f32[1,64], index: 2, kind: input, shape index: {}]   ;;  %s1966_s3 = inlined_call_operand.vmem [shape: f32[1,64], index: 3, kind: input, shape index: {}]   ;;  %s1967_s4 = inlined_call_operand.vmem [shape: bf16[2,4,16,32], index: 4, kind: output, shape index: {0}]   ;;  %s1968_s5 = inlined_call_operand.vmem [shape: f32[2,1,32], index: 5, kind: output, shape index: {1}]   ;;  %s1969_s6 = inlined_call_operand.vmem [shape: f32[2,1,32], index: 6, kind: output, shape index: {2}]  }
   0x1   :  { %s1571_s23 = smov 0  }
   0x2 LB: > { %s29_s24 = sadd.s32 1, %s1524_s22  ;;  %p1304_p0 = scmp.ge.s32.totalorder %s1528_s23, 1  ;;  %s1528_s23 = sphi %s1571_s23, %s17_s23   ;;  %s1524_s22 = sphi %s1569_s22, %s1975_s22   ;;  %s1520_s21 = sphi %s1567_s21, %s1974_s21  }
   0x3   : > { %p31_p1 = scmp.ge.s32.totalorder %s29_s24, 2  ;;  %p231_p2 = scmp.lt.s32.totalorder %s1528_s23, 3 }
   0x5   : > { %s1977_s24 = smov (%p31_p1, %s29_s24), 0  ;;  %p232_p3 = pnand %p1304_p0, %p231_p2 }
   0x6   : > { %p272_p4 = scmp.lt.s32.totalorder (!%p232_p3), %s1520_s21, 1  ;;  %v1488_v0 = vld [vmem:[%s1964_s1 + $0x40] sm:$0xff] (!%p232_p3)   ;;  %vm486_vm0 = vcmask (!%p232_p3), 516096   ;;  %vm487_vm1 = vsmask.f32 (!%p232_p3), 256  ;;  %vm483_vm2 = vcmask (!%p232_p3), 519168  }
   0x7   : > { %235 = sbr.rel (%p232_p3) target bundleno = 446 (0x1be), region = 36  ;;  %1405 = vmatprep.subr.bf16.mxu0 (!%p232_p3), %v1488_v0  ;;  %1445 = vmatprep.subr.bf16.mxu1 (!%p232_p3), %v1488_v0  ;;  %v1489_v1 = vld [vmem:[%s1964_s1] sm:$0xff] (!%p232_p3)   ;;  %v1490_v22 = vld [vmem:[%s1964_s1 + $0x48] sm:$0xff] (!%p232_p3)   ;;  %v1492_v32 = vld [vmem:[%s1964_s1 + $0x50] sm:$0xff] (!%p232_p3)   ;;  %vm524_vm10 = vsmask.f32 (!%p232_p3), 3328 }
   0x8   : > { %v1597_v2 = vld [vmem:[%s1965_s2] ss:$0 sm:$0xff] (!%p232_p3)  ;;  %1406 = vmatpush3.bf16.msra.mxu0 (!%p232_p3), %v1489_v1  ;;  %1453 = vmatpush3.bf16.msra.mxu1 (!%p232_p3), %v1489_v1  ;;  %v1491_v27 = vld [vmem:[%s1964_s1 + $0x8] sm:$0xff] (!%p232_p3)   ;;  %v1493_v37 = vld [vmem:[%s1964_s1 + $0x10] sm:$0xff] (!%p232_p3)   ;;  %vm525_vm11 = vsmask.f32 (!%p232_p3), 7440 }
   0x9   : > { %v1613_v13 = vld [vmem:[%s1966_s3] ss:$0 sm:$0xff] (!%p232_p3)  ;;  %1407 = vmatprep.subr.bf16.mxu0 (!%p232_p3), %v1490_v22  ;;  %1446 = vmatprep.subr.bf16.mxu1 (!%p232_p3), %v1490_v22  ;;  %v1494_v39 = vld [vmem:[%s1964_s1 + $0x58] sm:$0xff] (!%p232_p3)   ;;  %v494_v42 = vld [vmem:[#allocation2 + $0x14] sm:$0x1] (!%p232_p3)  ;;  %s1530_s25 = smov (!%p232_p3), 64  }
   0xa   : > { %v1495_v47 = vld [vmem:[%s1964_s1 + $0x18] sm:$0xff] (!%p232_p3)   ;;  %vm1653_vm9 = vmand (!%p232_p3), %vm486_vm0, %vm487_vm1  ;;  %v504_v53 = vld [vmem:[#allocation2 + $0x2c] sm:$0x1] (!%p232_p3) }
   0xb   : > { %v1496_v63 = vld [vmem:[%s1964_s1 + $0x60] sm:$0xff] (!%p232_p3)   ;;  %vm1741_vm0 = vmor (!%p232_p3), %vm524_vm10, %vm525_vm11  ;;  %vm1063_vm10 = vcmask (!%p232_p3), 261120  }
   0xc   : > { %1408 = vmatpush3.bf16.msra.mxu0 (!%p232_p3), %v1491_v27  ;;  %1454 = vmatpush3.bf16.msra.mxu1 (!%p232_p3), %v1491_v27 }
   0xd   : > { %1409 = vmatprep.subr.bf16.mxu0 (!%p232_p3), %v1492_v32  ;;  %1447 = vmatprep.subr.bf16.mxu1 (!%p232_p3), %v1492_v32  ;;  %v1499_v32 = vld [vmem:[%s1964_s1 + $0x28] sm:$0xff] (!%p232_p3)  }
   0xe   : > { %s1979_s21 = smov (!%p272_p4, %s1520_s21), 1 }
   0xf   : > { %s1461_s27 = smul.u32 60, %s1979_s21  ;;  %s1902_s28 = scalar_lea.vmem %s1968_s5, %s1979_s21 }
  0x10   : > { %1410 = vmatpush3.bf16.msra.mxu0 %v1493_v37  ;;  %1455 = vmatpush3.bf16.msra.mxu1 %v1493_v37  ;;  %s1908_s7 = scalar_lea.vmem %s1969_s6, %s1979_s21  ;;  %s1367_s8 = sshll.u32 %s1979_s21, 5 }
  0x11   : > { %s1602_s10 = scalar_lea.vmem %s1963_s0, %s1461_s27  ;;  %1411 = vmatprep.subr.bf16.mxu0 %v1494_v39  ;;  %1448 = vmatprep.subr.bf16.mxu1 %v1494_v39 }
  0x12   : > { %v302_v3 = vld [vmem:[%s1602_s10 + $0xc] sm:$0xff]   ;;  %v304_v4 = vld [vmem:[%s1602_s10 + $0x14] sm:$0x1]  ;;  %v308_v5 = vld [vmem:[%s1602_s10 + $0x24] sm:$0xff]  }
  0x13   : > { %v317_v6 = vunpack.c.l.bf16 %v302_v3  ;;  %v318_v7 = vunpack.c.h.bf16 %v302_v3  ;;  %v319_v8 = vunpack.c.l.bf16 %v304_v4  ;;  %v310_v9 = vld [vmem:[%s1602_s10 + $0x2c] sm:$0x1]  ;;  %v323_v10 = vunpack.c.l.bf16 %v308_v5  ;;  %v1392_v11 = vld [vmem:[%s1602_s10] sm:$0xff]   ;;  %v301_v12 = vld [vmem:[%s1602_s10 + $0x8] sm:$0x1] }
  0x14   : > { %v324_v14 = vunpack.c.h.bf16 %v308_v5  ;;  %v325_v15 = vunpack.c.l.bf16 %v310_v9  ;;  %v1393_v16 = vunpack.c.l.bf16 %v1392_v11  ;;  %v1394_v17 = vunpack.c.h.bf16 %v1392_v11  ;;  %v1403_v46 = vld [vmem:[%s1602_s10 + $0x18] sm:$0xff]   ;;  %v307_v58 = vld [vmem:[%s1602_s10 + $0x20] sm:$0x1]  ;;  %v1672_v5 = vld [vmem:[%s1602_s10 + $0x30] sm:$0xff]   ;;  %1412 = vmatpush3.bf16.msra.mxu0 %v1495_v47  ;;  %1456 = vmatpush3.bf16.msra.mxu1 %v1495_v47 }
  0x15   : > { %v339_v18 = vmul.f32 %v1597_v2, %v317_v6  ;;  %v340_v19 = vmul.f32 %v1597_v2, %v318_v7  ;;  %v341_v20 = vmul.f32 %v1597_v2, %v319_v8  ;;  %v345_v21 = vmul.f32 %v1597_v2, %v323_v10  ;;  %v1497_v9 = vld [vmem:[%s1964_s1 + $0x20] sm:$0xff]   ;;  %1413 = vmatprep.subr.bf16.mxu0 %v1496_v63 }
  0x16   : > { %v346_v23 = vmul.f32 %v1597_v2, %v324_v14  ;;  %v347_v24 = vmul.f32 %v1597_v2, %v325_v15  ;;  %v316_v25 = vunpack.c.l.bf16 %v301_v12  ;;  %v336_v26 = vmul.f32 %v1393_v16, %v1597_v2  ;;  %v1682_v12 = vld [vmem:[%s1602_s10 + $0x38] sm:$0x1]  ;;  %1449 = vmatprep.subr.bf16.mxu1 %v1496_v63  ;;  %s1918_s10 = scalar_lea.vmem %s1967_s4, %s1367_s8 }
  0x17   : > { %v361_v28 = vadd.f32 %v1613_v13, %v339_v18  ;;  %v362_v29 = vadd.f32 %v1613_v13, %v340_v19  ;;  %v363_v30 = vadd.f32 %v1613_v13, %v341_v20  ;;  %v367_v31 = vadd.f32 %v1613_v13, %v345_v21  ;;  %v1498_v18 = vld [vmem:[%s1964_s1 + $0x68] sm:$0xff]  }
  0x18   : > { %v368_v33 = vadd.f32 %v1613_v13, %v346_v23  ;;  %v369_v34 = vadd.f32 %v1613_v13, %v347_v24  ;;  %v337_v35 = vmul.f32 %v1394_v17, %v1597_v2  ;;  %v338_v36 = vmul.f32 %v1597_v2, %v316_v25  ;;  %v489_v25 = vld [vmem:[#allocation2 + $0x8] sm:$0x1]  ;;  %1414 = vmatpush3.bf16.msra.mxu0 %v1497_v9 }
  0x19   : > { %vm376_vm3 = vcmp.ge.f32.partialorder %v361_v28, 0.0  ;;  %vm377_vm4 = vcmp.ge.f32.partialorder %v362_v29, 0.0  ;;  %vm378_vm5 = vcmp.ge.f32.partialorder %v363_v30, 0.0  ;;  %v391_v38 = vmul.f32 0.2, %v361_v28  ;;  %1457 = vmatpush3.bf16.msra.mxu1 %v1497_v9  ;;  %1415 = vmatprep.subr.bf16.mxu0 %v1498_v18 }
  0x1a   : > { %v392_v40 = vmul.f32 0.2, %v362_v29  ;;  %v393_v41 = vmul.f32 0.2, %v363_v30  ;;  %vm382_vm6 = vcmp.ge.f32.partialorder %v367_v31, 0.0  ;;  %vm383_vm7 = vcmp.ge.f32.partialorder %v368_v33, 0.0  ;;  %1450 = vmatprep.subr.bf16.mxu1 %v1498_v18 }
  0x1b   : > { %v406_v43 = vsel %vm376_vm3, %v361_v28, %v391_v38  ;;  %vm384_vm8 = vcmp.ge.f32.partialorder %v369_v34, 0.0  ;;  %v397_v44 = vmul.f32 0.2, %v367_v31  ;;  %v398_v45 = vmul.f32 0.2, %v368_v33  ;;  %v1500_v38 = vld [vmem:[%s1964_s1 + $0x70] sm:$0xff]  }
  0x1c   : > { %v407_v48 = vsel %vm377_vm4, %v362_v29, %v392_v40  ;;  %v408_v49 = vsel %vm378_vm5, %v363_v30, %v393_v41  ;;  %v1371_v50 = vpack.c.bf16 %v406_v43, %v406_v43  ;;  %v399_v52 = vmul.f32 0.2, %v369_v34  ;;  %1416 = vmatpush3.bf16.msra.mxu0 %v1499_v32 }
  0x1d   : > { %v1372_v54 = vpack.c.bf16 %v407_v48, %v407_v48  ;;  %v1373_v55 = vpack.c.bf16 %v408_v49, %v408_v49  ;;  %v412_v56 = vsel %vm382_vm6, %v367_v31, %v397_v44  ;;  %v413_v57 = vsel %vm383_vm7, %v368_v33, %v398_v45  ;;  %v1501_v45 = vld [vmem:[%s1964_s1 + $0x30] sm:$0xff]   ;;  %1458 = vmatpush3.bf16.msra.mxu1 %v1499_v32 }
  0x1e   : > { %492 = vst.msk [vmem:[#allocation2 + $0xc] sm:$0xf] %vm483_vm2, %v1371_v50  ;;  %v414_v59 = vsel %vm384_vm8, %v369_v34, %v399_v52  ;;  %v1377_v60 = vpack.c.bf16 %v412_v56, %v412_v56  ;;  %v1378_v61 = vpack.c.bf16 %v413_v57, %v413_v57  ;;  %v358_v62 = vadd.f32 %v1613_v13, %v336_v26 }
  0x1f   : > { %493 = vst.msk [vmem:[#allocation2 + $0x10] sm:$0xf] %vm483_vm2, %v1372_v54  ;;  %v495_v0 = vsel %vm1653_vm9, %v1373_v55, %v494_v42  ;;  %v1379_v1 = vpack.c.bf16 %v414_v59, %v414_v59  ;;  %v359_v3 = vadd.f32 %v1613_v13, %v337_v35  ;;  %v360_v4 = vadd.f32 %v1613_v13, %v338_v36 }
  0x20   : > { %496 = vst [vmem:[#allocation2 + $0x14] sm:$0x1] %v495_v0  ;;  %502 = vst.msk [vmem:[#allocation2 + $0x24] sm:$0xf] %vm483_vm2, %v1377_v60  ;;  %vm373_vm12 = vcmp.ge.f32.partialorder %v358_v62, 0.0  ;;  %v1397_v7 = vunpack.c.l.bf16 %v1403_v46  ;;  %v1398_v8 = vunpack.c.h.bf16 %v1403_v46  ;;  %v322_v16 = vunpack.c.l.bf16 %v307_v58  ;;  %1417 = vmatprep.subr.bf16.mxu0 %v1500_v38  ;;  %1451 = vmatprep.subr.bf16.mxu1 %v1500_v38 }
  0x21   : > { %503 = vst.msk [vmem:[#allocation2 + $0x28] sm:$0xf] %vm483_vm2, %v1378_v61  ;;  %v388_v6 = vmul.f32 0.2, %v358_v62  ;;  %v505_v10 = vsel %vm1653_vm9, %v1379_v1, %v504_v53  ;;  %vm374_vm13 = vcmp.ge.f32.partialorder %v359_v3, 0.0  ;;  %vm375_vm14 = vcmp.ge.f32.partialorder %v360_v4, 0.0  ;;  %1418 = vmatpush3.bf16.msra.mxu0 %v1501_v45  ;;  %1459 = vmatpush3.bf16.msra.mxu1 %v1501_v45 }
  0x22   : > { %v389_v11 = vmul.f32 0.2, %v359_v3  ;;  %506 = vst [vmem:[#allocation2 + $0x2c] sm:$0x1] %v505_v10  ;;  %v390_v14 = vmul.f32 0.2, %v360_v4  ;;  %v342_v17 = vmul.f32 %v1397_v7, %v1597_v2  ;;  %v343_v21 = vmul.f32 %v1398_v8, %v1597_v2 }
  0x23   : > { %v403_v15 = vsel %vm373_vm12, %v358_v62, %v388_v6  ;;  %v1401_v22 = vunpack.c.l.bf16 %v1672_v5  ;;  %v344_v26 = vmul.f32 %v1597_v2, %v322_v16  ;;  %v1402_v31 = vunpack.c.h.bf16 %v1672_v5  ;;  %v1502_v61 = vld [vmem:[%s1964_s1 + $0x78] sm:$0xff]  }
  0x24   : > { %v404_v19 = vsel %vm374_vm13, %v359_v3, %v389_v11  ;;  %v1368_v20 = vpack.c.bf16 %v403_v15, %v403_v15  ;;  %v405_v23 = vsel %vm375_vm14, %v360_v4, %v390_v14  ;;  %v1693_v27 = vadd.f32 %v1613_v13, %v342_v17  ;;  %v1503_v15 = vld [vmem:[%s1964_s1 + $0x38] sm:$0xff]   ;;  %1419 = vmatprep.subr.bf16.mxu0 %v1502_v61 }
  0x25   : > { %v1369_v24 = vpack.c.bf16 %v404_v19, %v404_v19  ;;  %v1695_v28 = vld [vmem:[#allocation2 + $0xc] sm:$0xf]  ;;  %v1370_v29 = vpack.c.bf16 %v405_v23, %v405_v23  ;;  %v1699_v30 = vadd.f32 %v1613_v13, %v343_v21  ;;  %v1711_v36 = vadd.f32 %v1613_v13, %v344_v26  ;;  %1452 = vmatprep.subr.bf16.mxu1 %v1502_v61 }
  0x26   : > { %484 = vst.msk [vmem:[#allocation2] sm:$0xf] %vm483_vm2, %v1368_v20  ;;  %v1705_v33 = vld [vmem:[#allocation2 + $0x10] sm:$0xf]  ;;  %v637_v34 = vshrl.u32 %v1695_v28, 16  ;;  %v640_v35 = vshll.u32 %v1695_v28, 16  ;;  %v328_v37 = vunpack.c.l.bf16 %v1682_v12  ;;  %v1724_v44 = vmul.f32 %v1401_v22, %v1597_v2  ;;  %1420 = vmatpush3.bf16.msra.mxu0 %v1503_v15  ;;  %1460 = vmatpush3.bf16.msra.mxu1 %v1503_v15 }
  0x27   : > { %485 = vst.msk [vmem:[#allocation2 + $0x4] sm:$0xf] %vm483_vm2, %v1369_v24  ;;  %v632_v39 = vld [vmem:[#allocation2 + $0x14] sm:$0x1]  ;;  %v646_v40 = vshll.u32 %v1705_v33, 16  ;;  %v650_v41 = vshrl.u32 %v1705_v33, 16  ;;  %v490_v43 = vsel %vm1653_vm9, %v1370_v29, %v489_v25 }
  0x28   : > { %v1719_v42 = vld [vmem:[#allocation2 + $0x24] sm:$0xf]  ;;  %v639_v46 = vrot.slane %v637_v34, 4  ;;  %v642_v47 = vrot.slane %v640_v35, 5  ;;  %v656_v48 = vshll.u32 %v632_v39, 16  ;;  %vm379_vm15 = vcmp.ge.f32.partialorder %v1693_v27, 0.0 }
  0x29   : > { %v1729_v49 = vld [vmem:[#allocation2 + $0x28] sm:$0xf]  ;;  %v685_v50 = vshrl.u32 %v1719_v42, 16  ;;  %491 = vst [vmem:[#allocation2 + $0x8] sm:$0x1] %v490_v43  ;;  %v648_v52 = vrot.slane %v646_v40, 5 }
  0x2a   : > { %v652_v53 = vrot.slane %v650_v41, 4  ;;  %v634_v54 = vld [vmem:[#allocation2 + $0x2c] sm:$0x1]  ;;  %v688_v55 = vshll.u32 %v1719_v42, 16  ;;  %v694_v56 = vshll.u32 %v1729_v49, 16  ;;  %v643_v57 = vor.u32 %v642_v47, %v639_v46 }
  0x2b   : > { %v658_v58 = vrot.slane %v656_v48, 5  ;;  %v687_v59 = vrot.slane %v685_v50, 4  ;;  %v698_v60 = vshrl.u32 %v1729_v49, 16  ;;  %v704_v3 = vshll.u32 %v634_v54, 16  ;;  %v1770_v46 = vld [vmem:[#allocation2 + $0xc] sm:$0xf] }
  0x2c   : > { %v653_v63 = vor.u32 %v652_v53, %v648_v52  ;;  %v690_v0 = vrot.slane %v688_v55, 5  ;;  %v696_v1 = vrot.slane %v694_v56, 5  ;;  %v644_v4 = vrot.slane %v643_v57, 4  ;;  %v1775_v53 = vld [vmem:[#allocation2 + $0x10] sm:$0xf] }
  0x2d   : > { %v700_v6 = vrot.slane %v698_v60, 4  ;;  %v1745_v7 = vld [vmem:[#allocation2] sm:$0xf]  ;;  %vm380_vm1 = vcmp.ge.f32.partialorder %v1699_v30, 0.0  ;;  %vm381_vm3 = vcmp.ge.f32.partialorder %v1711_v36, 0.0  ;;  %v706_v10 = vrot.slane %v704_v3, 5 }
  0x2e   : > { %v654_v8 = vrot.slane %v653_v63, 4  ;;  %v691_v9 = vor.u32 %v690_v0, %v687_v59  ;;  %v1749_v11 = vld [vmem:[#allocation2 + $0x4] sm:$0xf]  ;;  %v528_v14 = vshrl.u32 %v1745_v7, 16  ;;  %v649_v16 = vsel %vm1741_vm0, %v644_v4, %v648_v52  ;;  %v521_v59 = vld [vmem:[#allocation2 + $0x14] sm:$0x1] }
  0x2f   : > { %v701_v17 = vor.u32 %v700_v6, %v696_v1  ;;  %v531_v18 = vshll.u32 %v1745_v7, 16  ;;  %v537_v19 = vshll.u32 %v1749_v11, 16  ;;  %v541_v24 = vshrl.u32 %v1749_v11, 16 }
  0x30   : > { %v659_v20 = vsel %vm1741_vm0, %v654_v8, %v658_v58  ;;  %v692_v21 = vrot.slane %v691_v9, 4  ;;  %v520_v22 = vld [vmem:[#allocation2 + $0x8] sm:$0x1]  ;;  %v530_v23 = vrot.slane %v528_v14, 4  ;;  %v394_v39 = vmul.f32 0.2, %v1693_v27 }
  0x31   : > { %v1337_v25 = vcombine.low %v649_v16, %v659_v20  ;;  %v702_v26 = vrot.slane %v701_v17, 4  ;;  %v533_v29 = vrot.slane %v531_v18, 5  ;;  %v539_v32 = vrot.slane %v537_v19, 5  ;;  %v499_v58 = vld [vmem:[#allocation2 + $0x20] sm:$0x1] }
  0x32   : > { %v697_v34 = vsel %vm1741_vm0, %v692_v21, %v696_v1  ;;  %v543_v35 = vrot.slane %v541_v24, 4  ;;  %v547_v38 = vshll.u32 %v520_v22, 16  ;;  %v395_v43 = vmul.f32 0.2, %v1699_v30  ;;  %v1796_v9 = vld [vmem:[#allocation2 + $0x24] sm:$0xf] }
  0x33   : > { %804 = vrot.lane.b32.xlu0 %v1337_v25, %s1530_s25  ;;  %v707_v40 = vsel %vm1741_vm0, %v702_v26, %v706_v10  ;;  %v534_v41 = vor.u32 %v533_v29, %v530_v23  ;;  %v396_v45 = vmul.f32 0.2, %v1711_v36  ;;  %v409_v52 = vsel %vm379_vm15, %v1693_v27, %v394_v39 }
  0x34   : > { %v1339_v47 = vcombine.low %v697_v34, %v707_v40  ;;  %v544_v48 = vor.u32 %v543_v35, %v539_v32  ;;  %v549_v50 = vrot.slane %v547_v38, 5  ;;  %v410_v55 = vsel %vm380_vm1, %v1699_v30, %v395_v43 }
  0x35   : > { %v535_v54 = vrot.slane %v534_v41, 4  ;;  %v411_v56 = vsel %vm381_vm3, %v1711_v36, %v396_v45  ;;  %v1374_v57 = vpack.c.bf16 %v409_v52, %v409_v52  ;;  %v1375_v61 = vpack.c.bf16 %v410_v55, %v410_v55 }
  0x36   : > { %808 = vrot.lane.b32.xlu1 %v1339_v47, %s1530_s25  ;;  %v545_v60 = vrot.slane %v544_v48, 4  ;;  %v1376_v63 = vpack.c.bf16 %v411_v56, %v411_v56  ;;  %v552_v27 = vshrl.u32 %v1770_v46, 16  ;;  %v555_v30 = vshll.u32 %v1770_v46, 16 }
  0x37   : > { %v540_v0 = vsel %vm1741_vm0, %v535_v54, %v539_v32  ;;  %497 = vst.msk [vmem:[#allocation2 + $0x18] sm:$0xf] %vm483_vm2, %v1374_v57  ;;  %v561_v1 = vshll.u32 %v1775_v53, 16  ;;  %v565_v36 = vshrl.u32 %v1775_v53, 16  ;;  %498 = vst.msk [vmem:[#allocation2 + $0x1c] sm:$0xf] %vm483_vm2, %v1375_v61  ;;  %v349_v18 = vmul.f32 %v1402_v31, %v1597_v2 }
  0x38   : > { %v550_v3 = vsel %vm1741_vm0, %v545_v60, %v549_v50  ;;  %v500_v4 = vsel %vm1653_vm9, %v1376_v63, %v499_v58  ;;  %v554_v6 = vrot.slane %v552_v27, 4  ;;  %v571_v8 = vshll.u32 %v521_v59, 16 }
  0x39   : > { %v1329_v10 = vcombine.low %v540_v0, %v550_v3  ;;  %501 = vst [vmem:[#allocation2 + $0x20] sm:$0x1] %v500_v4  ;;  %v557_v14 = vrot.slane %v555_v30, 5  ;;  %v563_v15 = vrot.slane %v561_v1, 5  ;;  %v567_v16 = vrot.slane %v565_v36, 4 }
  0x3a   : > { %v573_v17 = vrot.slane %v571_v8, 5  ;;  %v350_v19 = vmul.f32 %v1597_v2, %v328_v37  ;;  %v370_v20 = vadd.f32 %v1613_v13, %v1724_v44  ;;  %v600_v23 = vshrl.u32 %v1796_v9, 16 }
  0x3b   : > { %764 = vrot.lane.b32.xlu0 %v1329_v10, %s1530_s25  ;;  %v558_v21 = vor.u32 %v557_v14, %v554_v6  ;;  %v568_v22 = vor.u32 %v567_v16, %v563_v15  ;;  %v603_v24 = vshll.u32 %v1796_v9, 16  ;;  %v371_v25 = vadd.f32 %v1613_v13, %v349_v18  ;;  %v1838_v18 = vld [vmem:[#allocation2 + $0x28] sm:$0xf] }
  0x3c   : > { %v372_v5 = vadd.f32 %v1613_v13, %v350_v19  ;;  %vm385_vm4 = vcmp.ge.f32.partialorder %v370_v20, 0.0  ;;  %v400_v31 = vmul.f32 0.2, %v370_v20  ;;  %v1811_v2 = vrot.slane %v600_v23, 4  ;;  %v509_v23 = vld [vmem:[#allocation2 + $0x38] sm:$0x1] }
  0x3d   : > { %v559_v12 = vrot.slane %v558_v21, 4  ;;  %v569_v26 = vrot.slane %v568_v22, 4  ;;  %v1813_v37 = vrot.slane %v603_v24, 5  ;;  %vm386_vm5 = vcmp.ge.f32.partialorder %v371_v25, 0.0 }
  0x3e   : > { %v1815_v44 = vld [vmem:[#allocation2 + $0x18] sm:$0xf]  ;;  %vm387_vm6 = vcmp.ge.f32.partialorder %v372_v5, 0.0  ;;  %v415_v32 = vsel %vm385_vm4, %v370_v20, %v400_v31  ;;  %v1333_v34 = vcombine.low %v1695_v28, %v1705_v33  ;;  %v1821_v35 = vld [vmem:[#allocation2 + $0x1c] sm:$0xf]  ;;  %vm1042_vm7 = vcmask 253952  }
  0x3f   : > { %v1817_v29 = vld [vmem:[#allocation2 + $0x18] sm:$0xf]  ;;  %v576_v13 = vshrl.u32 %v1815_v44, 16  ;;  %v579_v38 = vshll.u32 %v1815_v44, 16  ;;  %v1825_v39 = vld [vmem:[#allocation2 + $0x1c] sm:$0xf]  ;;  %v564_v40 = vsel %vm1741_vm0, %v559_v12, %v563_v15  ;;  %v574_v47 = vsel %vm1741_vm0, %v569_v26, %v573_v17 }
  0x40   : > { %v522_v41 = vld [vmem:[#allocation2 + $0x20] sm:$0x1]  ;;  %v585_v43 = vshll.u32 %v1821_v35, 16  ;;  %v589_v45 = vshrl.u32 %v1821_v35, 16  ;;  %v1380_v48 = vpack.c.bf16 %v415_v32, %v415_v32  ;;  %v661_v56 = vshrl.u32 %v1817_v29, 16 }
  0x41   : > { %v578_v50 = vrot.slane %v576_v13, 4  ;;  %v581_v52 = vrot.slane %v579_v38, 5  ;;  %v595_v54 = vshll.u32 %v522_v41, 16  ;;  %v633_v55 = vld [vmem:[#allocation2 + $0x20] sm:$0x1]  ;;  %v664_v59 = vshll.u32 %v1817_v29, 16 }
  0x42   : > { %v587_v57 = vrot.slane %v585_v43, 5  ;;  %v591_v58 = vrot.slane %v589_v45, 4  ;;  %v670_v60 = vshll.u32 %v1825_v39, 16  ;;  %507 = vst.msk [vmem:[#allocation2 + $0x30] sm:$0xf] %vm483_vm2, %v1380_v48  ;;  %v663_v27 = vrot.slane %v661_v56, 4 }
  0x43   : > { %v582_v61 = vor.u32 %v581_v52, %v578_v50  ;;  %v597_v63 = vrot.slane %v595_v54, 5  ;;  %v674_v0 = vshrl.u32 %v1825_v39, 16  ;;  %v666_v1 = vrot.slane %v664_v59, 5  ;;  %v523_v32 = vld [vmem:[#allocation2 + $0x2c] sm:$0x1] }
  0x44   : > { %v592_v30 = vor.u32 %v591_v58, %v587_v57  ;;  %v672_v36 = vrot.slane %v670_v60, 5  ;;  %v680_v3 = vshll.u32 %v633_v55, 16  ;;  %v401_v8 = vmul.f32 0.2, %v371_v25 }
  0x45   : > { %v583_v4 = vrot.slane %v582_v61, 4  ;;  %v676_v6 = vrot.slane %v674_v0, 4  ;;  %v402_v10 = vmul.f32 0.2, %v372_v5  ;;  %v667_v15 = vor.u32 %v666_v1, %v663_v27 }
  0x46   : > { %v593_v14 = vrot.slane %v592_v30, 4  ;;  %v682_v16 = vrot.slane %v680_v3, 5  ;;  %v1330_v17 = vcombine.low %v564_v40, %v574_v47  ;;  %v416_v21 = vsel %vm386_vm5, %v371_v25, %v401_v8 }
  0x47   : > { %v588_v19 = vsel %vm1741_vm0, %v583_v4, %v587_v57  ;;  %v677_v20 = vor.u32 %v676_v6, %v672_v36  ;;  %v417_v22 = vsel %vm387_vm6, %v372_v5, %v402_v10  ;;  %v668_v31 = vrot.slane %v667_v15, 4 }
  0x48   : > { %v598_v24 = vsel %vm1741_vm0, %v593_v14, %v597_v63  ;;  %v1381_v12 = vpack.c.bf16 %v416_v21, %v416_v21  ;;  %v1382_v26 = vpack.c.bf16 %v417_v22, %v417_v22  ;;  %v606_v41 = vor.u32 %v1813_v37, %v1811_v2 }
  0x49   : > { %v1331_v13 = vcombine.low %v588_v19, %v598_v24  ;;  %v678_v38 = vrot.slane %v677_v20, 4  ;;  %v1846_v40 = vld [vmem:[#allocation2 + $0x30] sm:$0xf]  ;;  %v609_v43 = vshll.u32 %v1838_v18, 16  ;;  %v673_v25 = vsel %vm1741_vm0, %v668_v31, %v672_v36 }
  0x4a   : > { %508 = vst.msk [vmem:[#allocation2 + $0x34] sm:$0xf] %vm483_vm2, %v1381_v12  ;;  %v510_v5 = vsel %vm1653_vm9, %v1382_v26, %v509_v23  ;;  %v709_v45 = vshrl.u32 %v1846_v40, 16  ;;  %v712_v47 = vshll.u32 %v1846_v40, 16  ;;  %v613_v37 = vshrl.u32 %v1838_v18, 16 }
  0x4b   : > { %768 = vrot.lane.b32.xlu1 %v1331_v13, %s1530_s25  ;;  %v683_v48 = vsel %vm1741_vm0, %v678_v38, %v682_v16  ;;  %511 = vst [vmem:[#allocation2 + $0x38] sm:$0x1] %v510_v5  ;;  %v611_v2 = vrot.slane %v609_v43, 5  ;;  %v619_v50 = vshll.u32 %v523_v32, 16  ;;  %v607_v56 = vrot.slane %v606_v41, 4 }
  0x4c   : > { %v1338_v52 = vcombine.low %v673_v25, %v683_v48  ;;  %v711_v54 = vrot.slane %v709_v45, 4  ;;  %v714_v55 = vrot.slane %v712_v47, 5  ;;  %v615_v51 = vrot.slane %v613_v37, 4 }
  0x4d   : > { %v1325_v57 = vcombine.low %v1745_v7, %v1749_v11  ;;  %v1335_v58 = vcombine.low %v1719_v42, %v1729_v49  ;;  %v1327_v59 = vcombine.low %v1815_v44, %v1821_v35  ;;  %v1334_v60 = vcombine.low %v1817_v29, %v1825_v39 }
  0x4e   : > { %806 = vrot.lane.b32.xlu0 %v1338_v52, %s1530_s25  ;;  %v616_v61 = vor.u32 %v615_v51, %v611_v2  ;;  %v621_v63 = vrot.slane %v619_v50, 5  ;;  %v1326_v27 = vcombine.low %v1770_v46, %v1775_v53  ;;  %v1328_v7 = vcombine.low %v1796_v9, %v1838_v18 }
  0x4f   : > { %766 = vrot.lane.b32.xlu1 %v1330_v17, %s1530_s25  ;;  %v715_v11 = vor.u32 %v714_v55, %v711_v54  ;;  %v612_v42 = vsel %vm1741_vm0, %v607_v56, %v611_v2  ;;  %vm812_vm2 = vcmask 523264   ;;  %v1531_v26 = vmov 0.0  }
  0x50   : > { %v617_v49 = vrot.slane %v616_v61, 4  ;;  %1043 = vst.msk [vmem:[%s1902_s28] sm:$0x1] %vm1042_vm7, %v1531_v26  ;;  %1044 = vst.msk [vmem:[%s1908_s7] sm:$0x1] %vm1042_vm7, %v1531_v26  ;;  %vm1152_vm8 = vcmask 257024   ;;  %v1045_v45 = vlaneseq }
  0x51   : > { %v631_v0 = vld [vmem:[#allocation2 + $0x34] sm:$0xf]  ;;  %v716_v36 = vrot.slane %v715_v11, 4 }
  0x52   : > { %v635_v44 = vld [vmem:[#allocation2 + $0x38] sm:$0x1]  ;;  %v718_v35 = vshll.u32 %v631_v0, 16  ;;  %v722_v30 = vshrl.u32 %v631_v0, 16  ;;  %v1336_v29 = vcombine.low %v1846_v40, %v631_v0  ;;  %v622_v1 = vsel %vm1741_vm0, %v617_v49, %v621_v63 }
  0x53   : > { %v728_v39 = vshll.u32 %v635_v44, 16  ;;  %v1332_v3 = vcombine.low %v612_v42, %v622_v1  ;;  %v1046_v47 = vshrl.u32 %v1045_v45, 7 }
  0x54   : > { %v720_v46 = vrot.slane %v718_v35, 5  ;;  %v724_v53 = vrot.slane %v722_v30, 4 }
  0x55   : > { %v730_v4 = vrot.slane %v728_v39, 5  ;;  %770 = vrot.lane.b32.xlu1 %v1332_v3, %s1530_s25  ;;  %vm1048_vm9 = vcmp.lt.s32.totalorder %v1046_v47, 4 }
  0x56   : > { %v725_v9 = vor.u32 %v724_v53, %v720_v46  ;;  %v721_v6 = vsel %vm1741_vm0, %v716_v36, %v720_v46 }
  0x58   : > { %v726_v8 = vrot.slane %v725_v9, 4 }
  0x5a   : > { %v731_v10 = vsel %vm1741_vm0, %v726_v8, %v730_v4 }
  0x5b   : > { %v1340_v14 = vcombine.low %v721_v6, %v731_v10 }
  0x5d   : > { %810 = vrot.lane.b32.xlu0 %v1340_v14, %s1530_s25 }
  0xa5   : > { %v805_v15 = vpop.permute.xlu0 %804 }
  0xa6   : > { %v831_v16 = vsel %vm812_vm2, %v1333_v34, %v805_v15 }
  0xa7   : > { %1005 = vmatprep.mubr.bf16.mxu0 %v831_v16 }
  0xa8   : > { %v809_v17 = vpop.permute.xlu1 %808 }
  0xa9   : > { %v839_v18 = vsel %vm812_vm2, %v1335_v58, %v809_v17 }
  0xaa   : > { %1021 = vmatprep.mubr.bf16.mxu1 %v839_v18 }
  0xad   : > { %v765_v19 = vpop.permute.xlu0 %764 }
  0xae   : > { %v815_v20 = vsel %vm812_vm2, %v1325_v57, %v765_v19 }
  0xaf   : > { %1006 = vmatmul.mubr.bf16.vlgmr.msra.gmra.mrb[0].mxu0 %v815_v20 }
  0xbd   : > { %v769_v62 = vpop.permute.xlu1 %768 }
  0xbe   : > { %v823_v21 = vsel %vm812_vm2, %v1327_v59, %v769_v62 }
  0xbf   : > { %1022 = vmatmul.mubr.bf16.vlgmr.msra.gmra.mrb[0].mxu1 %v823_v21 }
  0xc0   : > { %v807_v22 = vpop.permute.xlu0 %806 }
  0xc1   : > { %v767_v23 = vpop.permute.xlu1 %766  ;;  %v835_v28 = vsel %vm812_vm2, %v1334_v60, %v807_v22 }
  0xc2   : > { %1013 = vmatprep.mubr.bf16.mxu0 %v835_v28  ;;  %v819_v33 = vsel %vm812_vm2, %v1326_v27, %v767_v23 }
  0xc3   : > { %1014 = vmatmul.mubr.bf16.gmra.mrb[4].mxu0 %v819_v33 }
  0xc7   : > { %v771_v34 = vpop.permute.xlu1 %770 }
  0xc8   : > { %v827_v31 = vsel %vm812_vm2, %v1328_v7, %v771_v34 }
  0xcf   : > { %v811_v24 = vpop.permute.xlu0 %810 }
  0xd0   : > { %v843_v12 = vsel %vm812_vm2, %v1336_v29, %v811_v24 }
  0xd1   : > { %1029 = vmatprep.mubr.bf16.mxu1 %v843_v12 }
  0xd2   : > { %1030 = vmatmul.mubr.bf16.gmra.mrb[4].mxu1 %v827_v31 }
 0x182   : > { %v1421_v32 = vpop.f32.mrb[0].mxu0 }
 0x183   : > { %v1422_v13 = vpop.f32.mrb[1].mxu0 }
 0x184   : > { %v1423_v38 = vadd.f32 %v1422_v13, %v1421_v32  ;;  %v1424_v40 = vpop.f32.mrb[2].mxu0  ;;  %v1062_v13 = vld [vmem:[%s1902_s28] sm:$0x1] }
 0x185   : > { %v1425_v41 = vpop.f32.mrb[3].mxu0 }
 0x186   : > { %v1383_v43 = vpack.c.bf16 %v1423_v38, %v1423_v38  ;;  %v1426_v25 = vadd.f32 %v1425_v41, %v1424_v40  ;;  %v1054_v54 = vsel %vm1048_vm9, %v1423_v38, 0.0  ;;  %v1088_v41 = vld [vmem:[%s1908_s7] sm:$0x1] }
 0x187   : > { %v1089_v63 = vmul.f32 %v1054_v54, %v1054_v54  ;;  %v1064_v42 = vsel %vm1063_vm10, %v1054_v54, 0.0 }
 0x188   : > { %1153 = vst.msk [vmem:[%s1918_s10] sm:$0xf] %vm1152_vm8, %v1383_v43  ;;  %v1384_v5 = vpack.c.bf16 %v1426_v25, %v1426_v25 }
 0x189   : > { %v1097_v39 = vsel %vm1063_vm10, %v1089_v63, 0.0 }
 0x18a   : > { %1154 = vst.msk [vmem:[%s1918_s10 + $0x4] sm:$0xf] %vm1152_vm8, %v1384_v5 }
 0x192   : > { %v1433_v48 = vpop.f32.mrb[0].mxu1 }
 0x193   : > { %v1434_v2 = vpop.f32.mrb[1].mxu1 }
 0x194   : > { %v1435_v37 = vadd.f32 %v1434_v2, %v1433_v48  ;;  %v1436_v50 = vpop.f32.mrb[2].mxu1 }
 0x195   : > { %v1437_v52 = vpop.f32.mrb[3].mxu1 }
 0x196   : > { %v1387_v55 = vpack.c.bf16 %v1435_v37, %v1435_v37  ;;  %v1438_v56 = vadd.f32 %v1437_v52, %v1436_v50  ;;  %v1427_v51 = vpop.f32.mrb[4].mxu0  ;;  %v1058_v58 = vsel %vm1048_vm9, %v1435_v37, 0.0 }
 0x197   : > { %v1428_v57 = vpop.f32.mrb[5].mxu0  ;;  %v1093_v49 = vmul.f32 %v1058_v58, %v1058_v58  ;;  %v1071_v1 = vsel %vm1063_vm10, %v1058_v58, 0.0 }
 0x198   : > { %1157 = vst.msk [vmem:[%s1918_s10 + $0x10] sm:$0xf] %vm1152_vm8, %v1387_v55  ;;  %v1388_v59 = vpack.c.bf16 %v1438_v56, %v1438_v56  ;;  %v1429_v60 = vadd.f32 %v1428_v57, %v1427_v51  ;;  %v1430_v61 = vpop.f32.mrb[6].mxu0 }
 0x199   : > { %v1431_v27 = vpop.f32.mrb[7].mxu0  ;;  %v1104_v3 = vsel %vm1063_vm10, %v1093_v49, 0.0 }
 0x19a   : > { %1158 = vst.msk [vmem:[%s1918_s10 + $0x14] sm:$0xf] %vm1152_vm8, %v1388_v59  ;;  %v1056_v7 = vsel %vm1048_vm9, %v1429_v60, 0.0  ;;  %v1385_v11 = vpack.c.bf16 %v1429_v60, %v1429_v60  ;;  %v1432_v0 = vadd.f32 %v1431_v27, %v1430_v61 }
 0x19b   : > { %v1067_v44 = vsel %vm1063_vm10, %v1056_v7, 0.0  ;;  %v1091_v35 = vmul.f32 %v1056_v7, %v1056_v7 }
 0x19c   : > { %v1068_v30 = vadd.f32 %v1067_v44, %v1064_v42  ;;  %1155 = vst.msk [vmem:[%s1918_s10 + $0x8] sm:$0xf] %vm1152_vm8, %v1385_v11  ;;  %v1386_v29 = vpack.c.bf16 %v1432_v0, %v1432_v0 }
 0x19d   : > { %v1100_v36 = vsel %vm1063_vm10, %v1091_v35, 0.0 }
 0x19e   : > { %v1101_v46 = vadd.f32 %v1100_v36, %v1097_v39  ;;  %v1072_v53 = vadd.f32 %v1071_v1, %v1068_v30  ;;  %1156 = vst.msk [vmem:[%s1918_s10 + $0xc] sm:$0xf] %vm1152_vm8, %v1386_v29 }
 0x1a0   : > { %v1105_v9 = vadd.f32 %v1104_v3, %v1101_v46 }
 0x1a5   : > { %v1439_v4 = vpop.f32.mrb[4].mxu1 }
 0x1a6   : > { %v1440_v6 = vpop.f32.mrb[5].mxu1 }
 0x1a7   : > { %v1441_v8 = vadd.f32 %v1440_v6, %v1439_v4  ;;  %v1442_v10 = vpop.f32.mrb[6].mxu1 }
 0x1a8   : > { %v1443_v14 = vpop.f32.mrb[7].mxu1 }
 0x1a9   : > { %v1060_v15 = vsel %vm1048_vm9, %v1441_v8, 0.0  ;;  %v1389_v16 = vpack.c.bf16 %v1441_v8, %v1441_v8  ;;  %v1444_v17 = vadd.f32 %v1443_v14, %v1442_v10 }
 0x1aa   : > { %v1075_v18 = vsel %vm1063_vm10, %v1060_v15, 0.0  ;;  %v1095_v19 = vmul.f32 %v1060_v15, %v1060_v15 }
 0x1ab   : > { %v1076_v20 = vadd.f32 %v1075_v18, %v1072_v53  ;;  %1159 = vst.msk [vmem:[%s1918_s10 + $0x18] sm:$0xf] %vm1152_vm8, %v1389_v16  ;;  %v1390_v62 = vpack.c.bf16 %v1444_v17, %v1444_v17 }
 0x1ac   : > { %v1108_v21 = vsel %vm1063_vm10, %v1095_v19, 0.0 }
 0x1ad   : > { %v1079_v22 = vrot.slane %v1076_v20, 4  ;;  %v1109_v23 = vadd.f32 %v1108_v21, %v1105_v9  ;;  %1160 = vst.msk [vmem:[%s1918_s10 + $0x1c] sm:$0xf] %vm1152_vm8, %v1390_v62 }
 0x1af   : > { %v1080_v28 = vadd.f32 %v1079_v22, %v1076_v20  ;;  %v1112_v33 = vrot.slane %v1109_v23, 4 }
 0x1b1   : > { %v1081_v34 = vrot.slane %v1080_v28, 2  ;;  %v1113_v24 = vadd.f32 %v1112_v33, %v1109_v23 }
 0x1b3   : > { %v1082_v31 = vadd.f32 %v1081_v34, %v1080_v28  ;;  %v1114_v12 = vrot.slane %v1113_v24, 2 }
 0x1b5   : > { %v1083_v26 = vrot.slane %v1082_v31, 1  ;;  %v1115_v32 = vadd.f32 %v1114_v12, %v1113_v24 }
 0x1b7   : > { %v1084_v38 = vadd.f32 %v1083_v26, %v1082_v31  ;;  %v1116_v40 = vrot.slane %v1115_v32, 1 }
 0x1b9   : > { %v1085_v43 = vadd.f32 %v1084_v38, %v1062_v13  ;;  %v1117_v25 = vadd.f32 %v1116_v40, %v1115_v32 }
 0x1bb   : > { %1087 = vst.msk [vmem:[%s1902_s28] sm:$0x1] %vm1042_vm7, %v1085_v43  ;;  %v1118_v5 = vadd.f32 %v1117_v25, %v1088_v41 }
 0x1bd   : > { %1119 = vst.msk [vmem:[%s1908_s7] sm:$0x1] %vm1042_vm7, %v1118_v5 }
 0x1be PF: > { %s17_s23 = sadd.s32 1, %s1528_s23   ;;  %s1974_s21 = smov %s1524_s22 }
 0x1bf   : > { %p14_p5 = scmp.ge.s32.totalorder %s17_s23, 4   ;;  %s1975_s22 = smov %s1977_s24 }
 0x1c1   :  { %16 = sbr.rel (!%p14_p5) target bundleno = 2 (0x2), region = 96 }

// kernel: patchdis_forward.8
= control target key start
LH: loop header
LB: loop body
LE: loop exit
PB: predicated region body
PF: predicated region fallthrough
CT: control target
= control target key end

     0   :  { %s2618_s21 = smov 0   ;;  %s2620_s22 = smov 0   ;;  %s3486_s0 = inlined_call_operand.vmem [shape: bf16[2,6,19,32], index: 0, kind: input, shape index: {}]   ;;  %s3487_s1 = inlined_call_operand.vmem [shape: bf16[512,64], index: 1, kind: input, shape index: {}]   ;;  %s3488_s2 = inlined_call_operand.vmem [shape: f32[1,32], index: 2, kind: input, shape index: {}]   ;;  %s3489_s3 = inlined_call_operand.vmem [shape: f32[1,32], index: 3, kind: input, shape index: {}]   ;;  %s3490_s4 = inlined_call_operand.vmem [shape: bf16[2,3,16,64], index: 4, kind: output, shape index: {0}]   ;;  %s3491_s5 = inlined_call_operand.vmem [shape: f32[2,1,64], index: 5, kind: output, shape index: {1}]   ;;  %s3492_s6 = inlined_call_operand.vmem [shape: f32[2,1,64], index: 6, kind: output, shape index: {2}]  }
   0x1   :  { %s2622_s23 = smov 0  }
   0x2 LB: > { %s29_s24 = sadd.s32 1, %s2573_s22  ;;  %p2247_p0 = scmp.ge.s32.totalorder %s2577_s23, 1  ;;  %s2577_s23 = sphi %s2622_s23, %s17_s23   ;;  %s2573_s22 = sphi %s2620_s22, %s3502_s22   ;;  %s2569_s21 = sphi %s2618_s21, %s3501_s21  }
   0x3   : > { %p31_p1 = scmp.ge.s32.totalorder %s29_s24, 2  ;;  %p231_p2 = scmp.lt.s32.totalorder %s2577_s23, 3 }
   0x5   : > { %s3504_s24 = smov (%p31_p1, %s29_s24), 0  ;;  %p232_p3 = pnand %p2247_p0, %p231_p2 }
   0x6   : > { %p272_p4 = scmp.lt.s32.totalorder (!%p232_p3), %s2569_s21, 1  ;;  %v2642_v0 = vld [vmem:[%s3488_s2] ss:$0 sm:$0xff] (!%p232_p3)  ;;  %vm520_vm0 = vcmask (!%p232_p3), 254976   ;;  %vm521_vm1 = vsmask.f32 (!%p232_p3), 1280 }
   0x7   : > { %235 = sbr.rel (%p232_p3) target bundleno = 539 (0x21b), region = 36  ;;  %v2658_v11 = vld [vmem:[%s3489_s3] ss:$0 sm:$0xff] (!%p232_p3)  ;;  %vm517_vm2 = vcmask (!%p232_p3), 257024   ;;  %v528_v35 = vld [vmem:[#allocation2 + $0x14] sm:$0x3] (!%p232_p3)  ;;  %vm2678_vm11 = vmand (!%p232_p3), %vm520_vm0, %vm521_vm1 }
   0x8   : > { %vm647_vm8 = vcmask (!%p232_p3), 1042432   ;;  %vm648_vm9 = vcmask (!%p232_p3), 1046532   ;;  %v523_v45 = vld [vmem:[#allocation2 + $0x8] sm:$0x3] (!%p232_p3)  ;;  %s2579_s9 = smov (!%p232_p3), 64   ;;  %s2580_s28 = smov (!%p232_p3), 32  }
   0x9   : > { %vm2716_vm15 = vmor (!%p232_p3), %vm647_vm8, %vm648_vm9  ;;  %s2581_s8 = smov (!%p232_p3), 96  }
   0xe   : > { %s3506_s21 = smov (!%p272_p4, %s2569_s21), 1 }
   0xf   : > { %s2476_s25 = smul.u32 72, %s3506_s21  ;;  %s3438_s13 = scalar_lea.vmem %s3492_s6, %s3506_s21 }
  0x10   : > { %s2477_s14 = smul.u32 24, %s3506_s21 }
  0x11   : > { %s2647_s30 = scalar_lea.vmem %s3486_s0, %s2476_s25 }
  0x12   : > { %v302_v1 = vld [vmem:[%s2647_s30 + $0xc] sm:$0xff]   ;;  %v304_v2 = vld [vmem:[%s2647_s30 + $0x14] sm:$0x3]  ;;  %v2395_v3 = vld [vmem:[%s2647_s30] sm:$0xff]   ;;  %s3448_s17 = scalar_lea.vmem %s3490_s4, %s2477_s14 }
  0x13   : > { %v320_v4 = vunpack.c.l.bf16 %v302_v1  ;;  %v321_v5 = vunpack.c.h.bf16 %v302_v1  ;;  %v322_v6 = vunpack.c.l.bf16 %v304_v2  ;;  %v2396_v7 = vunpack.c.l.bf16 %v2395_v3  ;;  %v301_v8 = vld [vmem:[%s2647_s30 + $0x8] sm:$0x3]  ;;  %v310_v10 = vld [vmem:[%s2647_s30 + $0x2c] sm:$0x3]  ;;  %v2406_v39 = vld [vmem:[%s2647_s30 + $0x18] sm:$0xff]  }
  0x14   : > { %v308_v9 = vld [vmem:[%s2647_s30 + $0x24] sm:$0xff]   ;;  %v2397_v12 = vunpack.c.h.bf16 %v2395_v3  ;;  %v319_v13 = vunpack.c.l.bf16 %v301_v8  ;;  %v328_v22 = vunpack.c.l.bf16 %v310_v10  ;;  %v307_v50 = vld [vmem:[%s2647_s30 + $0x20] sm:$0x3]  ;;  %v2400_v60 = vunpack.c.l.bf16 %v2406_v39  ;;  %v2696_v62 = vld [vmem:[%s2647_s30 + $0x30] sm:$0xff]  }
  0x15   : > { %v326_v14 = vunpack.c.l.bf16 %v308_v9  ;;  %v327_v15 = vunpack.c.h.bf16 %v308_v9  ;;  %v345_v16 = vmul.f32 %v2642_v0, %v320_v4  ;;  %v346_v17 = vmul.f32 %v2642_v0, %v321_v5  ;;  %v2699_v63 = vld [vmem:[%s2647_s30 + $0x38] sm:$0x3]  ;;  %v538_v5 = vld [vmem:[#allocation2 + $0x2c] sm:$0x3] }
  0x16   : > { %v347_v18 = vmul.f32 %v2642_v0, %v322_v6  ;;  %v342_v19 = vmul.f32 %v2396_v7, %v2642_v0  ;;  %v343_v20 = vmul.f32 %v2397_v12, %v2642_v0  ;;  %v344_v21 = vmul.f32 %v2642_v0, %v319_v13 }
  0x17   : > { %v351_v23 = vmul.f32 %v2642_v0, %v326_v14  ;;  %v370_v24 = vadd.f32 %v2658_v11, %v345_v16  ;;  %v371_v25 = vadd.f32 %v2658_v11, %v346_v17  ;;  %v352_v30 = vmul.f32 %v2642_v0, %v327_v15 }
  0x18   : > { %v372_v26 = vadd.f32 %v2658_v11, %v347_v18  ;;  %v367_v27 = vadd.f32 %v2658_v11, %v342_v19  ;;  %v368_v28 = vadd.f32 %v2658_v11, %v343_v20  ;;  %v369_v29 = vadd.f32 %v2658_v11, %v344_v21 }
  0x19   : > { %v353_v31 = vmul.f32 %v2642_v0, %v328_v22  ;;  %vm388_vm3 = vcmp.ge.f32.partialorder %v370_v24, 0.0  ;;  %vm389_vm4 = vcmp.ge.f32.partialorder %v371_v25, 0.0  ;;  %v406_v32 = vmul.f32 0.2, %v370_v24 }
  0x1a   : > { %vm390_vm5 = vcmp.ge.f32.partialorder %v372_v26, 0.0  ;;  %v407_v33 = vmul.f32 0.2, %v371_v25  ;;  %v408_v34 = vmul.f32 0.2, %v372_v26  ;;  %vm385_vm6 = vcmp.ge.f32.partialorder %v367_v27, 0.0 }
  0x1b   : > { %vm386_vm7 = vcmp.ge.f32.partialorder %v368_v28, 0.0  ;;  %v424_v36 = vsel %vm388_vm3, %v370_v24, %v406_v32  ;;  %vm387_vm10 = vcmp.ge.f32.partialorder %v369_v29, 0.0  ;;  %v403_v37 = vmul.f32 0.2, %v367_v27 }
  0x1c   : > { %v404_v38 = vmul.f32 0.2, %v368_v28  ;;  %v425_v40 = vsel %vm389_vm4, %v371_v25, %v407_v33  ;;  %v426_v41 = vsel %vm390_vm5, %v372_v26, %v408_v34  ;;  %v2373_v42 = vpack.c.bf16 %v424_v36, %v424_v36 }
  0x1d   : > { %v405_v44 = vmul.f32 0.2, %v369_v29  ;;  %v2374_v46 = vpack.c.bf16 %v425_v40, %v425_v40  ;;  %v2375_v47 = vpack.c.bf16 %v426_v41, %v426_v41  ;;  %v421_v48 = vsel %vm385_vm6, %v367_v27, %v403_v37 }
  0x1e   : > { %v422_v49 = vsel %vm386_vm7, %v368_v28, %v404_v38  ;;  %526 = vst.msk [vmem:[#allocation2 + $0xc] sm:$0xf] %vm517_vm2, %v2373_v42  ;;  %v2370_v52 = vpack.c.bf16 %v421_v48, %v421_v48  ;;  %v376_v54 = vadd.f32 %v2658_v11, %v351_v23  ;;  %v377_v57 = vadd.f32 %v2658_v11, %v352_v30 }
  0x1f   : > { %v423_v51 = vsel %vm387_vm10, %v369_v29, %v405_v44  ;;  %v2371_v53 = vpack.c.bf16 %v422_v49, %v422_v49  ;;  %527 = vst.msk [vmem:[#allocation2 + $0x10] sm:$0xf] %vm517_vm2, %v2374_v46  ;;  %v529_v55 = vsel %vm2678_vm11, %v2375_v47, %v528_v35  ;;  %v378_v58 = vadd.f32 %v2658_v11, %v353_v31 }
  0x20   : > { %v2372_v56 = vpack.c.bf16 %v423_v51, %v423_v51  ;;  %530 = vst [vmem:[#allocation2 + $0x14] sm:$0x3] %v529_v55  ;;  %518 = vst.msk [vmem:[#allocation2] sm:$0xf] %vm517_vm2, %v2370_v52  ;;  %vm394_vm12 = vcmp.ge.f32.partialorder %v376_v54, 0.0  ;;  %v2401_v61 = vunpack.c.h.bf16 %v2406_v39  ;;  %vm395_vm13 = vcmp.ge.f32.partialorder %v377_v57, 0.0 }
  0x21   : > { %519 = vst.msk [vmem:[#allocation2 + $0x4] sm:$0xf] %vm517_vm2, %v2371_v53  ;;  %v412_v59 = vmul.f32 0.2, %v376_v54  ;;  %vm396_vm14 = vcmp.ge.f32.partialorder %v378_v58, 0.0  ;;  %v325_v6 = vunpack.c.l.bf16 %v307_v50  ;;  %v348_v7 = vmul.f32 %v2400_v60, %v2642_v0 }
  0x22   : > { %v524_v1 = vsel %vm2678_vm11, %v2372_v56, %v523_v45  ;;  %v413_v2 = vmul.f32 0.2, %v377_v57  ;;  %v414_v3 = vmul.f32 0.2, %v378_v58  ;;  %v349_v10 = vmul.f32 %v2401_v61, %v2642_v0 }
  0x23   : > { %525 = vst [vmem:[#allocation2 + $0x8] sm:$0x3] %v524_v1  ;;  %v430_v4 = vsel %vm394_vm12, %v376_v54, %v412_v59  ;;  %v2404_v12 = vunpack.c.l.bf16 %v2696_v62  ;;  %v350_v15 = vmul.f32 %v2642_v0, %v325_v6  ;;  %v373_v16 = vadd.f32 %v2658_v11, %v348_v7  ;;  %v533_v6 = vld [vmem:[#allocation2 + $0x20] sm:$0x3] }
  0x24   : > { %v431_v8 = vsel %vm395_vm13, %v377_v57, %v413_v2  ;;  %v2379_v9 = vpack.c.bf16 %v430_v4, %v430_v4  ;;  %v432_v13 = vsel %vm396_vm14, %v378_v58, %v414_v3  ;;  %v374_v19 = vadd.f32 %v2658_v11, %v349_v10 }
  0x25   : > { %v2380_v14 = vpack.c.bf16 %v431_v8, %v431_v8  ;;  %v2708_v17 = vld [vmem:[#allocation2 + $0xc] sm:$0xe]  ;;  %v2381_v18 = vpack.c.bf16 %v432_v13, %v432_v13  ;;  %v2405_v20 = vunpack.c.h.bf16 %v2696_v62  ;;  %v331_v21 = vunpack.c.l.bf16 %v2699_v63 }
  0x26   : > { %536 = vst.msk [vmem:[#allocation2 + $0x24] sm:$0xf] %vm517_vm2, %v2379_v9  ;;  %v2720_v23 = vld [vmem:[#allocation2 + $0x10] sm:$0xf]  ;;  %v2273_v24 = vrot.slane %v2708_v17, 9  ;;  %v865_v25 = vshrl.u32 %v2708_v17, 16  ;;  %v375_v27 = vadd.f32 %v2658_v11, %v350_v15  ;;  %v354_v32 = vmul.f32 %v2404_v12, %v2642_v0 }
  0x27   : > { %v868_v26 = vshll.u32 %v2708_v17, 16  ;;  %537 = vst.msk [vmem:[#allocation2 + $0x28] sm:$0xf] %vm517_vm2, %v2380_v14  ;;  %v2727_v28 = vld [vmem:[#allocation2 + $0x14] sm:$0x1]  ;;  %v842_v29 = vrot.slane %v2720_v23, 5  ;;  %v539_v31 = vsel %vm2678_vm11, %v2381_v18, %v538_v5  ;;  %v355_v18 = vmul.f32 %v2405_v20, %v2642_v0 }
  0x28   : > { %v2730_v30 = vld [vmem:[#allocation2 + $0x4] sm:$0xf]  ;;  %vm391_vm0 = vcmp.ge.f32.partialorder %v373_v16, 0.0  ;;  %v776_v33 = vshll.u32 %v2727_v28, 16  ;;  %v845_v34 = vrot.slane %v2727_v28, 5  ;;  %vm392_vm1 = vcmp.ge.f32.partialorder %v374_v19, 0.0 }
  0x29   : > { %v2737_v35 = vld [vmem:[#allocation2] sm:$0xe]  ;;  %v652_v36 = vrot.slane %v2730_v30, 5  ;;  %540 = vst [vmem:[#allocation2 + $0x2c] sm:$0x3] %v539_v31  ;;  %v843_v38 = vsel %vm2716_vm15, %v2273_v24, %v842_v29  ;;  %v844_v39 = vrot.slane %v842_v29, 4  ;;  %v356_v29 = vmul.f32 %v2642_v0, %v331_v21 }
  0x2a   : > { %v2740_v37 = vld [vmem:[#allocation2 + $0xc] sm:$0xe]  ;;  %v2744_v40 = vld [vmem:[#allocation2 + $0x8] sm:$0x1]  ;;  %v2270_v41 = vrot.slane %v2737_v35, 9  ;;  %v678_v42 = vshrl.u32 %v2737_v35, 16  ;;  %v379_v20 = vadd.f32 %v2658_v11, %v354_v32  ;;  %v380_v31 = vadd.f32 %v2658_v11, %v355_v18 }
  0x2b   : > { %v583_v44 = vshll.u32 %v2744_v40, 16  ;;  %v654_v45 = vrot.slane %v652_v36, 4  ;;  %v655_v46 = vrot.slane %v2744_v40, 5  ;;  %v681_v47 = vshll.u32 %v2737_v35, 16  ;;  %v2751_v48 = vld [vmem:[#allocation2 + $0x10] sm:$0xf] }
  0x2c   : > { %v846_v49 = vsel %vm2716_vm15, %v844_v39, %v845_v34  ;;  %v653_v50 = vsel %vm2716_vm15, %v2270_v41, %v652_v36  ;;  %vm393_vm3 = vcmp.ge.f32.partialorder %v375_v27, 0.0  ;;  %v409_v51 = vmul.f32 0.2, %v373_v16  ;;  %v2757_v52 = vld [vmem:[#allocation2 + $0x14] sm:$0x1]  ;;  %v2518_v17 = vld [vmem:[%s3487_s1 + $0x18] sm:$0xff]  }
  0x2d   : > { %v2300_v53 = vcombine.low %v843_v38, %v846_v49  ;;  %v656_v54 = vsel %vm2716_vm15, %v654_v45, %v655_v46  ;;  %v2761_v55 = vld [vmem:[#allocation2 + $0x24] sm:$0xe]  ;;  %v410_v56 = vmul.f32 0.2, %v374_v19  ;;  %v411_v57 = vmul.f32 0.2, %v375_v27 }
  0x2e   : > { %v2288_v58 = vcombine.low %v653_v50, %v656_v54  ;;  %v2763_v59 = vld [vmem:[#allocation2 + $0x28] sm:$0xf]  ;;  %v2279_v60 = vrot.slane %v2761_v55, 9  ;;  %v427_v61 = vsel %vm391_vm0, %v373_v16, %v409_v51  ;;  %v2271_v1 = vrot.slane %v2740_v37, 9  ;;  %v747_v13 = vld [vmem:[#allocation2 + $0xc] sm:$0xf] }
  0x2f   : > { %1400 = vrot.lane.b32.xlu1 %v2300_v53, %s2579_s9  ;;  %v1216_v2 = vrot.slane %v2763_v59, 5  ;;  %v428_v3 = vsel %vm392_vm1, %v374_v19, %v410_v56  ;;  %v429_v4 = vsel %vm393_vm3, %v375_v27, %v411_v57  ;;  %v2376_v5 = vpack.c.bf16 %v427_v61, %v427_v61  ;;  %v543_v49 = vld [vmem:[#allocation2 + $0x38] sm:$0x3]  ;;  %v2809_v53 = vld [vmem:[%s2647_s30 + $0x3c] sm:$0xff]  }
  0x30   : > { %1343 = vrot.lane.b32.xlu0 %v2288_v58, %s2579_s9  ;;  %v2773_v7 = vld [vmem:[#allocation2 + $0x2c] sm:$0x1]  ;;  %v2377_v8 = vpack.c.bf16 %v428_v3, %v428_v3  ;;  %v2378_v9 = vpack.c.bf16 %v429_v4, %v429_v4  ;;  %v659_v10 = vrot.slane %v2751_v48, 5  ;;  %v662_v12 = vrot.slane %v2757_v52, 5 }
  0x31   : > { %v1217_v14 = vsel %vm2716_vm15, %v2279_v60, %v1216_v2  ;;  %v1218_v15 = vrot.slane %v1216_v2, 4  ;;  %v1219_v16 = vrot.slane %v2773_v7, 5  ;;  %531 = vst.msk [vmem:[#allocation2 + $0x18] sm:$0xf] %vm517_vm2, %v2376_v5  ;;  %vm560_vm4 = vsmask.f32 3328 }
  0x32   : > { %vm561_vm5 = vsmask.f32 7440  ;;  %532 = vst.msk [vmem:[#allocation2 + $0x1c] sm:$0xf] %vm517_vm2, %v2377_v8  ;;  %v534_v19 = vsel %vm2678_vm11, %v2378_v9, %v533_v6  ;;  %v2789_v24 = vsel %vm2716_vm15, %v2271_v1, %v659_v10  ;;  %v661_v27 = vrot.slane %v659_v10, 4  ;;  %v2506_v2 = vld [vmem:[%s3487_s1 + $0x40] sm:$0xff]  }
  0x33   : > { %v1220_v62 = vsel %vm2716_vm15, %v1218_v15, %v1219_v16  ;;  %535 = vst [vmem:[#allocation2 + $0x20] sm:$0x3] %v534_v19  ;;  %v757_v34 = vshrl.u32 %v747_v13, 16  ;;  %v381_v39 = vadd.f32 %v2658_v11, %v356_v29  ;;  %v760_v63 = vshll.u32 %v747_v13, 16  ;;  %v1121_v1 = vld [vmem:[#allocation2 + $0x24] sm:$0xf]  ;;  %2408 = vmatprep.subr.bf16.mxu0 %v2506_v2  ;;  %vm2852_vm9 = vmor %vm560_vm4, %vm561_vm5 }
  0x34   : > { %v2324_v36 = vcombine.low %v1217_v14, %v1220_v62  ;;  %v2800_v38 = vsel %vm2716_vm15, %v661_v27, %v662_v12  ;;  %vm397_vm6 = vcmp.ge.f32.partialorder %v379_v20, 0.0  ;;  %vm398_vm7 = vcmp.ge.f32.partialorder %v380_v31, 0.0  ;;  %v2507_v27 = vld [vmem:[%s3487_s1] sm:$0xff]  }
  0x35   : > { %v2289_v0 = vcombine.low %v2789_v24, %v2800_v38  ;;  %v415_v21 = vmul.f32 0.2, %v379_v20  ;;  %vm399_vm8 = vcmp.ge.f32.partialorder %v381_v39, 0.0  ;;  %v416_v32 = vmul.f32 0.2, %v380_v31  ;;  %2409 = vmatpush3.bf16.msra.mxu0 %v2507_v27 }
  0x36   : > { %1514 = vrot.lane.b32.xlu1 %v2324_v36, %s2579_s9  ;;  %v417_v41 = vmul.f32 0.2, %v381_v39  ;;  %v759_v45 = vrot.slane %v757_v34, 4  ;;  %v762_v50 = vrot.slane %v760_v63, 5  ;;  %v766_v51 = vshll.u32 %v2720_v23, 16 }
  0x37   : > { %v433_v46 = vsel %vm397_vm6, %v379_v20, %v415_v21  ;;  %v770_v11 = vshrl.u32 %v2720_v23, 16  ;;  %v434_v57 = vsel %vm398_vm7, %v380_v31, %v416_v32  ;;  %v2817_v61 = vrot.slane %v776_v33, 5 }
  0x38   : > { %v2811_v54 = vld [vmem:[#allocation2 + $0x18] sm:$0xe]  ;;  %v435_v58 = vsel %vm399_vm8, %v381_v39, %v417_v41  ;;  %v2382_v60 = vpack.c.bf16 %v433_v46, %v433_v46  ;;  %v2383_v8 = vpack.c.bf16 %v434_v57, %v434_v57  ;;  %v763_v13 = vor.u32 %v762_v50, %v759_v45 }
  0x39   : > { %v2813_v56 = vld [vmem:[#allocation2 + $0x18] sm:$0xe]  ;;  %v2822_v3 = vld [vmem:[#allocation2 + $0x1c] sm:$0xf]  ;;  %v2276_v4 = vrot.slane %v2811_v54, 9  ;;  %v2384_v9 = vpack.c.bf16 %v435_v58, %v435_v58  ;;  %v332_v14 = vunpack.c.l.bf16 %v2809_v53  ;;  %v768_v19 = vrot.slane %v766_v51, 5 }
  0x3a   : > { %v2825_v5 = vld [vmem:[#allocation2 + $0x1c] sm:$0xf]  ;;  %v2274_v6 = vrot.slane %v2813_v56, 9  ;;  %v2828_v10 = vld [vmem:[#allocation2 + $0x20] sm:$0x1]  ;;  %v1029_v28 = vrot.slane %v2822_v3, 5 }
  0x3b   : > { %v2831_v33 = vld [vmem:[#allocation2 + $0x20] sm:$0x1]  ;;  %v849_v12 = vrot.slane %v2825_v5, 5  ;;  %541 = vst.msk [vmem:[#allocation2 + $0x30] sm:$0xf] %vm517_vm2, %v2382_v60  ;;  %v1032_v15 = vrot.slane %v2828_v10, 5  ;;  %v544_v18 = vsel %vm2678_vm11, %v2384_v9, %v543_v49 }
  0x3c   : > { %v852_v16 = vrot.slane %v2831_v33, 5  ;;  %542 = vst.msk [vmem:[#allocation2 + $0x34] sm:$0xf] %vm517_vm2, %v2383_v8  ;;  %v1030_v29 = vsel %vm2716_vm15, %v2276_v4, %v1029_v28  ;;  %v1031_v62 = vrot.slane %v1029_v28, 4  ;;  %545 = vst [vmem:[#allocation2 + $0x38] sm:$0x3] %v544_v18 }
  0x3d   : > { %v850_v20 = vsel %vm2716_vm15, %v2274_v6, %v849_v12  ;;  %v851_v31 = vrot.slane %v849_v12, 4  ;;  %v764_v36 = vrot.slane %v763_v13, 4  ;;  %v772_v39 = vrot.slane %v770_v11, 4  ;;  %v551_v49 = vld [vmem:[#allocation2] sm:$0xf] }
  0x3e   : > { %v1131_v63 = vshrl.u32 %v1121_v1, 16  ;;  %v1134_v21 = vshll.u32 %v1121_v1, 16  ;;  %v1033_v32 = vsel %vm2716_vm15, %v1031_v62, %v1032_v15  ;;  %v1140_v45 = vshll.u32 %v2763_v59, 16 }
  0x3f   : > { %v853_v41 = vsel %vm2716_vm15, %v851_v31, %v852_v16  ;;  %v1144_v46 = vshrl.u32 %v2763_v59, 16  ;;  %v2312_v50 = vcombine.low %v1030_v29, %v1033_v32  ;;  %v769_v58 = vsel %vm2852_vm9, %v764_v36, %v768_v19  ;;  %v2508_v36 = vld [vmem:[%s3487_s1 + $0x48] sm:$0xff]  }
  0x40   : > { %v2301_v57 = vcombine.low %v850_v20, %v853_v41  ;;  %v773_v60 = vor.u32 %v772_v39, %v768_v19  ;;  %v1133_v2 = vrot.slane %v1131_v63, 4  ;;  %v1136_v1 = vrot.slane %v1134_v21, 5  ;;  %v934_v41 = vld [vmem:[#allocation2 + $0x18] sm:$0xf]  ;;  %2410 = vmatprep.subr.bf16.mxu0 %v2508_v36 }
  0x41   : > { %v1142_v4 = vrot.slane %v1140_v45, 5  ;;  %v1146_v6 = vrot.slane %v1144_v46, 4  ;;  %1457 = vrot.lane.b32.xlu0 %v2312_v50, %s2579_s9  ;;  %v1150_v28 = vshll.u32 %v2773_v7, 16  ;;  %v564_v12 = vshrl.u32 %v551_v49, 16 }
  0x42   : > { %1402 = vrot.lane.b32.xlu1 %v2301_v57, %s2579_s9  ;;  %v2872_v8 = vld [vmem:[#allocation2 + $0x30] sm:$0xe]  ;;  %v774_v9 = vrot.slane %v773_v60, 4  ;;  %v567_v13 = vshll.u32 %v551_v49, 16  ;;  %v1137_v18 = vor.u32 %v1136_v1, %v1133_v2  ;;  %v573_v27 = vshll.u32 %v2730_v30, 16  ;;  %v2509_v49 = vld [vmem:[%s3487_s1 + $0xc0] sm:$0xff]  }
  0x43   : > { %v2875_v15 = vld [vmem:[#allocation2 + $0x34] sm:$0xf]  ;;  %v2280_v16 = vrot.slane %v2872_v8, 9  ;;  %v1147_v19 = vor.u32 %v1146_v6, %v1142_v4  ;;  %vm674_vm10 = vsmask.f32 2304  ;;  %v1152_v20 = vrot.slane %v1150_v28, 5  ;;  %2442 = vmatprep.subr.bf16.mxu1 %v2509_v49 }
  0x44   : > { %vm675_vm12 = vsmask.f32 6416  ;;  %v2879_v29 = vld [vmem:[#allocation2 + $0x38] sm:$0x1]  ;;  %v1223_v62 = vrot.slane %v2875_v15, 5  ;;  %v779_v7 = vsel %vm2852_vm9, %v774_v9, %v2817_v61  ;;  %v566_v31 = vrot.slane %v564_v12, 4 }
  0x45   : > { %v1226_v39 = vrot.slane %v2879_v29, 5  ;;  %v2297_v63 = vcombine.low %v769_v58, %v779_v7  ;;  %v1138_v21 = vrot.slane %v1137_v18, 4  ;;  %v1148_v32 = vrot.slane %v1147_v19, 4  ;;  %1345 = vrot.lane.b32.xlu0 %v2289_v0, %s2579_s9  ;;  %v2510_v60 = vld [vmem:[%s3487_s1 + $0x8] sm:$0xff]   ;;  %vm2970_vm13 = vmor %vm674_vm10, %vm675_vm12 }
  0x46   : > { %v1224_v61 = vsel %vm2716_vm15, %v2280_v16, %v1223_v62  ;;  %v1225_v50 = vrot.slane %v1223_v62, 4  ;;  %v569_v57 = vrot.slane %v567_v13, 5  ;;  %v2900_v58 = vrot.slane %v573_v27, 5  ;;  %2411 = vmatpush3.bf16.msra.mxu0 %v2510_v60 }
  0x47   : > { %v1143_v2 = vsel %vm2852_vm9, %v1138_v21, %v1142_v4  ;;  %v1153_v24 = vsel %vm2852_vm9, %v1148_v32, %v1152_v20  ;;  %v577_v38 = vshrl.u32 %v2730_v30, 16  ;;  %v585_v0 = vrot.slane %v583_v44, 5  ;;  %v2511_v4 = vld [vmem:[%s3487_s1 + $0x80] sm:$0xff]   ;;  %v2512_v44 = vld [vmem:[%s3487_s1 + $0x50] sm:$0xff]   ;;  %v2515_v32 = vld [vmem:[%s3487_s1 + $0x88] sm:$0xff]  }
  0x48   : > { %v1227_v1 = vsel %vm2716_vm15, %v1225_v50, %v1226_v39  ;;  %v2321_v6 = vcombine.low %v1143_v2, %v1153_v24  ;;  %v570_v9 = vor.u32 %v569_v57, %v566_v31  ;;  %v944_v28 = vshrl.u32 %v934_v41, 16  ;;  %v861_v20 = vld [vmem:[#allocation2 + $0x14] sm:$0x3]  ;;  %2443 = vmatpush3.bf16.msra.mxu1 %v2511_v4  ;;  %2412 = vmatprep.subr.bf16.mxu0 %v2512_v44  ;;  %v2516_v50 = vld [vmem:[%s3487_s1 + $0x58] sm:$0xff]   ;;  %v671_v4 = vld [vmem:[#allocation2 + $0x8] sm:$0x3] }
  0x49   : > { %v2325_v12 = vcombine.low %v1224_v61, %v1227_v1  ;;  %v579_v13 = vrot.slane %v577_v38, 4  ;;  %v947_v16 = vshll.u32 %v934_v41, 16  ;;  %v953_v40 = vshll.u32 %v2822_v3, 16  ;;  %1385 = vrot.lane.b32.xlu0 %v2297_v63, %s2580_s28  ;;  %v2513_v63 = vld [vmem:[%s3487_s1 + $0xc8] sm:$0xff]   ;;  %v2517_v57 = vld [vmem:[%s3487_s1 + $0xd0] sm:$0xff]   ;;  %v2520_v1 = vld [vmem:[%s3487_s1 + $0x60] sm:$0xff]  }
  0x4a   : > { %v571_v18 = vrot.slane %v570_v9, 4  ;;  %v946_v19 = vrot.slane %v944_v28, 4  ;;  %v957_v62 = vshrl.u32 %v2822_v3, 16  ;;  %v963_v7 = vshll.u32 %v2828_v10, 16  ;;  %v2514_v10 = vld [vmem:[%s3487_s1 + $0x10] sm:$0xff]   ;;  %2444 = vmatprep.subr.bf16.mxu1 %v2513_v63  ;;  %v2521_v44 = vld [vmem:[%s3487_s1 + $0xd8] sm:$0xff]  }
  0x4b   : > { %1516 = vrot.lane.b32.xlu1 %v2325_v12, %s2579_s9  ;;  %v580_v31 = vor.u32 %v579_v13, %v2900_v58  ;;  %v949_v36 = vrot.slane %v947_v16, 5  ;;  %v955_v39 = vrot.slane %v953_v40, 5  ;;  %v867_v21 = vrot.slane %v865_v25, 5  ;;  %2413 = vmatpush3.bf16.msra.mxu0 %v2514_v10 }
  0x4c   : > { %v576_v41 = vsel %vm2852_vm9, %v571_v18, %v2900_v58  ;;  %v959_v25 = vrot.slane %v957_v62, 4  ;;  %v965_v49 = vrot.slane %v963_v7, 5  ;;  %v870_v61 = vrot.slane %v868_v26, 6  ;;  %v2519_v26 = vld [vmem:[%s3487_s1 + $0x90] sm:$0xff]   ;;  %2445 = vmatpush3.bf16.msra.mxu1 %v2515_v32  ;;  %2414 = vmatprep.subr.bf16.mxu0 %v2516_v50  ;;  %v2522_v18 = vld [vmem:[%s3487_s1 + $0x20] sm:$0xff]  }
  0x4d   : > { %v581_v60 = vrot.slane %v580_v31, 4  ;;  %v950_v2 = vor.u32 %v949_v36, %v946_v19  ;;  %v873_v58 = vrot.slane %v770_v11, 5  ;;  %v874_v24 = vrot.slane %v766_v51, 6  ;;  %1499 = vrot.lane.b32.xlu0 %v2321_v6, %s2580_s28  ;;  %2446 = vmatprep.subr.bf16.mxu1 %v2517_v57  ;;  %v2525_v32 = vld [vmem:[%s3487_s1 + $0xe0] sm:$0xff]  }
  0x4e   : > { %v960_v11 = vor.u32 %v959_v25, %v955_v39  ;;  %v871_v51 = vor.u32 %v870_v61, %v867_v21  ;;  %v879_v9 = vshrl.u32 %v861_v20, 16  ;;  %v882_v28 = vshll.u32 %v861_v20, 16 }
  0x4f   : > { %v586_v12 = vsel %vm2852_vm9, %v581_v60, %v585_v0  ;;  %v951_v13 = vrot.slane %v950_v2, 4  ;;  %v875_v16 = vor.u32 %v874_v24, %v873_v58  ;;  %v680_v6 = vrot.slane %v678_v42, 5  ;;  %v2523_v0 = vld [vmem:[%s3487_s1 + $0x98] sm:$0xff]   ;;  %v2524_v42 = vld [vmem:[%s3487_s1 + $0x68] sm:$0xff]   ;;  %2415 = vmatpush3.bf16.msra.mxu0 %v2518_v17 }
  0x50   : > { %v2285_v19 = vcombine.low %v576_v41, %v586_v12  ;;  %v961_v7 = vrot.slane %v960_v11, 4  ;;  %v872_v20 = vrot.slane %v871_v51, 4  ;;  %v881_v31 = vrot.slane %v879_v9, 5  ;;  %2447 = vmatpush3.bf16.msra.mxu1 %v2519_v26  ;;  %v749_v2 = vld [vmem:[#allocation2 + $0x18] sm:$0xf]  ;;  %2416 = vmatprep.subr.bf16.mxu0 %v2520_v1  ;;  %v2528_v51 = vld [vmem:[%s3487_s1 + $0x70] sm:$0xff]  }
  0x51   : > { %v956_v36 = vsel %vm2852_vm9, %v951_v13, %v955_v39  ;;  %v877_v21 = vrot.slane %v875_v16, 4  ;;  %v884_v63 = vrot.slane %v882_v28, 6  ;;  %v683_v10 = vrot.slane %v681_v47, 6  ;;  %v1235_v47 = vld [vmem:[#allocation2 + $0x2c] sm:$0x3]  ;;  %2448 = vmatprep.subr.bf16.mxu1 %v2521_v44  ;;  %v2530_v44 = vld [vmem:[%s3487_s1 + $0x30] sm:$0xff]  }
  0x52   : > { %1328 = vrot.lane.b32.xlu1 %v2285_v19, %s2580_s28  ;;  %v966_v41 = vsel %vm2852_vm9, %v961_v7, %v965_v49  ;;  %v876_v25 = vsel %vm2970_vm13, %v872_v20, %v875_v16  ;;  %v686_v39 = vrot.slane %v577_v38, 5  ;;  %v687_v35 = vrot.slane %v573_v27, 6  ;;  %v2526_v49 = vld [vmem:[%s3487_s1 + $0x28] sm:$0xff]   ;;  %v2527_v27 = vld [vmem:[%s3487_s1 + $0xa0] sm:$0xff]  }
  0x53   : > { %v2309_v61 = vcombine.low %v956_v36, %v966_v41  ;;  %v885_v50 = vor.u32 %v884_v63, %v881_v31  ;;  %v684_v57 = vor.u32 %v683_v10, %v680_v6  ;;  %v692_v60 = vshrl.u32 %v671_v4, 16  ;;  %2417 = vmatpush3.bf16.msra.mxu0 %v2522_v18  ;;  %v2529_v12 = vld [vmem:[%s3487_s1 + $0xe8] sm:$0xff]  }
  0x54   : > { %v688_v58 = vor.u32 %v687_v35, %v686_v39  ;;  %v695_v24 = vshll.u32 %v671_v4, 16  ;;  %v1239_v38 = vshrl.u32 %v2761_v55, 16  ;;  %v1242_v30 = vshll.u32 %v2761_v55, 16  ;;  %2449 = vmatpush3.bf16.msra.mxu1 %v2523_v0  ;;  %2418 = vmatprep.subr.bf16.mxu0 %v2524_v42  ;;  %v2531_v31 = vld [vmem:[%s3487_s1 + $0xa8] sm:$0xff]  }
  0x55   : > { %1442 = vrot.lane.b32.xlu0 %v2309_v61, %s2580_s28  ;;  %v886_v17 = vsel %vm2970_vm13, %v877_v21, %v885_v50  ;;  %v685_v26 = vrot.slane %v684_v57, 4  ;;  %v694_v1 = vrot.slane %v692_v60, 5  ;;  %v1247_v11 = vrot.slane %v1144_v46, 5  ;;  %2450 = vmatprep.subr.bf16.mxu1 %v2525_v32  ;;  %v2532_v32 = vld [vmem:[%s3487_s1 + $0x78] sm:$0xff]   ;;  %v2533_v61 = vld [vmem:[%s3487_s1 + $0xf0] sm:$0xff]  }
  0x56   : > { %v2303_v55 = vcombine.low %v876_v25, %v886_v17  ;;  %v690_v9 = vrot.slane %v688_v58, 4  ;;  %v697_v28 = vrot.slane %v695_v24, 6  ;;  %v1241_v4 = vrot.slane %v1239_v38, 5 }
  0x57   : > { %v689_v13 = vsel %vm2970_vm13, %v685_v26, %v688_v58  ;;  %v1244_v16 = vrot.slane %v1242_v30, 6  ;;  %v1248_v46 = vrot.slane %v1140_v45, 6  ;;  %v1253_v6 = vshrl.u32 %v1235_v47, 16  ;;  %2419 = vmatpush3.bf16.msra.mxu0 %v2526_v49  ;;  %v3049_v49 = vld [vmem:[#allocation2 + $0xc] sm:$0xf] }
  0x58   : > { %1415 = vrot.lane.b32.xlu1 %v2303_v55, %s2581_s8  ;;  %v698_v18 = vor.u32 %v697_v28, %v694_v1  ;;  %v1256_v19 = vshll.u32 %v1235_v47, 16  ;;  %v781_v7 = vshrl.u32 %v749_v2, 16  ;;  %v784_v20 = vshll.u32 %v749_v2, 16  ;;  %2451 = vmatpush3.bf16.msra.mxu1 %v2527_v27  ;;  %v1048_v47 = vld [vmem:[#allocation2 + $0x20] sm:$0x3]  ;;  %v2534_v27 = vld [vmem:[%s3487_s1 + $0x38] sm:$0xff]  }
  0x59   : > { %v1245_v0 = vor.u32 %v1244_v16, %v1241_v4  ;;  %v1249_v59 = vor.u32 %v1248_v46, %v1247_v11  ;;  %v1255_v45 = vrot.slane %v1253_v6, 5  ;;  %v790_v42 = vshll.u32 %v2825_v5, 16  ;;  %2420 = vmatprep.subr.bf16.mxu0 %v2528_v51  ;;  %2452 = vmatprep.subr.bf16.mxu1 %v2529_v12 }
  0x5a   : > { %v699_v36 = vsel %vm2970_vm13, %v690_v9, %v698_v18  ;;  %v1258_v21 = vrot.slane %v1256_v19, 6  ;;  %v783_v63 = vrot.slane %v781_v7, 4  ;;  %v786_v10 = vrot.slane %v784_v20, 5  ;;  %v2536_v9 = vld [vmem:[%s3487_s1 + $0xf8] sm:$0xff]  }
  0x5b   : > { %v2291_v41 = vcombine.low %v689_v13, %v699_v36  ;;  %v1246_v25 = vrot.slane %v1245_v0, 4  ;;  %v1251_v39 = vrot.slane %v1249_v59, 4  ;;  %v792_v35 = vrot.slane %v790_v42, 5  ;;  %2421 = vmatpush3.bf16.msra.mxu0 %v2530_v44 }
  0x5c   : > { %v1259_v50 = vor.u32 %v1258_v21, %v1255_v45  ;;  %v787_v57 = vor.u32 %v786_v10, %v783_v63  ;;  %v794_v60 = vshrl.u32 %v2825_v5, 16  ;;  %v800_v2 = vshll.u32 %v2831_v33, 16  ;;  %2453 = vmatpush3.bf16.msra.mxu1 %v2531_v31  ;;  %2422 = vmatprep.subr.bf16.mxu0 %v2532_v32 }
  0x5d   : > { %1358 = vrot.lane.b32.xlu0 %v2291_v41, %s2581_s8  ;;  %v1250_v58 = vsel %vm2970_vm13, %v1246_v25, %v1249_v59  ;;  %v1052_v24 = vshrl.u32 %v2811_v54, 16  ;;  %v1055_v38 = vshll.u32 %v2811_v54, 16  ;;  %v1060_v30 = vrot.slane %v957_v62, 5  ;;  %v2535_v54 = vld [vmem:[%s3487_s1 + $0xb0] sm:$0xff]   ;;  %2454 = vmatprep.subr.bf16.mxu1 %v2533_v61 }
  0x5e   : > { %v1260_v33 = vsel %vm2970_vm13, %v1251_v39, %v1259_v50  ;;  %v788_v17 = vrot.slane %v787_v57, 4  ;;  %v796_v26 = vrot.slane %v794_v60, 4  ;;  %v802_v1 = vrot.slane %v800_v2, 5  ;;  %v2537_v39 = vld [vmem:[%s3487_s1 + $0xb8] sm:$0xff]   ;;  %v3098_v57 = vld [vmem:[#allocation2 + $0x24] sm:$0xf] }
  0x5f   : > { %v2327_v62 = vcombine.low %v1250_v58, %v1260_v33  ;;  %v1054_v11 = vrot.slane %v1052_v24, 5  ;;  %v1057_v51 = vrot.slane %v1055_v38, 6  ;;  %v1061_v55 = vrot.slane %v953_v40, 6  ;;  %v3078_v40 = vld [vmem:[#allocation2 + $0x30] sm:$0xf]  ;;  %2423 = vmatpush3.bf16.msra.mxu0 %v2534_v27 }
  0x60   : > { %v793_v28 = vsel %vm2852_vm9, %v788_v17, %v792_v35  ;;  %v797_v4 = vor.u32 %v796_v26, %v792_v35  ;;  %v1066_v12 = vshrl.u32 %v1048_v47, 16  ;;  %v1069_v13 = vshll.u32 %v1048_v47, 16  ;;  %2455 = vmatpush3.bf16.msra.mxu1 %v2535_v54  ;;  %v3103_v17 = vld [vmem:[#allocation2 + $0x28] sm:$0xf] }
  0x61   : > { %1529 = vrot.lane.b32.xlu1 %v2327_v62, %s2581_s8  ;;  %v1058_v16 = vor.u32 %v1057_v51, %v1054_v11  ;;  %v1062_v46 = vor.u32 %v1061_v55, %v1060_v30  ;;  %v588_v6 = vshrl.u32 %v3049_v49, 16  ;;  %v591_v3 = vshll.u32 %v3049_v49, 16  ;;  %2456 = vmatprep.subr.bf16.mxu1 %v2536_v9  ;;  %v941_v9 = vld [vmem:[#allocation2 + $0x2c] sm:$0x1] }
  0x62   : > { %v798_v44 = vrot.slane %v797_v4, 4  ;;  %v1068_v18 = vrot.slane %v1066_v12, 5  ;;  %v1071_v19 = vrot.slane %v1069_v13, 6  ;;  %v597_v7 = vshll.u32 %v2751_v48, 16 }
  0x63   : > { %v1059_v20 = vrot.slane %v1058_v16, 4  ;;  %v1064_v31 = vrot.slane %v1062_v46, 4  ;;  %v590_v0 = vrot.slane %v588_v6, 4  ;;  %v593_v59 = vrot.slane %v591_v3, 5 }
  0x64   : > { %v803_v45 = vsel %vm2852_vm9, %v798_v44, %v802_v1  ;;  %v1072_v36 = vor.u32 %v1071_v19, %v1068_v18  ;;  %v599_v21 = vrot.slane %v597_v7, 5  ;;  %v601_v63 = vshrl.u32 %v2751_v48, 16  ;;  %2457 = vmatpush3.bf16.msra.mxu1 %v2537_v39  ;;  %v3170_v48 = vld [vmem:[#allocation2 + $0x24] sm:$0xf] }
  0x65   : > { %v2298_v10 = vcombine.low %v793_v28, %v803_v45  ;;  %v1063_v32 = vsel %vm2970_vm13, %v1059_v20, %v1062_v46  ;;  %v594_v41 = vor.u32 %v593_v59, %v590_v0  ;;  %v607_v25 = vshll.u32 %v2757_v52, 16  ;;  %v862_v45 = vld [vmem:[#allocation2 + $0x20] sm:$0x3] }
  0x66   : > { %v1073_v35 = vsel %vm2970_vm13, %v1064_v31, %v1072_v36  ;;  %v603_v47 = vrot.slane %v601_v63, 4  ;;  %v1155_v61 = vshrl.u32 %v3078_v40, 16  ;;  %v1158_v50 = vshll.u32 %v3078_v40, 16 }
  0x67   : > { %1387 = vrot.lane.b32.xlu0 %v2298_v10, %s2580_s28  ;;  %v2315_v2 = vcombine.low %v1063_v32, %v1073_v35  ;;  %v595_v52 = vrot.slane %v594_v41, 4  ;;  %v609_v58 = vrot.slane %v607_v25, 5  ;;  %v1164_v24 = vshll.u32 %v2875_v15, 16 }
  0x68   : > { %v604_v38 = vor.u32 %v603_v47, %v599_v21  ;;  %v1157_v30 = vrot.slane %v1155_v61, 4  ;;  %v1160_v27 = vrot.slane %v1158_v50, 5  ;;  %v1168_v33 = vshrl.u32 %v2875_v15, 16 }
  0x69   : > { %1472 = vrot.lane.b32.xlu1 %v2315_v2, %s2581_s8  ;;  %v600_v26 = vsel %vm2852_vm9, %v595_v52, %v599_v21  ;;  %v1166_v1 = vrot.slane %v1164_v24, 5  ;;  %v1174_v54 = vshll.u32 %v2879_v29, 16  ;;  %v968_v62 = vshrl.u32 %v3098_v57, 16 }
  0x6a   : > { %v605_v11 = vrot.slane %v604_v38, 4  ;;  %v1161_v51 = vor.u32 %v1160_v27, %v1157_v30  ;;  %v1170_v55 = vrot.slane %v1168_v33, 4  ;;  %v971_v28 = vshll.u32 %v3098_v57, 16 }
  0x6b   : > { %v1176_v4 = vrot.slane %v1174_v54, 5  ;;  %v970_v12 = vrot.slane %v968_v62, 4  ;;  %v977_v13 = vshll.u32 %v3103_v17, 16  ;;  %v981_v16 = vshrl.u32 %v3103_v17, 16 }
  0x6c   : > { %v610_v46 = vsel %vm2852_vm9, %v605_v11, %v609_v58  ;;  %v1162_v29 = vrot.slane %v1161_v51, 4  ;;  %v1171_v6 = vor.u32 %v1170_v55, %v1166_v1  ;;  %v973_v3 = vrot.slane %v971_v28, 5  ;;  %v3134_v58 = vld [vmem:[#allocation2 + $0x24] sm:$0xe]  ;;  %v1236_v51 = vld [vmem:[#allocation2 + $0x38] sm:$0x3] }
  0x6d   : > { %v2286_v44 = vcombine.low %v600_v26, %v610_v46  ;;  %v979_v18 = vrot.slane %v977_v13, 5  ;;  %v983_v19 = vrot.slane %v981_v16, 4  ;;  %v987_v20 = vshll.u32 %v941_v9, 16 }
  0x6e   : > { %v1167_v31 = vsel %vm2852_vm9, %v1162_v29, %v1166_v1  ;;  %v1172_v0 = vrot.slane %v1171_v6, 4  ;;  %v974_v59 = vor.u32 %v973_v3, %v970_v12  ;;  %v888_v36 = vshrl.u32 %v2813_v56, 16 }
  0x6f   : > { %1330 = vrot.lane.b32.xlu0 %v2286_v44, %s2580_s28  ;;  %v984_v21 = vor.u32 %v983_v19, %v979_v18  ;;  %v989_v10 = vrot.slane %v987_v20, 5  ;;  %v891_v32 = vshll.u32 %v2813_v56, 16  ;;  %v896_v41 = vrot.slane %v794_v60, 5 }
  0x70   : > { %v1177_v25 = vsel %vm2852_vm9, %v1172_v0, %v1176_v4  ;;  %v975_v39 = vrot.slane %v974_v59, 4  ;;  %v890_v35 = vrot.slane %v888_v36, 5  ;;  %v897_v47 = vrot.slane %v790_v42, 6  ;;  %v672_v59 = vld [vmem:[#allocation2 + $0x14] sm:$0x3] }
  0x71   : > { %v2322_v61 = vcombine.low %v1167_v31, %v1177_v25  ;;  %v985_v50 = vrot.slane %v984_v21, 4  ;;  %v893_v2 = vrot.slane %v891_v32, 6  ;;  %v902_v52 = vshrl.u32 %v862_v45, 16 }
  0x72   : > { %v980_v56 = vsel %vm2852_vm9, %v975_v39, %v979_v18  ;;  %v898_v38 = vor.u32 %v897_v47, %v896_v41  ;;  %v905_v30 = vshll.u32 %v862_v45, 16  ;;  %v2277_v60 = vrot.slane %v3134_v58, 9 }
  0x73   : > { %1501 = vrot.lane.b32.xlu1 %v2322_v61, %s2580_s28  ;;  %v990_v27 = vsel %vm2852_vm9, %v985_v50, %v989_v10  ;;  %v894_v5 = vor.u32 %v893_v2, %v890_v35  ;;  %v904_v42 = vrot.slane %v902_v52, 5  ;;  %v1036_v26 = vrot.slane %v3103_v17, 5 }
  0x74   : > { %v2310_v1 = vcombine.low %v980_v56, %v990_v27  ;;  %v900_v54 = vrot.slane %v898_v38, 4  ;;  %v907_v62 = vrot.slane %v905_v30, 6  ;;  %v1039_v11 = vrot.slane %v941_v9, 5  ;;  %v1049_v27 = vld [vmem:[#allocation2 + $0x2c] sm:$0x3] }
  0x75   : > { %v895_v55 = vrot.slane %v894_v5, 4  ;;  %v1037_v28 = vsel %vm2716_vm15, %v2277_v60, %v1036_v26  ;;  %v1038_v4 = vrot.slane %v1036_v26, 4  ;;  %v1262_v12 = vshrl.u32 %v2872_v8, 16 }
  0x76   : > { %1444 = vrot.lane.b32.xlu0 %v2310_v1, %s2580_s28  ;;  %v908_v46 = vor.u32 %v907_v62, %v904_v42  ;;  %v1265_v29 = vshll.u32 %v2872_v8, 16  ;;  %v1270_v6 = vrot.slane %v1168_v33, 5  ;;  %v1271_v3 = vrot.slane %v1164_v24, 6 }
  0x77   : > { %v899_v9 = vsel %vm2970_vm13, %v895_v55, %v898_v38  ;;  %v1040_v44 = vsel %vm2716_vm15, %v1038_v4, %v1039_v11  ;;  %v1264_v18 = vrot.slane %v1262_v12, 5  ;;  %v1276_v19 = vshrl.u32 %v1236_v51, 16  ;;  %v3178_v4 = vld [vmem:[#allocation2 + $0x28] sm:$0xf] }
  0x78   : > { %v909_v20 = vsel %vm2970_vm13, %v900_v54, %v908_v46  ;;  %v2313_v31 = vcombine.low %v1037_v28, %v1040_v44  ;;  %v1267_v0 = vrot.slane %v1265_v29, 6  ;;  %v1272_v8 = vor.u32 %v1271_v3, %v1270_v6  ;;  %v3186_v6 = vld [vmem:[#allocation2 + $0x2c] sm:$0x1] }
  0x79   : > { %v2304_v45 = vcombine.low %v899_v9, %v909_v20  ;;  %v1278_v33 = vrot.slane %v1276_v19, 5  ;;  %v1279_v36 = vshll.u32 %v1236_v51, 16  ;;  %v701_v15 = vshrl.u32 %v2740_v37, 16  ;;  %v316_v19 = vld [vmem:[%s2647_s30 + $0x44] sm:$0x3] }
  0x7a   : > { %1459 = vrot.lane.b32.xlu0 %v2313_v31, %s2579_s9  ;;  %v1268_v24 = vor.u32 %v1267_v0, %v1264_v18  ;;  %v1274_v21 = vrot.slane %v1272_v8, 4  ;;  %v704_v10 = vshll.u32 %v2740_v37, 16  ;;  %v709_v32 = vrot.slane %v601_v63, 5 }
  0x7b   : > { %1417 = vrot.lane.b32.xlu1 %v2304_v45, %s2581_s8  ;;  %v1281_v41 = vrot.slane %v1279_v36, 6  ;;  %v703_v25 = vrot.slane %v701_v15, 5  ;;  %v710_v39 = vrot.slane %v597_v7, 6  ;;  %v715_v35 = vshrl.u32 %v672_v59, 16 }
  0x7c   : > { %v1269_v47 = vrot.slane %v1268_v24, 4  ;;  %v706_v61 = vrot.slane %v704_v10, 6  ;;  %v718_v50 = vshll.u32 %v672_v59, 16  ;;  %v1075_v2 = vshrl.u32 %v3134_v58, 16 }
  0x7d   : > { %v1282_v52 = vor.u32 %v1281_v41, %v1278_v33  ;;  %v711_v56 = vor.u32 %v710_v39, %v709_v32  ;;  %v717_v38 = vrot.slane %v715_v35, 5  ;;  %v1078_v37 = vshll.u32 %v3134_v58, 16  ;;  %v3199_v32 = vld [vmem:[#allocation2 + $0x18] sm:$0xf]  ;;  %v2541_v35 = vld [vmem:[%s3488_s2] ss:$0 sm:$0xff] }
  0x7e   : > { %v1273_v63 = vsel %vm2970_vm13, %v1269_v47, %v1272_v8  ;;  %v707_v30 = vor.u32 %v706_v61, %v703_v25  ;;  %v720_v60 = vrot.slane %v718_v50, 6  ;;  %v1077_v5 = vrot.slane %v1075_v2, 5  ;;  %v3210_v61 = vld [vmem:[#allocation2 + $0x1c] sm:$0xf] }
  0x7f   : > { %v1283_v7 = vsel %vm2970_vm13, %v1274_v21, %v1282_v52  ;;  %v713_v42 = vrot.slane %v711_v56, 4  ;;  %v1080_v26 = vrot.slane %v1078_v37, 6  ;;  %v1083_v1 = vrot.slane %v981_v16, 5  ;;  %v2542_v37 = vld [vmem:[%s3489_s3] ss:$0 sm:$0xff] }
  0x80   : > { %v2328_v54 = vcombine.low %v1273_v63, %v1283_v7  ;;  %v708_v62 = vrot.slane %v707_v30, 4  ;;  %v721_v58 = vor.u32 %v720_v60, %v717_v38  ;;  %v1084_v11 = vrot.slane %v977_v13, 6 }
  0x81   : > { %v1081_v51 = vor.u32 %v1080_v26, %v1077_v5  ;;  %v1089_v55 = vshrl.u32 %v1049_v27, 16  ;;  %v1092_v28 = vshll.u32 %v1049_v27, 16  ;;  %v805_v12 = vshrl.u32 %v3170_v48, 16 }
  0x82   : > { %1531 = vrot.lane.b32.xlu1 %v2328_v54, %s2581_s8  ;;  %v712_v46 = vsel %vm2970_vm13, %v708_v62, %v711_v56  ;;  %v722_v16 = vsel %vm2970_vm13, %v713_v42, %v721_v58  ;;  %v1085_v29 = vor.u32 %v1084_v11, %v1083_v1  ;;  %v808_v13 = vshll.u32 %v3170_v48, 16  ;;  %v3223_v11 = vld [vmem:[#allocation2 + $0x20] sm:$0x1] }
  0x83   : > { %v2292_v3 = vcombine.low %v712_v46, %v722_v16  ;;  %v1082_v9 = vrot.slane %v1081_v51, 4  ;;  %v1091_v44 = vrot.slane %v1089_v55, 5  ;;  %v1094_v18 = vrot.slane %v1092_v28, 6  ;;  %v3227_v28 = vld [vmem:[#allocation2 + $0x24] sm:$0xe] }
  0x84   : > { %v1087_v20 = vrot.slane %v1085_v29, 4  ;;  %v807_v31 = vrot.slane %v805_v12, 4  ;;  %v810_v0 = vrot.slane %v808_v13, 5  ;;  %v814_v8 = vshll.u32 %v3178_v4, 16  ;;  %v548_v13 = vld [vmem:[#allocation2 + $0x44] sm:$0x3] }
  0x85   : > { %1360 = vrot.lane.b32.xlu0 %v2292_v3, %s2581_s8  ;;  %v1086_v59 = vsel %vm2970_vm13, %v1082_v9, %v1085_v29  ;;  %v1095_v45 = vor.u32 %v1094_v18, %v1091_v44  ;;  %v818_v33 = vshrl.u32 %v3178_v4, 16  ;;  %v824_v36 = vshll.u32 %v3186_v6, 16  ;;  %v3229_v3 = vld [vmem:[#allocation2 + $0x30] sm:$0xf] }
  0x86   : > { %v811_v15 = vor.u32 %v810_v0, %v807_v31  ;;  %v816_v24 = vrot.slane %v814_v8, 5  ;;  %v333_v21 = vunpack.c.h.bf16 %v2809_v53  ;;  %v334_v10 = vunpack.c.l.bf16 %v316_v19 }
  0x87   : > { %v1096_v41 = vsel %vm2970_vm13, %v1087_v20, %v1095_v45  ;;  %v820_v25 = vrot.slane %v818_v33, 4  ;;  %v826_v39 = vrot.slane %v824_v36, 5  ;;  %v357_v47 = vmul.f32 %v2541_v35, %v332_v14  ;;  %v3238_v45 = vld [vmem:[#allocation2 + $0x34] sm:$0xf] }
  0x88   : > { %v2316_v50 = vcombine.low %v1086_v59, %v1096_v41  ;;  %v812_v2 = vrot.slane %v811_v15, 4  ;;  %v358_v52 = vmul.f32 %v2541_v35, %v333_v21  ;;  %v359_v56 = vmul.f32 %v2541_v35, %v334_v10  ;;  %v3245_v21 = vld [vmem:[#allocation2 + $0x38] sm:$0x1] }
  0x89   : > { %v821_v38 = vor.u32 %v820_v25, %v816_v24  ;;  %v382_v63 = vadd.f32 %v2542_v37, %v357_v47  ;;  %v612_v30 = vshrl.u32 %v3199_v32, 16  ;;  %v615_v60 = vshll.u32 %v3199_v32, 16 }
  0x8a   : > { %1474 = vrot.lane.b32.xlu1 %v2316_v50, %s2581_s8  ;;  %v817_v53 = vsel %vm2852_vm9, %v812_v2, %v816_v24  ;;  %v383_v14 = vadd.f32 %v2542_v37, %v358_v52  ;;  %v384_v27 = vadd.f32 %v2542_v37, %v359_v56  ;;  %v621_v5 = vshll.u32 %v3210_v61, 16 }
  0x8b   : > { %v822_v7 = vrot.slane %v821_v38, 4  ;;  %vm400_vm14 = vcmp.ge.f32.partialorder %v382_v63, 0.0  ;;  %v418_v42 = vmul.f32 0.2, %v382_v63  ;;  %v614_v26 = vrot.slane %v612_v30, 4 }
  0x8c   : > { %vm401_vm0 = vcmp.ge.f32.partialorder %v383_v14, 0.0  ;;  %vm402_vm1 = vcmp.ge.f32.partialorder %v384_v27, 0.0  ;;  %v419_v1 = vmul.f32 0.2, %v383_v14  ;;  %v420_v54 = vmul.f32 0.2, %v384_v27 }
  0x8d   : > { %v827_v62 = vsel %vm2852_vm9, %v822_v7, %v826_v39  ;;  %v436_v58 = vsel %vm400_vm14, %v382_v63, %v418_v42  ;;  %v617_v51 = vrot.slane %v615_v60, 5  ;;  %v623_v55 = vrot.slane %v621_v5, 5  ;;  %v3249_v39 = vld [vmem:[#allocation2 + $0x18] sm:$0xe] }
  0x8e   : > { %v2299_v12 = vcombine.low %v817_v53, %v827_v62  ;;  %v437_v46 = vsel %vm401_vm0, %v383_v14, %v419_v1  ;;  %v438_v16 = vsel %vm402_vm1, %v384_v27, %v420_v54  ;;  %v2385_v29 = vpack.c.bf16 %v436_v58, %v436_v58 }
  0x8f   : > { %v2386_v9 = vpack.c.bf16 %v437_v46, %v437_v46  ;;  %v2387_v44 = vpack.c.bf16 %v438_v16, %v438_v16  ;;  %v618_v18 = vor.u32 %v617_v51, %v614_v26  ;;  %v625_v19 = vshrl.u32 %v3210_v61, 16 }
  0x90   : > { %1389 = vrot.lane.b32.xlu0 %v2299_v12, %s2580_s28  ;;  %546 = vst.msk [vmem:[#allocation2 + $0x3c] sm:$0xf] %vm517_vm2, %v2385_v29  ;;  %v631_v20 = vshll.u32 %v3223_v11, 16  ;;  %v2275_v31 = vrot.slane %v3227_v28, 9  ;;  %v856_v0 = vrot.slane %v3178_v4, 5  ;;  %v859_v59 = vrot.slane %v3186_v6, 5 }
  0x91   : > { %547 = vst.msk [vmem:[#allocation2 + $0x40] sm:$0xf] %vm517_vm2, %v2386_v9  ;;  %v549_v36 = vsel %vm2678_vm11, %v2387_v44, %v548_v13  ;;  %v619_v15 = vrot.slane %v618_v18, 4  ;;  %v627_v24 = vrot.slane %v625_v19, 4  ;;  %v992_v10 = vshrl.u32 %v3229_v3, 16 }
  0x92   : > { %550 = vst [vmem:[#allocation2 + $0x44] sm:$0x3] %v549_v36  ;;  %v633_v41 = vrot.slane %v631_v20, 5  ;;  %v858_v25 = vrot.slane %v856_v0, 4  ;;  %v995_v6 = vshll.u32 %v3229_v3, 16  ;;  %v3253_v43 = vsel %vm2716_vm15, %v2275_v31, %v856_v0 }
  0x93   : > { %v628_v35 = vor.u32 %v627_v24, %v623_v55  ;;  %v994_v47 = vrot.slane %v992_v10, 4  ;;  %v1001_v50 = vshll.u32 %v3238_v45, 16  ;;  %v1005_v56 = vshrl.u32 %v3238_v45, 16 }
  0x94   : > { %v3258_v2 = vsel %vm2716_vm15, %v858_v25, %v859_v59  ;;  %v997_v52 = vrot.slane %v995_v6, 5  ;;  %v1011_v38 = vshll.u32 %v3245_v21, 16  ;;  %v624_v37 = vsel %vm2852_vm9, %v619_v15, %v623_v55 }
  0x95   : > { %v629_v63 = vrot.slane %v628_v35, 4  ;;  %v1003_v30 = vrot.slane %v1001_v50, 5  ;;  %v2272_v60 = vrot.slane %v3249_v39, 9  ;;  %v1007_v14 = vrot.slane %v1005_v56, 4 }
  0x96   : > { %v998_v53 = vor.u32 %v997_v52, %v994_v47  ;;  %v1013_v27 = vrot.slane %v1011_v38, 5  ;;  %v666_v7 = vrot.slane %v3210_v61, 5  ;;  %v2302_v1 = vcombine.low %v3253_v43, %v3258_v2 }
  0x97   : > { %v3270_v42 = vld [vmem:[#allocation2 + $0x3c] sm:$0xf]  ;;  %v634_v26 = vsel %vm2852_vm9, %v629_v63, %v633_v41  ;;  %v669_v62 = vrot.slane %v3223_v11, 5  ;;  %v911_v58 = vshrl.u32 %v3227_v28, 16  ;;  %v1008_v44 = vor.u32 %v1007_v14, %v1003_v30 }
  0x98   : > { %v3276_v54 = vld [vmem:[#allocation2 + $0x3c] sm:$0xe]  ;;  %v3280_v51 = vld [vmem:[#allocation2 + $0x40] sm:$0xf]  ;;  %v1179_v55 = vshrl.u32 %v3270_v42, 16  ;;  %v1182_v12 = vshll.u32 %v3270_v42, 16  ;;  %v2287_v46 = vcombine.low %v624_v37, %v634_v26  ;;  %v667_v6 = vsel %vm2716_vm15, %v2272_v60, %v666_v7 }
  0x99   : > { %v999_v16 = vrot.slane %v998_v53, 4  ;;  %v1129_v29 = vld [vmem:[#allocation2 + $0x44] sm:$0x1]  ;;  %v1188_v13 = vshll.u32 %v3280_v51, 16  ;;  %v1192_v9 = vshrl.u32 %v3280_v51, 16  ;;  %v2281_v18 = vrot.slane %v3276_v54, 9 }
  0x9a   : > { %v1181_v20 = vrot.slane %v1179_v55, 4  ;;  %v1184_v11 = vrot.slane %v1182_v12, 5  ;;  %v1198_v31 = vshll.u32 %v1129_v29, 16  ;;  %1332 = vrot.lane.b32.xlu0 %v2287_v46, %s2580_s28  ;;  %v1009_v15 = vrot.slane %v1008_v44, 4  ;;  %v863_v53 = vld [vmem:[#allocation2 + $0x2c] sm:$0x3] }
  0x9b   : > { %v1004_v0 = vsel %vm2852_vm9, %v999_v16, %v1003_v30  ;;  %v1190_v59 = vrot.slane %v1188_v13, 5  ;;  %v1194_v36 = vrot.slane %v1192_v9, 4  ;;  %v1230_v24 = vrot.slane %v3280_v51, 5 }
  0x9c   : > { %v1185_v10 = vor.u32 %v1184_v11, %v1181_v20  ;;  %v1200_v41 = vrot.slane %v1198_v31, 5  ;;  %v1233_v25 = vrot.slane %v1129_v29, 5  ;;  %v1014_v47 = vsel %vm2852_vm9, %v1009_v15, %v1013_v27  ;;  %v1237_v15 = vld [vmem:[#allocation2 + $0x44] sm:$0x3] }
  0x9d   : > { %v1195_v35 = vor.u32 %v1194_v36, %v1190_v59  ;;  %v3297_v52 = vsel %vm2716_vm15, %v2281_v18, %v1230_v24  ;;  %v1232_v38 = vrot.slane %v1230_v24, 4  ;;  %v2311_v63 = vcombine.low %v1004_v0, %v1014_v47 }
  0x9e   : > { %v1186_v37 = vrot.slane %v1185_v10, 4  ;;  %v668_v30 = vrot.slane %v666_v7, 4  ;;  %v913_v14 = vrot.slane %v911_v58, 5  ;;  %v914_v60 = vshll.u32 %v3227_v28, 16 }
  0x9f   : > { %v1196_v26 = vrot.slane %v1195_v35, 4  ;;  %v1234_v55 = vsel %vm2716_vm15, %v1232_v38, %v1233_v25  ;;  %v919_v12 = vrot.slane %v818_v33, 5  ;;  %1446 = vrot.lane.b32.xlu0 %v2311_v63, %s2580_s28  ;;  %v920_v58 = vrot.slane %v814_v8, 6  ;;  %v3314_v33 = vld [vmem:[#allocation2 + $0x30] sm:$0xe] }
  0xa0   : > { %v1191_v27 = vsel %vm2852_vm9, %v1186_v37, %v1190_v59  ;;  %v2326_v46 = vcombine.low %v3297_v52, %v1234_v55  ;;  %v670_v7 = vsel %vm2716_vm15, %v668_v30, %v669_v62  ;;  %v916_v29 = vrot.slane %v914_v60, 6 }
  0xa1   : > { %v1201_v16 = vsel %vm2852_vm9, %v1196_v26, %v1200_v41  ;;  %v2290_v28 = vcombine.low %v667_v6, %v670_v7  ;;  %v925_v44 = vshrl.u32 %v863_v53, 16  ;;  %v921_v20 = vor.u32 %v920_v58, %v919_v12 }
  0xa2   : > { %v2323_v18 = vcombine.low %v1191_v27, %v1201_v16  ;;  %v928_v11 = vshll.u32 %v863_v53, 16  ;;  %v2278_v31 = vrot.slane %v3314_v33, 9  ;;  %v917_v0 = vor.u32 %v916_v29, %v913_v14 }
  0xa3   : > { %v927_v59 = vrot.slane %v925_v44, 5  ;;  %v1043_v62 = vrot.slane %v3238_v45, 5  ;;  %v1046_v36 = vrot.slane %v3245_v21, 5  ;;  %1347 = vrot.lane.b32.xlu0 %v2290_v28, %s2579_s9  ;;  %v923_v34 = vrot.slane %v921_v20, 4 }
  0xa4   : > { %1503 = vrot.lane.b32.xlu1 %v2323_v18, %s2580_s28  ;;  %v930_v8 = vrot.slane %v928_v11, 6  ;;  %v1285_v24 = vshrl.u32 %v3276_v54, 16  ;;  %v1288_v10 = vshll.u32 %v3276_v54, 16  ;;  %v918_v41 = vrot.slane %v917_v0, 4  ;;  %v1401_v11 = vpop.permute.xlu1 %1400  ;;  %v1050_v0 = vld [vmem:[#allocation2 + $0x38] sm:$0x3] }
  0xa5   : > { %v1044_v25 = vsel %vm2716_vm15, %v2278_v31, %v1043_v62  ;;  %v1045_v6 = vrot.slane %v1043_v62, 4  ;;  %v1293_v35 = vrot.slane %v1192_v9, 5  ;;  %v1294_v38 = vrot.slane %v1188_v13, 6  ;;  %v673_v13 = vld [vmem:[#allocation2 + $0x20] sm:$0x3] }
  0xa6   : > { %v931_v47 = vor.u32 %v930_v8, %v927_v59  ;;  %v1287_v52 = vrot.slane %v1285_v24, 5  ;;  %v1290_v21 = vrot.slane %v1288_v10, 6  ;;  %v922_v37 = vsel %vm2970_vm13, %v918_v41, %v921_v20 }
  0xa7   : > { %v1047_v63 = vsel %vm2716_vm15, %v1045_v6, %v1046_v36  ;;  %v1299_v30 = vshrl.u32 %v1237_v15, 16  ;;  %v1302_v53 = vshll.u32 %v1237_v15, 16  ;;  %v1295_v26 = vor.u32 %v1294_v38, %v1293_v35 }
  0xa8   : > { %1404 = vrot.lane.b32.xlu1 %v2302_v1, %s2579_s9  ;;  %v932_v54 = vsel %vm2970_vm13, %v923_v34, %v931_v47  ;;  %v2314_v9 = vcombine.low %v1044_v25, %v1047_v63  ;;  %v1291_v14 = vor.u32 %v1290_v21, %v1287_v52  ;;  %v724_v22 = vshrl.u32 %v3249_v39, 16  ;;  %v1344_v34 = vpop.permute.xlu0 %1343 }
  0xa9   : > { %v2305_v55 = vcombine.low %v922_v37, %v932_v54  ;;  %v1301_v60 = vrot.slane %v1299_v30, 5  ;;  %v1304_v12 = vrot.slane %v1302_v53, 6  ;;  %v1297_v7 = vrot.slane %v1295_v26, 4 }
  0xaa   : > { %1461 = vrot.lane.b32.xlu0 %v2314_v9, %s2579_s9  ;;  %v1292_v27 = vrot.slane %v1291_v14, 4  ;;  %v727_v58 = vshll.u32 %v3249_v39, 16  ;;  %v732_v43 = vrot.slane %v625_v19, 5  ;;  %v726_v1 = vrot.slane %v724_v22, 5 }
  0xab   : > { %v1305_v2 = vor.u32 %v1304_v12, %v1301_v60  ;;  %v733_v16 = vrot.slane %v621_v5, 6  ;;  %v738_v28 = vshrl.u32 %v673_v13, 16  ;;  %v741_v18 = vshll.u32 %v673_v13, 16 }
  0xac   : > { %1518 = vrot.lane.b32.xlu1 %v2326_v46, %s2579_s9  ;;  %v1296_v29 = vsel %vm2970_vm13, %v1292_v27, %v1295_v26  ;;  %v729_v44 = vrot.slane %v727_v58, 6  ;;  %v1098_v20 = vshrl.u32 %v3314_v33, 16  ;;  %v1101_v59 = vshll.u32 %v3314_v33, 16  ;;  %v2543_v58 = vld [vmem:[#allocation2 + $0x10] sm:$0xf] }
  0xad   : > { %v1306_v39 = vsel %vm2970_vm13, %v1297_v7, %v1305_v2  ;;  %v734_v19 = vor.u32 %v733_v16, %v732_v43  ;;  %v740_v31 = vrot.slane %v738_v28, 5  ;;  %v743_v36 = vrot.slane %v741_v18, 6  ;;  %v2544_v43 = vld [vmem:[#allocation2 + $0xc] sm:$0xf] }
  0xae   : > { %v2329_v5 = vcombine.low %v1296_v29, %v1306_v39  ;;  %v730_v62 = vor.u32 %v729_v44, %v726_v1  ;;  %v1100_v46 = vrot.slane %v1098_v20, 5  ;;  %v1103_v15 = vrot.slane %v1101_v59, 6  ;;  %v2545_v29 = vld [vmem:[#allocation2 + $0x4] sm:$0xf]  ;;  %v2546_v44 = vld [vmem:[#allocation2] sm:$0xf] }
  0xaf   : > { %v736_v8 = vrot.slane %v734_v19, 4  ;;  %v1106_v24 = vrot.slane %v1005_v56, 5  ;;  %v1107_v10 = vrot.slane %v1001_v50, 6  ;;  %v744_v25 = vor.u32 %v743_v36, %v740_v31  ;;  %v1515_v56 = vpop.permute.xlu1 %1514  ;;  %v2548_v59 = vld [vmem:[#allocation2 + $0x24] sm:$0xf] }
  0xb0   : > { %1419 = vrot.lane.b32.xlu1 %v2305_v55, %s2581_s8  ;;  %v731_v41 = vrot.slane %v730_v62, 4  ;;  %v1112_v6 = vshrl.u32 %v1050_v0, 16  ;;  %v1115_v35 = vshll.u32 %v1050_v0, 16  ;;  %v1104_v33 = vor.u32 %v1103_v15, %v1100_v46  ;;  %v2547_v0 = vld [vmem:[#allocation2 + $0x28] sm:$0xf] }
  0xb1   : > { %v1108_v47 = vor.u32 %v1107_v10, %v1106_v24  ;;  %v745_v21 = vsel %vm2970_vm13, %v736_v8, %v744_v25  ;;  %v2296_v26 = vcombine.low %v3170_v48, %v3178_v4  ;;  %v2320_v13 = vcombine.low %v3270_v42, %v3280_v51 }
  0xb2   : > { %v735_v52 = vsel %vm2970_vm13, %v731_v41, %v734_v19  ;;  %v1114_v38 = vrot.slane %v1112_v6, 5  ;;  %v1117_v37 = vrot.slane %v1115_v35, 6  ;;  %v1105_v30 = vrot.slane %v1104_v33, 4  ;;  %v2550_v41 = vld [vmem:[#allocation2 + $0x18] sm:$0xf] }
  0xb3   : > { %v2293_v63 = vcombine.low %v735_v52, %v745_v21  ;;  %v1110_v50 = vrot.slane %v1108_v47, 4  ;;  %v1458_v54 = vpop.permute.xlu0 %1457  ;;  %v2284_v60 = vcombine.low %v3199_v32, %v3210_v61  ;;  %v2308_v12 = vcombine.low %v3229_v3, %v3238_v45 }
  0xb4   : > { %1533 = vrot.lane.b32.xlu1 %v2329_v5, %s2581_s8  ;;  %v1118_v53 = vor.u32 %v1117_v37, %v1114_v38  ;;  %v1109_v9 = vsel %vm2970_vm13, %v1105_v30, %v1108_v47  ;;  %v1403_v22 = vpop.permute.xlu1 %1402  ;;  %v2294_v2 = vcombine.low %v2544_v43, %v2543_v58  ;;  %vm1535_vm2 = vcmask 261120   ;;  %v2551_v38 = vld [vmem:[#allocation2 + $0x1c] sm:$0xf]  ;;  %v2552_v37 = vld [vmem:[#allocation2 + $0x18] sm:$0xf] }
  0xb5   : > { %1362 = vrot.lane.b32.xlu0 %v2293_v63, %s2581_s8  ;;  %vm1545_vm11 = vcmask 523264   ;;  %v2282_v18 = vcombine.low %v2546_v44, %v2545_v29  ;;  %vm1552_vm15 = vcmask 785408   ;;  %v2318_v5 = vcombine.low %v2548_v59, %v2547_v0 }
  0xb6   : > { %v1119_v14 = vsel %vm2970_vm13, %v1110_v50, %v1118_v53  ;;  %v2295_v63 = vcombine.low %v2552_v37, %v2551_v38  ;;  %v2553_v53 = vld [vmem:[#allocation2 + $0x34] sm:$0xf]  ;;  %vm2008_vm3 = vcmask 516096   ;;  %v2582_v3 = vmov 0.0  }
  0xb7   : > { %v2317_v55 = vcombine.low %v1109_v9, %v1119_v14  ;;  %v3372_v27 = vpop.permute.xlu0 %1345  ;;  %v2319_v9 = vcombine.low %v3078_v40, %v2553_v53  ;;  %v2307_v40 = vcombine.low %v3098_v57, %v3103_v17  ;;  %2010 = vst.msk [vmem:[%s3438_s13] sm:$0x1] %vm2008_vm3, %v2582_v3  ;;  %vm2097_vm4 = vcmask 519168  }
  0xb9   : > { %1476 = vrot.lane.b32.xlu1 %v2317_v55, %s2581_s8  ;;  %s3432_s8 = scalar_lea.vmem %s3491_s5, %s3506_s21 }
  0xba   : > { %2009 = vst.msk [vmem:[%s3432_s8] sm:$0x1] %vm2008_vm3, %v2582_v3 }
  0xbb   : > { %v1386_v23 = vpop.permute.xlu0 %1385 }
  0xbc   : > { %v1564_v28 = vsel %vm1535_vm2, %v2294_v2, %v1386_v23  ;;  %v2554_v23 = vld [vmem:[#allocation2 + $0x10] sm:$0xf] }
  0xbd   : > { %v1517_v7 = vpop.permute.xlu1 %1516  ;;  %v1572_v19 = vsel %vm1545_vm11, %v1564_v28, %v1401_v11  ;;  %v2549_v11 = vld [vmem:[#allocation2 + $0x1c] sm:$0xf]  ;;  %v2283_v58 = vcombine.low %v3049_v49, %v2554_v23 }
  0xbe   : > { %v2306_v25 = vcombine.low %v2550_v41, %v2549_v11 }
  0xbf   : > { %v1500_v1 = vpop.permute.xlu0 %1499 }
  0xc0   : > { %v1612_v8 = vsel %vm1535_vm2, %v2318_v5, %v1500_v1 }
  0xc1   : > { %v1620_v10 = vsel %vm1545_vm11, %v1612_v8, %v1515_v56 }
  0xc4   : > { %v1329_v16 = vpop.permute.xlu1 %1328 }
  0xc5   : > { %v1538_v62 = vsel %vm1535_vm2, %v2282_v18, %v1329_v16 }
  0xc6   : > { %v1547_v46 = vsel %vm1545_vm11, %v1538_v62, %v1344_v34 }
  0xc7   : > { %v1443_v20 = vpop.permute.xlu0 %1442 }
  0xc8   : > { %v1588_v35 = vsel %vm1535_vm2, %v2306_v25, %v1443_v20 }
  0xc9   : > { %v1596_v47 = vsel %vm1545_vm11, %v1588_v35, %v1458_v54 }
  0xca   : > { %v1416_v39 = vpop.permute.xlu1 %1415 }
  0xcb   : > { %v1578_v31 = vsel %vm1552_vm15, %v1572_v19, %v1416_v39 }
  0xcc   : > { %1922 = vmatprep.mubr.bf16.mxu0 %v1578_v31 }
  0xcf   : > { %v1359_v36 = vpop.permute.xlu0 %1358 }
  0xd0   : > { %v1554_v15 = vsel %vm1552_vm15, %v1547_v46, %v1359_v36 }
  0xd1   : > { %1923 = vmatmul.mubr.bf16.vlgmr.msra.gmra.mrb[0].mxu0 %v1554_v15 }
  0xd3   : > { %v1530_v24 = vpop.permute.xlu1 %1529 }
  0xd4   : > { %v1626_v6 = vsel %vm1552_vm15, %v1620_v10, %v1530_v24 }
  0xd5   : > { %1979 = vmatprep.mubr.bf16.mxu1 %v1626_v6 }
  0xd9   : > { %v1388_v52 = vpop.permute.xlu0 %1387 }
  0xda   : > { %v1567_v30 = vsel %vm1535_vm2, %v2295_v63, %v1388_v52 }
  0xdb   : > { %v1473_v33 = vpop.permute.xlu1 %1472  ;;  %v1574_v55 = vsel %vm1545_vm11, %v1567_v30, %v1403_v22  ;;  %v2011_v30 = vlaneseq }
  0xdc   : > { %v1602_v34 = vsel %vm1552_vm15, %v1596_v47, %v1473_v33 }
  0xdd   : > { %1980 = vmatmul.mubr.bf16.vlgmr.msra.gmra.mrb[0].mxu1 %v1602_v34 }
  0xe1   : > { %v1331_v21 = vpop.permute.xlu0 %1330 }
  0xe2   : > { %v1541_v1 = vsel %vm1535_vm2, %v2283_v58, %v1331_v21 }
  0xe3   : > { %v1549_v44 = vsel %vm1545_vm11, %v1541_v1, %v3372_v27 }
  0xe5   : > { %v1502_v56 = vpop.permute.xlu1 %1501 }
  0xe6   : > { %v1615_v43 = vsel %vm1535_vm2, %v2319_v9, %v1502_v56 }
  0xe7   : > { %v1622_v28 = vsel %vm1545_vm11, %v1615_v43, %v1517_v7 }
  0xe8   : > { %v1445_v50 = vpop.permute.xlu0 %1444 }
  0xe9   : > { %v1591_v18 = vsel %vm1535_vm2, %v2307_v40, %v1445_v50  ;;  %v2012_v50 = vshrl.u32 %v2011_v30, 7 }
  0xeb   : > { %vm2014_vm5 = vcmp.lt.s32.totalorder %v2012_v50, 3 }
  0xec   : > { %v1460_v2 = vpop.permute.xlu0 %1459 }
  0xed   : > { %v1418_v14 = vpop.permute.xlu1 %1417  ;;  %v1598_v20 = vsel %vm1545_vm11, %v1591_v18, %v1460_v2 }
  0xee   : > { %v1581_v54 = vsel %vm1552_vm15, %v1574_v55, %v1418_v14 }
  0xef   : > { %1930 = vmatprep.mubr.bf16.mxu0 %v1581_v54 }
  0xf4   : > { %v1532_v16 = vpop.permute.xlu1 %1531 }
  0xf5   : > { %v1629_v29 = vsel %vm1552_vm15, %v1622_v28, %v1532_v16 }
  0xf6   : > { %1987 = vmatprep.mubr.bf16.mxu1 %v1629_v29 }
  0xf7   : > { %v1361_v22 = vpop.permute.xlu0 %1360 }
  0xf8   : > { %v1557_v49 = vsel %vm1552_vm15, %v1549_v44, %v1361_v22 }
  0xf9   : > { %1931 = vmatmul.mubr.bf16.gmra.mrb[4].mxu0 %v1557_v49 }
  0xfc   : > { %v1475_v39 = vpop.permute.xlu1 %1474 }
  0xfd   : > { %v1605_v7 = vsel %vm1552_vm15, %v1598_v20, %v1475_v39 }
  0xfe   : > { %1988 = vmatmul.mubr.bf16.gmra.mrb[4].mxu1 %v1605_v7 }
 0x102   : > { %v1390_v19 = vpop.permute.xlu0 %1389 }
 0x103   : > { %v1570_v27 = vsel %vm1535_vm2, %v2296_v26, %v1390_v19 }
 0x10c   : > { %v1333_v31 = vpop.permute.xlu0 %1332 }
 0x10d   : > { %v1544_v48 = vsel %vm1535_vm2, %v2284_v60, %v1333_v31 }
 0x111   : > { %v1447_v0 = vpop.permute.xlu0 %1446 }
 0x112   : > { %v1594_v32 = vsel %vm1535_vm2, %v2308_v12, %v1447_v0 }
 0x115   : > { %v1348_v17 = vpop.permute.xlu0 %1347 }
 0x116   : > { %v1504_v59 = vpop.permute.xlu1 %1503  ;;  %v1551_v24 = vsel %vm1545_vm11, %v1544_v48, %v1348_v17 }
 0x117   : > { %v1618_v15 = vsel %vm1535_vm2, %v2320_v13, %v1504_v59 }
 0x11a   : > { %v1405_v57 = vpop.permute.xlu1 %1404 }
 0x11b   : > { %v1576_v36 = vsel %vm1545_vm11, %v1570_v27, %v1405_v57 }
 0x11c   : > { %v1462_v62 = vpop.permute.xlu0 %1461 }
 0x11d   : > { %v1600_v61 = vsel %vm1545_vm11, %v1594_v32, %v1462_v62 }
 0x11e   : > { %v1519_v5 = vpop.permute.xlu1 %1518 }
 0x11f   : > { %v1624_v4 = vsel %vm1545_vm11, %v1618_v15, %v1519_v5 }
 0x122   : > { %v1420_v46 = vpop.permute.xlu1 %1419 }
 0x123   : > { %v1584_v8 = vsel %vm1552_vm15, %v1576_v36, %v1420_v46 }
 0x124   : > { %1938 = vmatprep.mubr.bf16.mxu0 %v1584_v8 }
 0x126   : > { %v1534_v26 = vpop.permute.xlu1 %1533 }
 0x127   : > { %v1632_v10 = vsel %vm1552_vm15, %v1624_v4, %v1534_v26  ;;  %v1363_v11 = vpop.permute.xlu0 %1362 }
 0x128   : > { %1995 = vmatprep.mubr.bf16.mxu1 %v1632_v10  ;;  %v1560_v42 = vsel %vm1552_vm15, %v1551_v24, %v1363_v11 }
 0x129   : > { %1939 = vmatmul.mubr.bf16.gmra.mrb[8].mxu0 %v1560_v42 }
 0x12b   : > { %v1477_v51 = vpop.permute.xlu1 %1476 }
 0x12c   : > { %v1608_v13 = vsel %vm1552_vm15, %v1600_v61, %v1477_v51 }
 0x12d   : > { %1996 = vmatmul.mubr.bf16.gmra.mrb[8].mxu1 %v1608_v13 }
 0x1a4   : > { %v2424_v45 = vpop.f32.mrb[0].mxu0 }
 0x1a5   : > { %v2425_v60 = vpop.f32.mrb[1].mxu0 }
 0x1a6   : > { %v2426_v12 = vadd.f32 %v2425_v60, %v2424_v45  ;;  %v2427_v41 = vpop.f32.mrb[2].mxu0 }
 0x1a7   : > { %v2428_v25 = vpop.f32.mrb[3].mxu0 }
 0x1a8   : > { %v2429_v6 = vadd.f32 %v2428_v25, %v2427_v41 }
 0x1b0   : > { %v2458_v35 = vpop.f32.mrb[0].mxu1 }
 0x1b1   : > { %v2459_v33 = vpop.f32.mrb[1].mxu1 }
 0x1b2   : > { %v2460_v47 = vadd.f32 %v2459_v33, %v2458_v35  ;;  %v2461_v34 = vpop.f32.mrb[2].mxu1 }
 0x1b3   : > { %v2462_v52 = vpop.f32.mrb[3].mxu1 }
 0x1b4   : > { %v1982_v21 = vadd.f32 %v2460_v47, %v2426_v12  ;;  %v2463_v38 = vadd.f32 %v2462_v52, %v2461_v34 }
 0x1b6   : > { %v2388_v37 = vpack.c.bf16 %v1982_v21, %v1982_v21  ;;  %v1985_v63 = vadd.f32 %v2463_v38, %v2429_v6  ;;  %v2020_v2 = vsel %vm2014_vm5, %v1982_v21, 0.0  ;;  %v2026_v21 = vld [vmem:[%s3432_s8] sm:$0x1] }
 0x1b7   : > { %v2048_v22 = vmul.f32 %v2020_v2, %v2020_v2  ;;  %v2027_v20 = vsel %vm1545_vm11, %v2020_v2, 0.0 }
 0x1b8   : > { %2098 = vst.msk [vmem:[%s3448_s17] sm:$0xf] %vm2097_vm4, %v2388_v37  ;;  %v2389_v56 = vpack.c.bf16 %v1985_v63, %v1985_v63  ;;  %v2047_v63 = vld [vmem:[%s3438_s13] sm:$0x1] }
 0x1b9   : > { %v2054_v0 = vsel %vm1545_vm11, %v2048_v22, 0.0 }
 0x1ba   : > { %2099 = vst.msk [vmem:[%s3448_s17 + $0x4] sm:$0xf] %vm2097_vm4, %v2389_v56 }
 0x1cc   : > { %v2430_v53 = vpop.f32.mrb[4].mxu0 }
 0x1cd   : > { %v2431_v9 = vpop.f32.mrb[5].mxu0 }
 0x1ce   : > { %v2432_v14 = vadd.f32 %v2431_v9, %v2430_v53  ;;  %v2433_v55 = vpop.f32.mrb[6].mxu0 }
 0x1cf   : > { %v2434_v54 = vpop.f32.mrb[7].mxu0 }
 0x1d0   : > { %v2435_v23 = vadd.f32 %v2434_v54, %v2433_v55 }
 0x1d1   : > { %v2464_v58 = vpop.f32.mrb[4].mxu1 }
 0x1d2   : > { %v2465_v43 = vpop.f32.mrb[5].mxu1 }
 0x1d3   : > { %v2466_v1 = vadd.f32 %v2465_v43, %v2464_v58  ;;  %v2467_v16 = vpop.f32.mrb[6].mxu1 }
 0x1d4   : > { %v2468_v28 = vpop.f32.mrb[7].mxu1 }
 0x1d5   : > { %v1990_v29 = vadd.f32 %v2466_v1, %v2432_v14  ;;  %v2469_v40 = vadd.f32 %v2468_v28, %v2467_v16 }
 0x1d7   : > { %v2022_v44 = vsel %vm2014_vm5, %v1990_v29, 0.0  ;;  %v2390_v49 = vpack.c.bf16 %v1990_v29, %v1990_v29  ;;  %v1993_v18 = vadd.f32 %v2469_v40, %v2435_v23 }
 0x1d8   : > { %v2030_v39 = vsel %vm1545_vm11, %v2022_v44, 0.0  ;;  %v2050_v7 = vmul.f32 %v2022_v44, %v2022_v44 }
 0x1d9   : > { %v2031_v19 = vadd.f32 %v2030_v39, %v2027_v20  ;;  %2100 = vst.msk [vmem:[%s3448_s17 + $0x8] sm:$0xf] %vm2097_vm4, %v2390_v49  ;;  %v2391_v31 = vpack.c.bf16 %v1993_v18, %v1993_v18 }
 0x1da   : > { %v2057_v59 = vsel %vm1545_vm11, %v2050_v7, 0.0 }
 0x1db   : > { %v2058_v57 = vadd.f32 %v2057_v59, %v2054_v0  ;;  %2101 = vst.msk [vmem:[%s3448_s17 + $0xc] sm:$0xf] %vm2097_vm4, %v2391_v31 }
 0x1fc   : > { %v2436_v17 = vpop.f32.mrb[8].mxu0 }
 0x1fd   : > { %v2437_v5 = vpop.f32.mrb[9].mxu0 }
 0x1fe   : > { %v2438_v27 = vadd.f32 %v2437_v5, %v2436_v17  ;;  %v2439_v62 = vpop.f32.mrb[10].mxu0 }
 0x1ff   : > { %v2440_v36 = vpop.f32.mrb[11].mxu0 }
 0x200   : > { %v2470_v46 = vpop.f32.mrb[8].mxu1  ;;  %v2441_v8 = vadd.f32 %v2440_v36, %v2439_v62 }
 0x201   : > { %v2471_v15 = vpop.f32.mrb[9].mxu1 }
 0x202   : > { %v2472_v48 = vadd.f32 %v2471_v15, %v2470_v46  ;;  %v2473_v4 = vpop.f32.mrb[10].mxu1 }
 0x203   : > { %v2474_v26 = vpop.f32.mrb[11].mxu1 }
 0x204   : > { %v1998_v24 = vadd.f32 %v2472_v48, %v2438_v27  ;;  %v2475_v10 = vadd.f32 %v2474_v26, %v2473_v4 }
 0x206   : > { %v2024_v11 = vsel %vm2014_vm5, %v1998_v24, 0.0  ;;  %v2392_v42 = vpack.c.bf16 %v1998_v24, %v1998_v24  ;;  %v2001_v32 = vadd.f32 %v2475_v10, %v2441_v8 }
 0x207   : > { %v2034_v61 = vsel %vm1545_vm11, %v2024_v11, 0.0  ;;  %v2052_v51 = vmul.f32 %v2024_v11, %v2024_v11 }
 0x208   : > { %v2035_v13 = vadd.f32 %v2034_v61, %v2031_v19  ;;  %2102 = vst.msk [vmem:[%s3448_s17 + $0x10] sm:$0xf] %vm2097_vm4, %v2392_v42  ;;  %v2393_v3 = vpack.c.bf16 %v2001_v32, %v2001_v32 }
 0x209   : > { %v2061_v45 = vsel %vm1545_vm11, %v2052_v51, 0.0 }
 0x20a   : > { %v2038_v60 = vrot.slane %v2035_v13, 4  ;;  %v2062_v12 = vadd.f32 %v2061_v45, %v2058_v57  ;;  %2103 = vst.msk [vmem:[%s3448_s17 + $0x14] sm:$0xf] %vm2097_vm4, %v2393_v3 }
 0x20c   : > { %v2039_v41 = vadd.f32 %v2038_v60, %v2035_v13  ;;  %v2065_v25 = vrot.slane %v2062_v12, 4 }
 0x20e   : > { %v2040_v6 = vrot.slane %v2039_v41, 2  ;;  %v2066_v35 = vadd.f32 %v2065_v25, %v2062_v12 }
 0x210   : > { %v2041_v33 = vadd.f32 %v2040_v6, %v2039_v41  ;;  %v2067_v47 = vrot.slane %v2066_v35, 2 }
 0x212   : > { %v2042_v34 = vrot.slane %v2041_v33, 1  ;;  %v2068_v52 = vadd.f32 %v2067_v47, %v2066_v35 }
 0x214   : > { %v2043_v38 = vadd.f32 %v2042_v34, %v2041_v33  ;;  %v2069_v37 = vrot.slane %v2068_v52, 1 }
 0x216   : > { %v2044_v56 = vadd.f32 %v2043_v38, %v2026_v21  ;;  %v2070_v30 = vadd.f32 %v2069_v37, %v2068_v52 }
 0x218   : > { %2046 = vst.msk [vmem:[%s3432_s8] sm:$0x1] %vm2008_vm3, %v2044_v56  ;;  %v2071_v50 = vadd.f32 %v2070_v30, %v2047_v63 }
 0x21a   : > { %2072 = vst.msk [vmem:[%s3438_s13] sm:$0x1] %vm2008_vm3, %v2071_v50 }
 0x21b PF: > { %s17_s23 = sadd.s32 1, %s2577_s23   ;;  %s3501_s21 = smov %s2573_s22 }
 0x21c   : > { %p14_p5 = scmp.ge.s32.totalorder %s17_s23, 4   ;;  %s3502_s22 = smov %s3504_s24 }
 0x21e   :  { %16 = sbr.rel (!%p14_p5) target bundleno = 2 (0x2), region = 98 }

// kernel: patchdis_forward.9
= control target key start
LH: loop header
LB: loop body
LE: loop exit
PB: predicated region body
PF: predicated region fallthrough
CT: control target
= control target key end

     0   :  { %s2408_s18 = smov 0   ;;  %s2410_s19 = smov 0   ;;  %s3156_s0 = inlined_call_operand.vmem [shape: bf16[2,5,19,64], index: 0, kind: input, shape index: {}]   ;;  %s3157_s1 = inlined_call_operand.vmem [shape: bf16[1024,8], index: 1, kind: input, shape index: {}]   ;;  %s3158_s2 = inlined_call_operand.vmem [shape: f32[1,64], index: 2, kind: input, shape index: {}]   ;;  %s3159_s3 = inlined_call_operand.vmem [shape: f32[1,64], index: 3, kind: input, shape index: {}]   ;;  %s3160_s4 = inlined_call_operand.vmem [shape: f32[1,8], index: 4, kind: input, shape index: {}]   ;;  %s3161_s5 = inlined_call_operand.vmem [shape: f32[2,2,16,8], index: 5, kind: output, shape index: {}]  }
   0x1   :  { %s2412_s20 = smov 0  }
   0x2 LB: > { %s27_s21 = sadd.s32 1, %s2371_s19  ;;  %p1990_p0 = scmp.ge.s32.totalorder %s2375_s20, 1  ;;  %s2375_s20 = sphi %s2412_s20, %s15_s20   ;;  %s2371_s19 = sphi %s2410_s19, %s3172_s19   ;;  %s2367_s18 = sphi %s2408_s18, %s3171_s18  }
   0x3   : > { %p29_p1 = scmp.ge.s32.totalorder %s27_s21, 2  ;;  %p201_p2 = scmp.lt.s32.totalorder %s2375_s20, 3 }
   0x5   : > { %s3174_s21 = smov (%p29_p1, %s27_s21), 0  ;;  %p202_p3 = pnand %p1990_p0, %p201_p2 }
   0x6   : > { %p234_p4 = scmp.lt.s32.totalorder (!%p202_p3), %s2367_s18, 1  ;;  %v2286_v0 = vld [vmem:[%s3157_s1 + $0x40] sm:$0xff] (!%p202_p3)   ;;  %vm442_vm0 = vcmask (!%p202_p3), 517120   ;;  %vm443_vm1 = vsmask.f32 (!%p202_p3), 1280  ;;  %vm439_vm2 = vcmask (!%p202_p3), 519168  }
   0x7   : > { %205 = sbr.rel (%p202_p3) target bundleno = 463 (0x1cf), region = 40  ;;  %2148 = vmatprep.subr.bf16.mxu0 (!%p202_p3), %v2286_v0  ;;  %v2435_v1 = vld [vmem:[%s3158_s2] ss:$0 sm:$0xff] (!%p202_p3)  ;;  %v2290_v36 = vld [vmem:[%s3157_s1 + $0x48] sm:$0xff] (!%p202_p3)   ;;  %v450_v41 = vld [vmem:[#allocation2 + $0x14] sm:$0x3] (!%p202_p3) }
   0x8   : > { %v2287_v2 = vld [vmem:[%s3157_s1 + $0xc0] sm:$0xff] (!%p202_p3)   ;;  %v2291_v38 = vld [vmem:[%s3157_s1 + $0xc8] sm:$0xff] (!%p202_p3)   ;;  %vm2491_vm9 = vmand (!%p202_p3), %vm442_vm0, %vm443_vm1  ;;  %vm552_vm10 = vsmask.f32 (!%p202_p3), 2304  ;;  %vm553_vm11 = vsmask.f32 (!%p202_p3), 6416 }
   0x9   : > { %2176 = vmatprep.subr.bf16.mxu1 (!%p202_p3), %v2287_v2  ;;  %v2454_v13 = vld [vmem:[%s3159_s3] ss:$0 sm:$0xff] (!%p202_p3)  ;;  %v2292_v46 = vld [vmem:[%s3157_s1 + $0x8] sm:$0xff] (!%p202_p3)   ;;  %v2294_v0 = vld [vmem:[%s3157_s1 + $0x50] sm:$0xff] (!%p202_p3)   ;;  %vm474_vm15 = vsmask.f32 (!%p202_p3), 3328 }
   0xa   : > { %v2288_v26 = vld [vmem:[%s3157_s1] sm:$0xff] (!%p202_p3)   ;;  %v445_v52 = vld [vmem:[#allocation2 + $0x8] sm:$0x3] (!%p202_p3)  ;;  %vm475_vm0 = vsmask.f32 (!%p202_p3), 7440  ;;  %vm2577_vm1 = vmor (!%p202_p3), %vm552_vm10, %vm553_vm11  ;;  %s2377_s26 = smov (!%p202_p3), 64  }
   0xb   : > { %v2289_v31 = vld [vmem:[%s3157_s1 + $0x80] sm:$0xff] (!%p202_p3)   ;;  %2149 = vmatpush3.bf16.msra.mxu0 (!%p202_p3), %v2288_v26  ;;  %v2293_v58 = vld [vmem:[%s3157_s1 + $0x88] sm:$0xff] (!%p202_p3)  }
   0xc   : > { %2177 = vmatpush3.bf16.msra.mxu1 (!%p202_p3), %v2289_v31  ;;  %2150 = vmatprep.subr.bf16.mxu0 (!%p202_p3), %v2290_v36 }
   0xd   : > { %2178 = vmatprep.subr.bf16.mxu1 (!%p202_p3), %v2291_v38 }
   0xe   : > { %s3176_s18 = smov (!%p234_p4, %s2367_s18), 1 }
   0xf   : > { %s2260_s24 = smul.u32 60, %s3176_s18  ;;  %2151 = vmatpush3.bf16.msra.mxu0 %v2292_v46  ;;  %s2118_s11 = sshll.u32 %s3176_s18, 5 }
  0x10   : > { %2179 = vmatpush3.bf16.msra.mxu1 %v2293_v58  ;;  %2152 = vmatprep.subr.bf16.mxu0 %v2294_v0  ;;  %s248_s13 = scalar_lea.vmem %s3161_s5, %s2118_s11 }
  0x11   : > { %s2440_s29 = scalar_lea.vmem %s3156_s0, %s2260_s24 }
  0x12   : > { %v258_v3 = vld [vmem:[%s2440_s29 + $0xc] sm:$0xff]   ;;  %v260_v4 = vld [vmem:[%s2440_s29 + $0x14] sm:$0x3]  ;;  %v2135_v5 = vld [vmem:[%s2440_s29] sm:$0xff]  }
  0x13   : > { %v273_v6 = vunpack.c.l.bf16 %v258_v3  ;;  %v274_v7 = vunpack.c.h.bf16 %v258_v3  ;;  %v275_v8 = vunpack.c.l.bf16 %v260_v4  ;;  %v2136_v9 = vunpack.c.l.bf16 %v2135_v5  ;;  %v257_v10 = vld [vmem:[%s2440_s29 + $0x8] sm:$0x3]  ;;  %v2146_v11 = vld [vmem:[%s2440_s29 + $0x18] sm:$0xff]   ;;  %v263_v12 = vld [vmem:[%s2440_s29 + $0x20] sm:$0x3] }
  0x14   : > { %v2137_v14 = vunpack.c.h.bf16 %v2135_v5  ;;  %v272_v15 = vunpack.c.l.bf16 %v257_v10  ;;  %v2140_v16 = vunpack.c.l.bf16 %v2146_v11  ;;  %v2141_v17 = vunpack.c.h.bf16 %v2146_v11  ;;  %v264_v45 = vld [vmem:[%s2440_s29 + $0x24] sm:$0xff]   ;;  %v266_v57 = vld [vmem:[%s2440_s29 + $0x2c] sm:$0x3]  ;;  %v2505_v63 = vld [vmem:[%s2440_s29 + $0x30] sm:$0xff]  }
  0x15   : > { %v295_v18 = vmul.f32 %v2435_v1, %v273_v6  ;;  %v296_v19 = vmul.f32 %v2435_v1, %v274_v7  ;;  %v297_v20 = vmul.f32 %v2435_v1, %v275_v8  ;;  %v292_v21 = vmul.f32 %v2136_v9, %v2435_v1  ;;  %v2295_v6 = vld [vmem:[%s3157_s1 + $0xd0] sm:$0xff]   ;;  %v2521_v10 = vld [vmem:[%s2440_s29 + $0x38] sm:$0x3] }
  0x16   : > { %v293_v22 = vmul.f32 %v2137_v14, %v2435_v1  ;;  %v294_v23 = vmul.f32 %v2435_v1, %v272_v15  ;;  %v278_v24 = vunpack.c.l.bf16 %v263_v12  ;;  %v298_v25 = vmul.f32 %v2140_v16, %v2435_v1  ;;  %v2296_v11 = vld [vmem:[%s3157_s1 + $0x10] sm:$0xff]   ;;  %2180 = vmatprep.subr.bf16.mxu1 %v2295_v6  ;;  %v2300_v6 = vld [vmem:[%s3157_s1 + $0x18] sm:$0xff]  }
  0x17   : > { %v317_v27 = vadd.f32 %v2454_v13, %v295_v18  ;;  %v318_v28 = vadd.f32 %v2454_v13, %v296_v19  ;;  %v319_v29 = vadd.f32 %v2454_v13, %v297_v20  ;;  %v314_v30 = vadd.f32 %v2454_v13, %v292_v21  ;;  %2153 = vmatpush3.bf16.msra.mxu0 %v2296_v11 }
  0x18   : > { %v315_v32 = vadd.f32 %v2454_v13, %v293_v22  ;;  %v316_v33 = vadd.f32 %v2454_v13, %v294_v23  ;;  %v299_v34 = vmul.f32 %v2141_v17, %v2435_v1  ;;  %v300_v35 = vmul.f32 %v2435_v1, %v278_v24  ;;  %v455_v17 = vld [vmem:[#allocation2 + $0x20] sm:$0x3]  ;;  %v2297_v24 = vld [vmem:[%s3157_s1 + $0x90] sm:$0xff]  }
  0x19   : > { %vm332_vm3 = vcmp.ge.f32.partialorder %v317_v27, 0.0  ;;  %vm333_vm4 = vcmp.ge.f32.partialorder %v318_v28, 0.0  ;;  %vm334_vm5 = vcmp.ge.f32.partialorder %v319_v29, 0.0  ;;  %v347_v37 = vmul.f32 0.2, %v317_v27  ;;  %2181 = vmatpush3.bf16.msra.mxu1 %v2297_v24 }
  0x1a   : > { %v348_v39 = vmul.f32 0.2, %v318_v28  ;;  %v349_v40 = vmul.f32 0.2, %v319_v29  ;;  %vm329_vm6 = vcmp.ge.f32.partialorder %v314_v30, 0.0  ;;  %vm330_vm7 = vcmp.ge.f32.partialorder %v315_v32, 0.0 }
  0x1b   : > { %v362_v42 = vsel %vm332_vm3, %v317_v27, %v347_v37  ;;  %vm331_vm8 = vcmp.ge.f32.partialorder %v316_v33, 0.0  ;;  %v344_v43 = vmul.f32 0.2, %v314_v30  ;;  %v345_v44 = vmul.f32 0.2, %v315_v32  ;;  %vm2606_vm3 = vmor %vm474_vm15, %vm475_vm0 }
  0x1c   : > { %v363_v47 = vsel %vm333_vm4, %v318_v28, %v348_v39  ;;  %v364_v48 = vsel %vm334_vm5, %v319_v29, %v349_v40  ;;  %v2122_v49 = vpack.c.bf16 %v362_v42, %v362_v42  ;;  %v346_v51 = vmul.f32 0.2, %v316_v33  ;;  %v2298_v29 = vld [vmem:[%s3157_s1 + $0x58] sm:$0xff]  }
  0x1d   : > { %v2123_v53 = vpack.c.bf16 %v363_v47, %v363_v47  ;;  %v2124_v54 = vpack.c.bf16 %v364_v48, %v364_v48  ;;  %v359_v55 = vsel %vm329_vm6, %v314_v30, %v344_v43  ;;  %v360_v56 = vsel %vm330_vm7, %v315_v32, %v345_v44  ;;  %2154 = vmatprep.subr.bf16.mxu0 %v2298_v29 }
  0x1e   : > { %448 = vst.msk [vmem:[#allocation2 + $0xc] sm:$0xf] %vm439_vm2, %v2122_v49  ;;  %v361_v59 = vsel %vm331_vm8, %v316_v33, %v346_v51  ;;  %v2119_v60 = vpack.c.bf16 %v359_v55, %v359_v55  ;;  %v2120_v61 = vpack.c.bf16 %v360_v56, %v360_v56  ;;  %v320_v62 = vadd.f32 %v2454_v13, %v298_v25 }
  0x1f   : > { %449 = vst.msk [vmem:[#allocation2 + $0x10] sm:$0xf] %vm439_vm2, %v2123_v53  ;;  %v451_v2 = vsel %vm2491_vm9, %v2124_v54, %v450_v41  ;;  %v2121_v3 = vpack.c.bf16 %v361_v59, %v361_v59  ;;  %v321_v4 = vadd.f32 %v2454_v13, %v299_v34  ;;  %v322_v5 = vadd.f32 %v2454_v13, %v300_v35 }
  0x20   : > { %452 = vst [vmem:[#allocation2 + $0x14] sm:$0x3] %v451_v2  ;;  %440 = vst.msk [vmem:[#allocation2] sm:$0xf] %vm439_vm2, %v2119_v60  ;;  %vm335_vm12 = vcmp.ge.f32.partialorder %v320_v62, 0.0  ;;  %v279_v8 = vunpack.c.l.bf16 %v264_v45  ;;  %v280_v9 = vunpack.c.h.bf16 %v264_v45  ;;  %v281_v18 = vunpack.c.l.bf16 %v266_v57  ;;  %2155 = vmatpush3.bf16.msra.mxu0 %v2300_v6 }
  0x21   : > { %441 = vst.msk [vmem:[#allocation2 + $0x4] sm:$0xf] %vm439_vm2, %v2120_v61  ;;  %v350_v7 = vmul.f32 0.2, %v320_v62  ;;  %v446_v12 = vsel %vm2491_vm9, %v2121_v3, %v445_v52  ;;  %vm336_vm13 = vcmp.ge.f32.partialorder %v321_v4, 0.0  ;;  %vm337_vm14 = vcmp.ge.f32.partialorder %v322_v5, 0.0 }
  0x22   : > { %v351_v14 = vmul.f32 0.2, %v321_v4  ;;  %447 = vst [vmem:[#allocation2 + $0x8] sm:$0x3] %v446_v12  ;;  %v352_v15 = vmul.f32 0.2, %v322_v5  ;;  %v301_v19 = vmul.f32 %v2435_v1, %v279_v8  ;;  %v302_v22 = vmul.f32 %v2435_v1, %v280_v9 }
  0x23   : > { %v365_v16 = vsel %vm335_vm12, %v320_v62, %v350_v7  ;;  %v2144_v23 = vunpack.c.l.bf16 %v2505_v63  ;;  %v303_v27 = vmul.f32 %v2435_v1, %v281_v18  ;;  %v2145_v34 = vunpack.c.h.bf16 %v2505_v63  ;;  %v2299_v62 = vld [vmem:[%s3157_s1 + $0xd8] sm:$0xff]  }
  0x24   : > { %v366_v20 = vsel %vm336_vm13, %v321_v4, %v351_v14  ;;  %v2125_v21 = vpack.c.bf16 %v365_v16, %v365_v16  ;;  %v367_v25 = vsel %vm337_vm14, %v322_v5, %v352_v15  ;;  %v2536_v28 = vadd.f32 %v2454_v13, %v301_v19  ;;  %2182 = vmatprep.subr.bf16.mxu1 %v2299_v62  ;;  %v2301_v12 = vld [vmem:[%s3157_s1 + $0x98] sm:$0xff]   ;;  %v2302_v19 = vld [vmem:[%s3157_s1 + $0x60] sm:$0xff]  }
  0x25   : > { %v2126_v26 = vpack.c.bf16 %v366_v20, %v366_v20  ;;  %v2541_v30 = vld [vmem:[#allocation2 + $0xc] sm:$0xe]  ;;  %v2127_v32 = vpack.c.bf16 %v367_v25, %v367_v25  ;;  %v2547_v33 = vadd.f32 %v2454_v13, %v302_v22  ;;  %v284_v35 = vunpack.c.l.bf16 %v2521_v10  ;;  %2183 = vmatpush3.bf16.msra.mxu1 %v2301_v12  ;;  %2156 = vmatprep.subr.bf16.mxu0 %v2302_v19 }
  0x26   : > { %v2543_v31 = vld [vmem:[#allocation2 + $0xc] sm:$0xf]  ;;  %453 = vst.msk [vmem:[#allocation2 + $0x18] sm:$0xf] %vm439_vm2, %v2125_v21  ;;  %v2551_v36 = vld [vmem:[#allocation2 + $0x10] sm:$0xf]  ;;  %v2565_v46 = vadd.f32 %v2454_v13, %v303_v27 }
  0x27   : > { %v681_v37 = vshrl.u32 %v2541_v30, 16  ;;  %v684_v38 = vshll.u32 %v2541_v30, 16  ;;  %v609_v39 = vshrl.u32 %v2543_v31, 16  ;;  %v612_v40 = vshll.u32 %v2543_v31, 16  ;;  %454 = vst.msk [vmem:[#allocation2 + $0x1c] sm:$0xf] %vm439_vm2, %v2126_v26 }
  0x28   : > { %v618_v41 = vshll.u32 %v2551_v36, 16  ;;  %v622_v42 = vshrl.u32 %v2551_v36, 16  ;;  %v678_v43 = vld [vmem:[#allocation2 + $0x14] sm:$0x3]  ;;  %v2560_v44 = vld [vmem:[#allocation2 + $0x4] sm:$0xf]  ;;  %v456_v45 = vsel %vm2491_vm9, %v2127_v32, %v455_v17 }
  0x29   : > { %v683_v47 = vrot.slane %v681_v37, 5  ;;  %v686_v48 = vrot.slane %v684_v38, 6  ;;  %v695_v49 = vshrl.u32 %v678_v43, 16  ;;  %v698_v51 = vshll.u32 %v678_v43, 16  ;;  %v2567_v52 = vld [vmem:[#allocation2] sm:$0xe] }
  0x2a   : > { %457 = vst [vmem:[#allocation2 + $0x20] sm:$0x3] %v456_v45  ;;  %v689_v53 = vrot.slane %v622_v42, 5  ;;  %v690_v54 = vrot.slane %v618_v41, 6  ;;  %v487_v55 = vshll.u32 %v2560_v44, 16  ;;  %v491_v56 = vshrl.u32 %v2560_v44, 16 }
  0x2b   : > { %v550_v57 = vld [vmem:[#allocation2 + $0x8] sm:$0x3]  ;;  %v687_v58 = vor.u32 %v686_v48, %v683_v47  ;;  %v697_v59 = vrot.slane %v695_v49, 5  ;;  %v700_v60 = vrot.slane %v698_v51, 6  ;;  %v556_v61 = vshrl.u32 %v2567_v52, 16  ;;  %v2303_v26 = vld [vmem:[%s3157_s1 + $0xe0] sm:$0xff]  }
  0x2c   : > { %v691_v2 = vor.u32 %v690_v54, %v689_v53  ;;  %v559_v3 = vshll.u32 %v2567_v52, 16  ;;  %v564_v4 = vrot.slane %v491_v56, 5  ;;  %v565_v5 = vrot.slane %v487_v55, 6  ;;  %v2590_v18 = vld [vmem:[#allocation2 + $0x14] sm:$0x1]  ;;  %2184 = vmatprep.subr.bf16.mxu1 %v2303_v26 }
  0x2d   : > { %v688_v7 = vrot.slane %v687_v58, 4  ;;  %v701_v8 = vor.u32 %v700_v60, %v697_v59  ;;  %v558_v9 = vrot.slane %v556_v61, 5  ;;  %v570_v11 = vshrl.u32 %v550_v57, 16  ;;  %v2597_v25 = vld [vmem:[#allocation2] sm:$0xf] }
  0x2e   : > { %v693_v14 = vrot.slane %v691_v2, 4  ;;  %v561_v15 = vrot.slane %v559_v3, 6  ;;  %v566_v16 = vor.u32 %v565_v5, %v564_v4  ;;  %v573_v17 = vshll.u32 %v550_v57, 16  ;;  %v2611_v51 = vld [vmem:[#allocation2 + $0x8] sm:$0x1]  ;;  %v2305_v60 = vld [vmem:[%s3157_s1 + $0xa0] sm:$0xff]  }
  0x2f   : > { %v692_v20 = vsel %vm2577_vm1, %v688_v7, %v691_v2  ;;  %v572_v21 = vrot.slane %v570_v11, 5  ;;  %v611_v22 = vrot.slane %v609_v39, 4  ;;  %v614_v24 = vrot.slane %v612_v40, 5  ;;  %v2619_v59 = vld [vmem:[#allocation2 + $0x10] sm:$0xf]  ;;  %2185 = vmatpush3.bf16.msra.mxu1 %v2305_v60 }
  0x30   : > { %v702_v27 = vsel %vm2577_vm1, %v693_v14, %v701_v8  ;;  %v562_v29 = vor.u32 %v561_v15, %v558_v9  ;;  %v568_v32 = vrot.slane %v566_v16, 4  ;;  %v575_v37 = vrot.slane %v573_v17, 6  ;;  %v2628_v4 = vld [vmem:[#allocation2 + $0xc] sm:$0xe]  ;;  %v551_v14 = vld [vmem:[#allocation2 + $0x14] sm:$0x3] }
  0x31   : > { %v2033_v38 = vcombine.low %v692_v20, %v702_v27  ;;  %v615_v43 = vor.u32 %v614_v24, %v611_v22  ;;  %v620_v45 = vrot.slane %v618_v41, 5  ;;  %v624_v47 = vrot.slane %v622_v42, 4  ;;  %v2304_v41 = vld [vmem:[%s3157_s1 + $0x20] sm:$0xff]   ;;  %v470_v20 = vld [vmem:[#allocation2 + $0xc] sm:$0xf] }
  0x32   : > { %v563_v39 = vrot.slane %v562_v29, 4  ;;  %v576_v40 = vor.u32 %v575_v37, %v572_v21  ;;  %v628_v49 = vshll.u32 %v2590_v18, 16  ;;  %v478_v53 = vshrl.u32 %v2597_v25, 16  ;;  %2157 = vmatpush3.bf16.msra.mxu0 %v2304_v41  ;;  %v2642_v37 = vld [vmem:[#allocation2 + $0x14] sm:$0x1] }
  0x33   : > { %1040 = vrot.lane.b32.xlu1 %v2033_v38, %s2377_s26  ;;  %v616_v42 = vrot.slane %v615_v43, 4  ;;  %v625_v54 = vor.u32 %v624_v47, %v620_v45  ;;  %v481_v57 = vshll.u32 %v2597_v25, 16  ;;  %v489_v58 = vrot.slane %v487_v55, 5 }
  0x34   : > { %v567_v61 = vsel %vm2577_vm1, %v563_v39, %v566_v16  ;;  %v577_v62 = vsel %vm2577_vm1, %v568_v32, %v576_v40  ;;  %v630_v2 = vrot.slane %v628_v49, 5  ;;  %v480_v3 = vrot.slane %v478_v53, 4  ;;  %v2645_v39 = vld [vmem:[#allocation2 + $0x1c] sm:$0xf] }
  0x35   : > { %v2025_v5 = vcombine.low %v567_v61, %v577_v62  ;;  %v621_v55 = vsel %vm2606_vm3, %v616_v42, %v620_v45  ;;  %v626_v6 = vrot.slane %v625_v54, 4  ;;  %v483_v7 = vrot.slane %v481_v57, 5  ;;  %v2649_v42 = vld [vmem:[#allocation2 + $0x18] sm:$0xe]  ;;  %v2306_v54 = vld [vmem:[%s3157_s1 + $0x68] sm:$0xff]  }
  0x36   : > { %v493_v8 = vrot.slane %v491_v56, 4  ;;  %v497_v9 = vshll.u32 %v2611_v51, 16  ;;  %v511_v11 = vshll.u32 %v2619_v59, 16  ;;  %v515_v12 = vshrl.u32 %v2619_v59, 16  ;;  %2158 = vmatprep.subr.bf16.mxu0 %v2306_v54 }
  0x37   : > { %1006 = vrot.lane.b32.xlu0 %v2025_v5, %s2377_s26  ;;  %v631_v15 = vsel %vm2606_vm3, %v626_v6, %v630_v2  ;;  %v484_v16 = vor.u32 %v483_v7, %v480_v3  ;;  %v579_v17 = vshrl.u32 %v2628_v4, 16  ;;  %v582_v19 = vshll.u32 %v2628_v4, 16  ;;  %v2307_v2 = vld [vmem:[%s3157_s1 + $0xe8] sm:$0xff]   ;;  %v679_v6 = vld [vmem:[#allocation2 + $0x20] sm:$0x3] }
  0x38   : > { %v2029_v21 = vcombine.low %v621_v55, %v631_v15  ;;  %v494_v56 = vor.u32 %v493_v8, %v489_v58  ;;  %v499_v22 = vrot.slane %v497_v9, 5  ;;  %v587_v24 = vrot.slane %v515_v12, 5  ;;  %v2308_v7 = vld [vmem:[%s3157_s1 + $0x28] sm:$0xff]   ;;  %2186 = vmatprep.subr.bf16.mxu1 %v2307_v2 }
  0x39   : > { %v485_v26 = vrot.slane %v484_v16, 4  ;;  %v581_v27 = vrot.slane %v579_v17, 5  ;;  %v584_v29 = vrot.slane %v582_v19, 6  ;;  %v588_v32 = vrot.slane %v511_v11, 6  ;;  %v2663_v16 = vld [vmem:[#allocation2 + $0x18] sm:$0xf]  ;;  %2159 = vmatpush3.bf16.msra.mxu0 %v2308_v7 }
  0x3a   : > { %1024 = vrot.lane.b32.xlu1 %v2029_v21, %s2377_s26  ;;  %v495_v38 = vrot.slane %v494_v56, 4  ;;  %v593_v43 = vshrl.u32 %v551_v14, 16  ;;  %v596_v45 = vshll.u32 %v551_v14, 16  ;;  %v502_v47 = vshrl.u32 %v470_v20, 16  ;;  %v2309_v17 = vld [vmem:[%s3157_s1 + $0xa8] sm:$0xff]  }
  0x3b   : > { %v490_v40 = vsel %vm2606_vm3, %v485_v26, %v489_v58  ;;  %v585_v49 = vor.u32 %v584_v29, %v581_v27  ;;  %v589_v53 = vor.u32 %v588_v32, %v587_v24  ;;  %v505_v41 = vshll.u32 %v470_v20, 16  ;;  %2187 = vmatpush3.bf16.msra.mxu1 %v2309_v17 }
  0x3c   : > { %v500_v57 = vsel %vm2606_vm3, %v495_v38, %v499_v22  ;;  %v595_v60 = vrot.slane %v593_v43, 5  ;;  %v598_v61 = vrot.slane %v596_v45, 6  ;;  %v504_v62 = vrot.slane %v502_v47, 4  ;;  %v2310_v38 = vld [vmem:[%s3157_s1 + $0x70] sm:$0xff]  }
  0x3d   : > { %v2021_v58 = vcombine.low %v490_v40, %v500_v57  ;;  %v586_v3 = vrot.slane %v585_v49, 4  ;;  %v591_v5 = vrot.slane %v589_v53, 4  ;;  %v507_v55 = vrot.slane %v505_v41, 5  ;;  %v2680_v49 = vld [vmem:[#allocation2 + $0x20] sm:$0x1]  ;;  %2160 = vmatprep.subr.bf16.mxu0 %v2310_v38 }
  0x3e   : > { %v599_v8 = vor.u32 %v598_v61, %v595_v60  ;;  %v513_v9 = vrot.slane %v511_v11, 5  ;;  %v517_v14 = vrot.slane %v515_v12, 4  ;;  %v521_v15 = vshll.u32 %v2642_v37, 16  ;;  %v2688_v61 = vld [vmem:[#allocation2 + $0x18] sm:$0xe] }
  0x3f   : > { %990 = vrot.lane.b32.xlu0 %v2021_v58, %s2377_s26  ;;  %v590_v19 = vsel %vm2577_vm1, %v586_v3, %v589_v53  ;;  %v508_v20 = vor.u32 %v507_v55, %v504_v62  ;;  %v642_v21 = vshll.u32 %v2645_v39, 16  ;;  %v646_v11 = vshrl.u32 %v2645_v39, 16  ;;  %v2682_v53 = vld [vmem:[#allocation2 + $0x1c] sm:$0xf]  ;;  %v2311_v62 = vld [vmem:[%s3157_s1 + $0xf0] sm:$0xff]  }
  0x40   : > { %v600_v12 = vsel %vm2577_vm1, %v591_v5, %v599_v8  ;;  %v518_v56 = vor.u32 %v517_v14, %v513_v9  ;;  %v523_v22 = vrot.slane %v521_v15, 5  ;;  %v704_v24 = vshrl.u32 %v2649_v42, 16  ;;  %2188 = vmatprep.subr.bf16.mxu1 %v2311_v62 }
  0x41   : > { %v2026_v26 = vcombine.low %v590_v19, %v600_v12  ;;  %v509_v27 = vrot.slane %v508_v20, 4  ;;  %v707_v29 = vshll.u32 %v2649_v42, 16  ;;  %v712_v32 = vrot.slane %v646_v11, 5  ;;  %v803_v19 = vld [vmem:[#allocation2 + $0x20] sm:$0x3] }
  0x42   : > { %v519_v43 = vrot.slane %v518_v56, 4  ;;  %v706_v45 = vrot.slane %v704_v24, 5  ;;  %v713_v47 = vrot.slane %v642_v21, 6  ;;  %v718_v40 = vshrl.u32 %v679_v6, 16  ;;  %v2699_v24 = vld [vmem:[#allocation2 + $0x18] sm:$0xf] }
  0x43   : > { %1008 = vrot.lane.b32.xlu0 %v2026_v26, %s2377_s26  ;;  %v514_v41 = vsel %vm2606_vm3, %v509_v27, %v513_v9  ;;  %v709_v54 = vrot.slane %v707_v29, 6  ;;  %v721_v57 = vshll.u32 %v679_v6, 16  ;;  %v633_v60 = vshrl.u32 %v2663_v16, 16  ;;  %v2312_v26 = vld [vmem:[%s3157_s1 + $0x30] sm:$0xff]  }
  0x44   : > { %v524_v2 = vsel %vm2606_vm3, %v519_v43, %v523_v22  ;;  %v714_v58 = vor.u32 %v713_v47, %v712_v32  ;;  %v720_v3 = vrot.slane %v718_v40, 5  ;;  %v636_v5 = vshll.u32 %v2663_v16, 16  ;;  %2161 = vmatpush3.bf16.msra.mxu0 %v2312_v26 }
  0x45   : > { %v2022_v55 = vcombine.low %v514_v41, %v524_v2  ;;  %v710_v7 = vor.u32 %v709_v54, %v706_v45  ;;  %v723_v8 = vrot.slane %v721_v57, 6  ;;  %v635_v6 = vrot.slane %v633_v60, 4  ;;  %v2711_v57 = vld [vmem:[#allocation2 + $0x20] sm:$0x1]  ;;  %v2313_v60 = vld [vmem:[%s3157_s1 + $0xb0] sm:$0xff]  }
  0x46   : > { %v716_v9 = vrot.slane %v714_v58, 4  ;;  %v638_v14 = vrot.slane %v636_v5, 5  ;;  %v644_v15 = vrot.slane %v642_v21, 5  ;;  %v648_v17 = vrot.slane %v646_v11, 4  ;;  %2189 = vmatpush3.bf16.msra.mxu1 %v2313_v60 }
  0x47   : > { %992 = vrot.lane.b32.xlu1 %v2022_v55, %s2377_s26  ;;  %v711_v20 = vrot.slane %v710_v7, 4  ;;  %v724_v12 = vor.u32 %v723_v8, %v720_v3  ;;  %v652_v56 = vshll.u32 %v2680_v49, 16  ;;  %v743_v22 = vshll.u32 %v2682_v53, 16 }
  0x48   : > { %v639_v27 = vor.u32 %v638_v14, %v635_v6  ;;  %v649_v29 = vor.u32 %v648_v17, %v644_v15  ;;  %v747_v21 = vshrl.u32 %v2682_v53, 16  ;;  %v806_v11 = vshrl.u32 %v2688_v61, 16  ;;  %v2314_v6 = vld [vmem:[%s3157_s1 + $0x78] sm:$0xff]  }
  0x49   : > { %v715_v32 = vsel %vm2577_vm1, %v711_v20, %v714_v58  ;;  %v725_v38 = vsel %vm2577_vm1, %v716_v9, %v724_v12  ;;  %v654_v43 = vrot.slane %v652_v56, 5  ;;  %v809_v45 = vshll.u32 %v2688_v61, 16  ;;  %v2315_v9 = vld [vmem:[%s3157_s1 + $0xf8] sm:$0xff]   ;;  %2162 = vmatprep.subr.bf16.mxu0 %v2314_v6 }
  0x4a   : > { %v2034_v47 = vcombine.low %v715_v32, %v725_v38  ;;  %v640_v40 = vrot.slane %v639_v27, 4  ;;  %v650_v41 = vrot.slane %v649_v29, 4  ;;  %v808_v54 = vrot.slane %v806_v11, 5  ;;  %2190 = vmatprep.subr.bf16.mxu1 %v2315_v9 }
  0x4b   : > { %v811_v62 = vrot.slane %v809_v45, 6  ;;  %v814_v2 = vrot.slane %v747_v21, 5  ;;  %v815_v58 = vrot.slane %v743_v22, 6  ;;  %v820_v3 = vshrl.u32 %v803_v19, 16 }
  0x4c   : > { %1042 = vrot.lane.b32.xlu0 %v2034_v47, %s2377_s26  ;;  %v645_v5 = vsel %vm2606_vm3, %v640_v40, %v644_v15  ;;  %v655_v55 = vsel %vm2606_vm3, %v650_v41, %v654_v43  ;;  %v823_v7 = vshll.u32 %v803_v19, 16  ;;  %v734_v8 = vshrl.u32 %v2699_v24, 16  ;;  %v2316_v15 = vld [vmem:[%s3157_s1 + $0x38] sm:$0xff]  }
  0x4d   : > { %v2030_v14 = vcombine.low %v645_v5, %v655_v55  ;;  %v812_v17 = vor.u32 %v811_v62, %v808_v54  ;;  %v816_v20 = vor.u32 %v815_v58, %v814_v2  ;;  %v822_v12 = vrot.slane %v820_v3, 5  ;;  %2163 = vmatpush3.bf16.msra.mxu0 %v2316_v15  ;;  %v2318_v55 = vld [vmem:[%s3157_s1 + $0x140] sm:$0xff]  }
  0x4e   : > { %v825_v19 = vrot.slane %v823_v7, 6  ;;  %v736_v56 = vrot.slane %v734_v8, 4  ;;  %v737_v26 = vshll.u32 %v2699_v24, 16  ;;  %v745_v27 = vrot.slane %v743_v22, 5  ;;  %v2317_v22 = vld [vmem:[%s3157_s1 + $0xb8] sm:$0xff]   ;;  %2204 = vmatprep.subr.bf16.mxu0 %v2318_v55 }
  0x4f   : > { %1026 = vrot.lane.b32.xlu1 %v2030_v14, %s2377_s26  ;;  %v813_v29 = vrot.slane %v812_v17, 4  ;;  %v818_v11 = vrot.slane %v816_v20, 4  ;;  %v749_v32 = vrot.slane %v747_v21, 4  ;;  %v753_v38 = vshll.u32 %v2711_v57, 16  ;;  %2191 = vmatpush3.bf16.msra.mxu1 %v2317_v22 }
  0x50   : > { %v826_v43 = vor.u32 %v825_v19, %v822_v12  ;;  %v739_v45 = vrot.slane %v737_v26, 5  ;;  %vm338_vm4 = vcmp.ge.f32.partialorder %v2536_v28, 0.0  ;;  %vm339_vm5 = vcmp.ge.f32.partialorder %v2547_v33, 0.0 }
  0x51   : > { %v817_v47 = vsel %vm2577_vm1, %v813_v29, %v816_v20  ;;  %v750_v40 = vor.u32 %v749_v32, %v745_v27  ;;  %v755_v41 = vrot.slane %v753_v38, 5  ;;  %vm340_vm6 = vcmp.ge.f32.partialorder %v2565_v46, 0.0 }
  0x52   : > { %v827_v21 = vsel %vm2577_vm1, %v818_v11, %v826_v43  ;;  %v740_v54 = vor.u32 %v739_v45, %v736_v56  ;;  %v353_v60 = vmul.f32 0.2, %v2536_v28  ;;  %v354_v62 = vmul.f32 0.2, %v2547_v33  ;;  %v465_v45 = vld [vmem:[#allocation2 + $0x38] sm:$0x3] }
  0x53   : > { %v2041_v2 = vcombine.low %v817_v47, %v827_v21  ;;  %v751_v58 = vrot.slane %v750_v40, 4  ;;  %v355_v3 = vmul.f32 0.2, %v2565_v46  ;;  %v304_v5 = vmul.f32 %v2144_v23, %v2435_v1  ;;  %v2319_v23 = vld [vmem:[%s3157_s1 + $0x1c0] sm:$0xff]  }
  0x54   : > { %v741_v7 = vrot.slane %v740_v54, 4  ;;  %v368_v8 = vsel %vm338_vm4, %v2536_v28, %v353_v60  ;;  %v369_v6 = vsel %vm339_vm5, %v2547_v33, %v354_v62  ;;  %v305_v9 = vmul.f32 %v2145_v34, %v2435_v1  ;;  %v460_v33 = vld [vmem:[#allocation2 + $0x2c] sm:$0x3]  ;;  %2232 = vmatprep.subr.bf16.mxu1 %v2319_v23 }
  0x55   : > { %1074 = vrot.lane.b32.xlu0 %v2041_v2, %s2377_s26  ;;  %v756_v14 = vsel %vm2606_vm3, %v751_v58, %v755_v41  ;;  %v370_v28 = vsel %vm340_vm6, %v2565_v46, %v355_v3  ;;  %v2128_v17 = vpack.c.bf16 %v368_v8, %v368_v8  ;;  %v2129_v20 = vpack.c.bf16 %v369_v6, %v369_v6 }
  0x56   : > { %v746_v63 = vsel %vm2606_vm3, %v741_v7, %v745_v27  ;;  %v2130_v34 = vpack.c.bf16 %v370_v28, %v370_v28  ;;  %v306_v12 = vmul.f32 %v2435_v1, %v284_v35  ;;  %v326_v15 = vadd.f32 %v2454_v13, %v304_v5  ;;  %v2321_v35 = vld [vmem:[%s3157_s1 + $0x180] sm:$0xff]  }
  0x57   : > { %v2037_v19 = vcombine.low %v746_v63, %v756_v14  ;;  %458 = vst.msk [vmem:[#allocation2 + $0x24] sm:$0xf] %vm439_vm2, %v2128_v17  ;;  %459 = vst.msk [vmem:[#allocation2 + $0x28] sm:$0xf] %vm439_vm2, %v2129_v20  ;;  %v327_v46 = vadd.f32 %v2454_v13, %v305_v9  ;;  %vm533_vm7 = vcmask 1042432   ;;  %vm534_vm8 = vcmask 1046532  }
  0x58   : > { %v461_v56 = vsel %vm2491_vm9, %v2130_v34, %v460_v33  ;;  %v328_v10 = vadd.f32 %v2454_v13, %v306_v12  ;;  %vm341_vm10 = vcmp.ge.f32.partialorder %v326_v15, 0.0  ;;  %v356_v1 = vmul.f32 0.2, %v326_v15  ;;  %vm2783_vm11 = vmor %vm533_vm7, %vm534_vm8 }
  0x59   : > { %1058 = vrot.lane.b32.xlu1 %v2037_v19, %s2377_s26  ;;  %462 = vst [vmem:[#allocation2 + $0x2c] sm:$0x3] %v461_v56  ;;  %vm342_vm12 = vcmp.ge.f32.partialorder %v327_v46, 0.0  ;;  %v357_v26 = vmul.f32 0.2, %v327_v46  ;;  %v2011_v27 = vrot.slane %v2567_v52, 9  ;;  %v2027_v5 = vcombine.low %v2543_v31, %v2551_v36 }
  0x5a   : > { %v538_v29 = vrot.slane %v2560_v44, 5  ;;  %vm343_vm13 = vcmp.ge.f32.partialorder %v328_v10, 0.0  ;;  %v358_v11 = vmul.f32 0.2, %v328_v10  ;;  %v371_v32 = vsel %vm341_vm10, %v326_v15, %v356_v1  ;;  %v2322_v31 = vld [vmem:[%s3157_s1 + $0x148] sm:$0xff]  }
  0x5b   : > { %v541_v13 = vrot.slane %v2611_v51, 5  ;;  %v372_v38 = vsel %vm342_vm12, %v327_v46, %v357_v26  ;;  %v2131_v43 = vpack.c.bf16 %v371_v32, %v371_v32  ;;  %v2013_v21 = vrot.slane %v2541_v30, 9 }
  0x5c   : > { %v2793_v22 = vsel %vm2783_vm11, %v2011_v27, %v538_v29  ;;  %v540_v47 = vrot.slane %v538_v29, 4  ;;  %v373_v40 = vsel %vm343_vm13, %v328_v10, %v358_v11  ;;  %v2132_v41 = vpack.c.bf16 %v372_v38, %v372_v38 }
  0x5d   : > { %v2133_v52 = vpack.c.bf16 %v373_v40, %v373_v40  ;;  %463 = vst.msk [vmem:[#allocation2 + $0x30] sm:$0xf] %vm439_vm2, %v2131_v43  ;;  %v666_v51 = vrot.slane %v2551_v36, 5  ;;  %v669_v60 = vrot.slane %v2590_v18, 5  ;;  %v3170_v36 = vcombine.low %v2597_v25, %v2560_v44  ;;  %v2326_v44 = vld [vmem:[%s3157_s1 + $0x150] sm:$0xff]  }
  0x5e   : > { %v2799_v54 = vsel %vm2783_vm11, %v540_v47, %v541_v13  ;;  %v2803_v62 = vld [vmem:[#allocation2 + $0x28] sm:$0xf]  ;;  %v2805_v2 = vld [vmem:[#allocation2 + $0x24] sm:$0xe]  ;;  %464 = vst.msk [vmem:[#allocation2 + $0x34] sm:$0xf] %vm439_vm2, %v2132_v41 }
  0x5f   : > { %v2807_v58 = vld [vmem:[#allocation2 + $0x24] sm:$0xf]  ;;  %v2023_v30 = vcombine.low %v2793_v22, %v2799_v54  ;;  %v868_v55 = vshll.u32 %v2803_v62, 16  ;;  %v872_v7 = vshrl.u32 %v2803_v62, 16  ;;  %v931_v8 = vshrl.u32 %v2805_v2, 16  ;;  %v2325_v22 = vld [vmem:[%s3157_s1 + $0x188] sm:$0xff]  }
  0x60   : > { %v934_v6 = vshll.u32 %v2805_v2, 16  ;;  %v928_v9 = vld [vmem:[#allocation2 + $0x2c] sm:$0x3]  ;;  %v859_v23 = vshrl.u32 %v2807_v58, 16  ;;  %v862_v14 = vshll.u32 %v2807_v58, 16  ;;  %v466_v28 = vsel %vm2491_vm9, %v2133_v52, %v465_v45  ;;  %v2320_v54 = vld [vmem:[%s3157_s1 + $0x100] sm:$0xff]  }
  0x61   : > { %v2828_v17 = vsel %vm2783_vm11, %v2013_v21, %v666_v51  ;;  %v933_v20 = vrot.slane %v931_v8, 5  ;;  %v939_v63 = vrot.slane %v872_v7, 5  ;;  %v940_v34 = vrot.slane %v868_v55, 6  ;;  %v2830_v12 = vld [vmem:[#allocation2 + $0x2c] sm:$0x1] }
  0x62   : > { %v936_v33 = vrot.slane %v934_v6, 6  ;;  %467 = vst [vmem:[#allocation2 + $0x38] sm:$0x3] %v466_v28  ;;  %v945_v15 = vshrl.u32 %v928_v9, 16  ;;  %v948_v19 = vshll.u32 %v928_v9, 16  ;;  %v861_v46 = vrot.slane %v859_v23, 4 }
  0x63   : > { %v864_v56 = vrot.slane %v862_v14, 5  ;;  %v2832_v10 = vld [vmem:[#allocation2 + $0x28] sm:$0xf]  ;;  %v941_v1 = vor.u32 %v940_v34, %v939_v63  ;;  %v870_v26 = vrot.slane %v868_v55, 5  ;;  %v874_v27 = vrot.slane %v872_v7, 4 }
  0x64   : > { %v937_v50 = vor.u32 %v936_v33, %v933_v20  ;;  %v947_v29 = vrot.slane %v945_v15, 5  ;;  %v950_v11 = vrot.slane %v948_v19, 6  ;;  %v878_v13 = vshll.u32 %v2830_v12, 16  ;;  %v2835_v38 = vld [vmem:[#allocation2 + $0x24] sm:$0xe] }
  0x65   : > { %v865_v32 = vor.u32 %v864_v56, %v861_v46  ;;  %v943_v45 = vrot.slane %v941_v1, 4  ;;  %v875_v47 = vor.u32 %v874_v27, %v870_v26  ;;  %v767_v40 = vshll.u32 %v2832_v10, 16  ;;  %v804_v6 = vld [vmem:[#allocation2 + $0x2c] sm:$0x3]  ;;  %v2847_v63 = vld [vmem:[#allocation2 + $0x24] sm:$0xf] }
  0x66   : > { %v938_v43 = vrot.slane %v937_v50, 4  ;;  %v951_v41 = vor.u32 %v950_v11, %v947_v29  ;;  %v880_v52 = vrot.slane %v878_v13, 5  ;;  %v771_v8 = vshrl.u32 %v2832_v10, 16  ;;  %v2849_v34 = vld [vmem:[#allocation2 + $0x2c] sm:$0x1] }
  0x67   : > { %v866_v21 = vrot.slane %v865_v32, 4  ;;  %v876_v7 = vrot.slane %v875_v47, 4  ;;  %v829_v9 = vshrl.u32 %v2835_v38, 16  ;;  %v832_v23 = vshll.u32 %v2835_v38, 16  ;;  %v2853_v50 = vld [vmem:[#allocation2 + $0x34] sm:$0xf] }
  0x68   : > { %v942_v55 = vsel %vm2577_vm1, %v938_v43, %v941_v1  ;;  %v952_v14 = vsel %vm2577_vm1, %v943_v45, %v951_v41  ;;  %v837_v20 = vrot.slane %v771_v8, 5  ;;  %v838_v33 = vrot.slane %v767_v40, 6  ;;  %v2855_v32 = vld [vmem:[#allocation2 + $0x30] sm:$0xe] }
  0x69   : > { %v871_v28 = vsel %vm2606_vm3, %v866_v21, %v870_v26  ;;  %v2049_v15 = vcombine.low %v942_v55, %v952_v14  ;;  %v881_v19 = vsel %vm2606_vm3, %v876_v7, %v880_v52  ;;  %v831_v46 = vrot.slane %v829_v9, 5 }
  0x6a   : > { %v834_v56 = vrot.slane %v832_v23, 6  ;;  %v2045_v1 = vcombine.low %v871_v28, %v881_v19  ;;  %v839_v27 = vor.u32 %v838_v33, %v837_v20  ;;  %v843_v29 = vshrl.u32 %v804_v6, 16  ;;  %v929_v23 = vld [vmem:[#allocation2 + $0x38] sm:$0x3] }
  0x6b   : > { %v846_v11 = vshll.u32 %v804_v6, 16  ;;  %1108 = vrot.lane.b32.xlu0 %v2049_v15, %s2377_s26  ;;  %v758_v13 = vshrl.u32 %v2847_v63, 16  ;;  %v761_v43 = vshll.u32 %v2847_v63, 16  ;;  %v769_v45 = vrot.slane %v767_v40, 5  ;;  %v2864_v15 = vld [vmem:[#allocation2 + $0x30] sm:$0xf] }
  0x6c   : > { %v835_v26 = vor.u32 %v834_v56, %v831_v46  ;;  %1092 = vrot.lane.b32.xlu1 %v2045_v1, %s2377_s26  ;;  %v841_v47 = vrot.slane %v839_v27, 4  ;;  %v845_v41 = vrot.slane %v843_v29, 5  ;;  %v773_v52 = vrot.slane %v771_v8, 4 }
  0x6d   : > { %v848_v21 = vrot.slane %v846_v11, 6  ;;  %v760_v7 = vrot.slane %v758_v13, 4  ;;  %v763_v9 = vrot.slane %v761_v43, 5  ;;  %v777_v6 = vshll.u32 %v2849_v34, 16 }
  0x6e   : > { %v836_v55 = vrot.slane %v835_v26, 4  ;;  %v774_v28 = vor.u32 %v773_v52, %v769_v45  ;;  %v892_v20 = vshll.u32 %v2853_v50, 16  ;;  %v896_v33 = vshrl.u32 %v2853_v50, 16 }
  0x6f   : > { %v849_v14 = vor.u32 %v848_v21, %v845_v41  ;;  %v764_v19 = vor.u32 %v763_v9, %v760_v7  ;;  %v779_v46 = vrot.slane %v777_v6, 5  ;;  %v954_v8 = vshrl.u32 %v2855_v32, 16  ;;  %v2872_v21 = vld [vmem:[#allocation2 + $0x38] sm:$0x1] }
  0x70   : > { %v840_v40 = vsel %vm2577_vm1, %v836_v55, %v839_v27  ;;  %v775_v1 = vrot.slane %v774_v28, 4  ;;  %v957_v29 = vshll.u32 %v2855_v32, 16  ;;  %v962_v11 = vrot.slane %v896_v33, 5 }
  0x71   : > { %v850_v56 = vsel %vm2577_vm1, %v841_v47, %v849_v14  ;;  %v765_v13 = vrot.slane %v764_v19, 4  ;;  %v956_v43 = vrot.slane %v954_v8, 5  ;;  %v963_v41 = vrot.slane %v892_v20, 6 }
  0x72   : > { %v2042_v26 = vcombine.low %v840_v40, %v850_v56  ;;  %v780_v27 = vsel %vm2606_vm3, %v775_v1, %v779_v46  ;;  %v959_v52 = vrot.slane %v957_v29, 6  ;;  %v968_v55 = vshrl.u32 %v929_v23, 16 }
  0x73   : > { %v971_v7 = vshll.u32 %v929_v23, 16  ;;  %v770_v47 = vsel %vm2606_vm3, %v765_v13, %v769_v45  ;;  %v964_v9 = vor.u32 %v963_v41, %v962_v11  ;;  %v883_v6 = vshrl.u32 %v2864_v15, 16 }
  0x74   : > { %1076 = vrot.lane.b32.xlu0 %v2042_v26, %s2377_s26  ;;  %v886_v14 = vshll.u32 %v2864_v15, 16  ;;  %v2038_v28 = vcombine.low %v770_v47, %v780_v27  ;;  %v960_v40 = vor.u32 %v959_v52, %v956_v43  ;;  %v970_v19 = vrot.slane %v968_v55, 5 }
  0x75   : > { %v973_v8 = vrot.slane %v971_v7, 6  ;;  %v966_v56 = vrot.slane %v964_v9, 4  ;;  %v885_v3 = vrot.slane %v883_v6, 4  ;;  %v894_v1 = vrot.slane %v892_v20, 5 }
  0x76   : > { %v888_v46 = vrot.slane %v886_v14, 5  ;;  %1060 = vrot.lane.b32.xlu1 %v2038_v28, %s2377_s26  ;;  %v961_v23 = vrot.slane %v960_v40, 4  ;;  %v898_v26 = vrot.slane %v896_v33, 4  ;;  %v902_v45 = vshll.u32 %v2872_v21, 16 }
  0x77   : > { %v974_v29 = vor.u32 %v973_v8, %v970_v19  ;;  %v668_v13 = vrot.slane %v666_v51, 4  ;;  %v2012_v41 = vrot.slane %v2628_v4, 9  ;;  %v2028_v43 = vcombine.low %v2663_v16, %v2645_v39 }
  0x78   : > { %v889_v11 = vor.u32 %v888_v46, %v885_v3  ;;  %v965_v27 = vsel %vm2577_vm1, %v961_v23, %v964_v9  ;;  %v899_v52 = vor.u32 %v898_v26, %v894_v1  ;;  %v904_v55 = vrot.slane %v902_v45, 5 }
  0x79   : > { %v975_v20 = vsel %vm2577_vm1, %v966_v56, %v974_v29  ;;  %v670_v51 = vsel %vm2783_vm11, %v668_v13, %v669_v60  ;;  %v545_v4 = vrot.slane %v2619_v59, 5  ;;  %v548_v6 = vrot.slane %v2642_v37, 5 }
  0x7a   : > { %v2050_v33 = vcombine.low %v965_v27, %v975_v20  ;;  %v890_v7 = vrot.slane %v889_v11, 4  ;;  %v900_v3 = vrot.slane %v899_v52, 4  ;;  %v2031_v47 = vcombine.low %v2828_v17, %v670_v51 }
  0x7b   : > { %v2014_v9 = vrot.slane %v2649_v42, 9  ;;  %v2905_v18 = vsel %vm2783_vm11, %v2012_v41, %v545_v4  ;;  %v547_v14 = vrot.slane %v545_v4, 4  ;;  %v673_v60 = vrot.slane %v2645_v39, 5  ;;  %v2347_v39 = vld [vmem:[%s3157_s1 + $0x1f8] sm:$0xff]  }
  0x7c   : > { %1110 = vrot.lane.b32.xlu0 %v2050_v33, %s2377_s26  ;;  %v895_v0 = vsel %vm2606_vm3, %v890_v7, %v894_v1  ;;  %v905_v59 = vsel %vm2606_vm3, %v900_v3, %v904_v55  ;;  %v676_v17 = vrot.slane %v2680_v49, 5  ;;  %v2035_v37 = vcombine.low %v2699_v24, %v2682_v53 }
  0x7d   : > { %v2043_v42 = vcombine.low %v2807_v58, %v2803_v62  ;;  %v2046_v28 = vcombine.low %v895_v0, %v905_v59  ;;  %v2917_v40 = vsel %vm2783_vm11, %v547_v14, %v548_v6  ;;  %v2921_v19 = vsel %vm2783_vm11, %v2014_v9, %v673_v60 }
  0x7e   : > { %v675_v8 = vrot.slane %v673_v60, 4  ;;  %v2024_v48 = vcombine.low %v2905_v18, %v2917_v40  ;;  %v2036_v49 = vcombine.low %v2847_v63, %v2832_v10  ;;  %v2044_v56 = vcombine.low %v2864_v15, %v2853_v50  ;;  %v2335_v18 = vld [vmem:[%s3157_s1 + $0x1e0] sm:$0xff]   ;;  %v2330_v40 = vld [vmem:[%s3157_s1 + $0x158] sm:$0xff]  }
  0x7f   : > { %1094 = vrot.lane.b32.xlu1 %v2046_v28, %s2377_s26  ;;  %v2015_v1 = vrot.slane %v2688_v61, 9  ;;  %v791_v29 = vrot.slane %v2682_v53, 5  ;;  %v794_v26 = vrot.slane %v2711_v57, 5  ;;  %v2017_v13 = vrot.slane %v2805_v2, 9 }
  0x80   : > { %v2932_v46 = vsel %vm2783_vm11, %v675_v8, %v676_v17  ;;  %v916_v61 = vrot.slane %v2803_v62, 5  ;;  %v919_v27 = vrot.slane %v2830_v12, 5  ;;  %v2016_v20 = vrot.slane %v2835_v38, 9 }
  0x81   : > { %v2032_v23 = vcombine.low %v2921_v19, %v2932_v46  ;;  %v2941_v45 = vsel %vm2783_vm11, %v2015_v1, %v791_v29  ;;  %v793_v11 = vrot.slane %v791_v29, 4  ;;  %v798_v52 = vrot.slane %v2832_v10, 5  ;;  %v2323_v1 = vld [vmem:[%s3157_s1 + $0x1c8] sm:$0xff]   ;;  %v2343_v19 = vld [vmem:[%s3157_s1 + $0x1f0] sm:$0xff]  }
  0x82   : > { %v801_v55 = vrot.slane %v2849_v34, 5  ;;  %v2018_v33 = vrot.slane %v2855_v32, 9  ;;  %v2958_v2 = vsel %vm2783_vm11, %v2017_v13, %v916_v61  ;;  %v918_v7 = vrot.slane %v916_v61, 4  ;;  %v2331_v13 = vld [vmem:[%s3157_s1 + $0x1d8] sm:$0xff]  }
  0x83   : > { %v2946_v41 = vsel %vm2783_vm11, %v793_v11, %v794_v26  ;;  %v923_v51 = vrot.slane %v2853_v50, 5  ;;  %v926_v12 = vrot.slane %v2872_v21, 5  ;;  %v2964_v38 = vsel %vm2783_vm11, %v2016_v20, %v798_v52  ;;  %v2329_v26 = vld [vmem:[%s3157_s1 + $0x190] sm:$0xff]   ;;  %v2324_v11 = vld [vmem:[%s3157_s1 + $0x108] sm:$0xff]  }
  0x84   : > { %v2039_v57 = vcombine.low %v2941_v45, %v2946_v41  ;;  %v800_v4 = vrot.slane %v798_v52, 4  ;;  %v2968_v3 = vsel %vm2783_vm11, %v918_v7, %v919_v27  ;;  %vm1112_vm2 = vcmask 523264   ;;  %v2351_v27 = vld [vmem:[#allocation2 + $0x10] sm:$0xf]  ;;  %v2352_v20 = vld [vmem:[#allocation2 + $0xc] sm:$0xf] }
  0x85   : > { %v2972_v34 = vsel %vm2783_vm11, %v2018_v33, %v923_v51  ;;  %v925_v32 = vrot.slane %v923_v51, 4  ;;  %v2047_v6 = vcombine.low %v2958_v2, %v2968_v3  ;;  %v2020_v52 = vcombine.low %v2352_v20, %v2351_v27  ;;  %v2328_v33 = vld [vmem:[%s3157_s1 + $0x110] sm:$0xff]   ;;  %v2337_v51 = vld [vmem:[%s3157_s1 + $0x1a0] sm:$0xff]  }
  0x86   : > { %v2978_v21 = vsel %vm2783_vm11, %v800_v4, %v801_v55  ;;  %v2333_v55 = vld [vmem:[%s3157_s1 + $0x198] sm:$0xff]   ;;  %v2334_v4 = vld [vmem:[%s3157_s1 + $0x160] sm:$0xff]   ;;  %vm1892_vm9 = vcmask 64512  }
  0x87   : > { %v2040_v9 = vcombine.low %v2964_v38, %v2978_v21  ;;  %v2984_v0 = vsel %vm2783_vm11, %v925_v32, %v926_v12  ;;  %v2332_v12 = vld [vmem:[%s3157_s1 + $0x118] sm:$0xff]   ;;  %v2339_v32 = vld [vmem:[%s3157_s1 + $0x1e8] sm:$0xff]  }
  0x88   : > { %v2048_v14 = vcombine.low %v2972_v34, %v2984_v0  ;;  %v2051_v34 = vld [vmem:[%s3160_s4] ss:$0 sm:$0xff] }
  0xa5   : > { %v1041_v60 = vpop.permute.xlu1 %1040 }
  0xa6   : > { %v1139_v59 = vsel %vm1112_vm2, %v2031_v47, %v1041_v60 }
  0xa7   : > { %1777 = vmatprep.mubr.bf16.mxu1 %v1139_v59 }
  0xa9   : > { %v1007_v17 = vpop.permute.xlu0 %1006 }
  0xaa   : > { %v1123_v28 = vsel %vm1112_vm2, %v2023_v30, %v1007_v17  ;;  %v2327_v30 = vld [vmem:[%s3157_s1 + $0x1d0] sm:$0xff]   ;;  %v2336_v17 = vld [vmem:[%s3157_s1 + $0x120] sm:$0xff]  }
  0xab   : > { %1728 = vmatprep.mubr.bf16.mxu0 %v1123_v28  ;;  %v2341_v28 = vld [vmem:[%s3157_s1 + $0x1a8] sm:$0xff]  }
  0xac   : > { %v1025_v8 = vpop.permute.xlu1 %1024 }
  0xad   : > { %v1131_v47 = vsel %vm1112_vm2, %v2027_v5, %v1025_v8  ;;  %v2338_v8 = vld [vmem:[%s3157_s1 + $0x168] sm:$0xff]  }
  0xae   : > { %1778 = vmatmul.mubr.bf16.vlgmr.msra.gmra.mrb[0].mxu1 %v1131_v47  ;;  %v2342_v47 = vld [vmem:[%s3157_s1 + $0x170] sm:$0xff]  }
  0xaf   : > { %2233 = vmatpush3.bf16.msra.mxu1 %v2321_v35 }
  0xb0   : > { %2234 = vmatprep.subr.bf16.mxu1 %v2323_v1  ;;  %v2345_v1 = vld [vmem:[%s3157_s1 + $0x1b0] sm:$0xff]  }
  0xb1   : > { %v991_v29 = vpop.permute.xlu0 %990 }
  0xb2   : > { %v1115_v5 = vsel %vm1112_vm2, %v3170_v36, %v991_v29  ;;  %v2348_v29 = vld [vmem:[%s3157_s1 + $0x138] sm:$0xff]  }
  0xb3   : > { %1729 = vmatmul.mubr.bf16.vlgmr.msra.gmra.mrb[0].mxu0 %v1115_v5  ;;  %2235 = vmatpush3.bf16.msra.mxu1 %v2325_v22 }
  0xb4   : > { %2205 = vmatpush3.bf16.msra.mxu0 %v2320_v54  ;;  %2236 = vmatprep.subr.bf16.mxu1 %v2327_v30  ;;  %v2349_v54 = vld [vmem:[%s3157_s1 + $0x1b8] sm:$0xff]  }
  0xb5   : > { %2206 = vmatprep.subr.bf16.mxu0 %v2322_v31  ;;  %v1009_v25 = vpop.permute.xlu0 %1008  ;;  %v2346_v30 = vld [vmem:[%s3157_s1 + $0x178] sm:$0xff]  }
  0xb6   : > { %v1127_v61 = vsel %vm1112_vm2, %v2024_v48, %v1009_v25 }
  0xb7   : > { %2237 = vmatpush3.bf16.msra.mxu1 %v2329_v26  ;;  %1736 = vmatprep.mubr.bf16.mxu0 %v1127_v61 }
  0xb8   : > { %2207 = vmatpush3.bf16.msra.mxu0 %v2324_v11  ;;  %2238 = vmatprep.subr.bf16.mxu1 %v2331_v13 }
  0xb9   : > { %2208 = vmatprep.subr.bf16.mxu0 %v2326_v44  ;;  %v993_v48 = vpop.permute.xlu1 %992 }
  0xba   : > { %v1119_v7 = vsel %vm1112_vm2, %v2020_v52, %v993_v48 }
  0xbb   : > { %2239 = vmatpush3.bf16.msra.mxu1 %v2333_v55  ;;  %1737 = vmatmul.mubr.bf16.gmra.mrb[4].mxu0 %v1119_v7 }
  0xbc   : > { %2209 = vmatpush3.bf16.msra.mxu0 %v2328_v33  ;;  %2240 = vmatprep.subr.bf16.mxu1 %v2335_v18 }
  0xbd   : > { %2210 = vmatprep.subr.bf16.mxu0 %v2330_v40 }
  0xbe   : > { %v1043_v60 = vpop.permute.xlu0 %1042 }
  0xbf   : > { %2241 = vmatpush3.bf16.msra.mxu1 %v2337_v51  ;;  %v1143_v59 = vsel %vm1112_vm2, %v2032_v23, %v1043_v60  ;;  %v2340_v23 = vld [vmem:[%s3157_s1 + $0x128] sm:$0xff]  }
  0xc0   : > { %2211 = vmatpush3.bf16.msra.mxu0 %v2332_v12  ;;  %1785 = vmatprep.mubr.bf16.mxu1 %v1143_v59 }
  0xc1   : > { %2212 = vmatprep.subr.bf16.mxu0 %v2334_v4  ;;  %v1027_v35 = vpop.permute.xlu1 %1026  ;;  %2242 = vmatprep.subr.bf16.mxu1 %v2339_v32 }
  0xc2   : > { %v1135_v46 = vsel %vm1112_vm2, %v2028_v43, %v1027_v35  ;;  %v2344_v43 = vld [vmem:[%s3157_s1 + $0x130] sm:$0xff]  }
  0xc3   : > { %1786 = vmatmul.mubr.bf16.gmra.mrb[4].mxu1 %v1135_v46 }
  0xc4   : > { %2213 = vmatpush3.bf16.msra.mxu0 %v2336_v17  ;;  %2243 = vmatpush3.bf16.msra.mxu1 %v2341_v28 }
  0xc5   : > { %2214 = vmatprep.subr.bf16.mxu0 %v2338_v8  ;;  %2244 = vmatprep.subr.bf16.mxu1 %v2343_v19 }
  0xc7   : > { %v1075_v16 = vpop.permute.xlu0 %1074 }
  0xc8   : > { %2215 = vmatpush3.bf16.msra.mxu0 %v2340_v23  ;;  %2245 = vmatpush3.bf16.msra.mxu1 %v2345_v1  ;;  %v1155_v22 = vsel %vm1112_vm2, %v2039_v57, %v1075_v16 }
  0xc9   : > { %2216 = vmatprep.subr.bf16.mxu0 %v2342_v47  ;;  %2246 = vmatprep.subr.bf16.mxu1 %v2347_v39 }
  0xca   : > { %1826 = vmatprep.mubr.bf16.mxu0 %v1155_v22 }
  0xcb   : > { %v1059_v45 = vpop.permute.xlu1 %1058 }
  0xcc   : > { %2217 = vmatpush3.bf16.msra.mxu0 %v2344_v43  ;;  %2247 = vmatpush3.bf16.msra.mxu1 %v2349_v54  ;;  %v1147_v41 = vsel %vm1112_vm2, %v2035_v37, %v1059_v45 }
  0xcd   : > { %2218 = vmatprep.subr.bf16.mxu0 %v2346_v30 }
  0xd0   : > { %2219 = vmatpush3.bf16.msra.mxu0 %v2348_v29 }
  0xd3   : > { %1827 = vmatmul.mubr.bf16.vlgmr.msra.gmra.mrb[8].mxu0 %v1147_v41 }
  0xdd   : > { %v1109_v57 = vpop.permute.xlu0 %1108 }
  0xde   : > { %v1093_v31 = vpop.permute.xlu1 %1092  ;;  %v1171_v36 = vsel %vm1112_vm2, %v2047_v6, %v1109_v57 }
  0xdf   : > { %v1163_v5 = vsel %vm1112_vm2, %v2043_v42, %v1093_v31  ;;  %1875 = vmatprep.mubr.bf16.mxu1 %v1171_v36 }
  0xe0   : > { %1876 = vmatmul.mubr.bf16.vlgmr.msra.gmra.mrb[8].mxu1 %v1163_v5 }
  0xe6   : > { %v1077_v26 = vpop.permute.xlu0 %1076 }
  0xe7   : > { %v1159_v53 = vsel %vm1112_vm2, %v2040_v9, %v1077_v26 }
  0xe8   : > { %1834 = vmatprep.mubr.bf16.mxu0 %v1159_v53  ;;  %v1061_v24 = vpop.permute.xlu1 %1060 }
  0xe9   : > { %v1151_v37 = vsel %vm1112_vm2, %v2036_v49, %v1061_v24 }
  0xea   : > { %1835 = vmatmul.mubr.bf16.gmra.mrb[12].mxu0 %v1151_v37 }
  0xee   : > { %v1111_v2 = vpop.permute.xlu0 %1110 }
  0xef   : > { %v1175_v62 = vsel %vm1112_vm2, %v2048_v14, %v1111_v2 }
  0xf0   : > { %1883 = vmatprep.mubr.bf16.mxu1 %v1175_v62 }
  0xf1   : > { %v1095_v58 = vpop.permute.xlu1 %1094 }
  0xf2   : > { %v1167_v42 = vsel %vm1112_vm2, %v2044_v56, %v1095_v58 }
  0xf3   : > { %1884 = vmatmul.mubr.bf16.gmra.mrb[12].mxu1 %v1167_v42 }
 0x181   : > { %v2192_v38 = vpop.f32.mrb[0].mxu1 }
 0x182   : > { %v2193_v3 = vpop.f32.mrb[1].mxu1 }
 0x183   : > { %v2194_v10 = vadd.f32 %v2193_v3, %v2192_v38  ;;  %v2195_v63 = vpop.f32.mrb[2].mxu1 }
 0x184   : > { %v2196_v49 = vpop.f32.mrb[3].mxu1 }
 0x185   : > { %v2197_v6 = vadd.f32 %v2196_v49, %v2195_v63 }
 0x186   : > { %v2164_v21 = vpop.f32.mrb[0].mxu0 }
 0x187   : > { %v2165_v9 = vpop.f32.mrb[1].mxu0 }
 0x188   : > { %v2166_v0 = vadd.f32 %v2165_v9, %v2164_v21  ;;  %v2167_v14 = vpop.f32.mrb[2].mxu0 }
 0x189   : > { %v2168_v11 = vpop.f32.mrb[3].mxu0 }
 0x18a   : > { %v1731_v13 = vadd.f32 %v2166_v0, %v2051_v34  ;;  %v2169_v50 = vadd.f32 %v2168_v11, %v2167_v14 }
 0x18c   : > { %v1780_v15 = vadd.f32 %v2194_v10, %v1731_v13  ;;  %v1734_v56 = vadd.f32 %v2169_v50, %v2051_v34 }
 0x18e   : > { %v1783_v44 = vadd.f32 %v2197_v6, %v1734_v56  ;;  %v2170_v25 = vpop.f32.mrb[4].mxu0 }
 0x18f   : > { %v2171_v61 = vpop.f32.mrb[5].mxu0 }
 0x190   : > { %v2172_v27 = vadd.f32 %v2171_v61, %v2170_v25  ;;  %v2173_v20 = vpop.f32.mrb[6].mxu0 }
 0x191   : > { %v2174_v52 = vpop.f32.mrb[7].mxu0 }
 0x192   : > { %v2175_v55 = vadd.f32 %v2174_v52, %v2173_v20  ;;  %v1739_v33 = vadd.f32 %v2172_v27, %v2051_v34 }
 0x194   : > { %v1742_v48 = vadd.f32 %v2175_v55, %v2051_v34 }
 0x196   : > { %v2198_v18 = vpop.f32.mrb[4].mxu1 }
 0x197   : > { %v2199_v40 = vpop.f32.mrb[5].mxu1 }
 0x198   : > { %v2200_v7 = vadd.f32 %v2199_v40, %v2198_v18  ;;  %v2201_v51 = vpop.f32.mrb[6].mxu1 }
 0x199   : > { %v2202_v12 = vpop.f32.mrb[7].mxu1 }
 0x19a   : > { %v1788_v4 = vadd.f32 %v2200_v7, %v1739_v33  ;;  %v2203_v32 = vadd.f32 %v2202_v12, %v2201_v51 }
 0x19c   : > { %v1791_v60 = vadd.f32 %v2203_v32, %v1742_v48 }
 0x1a6   : > { %v2220_v59 = vpop.f32.mrb[8].mxu0 }
 0x1a7   : > { %v2221_v17 = vpop.f32.mrb[9].mxu0 }
 0x1a8   : > { %v2222_v28 = vadd.f32 %v2221_v17, %v2220_v59  ;;  %v2223_v35 = vpop.f32.mrb[10].mxu0 }
 0x1a9   : > { %v2224_v8 = vpop.f32.mrb[11].mxu0 }
 0x1aa   : > { %v1829_v19 = vadd.f32 %v2222_v28, %v1780_v15  ;;  %v2225_v46 = vadd.f32 %v2224_v8, %v2223_v35 }
 0x1ac   : > { %v1832_v23 = vadd.f32 %v2225_v46, %v1783_v44 }
 0x1b3   : > { %v2248_v1 = vpop.f32.mrb[8].mxu1 }
 0x1b4   : > { %v2249_v47 = vpop.f32.mrb[9].mxu1 }
 0x1b5   : > { %v2250_v39 = vadd.f32 %v2249_v47, %v2248_v1  ;;  %v2251_v16 = vpop.f32.mrb[10].mxu1 }
 0x1b6   : > { %v2252_v43 = vpop.f32.mrb[11].mxu1 }
 0x1b7   : > { %v1878_v22 = vadd.f32 %v2250_v39, %v1829_v19  ;;  %v2253_v54 = vadd.f32 %v2252_v43, %v2251_v16 }
 0x1b9   : > { %1893 = vst.msk [vmem:[%s248_s13] sm:$0xff] %vm1892_vm9, %v1878_v22  ;;  %v1881_v30 = vadd.f32 %v2253_v54, %v1832_v23 }
 0x1bb   : > { %1894 = vst.msk [vmem:[%s248_s13 + $0x8] sm:$0xff] %vm1892_vm9, %v1881_v30 }
 0x1bd   : > { %v2226_v29 = vpop.f32.mrb[12].mxu0 }
 0x1be   : > { %v2227_v45 = vpop.f32.mrb[13].mxu0 }
 0x1bf   : > { %v2228_v41 = vadd.f32 %v2227_v45, %v2226_v29  ;;  %v2229_v57 = vpop.f32.mrb[14].mxu0 }
 0x1c0   : > { %v2230_v31 = vpop.f32.mrb[15].mxu0 }
 0x1c1   : > { %v1837_v36 = vadd.f32 %v2228_v41, %v1788_v4  ;;  %v2231_v5 = vadd.f32 %v2230_v31, %v2229_v57 }
 0x1c3   : > { %v1840_v26 = vadd.f32 %v2231_v5, %v1791_v60 }
 0x1c6   : > { %v2254_v53 = vpop.f32.mrb[12].mxu1 }
 0x1c7   : > { %v2255_v24 = vpop.f32.mrb[13].mxu1 }
 0x1c8   : > { %v2256_v37 = vadd.f32 %v2255_v24, %v2254_v53  ;;  %v2257_v2 = vpop.f32.mrb[14].mxu1 }
 0x1c9   : > { %v2258_v62 = vpop.f32.mrb[15].mxu1 }
 0x1ca   : > { %v1886_v58 = vadd.f32 %v2256_v37, %v1837_v36  ;;  %v2259_v42 = vadd.f32 %v2258_v62, %v2257_v2 }
 0x1cc   : > { %1895 = vst.msk [vmem:[%s248_s13 + $0x10] sm:$0xff] %vm1892_vm9, %v1886_v58  ;;  %v1889_v38 = vadd.f32 %v2259_v42, %v1840_v26 }
 0x1ce   : > { %1896 = vst.msk [vmem:[%s248_s13 + $0x18] sm:$0xff] %vm1892_vm9, %v1889_v38 }
 0x1cf PF: > { %s15_s20 = sadd.s32 1, %s2375_s20   ;;  %s3171_s18 = smov %s2371_s19 }
 0x1d0   : > { %p12_p5 = scmp.ge.s32.totalorder %s15_s20, 4   ;;  %s3172_s19 = smov %s3174_s21 }
 0x1d2   :  { %14 = sbr.rel (!%p12_p5) target bundleno = 2 (0x2), region = 74 }

</bundles_post_ra>
